<compile_context>
chip_gen: v7x
topology: tpu7x:2x2x1
jax: 0.10.0
libtpu: 0.0.40
codegen_flags: <defaults>
</compile_context>

<pallas_src>
import functools
import math

import jax
import jax.numpy as jnp
from jax.experimental import pallas as pl
from jax.experimental.pallas import tpu as pltpu

LEAK = 0.1          # LeakyReLU(0.1) used by every `conv(...)` block in STFAN
KS = 3              # standard conv kernel size
KS2D = 5            # filter-adaptive-conv kernel size
CH1, CH2, CH3 = 32, 64, 128

_VMEM_LIMIT = 48 * 1024 * 1024        # per-kernel scoped VMEM cap (<= 64 MiB on v7x)
# TODO(synk): make the FAC tile budget generation-aware via pltpu.get_tpu_info().
_FAC_TILE_BUDGET = 20 * 1024 * 1024   # per-grid-step VMEM budget for the FAC kernel


def _round_up(v, m):
    return (v + m - 1) // m * m


# ----------------------------------------------------------------------------
# Tiled matmul + bias + LeakyReLU (+ optional fused residual) Pallas kernels
# ----------------------------------------------------------------------------
def _mm_kernel_1k(*refs, act, has_skip):
    """Single-K-step fast path: o = act(x@w + b) [+ skip], no scratch, no pl.when."""
    if has_skip:
        x_ref, w_ref, b_ref, skip_ref, o_ref = refs
    else:
        x_ref, w_ref, b_ref, o_ref = refs
        skip_ref = None
    y = jnp.dot(x_ref[...], w_ref[...], preferred_element_type=jnp.float32)
    y = y + b_ref[...]
    if act:
        y = jnp.where(y >= 0, y, LEAK * y)            # f32 on the VPU (v5e-friendly)
    if has_skip:
        y = y + skip_ref[...].astype(jnp.float32)
    o_ref[...] = y.astype(o_ref.dtype)


def _mm_kernel_nk(*refs, act, has_skip):
    """acc += x @ w over the K grid axis; finalize: o = act(acc + b) [+ skip]."""
    if has_skip:
        x_ref, w_ref, b_ref, skip_ref, o_ref, acc_ref = refs
    else:
        x_ref, w_ref, b_ref, o_ref, acc_ref = refs
        skip_ref = None

    @pl.when(pl.program_id(2) == 0)
    def _():
        acc_ref[...] = jnp.zeros_like(acc_ref)

    acc_ref[...] += jnp.dot(x_ref[...], w_ref[...],
                            preferred_element_type=jnp.float32)

    @pl.when(pl.program_id(2) == pl.num_programs(2) - 1)
    def _():
        y = acc_ref[...] + b_ref[...]
        if act:
            y = jnp.where(y >= 0, y, LEAK * y)
        if has_skip:
            y = y + skip_ref[...].astype(jnp.float32)
        o_ref[...] = y.astype(o_ref.dtype)


def _tile_m(M):
    """Pick a large M tile (fewer grid steps, better weight reuse)."""
    for t in (512, 256, 128):
        if M % t == 0:
            return t, M
    if M <= 1024:
        mp = _round_up(M, 8)
        return mp, mp
    mp = _round_up(M, 128)
    for t in (512, 256, 128):
        if mp % t == 0:
            return t, mp
    return 128, mp


def _tile_div(D, cap=640):
    """Largest multiple-of-128 divisor of D up to `cap` (e.g. 3200->640, 1152->384);
       otherwise the full (small / non-128-multiple) dim."""
    if D % 128 != 0:
        return D
    d = D // 128
    best = 1
    for f in range(1, d + 1):
        if d % f == 0 and 128 * f <= cap:
            best = f
    return 128 * best


def pallas_matmul_bias(x, w, b, act=True, skip=None, out_dtype=jnp.bfloat16):
    """x:(M,K) bf16, w:(K,N) bf16, b:(N,) f32, skip optional (M,N).
       Returns act(x@w + b) [+ skip] in `out_dtype`. f32 accumulate on the MXU."""
    M, K = x.shape
    N = w.shape[1]
    tm, Mp = _tile_m(M)
    tk = _tile_div(K)
    tn = _tile_div(N)
    nm, nn, nk = Mp // tm, N // tn, K // tk

    xb = x.astype(jnp.bfloat16)
    wb = w.astype(jnp.bfloat16)
    if Mp != M:
        xb = jnp.pad(xb, ((0, Mp - M), (0, 0)))
    b2 = b.reshape(1, N).astype(jnp.float32)

    has_skip = skip is not None
    if has_skip and Mp != M:
        skip = jnp.pad(skip, ((0, Mp - M), (0, 0)))

    # TODO(synk): small-Cout layers (32/64/3) still store lane-sparse output tiles;
    #             lane-padding weights + post-slice would trade HBM bytes for dense vst.
    if nk == 1:
        in_specs = [
            pl.BlockSpec((tm, tk), lambda i, j: (i, 0)),
            pl.BlockSpec((tk, tn), lambda i, j: (0, j)),
            pl.BlockSpec((1, tn), lambda i, j: (0, j)),
        ]
        args = [xb, wb, b2]
        if has_skip:
            in_specs.append(pl.BlockSpec((tm, tn), lambda i, j: (i, j)))
            args.append(skip)
        out = pl.pallas_call(
            functools.partial(_mm_kernel_1k, act=act, has_skip=has_skip),
            grid=(nm, nn),
            in_specs=in_specs,
            out_specs=pl.BlockSpec((tm, tn), lambda i, j: (i, j)),
            out_shape=jax.ShapeDtypeStruct((Mp, N), out_dtype),
            compiler_params=pltpu.CompilerParams(
                dimension_semantics=("parallel", "parallel"),
                vmem_limit_bytes=_VMEM_LIMIT),
        )(*args)
    else:
        in_specs = [
            pl.BlockSpec((tm, tk), lambda i, j, k: (i, k)),
            pl.BlockSpec((tk, tn), lambda i, j, k: (k, j)),
            pl.BlockSpec((1, tn), lambda i, j, k: (0, j)),
        ]
        args = [xb, wb, b2]
        if has_skip:
            in_specs.append(pl.BlockSpec((tm, tn), lambda i, j, k: (i, j)))
            args.append(skip)
        out = pl.pallas_call(
            functools.partial(_mm_kernel_nk, act=act, has_skip=has_skip),
            grid=(nm, nn, nk),
            in_specs=in_specs,
            out_specs=pl.BlockSpec((tm, tn), lambda i, j, k: (i, j)),
            out_shape=jax.ShapeDtypeStruct((Mp, N), out_dtype),
            scratch_shapes=[pltpu.VMEM((tm, tn), jnp.float32)],
            compiler_params=pltpu.CompilerParams(
                dimension_semantics=("parallel", "parallel", "arbitrary"),
                vmem_limit_bytes=_VMEM_LIMIT),
        )(*args)

    if Mp != M:
        out = out[:M]
    return out


# ----------------------------------------------------------------------------
# Filter-adaptive convolution (KernelConv2D), halo-tiled over H, bf16 streaming
# ----------------------------------------------------------------------------
def _fac_kernel(feat_hbm, kern_ref, o_ref, feat_buf, sem, *, K, th, C):
    """out[b,h,w,c] = sum_{u,v} feat_pad[b,h+u,w+v,c] * kern[b,h,w,(u*K+v)*C + c].
       feat_hbm stays in HBM; a (th + K - 1)-row halo window is DMA'd per grid step."""
    b = pl.program_id(0)
    h0 = pl.program_id(1) * th
    rows = th + K - 1
    cp = pltpu.make_async_copy(
        feat_hbm.at[pl.ds(b, 1), pl.ds(h0, rows), :, :], feat_buf, sem)
    cp.start()
    cp.wait()

    W = o_ref.shape[2]
    acc = jnp.zeros(o_ref.shape, jnp.float32)
    for u in range(K):
        for v in range(K):
            t = u * K + v
            f = feat_buf[:, u:u + th, v:v + W, :].astype(jnp.float32)
            g = kern_ref[:, :, :, t * C:(t + 1) * C].astype(jnp.float32)   # 128-aligned
            acc = acc + f * g
    o_ref[...] = acc.astype(o_ref.dtype)


def _pick_fac_rows(H, W, C, K):
    """Largest H tile s.t. (double-buffered kernel tile + halo feature + output) fits."""
    for th in (64, 32, 16, 8, 4, 2):
        if H % th:
            continue
        kern_bytes = 2 * th * W * K * K * C * 2        # bf16, double-buffered
        feat_bytes = (th + K - 1) * (W + K - 1) * C * 2
        out_bytes = 2 * th * W * C * 2
        if kern_bytes + feat_bytes + out_bytes <= _FAC_TILE_BUDGET:
            return th
    return 1


def pallas_fac(feat, kern_flat, K):
    """feat: (B, H, W, C); kern_flat (tap-major, flat): (B, H, W, K*K*C) -> (B, H, W, C)."""
    B, H, W, C = feat.shape
    assert kern_flat.shape == (B, H, W, K * K * C)
    pad = (K - 1) // 2
    # TODO(synk): zero padding assumed for the KernelConv2D CUDA extension border behavior.
    feat_p = jnp.pad(feat.astype(jnp.bfloat16),
                     ((0, 0), (pad, pad), (pad, pad), (0, 0)))
    kern_flat = kern_flat.astype(jnp.bfloat16)
    Wp = W + 2 * pad
    th = _pick_fac_rows(H, W, C, K)
    return pl.pallas_call(
        functools.partial(_fac_kernel, K=K, th=th, C=C),
        grid=(B, H // th),
        in_specs=[
            pl.BlockSpec(memory_space=pl.ANY),                          # padded feature, HBM
            pl.BlockSpec((1, th, W, K * K * C), lambda b, h: (b, h, 0, 0)),
        ],
        out_specs=pl.BlockSpec((1, th, W, C), lambda b, h: (b, h, 0, 0)),
        out_shape=jax.ShapeDtypeStruct((B, H, W, C), jnp.bfloat16),
        scratch_shapes=[pltpu.VMEM((1, th + K - 1, Wp, C), jnp.bfloat16),
                        pltpu.SemaphoreType.DMA(())],
        compiler_params=pltpu.CompilerParams(
            dimension_semantics=("parallel", "parallel"),
            vmem_limit_bytes=_VMEM_LIMIT),
    )(feat_p, kern_flat)


# ----------------------------------------------------------------------------
# Conv building blocks (im2col glue in JAX, matmul in Pallas)
# ----------------------------------------------------------------------------
def _im2col(x, k, stride, pad):
    """x: (B,H,W,C) -> ((B*Ho*Wo, k*k*C), (B,Ho,Wo)); patch layout = tap-major then channel."""
    if pad:
        x = jnp.pad(x, ((0, 0), (pad, pad), (pad, pad), (0, 0)))
    B, Hp, Wp, C = x.shape
    Ho = (Hp - k) // stride + 1
    Wo = (Wp - k) // stride + 1
    cols = []
    for i in range(k):
        for j in range(k):
            cols.append(x[:, i:i + stride * (Ho - 1) + 1:stride,
                            j:j + stride * (Wo - 1) + 1:stride, :])
    patches = jnp.concatenate(cols, axis=-1)      # (B, Ho, Wo, k*k*C)
    return patches.reshape(B * Ho * Wo, k * k * C), (B, Ho, Wo)


def conv_layer(x, p, stride=1, act=True, skip=None, out_dtype=jnp.bfloat16):
    """Conv2d(kernel k, padding (k-1)//2) + optional LeakyReLU(0.1) + optional residual.
       p['w']: (k*k*Cin, Cout) bf16 (pre-laid-out), p['b']: (Cout,) f32."""
    w, b = p['w'], p['b']
    cin = x.shape[-1]
    cout = w.shape[1]
    k = int(math.isqrt(w.shape[0] // cin))
    pad = (k - 1) // 2
    # bf16 cast BEFORE im2col -> halves the 9x-duplicated patch HBM traffic
    cols, (B, Ho, Wo) = _im2col(x.astype(jnp.bfloat16), k, stride, pad)
    s = None if skip is None else skip.reshape(B * Ho * Wo, cout)
    y = pallas_matmul_bias(cols, w, b, act=act, skip=s, out_dtype=out_dtype)
    return y.reshape(B, Ho, Wo, cout)


def resnet_block(x, p):
    """conv -> LeakyReLU -> conv (+ identity skip fused into the second conv's epilogue)."""
    y = conv_layer(x, p['c1'], 1, act=True)
    return conv_layer(y, p['c2'], 1, act=False, skip=x)


def upconv_layer(x, p):
    """ConvTranspose2d(k=4, stride=2, pad=1) + LeakyReLU(0.1).
       Phase-decomposed: 4 independent 2x2 stride-1 convs, one per output-pixel parity."""
    B, H, W, _ = x.shape
    cout = p['w_ph'][0].shape[1]
    x_pad = jnp.pad(x.astype(jnp.bfloat16), ((0, 0), (1, 1), (1, 1), (0, 0)))
    phases = []
    for pa in range(2):
        for pb in range(2):
            region = x_pad[:, pa:pa + H + 1, pb:pb + W + 1, :]
            cols, _ = _im2col(region, 2, 1, 0)                  # (B*H*W, 4*Cin) bf16
            y = pallas_matmul_bias(cols, p['w_ph'][pa * 2 + pb], p['b'], act=True)
            phases.append(y.reshape(B, H, W, cout))
    # TODO(synk): fuse the four phase matmuls into one pallas_call (leading phase grid axis).
    y4 = jnp.stack(phases, axis=0).reshape(2, 2, B, H, W, cout)
    out = jnp.transpose(y4, (2, 3, 0, 4, 1, 5)).reshape(B, 2 * H, 2 * W, cout)
    return out                                   # out[2m+a, 2n+b] = phase(a,b)[m,n]


def kernel_conv(feat, kernel_flat, K):
    """KernelConv2D. kernel_flat is produced tap-major (index t*C + c) by the weight
       permutation in prepare_params and stays FLAT (no (25, C) sublane-padded reshape)."""
    return pallas_fac(feat, kernel_flat, K)


# ----------------------------------------------------------------------------
# Parameters (deterministic synthetic init) + Pallas-friendly re-layout
# ----------------------------------------------------------------------------
def init_params(key):
    keys = iter(jax.random.split(key, 256))

    def conv_p(cin, cout, k):
        s = 1.0 / float(k * k * cin) ** 0.5
        return {'w': s * jax.random.normal(next(keys), (k, k, cin, cout), jnp.float32),
                'b': 0.01 * jax.random.normal(next(keys), (cout,), jnp.float32)}

    def res_p(c, k=3):
        a = conv_p(c, c, k)
        b = conv_p(c, c, k)
        return {'w1': a['w'], 'b1': a['b'], 'w2': b['w'], 'b2': b['b']}

    def upconv_p(cin, cout):
        s = 1.0 / float(16 * cin) ** 0.5
        return {'w': s * jax.random.normal(next(keys), (cin, cout, 4, 4), jnp.float32),
                'b': 0.01 * jax.random.normal(next(keys), (cout,), jnp.float32)}

    p = {}
    p['fea'] = conv_p(2 * CH3, CH3, 3)
    p['conv1_1'] = conv_p(3, CH1, 3)
    p['conv1_2'] = res_p(CH1); p['conv1_3'] = res_p(CH1)
    p['conv2_1'] = conv_p(CH1, CH2, 3)
    p['conv2_2'] = res_p(CH2); p['conv2_3'] = res_p(CH2)
    p['conv3_1'] = conv_p(CH2, CH3, 3)
    p['conv3_2'] = res_p(CH3); p['conv3_3'] = res_p(CH3)
    p['upconv2_u'] = upconv_p(2 * CH3, CH2)
    p['upconv2_2'] = res_p(CH2); p['upconv2_1'] = res_p(CH2)
    p['upconv1_u'] = upconv_p(CH2, CH1)
    p['upconv1_2'] = res_p(CH1); p['upconv1_1'] = res_p(CH1)
    p['img_prd'] = conv_p(CH1, 3, 3)
    p['kconv1_1'] = conv_p(9, CH1, 3)
    p['kconv1_2'] = res_p(CH1); p['kconv1_3'] = res_p(CH1)
    p['kconv2_1'] = conv_p(CH1, CH2, 3)
    p['kconv2_2'] = res_p(CH2); p['kconv2_3'] = res_p(CH2)
    p['kconv3_1'] = conv_p(CH2, CH3, 3)
    p['kconv3_2'] = res_p(CH3); p['kconv3_3'] = res_p(CH3)
    p['fac_warp'] = {'c1': conv_p(CH3, CH3, 3), 'r1': res_p(CH3), 'r2': res_p(CH3),
                     'c2': conv_p(CH3, CH3 * KS2D ** 2, 1)}
    p['kconv4'] = conv_p(CH3 * KS2D ** 2, CH3, 1)
    p['fac_deblur'] = {'c1': conv_p(2 * CH3, CH3, 3), 'r1': res_p(CH3), 'r2': res_p(CH3),
                       'c2': conv_p(CH3, CH3 * KS2D ** 2, 1)}
    return p


def _to_tap_major(w, b):
    """Permute FAC-kernel-producing conv output channels from (c, tap) to (tap, c)."""
    kh, kw, cin, _ = w.shape
    T = KS2D * KS2D
    w2 = (w.reshape(kh, kw, cin, CH3, T)
           .transpose(0, 1, 2, 4, 3)
           .reshape(kh, kw, cin, CH3 * T))
    b2 = b.reshape(CH3, T).T.reshape(CH3 * T)
    return w2, b2


def _prep_conv(c):
    """Flatten (k,k,Cin,Cout) -> (k*k*Cin,Cout) and cast to bf16 once (im2col tap-major)."""
    w, b = c['w'], c['b']
    k, _, cin, cout = w.shape
    return {'w': jnp.asarray(w, jnp.bfloat16).reshape(k * k * cin, cout),
            'b': jnp.asarray(b, jnp.float32)}


def _prep_res(r):
    return {'c1': _prep_conv({'w': r['w1'], 'b': r['b1']}),
            'c2': _prep_conv({'w': r['w2'], 'b': r['b2']})}


def _prep_upconv(u):
    """ConvTranspose weights (Cin,Cout,4,4) -> four per-phase (4*Cin, Cout) bf16 matrices."""
    wt, b = u['w'], u['b']
    cin, cout = wt.shape[0], wt.shape[1]
    w_flip = jnp.transpose(wt[:, :, ::-1, ::-1], (2, 3, 0, 1))   # (4,4,Cin,Cout)
    phases = []
    for pa in range(2):
        for pb in range(2):
            w_ab = w_flip[pa::2, pb::2]                          # (2,2,Cin,Cout)
            phases.append(jnp.asarray(w_ab.reshape(4 * cin, cout), jnp.bfloat16))
    return {'w_ph': phases, 'b': jnp.asarray(b, jnp.float32)}


def prepare_params(p):
    """Re-layout canonical (PyTorch-convention) params for the Pallas kernels:
       - flatten + bf16-cast every conv weight ONCE (not per call / per frame)
       - the two 1x1 convs emitting per-pixel FAC kernels get tap-major output channels
         and kconv4's input channels are permuted to match (no runtime transpose)
       - ConvTranspose weights are pre-split into the 4 phase matrices."""
    T = KS2D * KS2D
    q = {}
    q['fea'] = _prep_conv(p['fea'])
    q['conv1_1'] = _prep_conv(p['conv1_1'])
    q['conv1_2'] = _prep_res(p['conv1_2']); q['conv1_3'] = _prep_res(p['conv1_3'])
    q['conv2_1'] = _prep_conv(p['conv2_1'])
    q['conv2_2'] = _prep_res(p['conv2_2']); q['conv2_3'] = _prep_res(p['conv2_3'])
    q['conv3_1'] = _prep_conv(p['conv3_1'])
    q['conv3_2'] = _prep_res(p['conv3_2']); q['conv3_3'] = _prep_res(p['conv3_3'])
    q['upconv2_u'] = _prep_upconv(p['upconv2_u'])
    q['upconv2_2'] = _prep_res(p['upconv2_2']); q['upconv2_1'] = _prep_res(p['upconv2_1'])
    q['upconv1_u'] = _prep_upconv(p['upconv1_u'])
    q['upconv1_2'] = _prep_res(p['upconv1_2']); q['upconv1_1'] = _prep_res(p['upconv1_1'])
    q['img_prd'] = _prep_conv(p['img_prd'])
    q['kconv1_1'] = _prep_conv(p['kconv1_1'])
    q['kconv1_2'] = _prep_res(p['kconv1_2']); q['kconv1_3'] = _prep_res(p['kconv1_3'])
    q['kconv2_1'] = _prep_conv(p['kconv2_1'])
    q['kconv2_2'] = _prep_res(p['kconv2_2']); q['kconv2_3'] = _prep_res(p['kconv2_3'])
    q['kconv3_1'] = _prep_conv(p['kconv3_1'])
    q['kconv3_2'] = _prep_res(p['kconv3_2']); q['kconv3_3'] = _prep_res(p['kconv3_3'])

    fw = p['fac_warp']
    w2, b2 = _to_tap_major(fw['c2']['w'], fw['c2']['b'])
    q['fac_warp'] = {'c1': _prep_conv(fw['c1']), 'r1': _prep_res(fw['r1']),
                     'r2': _prep_res(fw['r2']), 'c2': _prep_conv({'w': w2, 'b': b2})}

    fd = p['fac_deblur']
    w2, b2 = _to_tap_major(fd['c2']['w'], fd['c2']['b'])
    q['fac_deblur'] = {'c1': _prep_conv(fd['c1']), 'r1': _prep_res(fd['r1']),
                       'r2': _prep_res(fd['r2']), 'c2': _prep_conv({'w': w2, 'b': b2})}

    w4 = p['kconv4']['w']
    kh, kw, cin, cout = w4.shape
    w4 = (w4.reshape(kh, kw, CH3, T, cout)
             .transpose(0, 1, 3, 2, 4)
             .reshape(kh, kw, cin, cout))
    q['kconv4'] = _prep_conv({'w': w4, 'b': p['kconv4']['b']})
    return q


# ----------------------------------------------------------------------------
# STFANCell / STFAN forward
# ----------------------------------------------------------------------------
def stfan_cell(p, img_blur, last_img_blur, output_last_img, output_last_fea):
    # all features NHWC; intermediates stream as bf16, f32 accumulation inside kernels
    merge = jnp.concatenate([img_blur, last_img_blur, output_last_img], axis=-1)

    kconv1 = resnet_block(resnet_block(conv_layer(merge, p['kconv1_1'], 1), p['kconv1_2']), p['kconv1_3'])
    kconv2 = resnet_block(resnet_block(conv_layer(kconv1, p['kconv2_1'], 2), p['kconv2_2']), p['kconv2_3'])
    kconv3 = resnet_block(resnet_block(conv_layer(kconv2, p['kconv3_1'], 2), p['kconv3_2']), p['kconv3_3'])

    fw = p['fac_warp']
    t = conv_layer(kconv3, fw['c1'], 1)
    t = resnet_block(t, fw['r1'])
    t = resnet_block(t, fw['r2'])
    kernel_warp = conv_layer(t, fw['c2'], 1)        # (B,h,w,25*CH3), tap-major, bf16

    kconv4 = conv_layer(kernel_warp, p['kconv4'], 1)

    fd = p['fac_deblur']
    t = conv_layer(jnp.concatenate([kconv3, kconv4], axis=-1), fd['c1'], 1)
    t = resnet_block(t, fd['r1'])
    t = resnet_block(t, fd['r2'])
    kernel_deblur = conv_layer(t, fd['c2'], 1)

    conv1_d = conv_layer(img_blur, p['conv1_1'], 1)
    conv1_d = resnet_block(resnet_block(conv1_d, p['conv1_2']), p['conv1_3'])
    conv2_d = conv_layer(conv1_d, p['conv2_1'], 2)
    conv2_d = resnet_block(resnet_block(conv2_d, p['conv2_2']), p['conv2_3'])
    conv3_d = conv_layer(conv2_d, p['conv3_1'], 2)
    conv3_d = resnet_block(resnet_block(conv3_d, p['conv3_2']), p['conv3_3'])

    conv3_d_k = kernel_conv(conv3_d, kernel_deblur, KS2D)

    if output_last_fea is None:
        output_last_fea = jnp.concatenate([conv3_d, conv3_d], axis=-1)
    output_last_fea = conv_layer(output_last_fea, p['fea'], 1)

    conv_a_k = kernel_conv(output_last_fea, kernel_warp, KS2D)

    conv3 = jnp.concatenate([conv3_d_k, conv_a_k], axis=-1)
    up2 = upconv_layer(conv3, p['upconv2_u'])
    up2 = resnet_block(resnet_block(up2, p['upconv2_2']), p['upconv2_1'])
    up1 = upconv_layer(up2, p['upconv1_u'])
    up1 = resnet_block(resnet_block(up1, p['upconv1_2']), p['upconv1_1'])

    # img_prd: output_img = LeakyReLU(conv(up1)) + img_blur, residual fused in-kernel
    output_img = conv_layer(up1, p['img_prd'], 1, act=True, skip=img_blur,
                            out_dtype=jnp.float32)
    output_fea = conv3
    return output_img, output_fea


def stfan_forward(params, x):
    """x: (B, N, C, H, W) float32 (PyTorch convention) -> (B, N, 3, H, W)."""
    assert x.ndim == 5, f'Input x should be in 5 dims, but got {x.ndim} instead!'
    b, n, c, h, w = x.shape
    xh = jnp.transpose(x, (0, 1, 3, 4, 2))     # per-frame NHWC
    out_img_last = xh[:, 0]
    blur_img_last = xh[:, 0]
    hidden_feats = None
    outputs = []
    for frame_idx in range(n):
        out_img, hidden_feats = stfan_cell(params, xh[:, frame_idx], blur_img_last,
                                           out_img_last, hidden_feats)
        out_img_last = out_img
        blur_img_last = xh[:, frame_idx]
        outputs.append(out_img)
    out = jnp.stack(outputs, axis=1)                 # (B, N, H, W, 3)
    return jnp.transpose(out, (0, 1, 4, 2, 3))       # back to NCHW per frame


# ----------------------------------------------------------------------------
if __name__ == "__main__":
    key = jax.random.PRNGKey(0)
    pkey, xkey = jax.random.split(key)
    params = prepare_params(init_params(pkey))

    # Small shapes consistent with the module (H, W divisible by 4 for the two stride-2 stages).
    B, N, C, H, W = 1, 2, 3, 16, 16
    x = jax.random.normal(xkey, (B, N, C, H, W), jnp.float32)

    fwd = jax.jit(stfan_forward)
    out = jax.block_until_ready(fwd(params, x))

    assert out.shape == (B, N, C, H, W), out.shape
    assert bool(jnp.all(jnp.isfinite(out)))
    print("KERNEL_OK")
</pallas_src>

<mosaic_0001>
module attributes {stable_mosaic.version = 11 : i64} {
  func.func @_mm_kernel_1k(%arg0: i32, %arg1: i32, %arg2: memref<256x27xbf16, #tpu.memory_space<vmem>>, %arg3: memref<27x32xbf16, #tpu.memory_space<vmem>>, %arg4: memref<1x32xf32, #tpu.memory_space<vmem>>, %arg5: memref<256x32xbf16, #tpu.memory_space<vmem>>) attributes {dimension_semantics = [#tpu.dimension_semantics<parallel>, #tpu.dimension_semantics<parallel>], iteration_bounds = array<i64: 1, 1>, scalar_prefetch = 0 : i64, scratch_operands = 0 : i64, tpu.core_type = #tpu.core_type<tc>, window_params = [{transform_indices = @transform_0, window_bounds = array<i64: 256, 27>}, {transform_indices = @transform_1, window_bounds = array<i64: 27, 32>}, {transform_indices = @transform_2, window_bounds = array<i64: 1, 32>}, {transform_indices = @transform_3, window_bounds = array<i64: 256, 32>}]} {
    %c0 = arith.constant 0 : index
    %c0_0 = arith.constant 0 : index
    %0 = vector.load %arg2[%c0, %c0_0] : memref<256x27xbf16, #tpu.memory_space<vmem>>, vector<256x27xbf16>
    %c0_1 = arith.constant 0 : index
    %c0_2 = arith.constant 0 : index
    %1 = vector.load %arg3[%c0_1, %c0_2] : memref<27x32xbf16, #tpu.memory_space<vmem>>, vector<27x32xbf16>
    %cst = arith.constant dense<0.000000e+00> : vector<256x32xf32>
    %2 = tpu.matmul %0, %1, %cst {dimension_numbers = #tpu.dot_dimension_numbers<[1], [0], [0], [1], [0, 0, 1, 1], [], []>} : vector<256x27xbf16>, vector<27x32xbf16>, vector<256x32xf32> -> vector<256x32xf32>
    %c0_3 = arith.constant 0 : index
    %c0_4 = arith.constant 0 : index
    %3 = vector.load %arg4[%c0_3, %c0_4] : memref<1x32xf32, #tpu.memory_space<vmem>>, vector<1x32xf32>
    %4 = vector.broadcast %3 : vector<1x32xf32> to vector<256x32xf32>
    %5 = arith.addf %2, %4 : vector<256x32xf32>
    %cst_5 = arith.constant 0.000000e+00 : f32
    %6 = vector.broadcast %cst_5 : f32 to vector<256x32xf32>
    %7 = arith.cmpf oge, %5, %6 : vector<256x32xf32>
    %cst_6 = arith.constant 1.000000e-01 : f32
    %8 = vector.broadcast %cst_6 : f32 to vector<256x32xf32>
    %9 = arith.mulf %8, %5 : vector<256x32xf32>
    %10 = arith.select %7, %5, %9 : vector<256x32xi1>, vector<256x32xf32>
    %11 = arith.truncf %10 : vector<256x32xf32> to vector<256x32xbf16>
    %c0_7 = arith.constant 0 : index
    %c0_8 = arith.constant 0 : index
    %12 = vector.load %arg5[%c0_7, %c0_8] : memref<256x32xbf16, #tpu.memory_space<vmem>>, vector<256x32xbf16>
    tpu.vector_store %arg5[%c0_7, %c0_8], %11 {strides = array<i32>} : memref<256x32xbf16, #tpu.memory_space<vmem>>, vector<256x32xbf16>,
    return
  }
  func.func @transform_0(%arg0: i32, %arg1: i32) -> (i32, i32) {
    %c0_i32 = arith.constant 0 : i32
    %c0_i32_0 = arith.constant 0 : i32
    return %arg0, %c0_i32 : i32, i32
  }
  func.func @transform_1(%arg0: i32, %arg1: i32) -> (i32, i32) {
    %c0_i32 = arith.constant 0 : i32
    %c0_i32_0 = arith.constant 0 : i32
    return %c0_i32, %arg1 : i32, i32
  }
  func.func @transform_2(%arg0: i32, %arg1: i32) -> (i32, i32) {
    %c0_i32 = arith.constant 0 : i32
    %c0_i32_0 = arith.constant 0 : i32
    return %c0_i32, %arg1 : i32, i32
  }
  func.func @transform_3(%arg0: i32, %arg1: i32) -> (i32, i32) {
    %c0_i32 = arith.constant 0 : i32
    return %arg0, %arg1 : i32, i32
  }
}

module attributes {stable_mosaic.version = 11 : i64} {
  func.func @_mm_kernel_1k(%arg0: i32, %arg1: i32, %arg2: memref<256x288xbf16, #tpu.memory_space<vmem>>, %arg3: memref<288x32xbf16, #tpu.memory_space<vmem>>, %arg4: memref<1x32xf32, #tpu.memory_space<vmem>>, %arg5: memref<256x32xbf16, #tpu.memory_space<vmem>>) attributes {dimension_semantics = [#tpu.dimension_semantics<parallel>, #tpu.dimension_semantics<parallel>], iteration_bounds = array<i64: 1, 1>, scalar_prefetch = 0 : i64, scratch_operands = 0 : i64, tpu.core_type = #tpu.core_type<tc>, window_params = [{transform_indices = @transform_0, window_bounds = array<i64: 256, 288>}, {transform_indices = @transform_1, window_bounds = array<i64: 288, 32>}, {transform_indices = @transform_2, window_bounds = array<i64: 1, 32>}, {transform_indices = @transform_3, window_bounds = array<i64: 256, 32>}]} {
    %c0 = arith.constant 0 : index
    %c0_0 = arith.constant 0 : index
    %0 = vector.load %arg2[%c0, %c0_0] : memref<256x288xbf16, #tpu.memory_space<vmem>>, vector<256x288xbf16>
    %c0_1 = arith.constant 0 : index
    %c0_2 = arith.constant 0 : index
    %1 = vector.load %arg3[%c0_1, %c0_2] : memref<288x32xbf16, #tpu.memory_space<vmem>>, vector<288x32xbf16>
    %cst = arith.constant dense<0.000000e+00> : vector<256x32xf32>
    %2 = tpu.matmul %0, %1, %cst {dimension_numbers = #tpu.dot_dimension_numbers<[1], [0], [0], [1], [0, 0, 1, 1], [], []>} : vector<256x288xbf16>, vector<288x32xbf16>, vector<256x32xf32> -> vector<256x32xf32>
    %c0_3 = arith.constant 0 : index
    %c0_4 = arith.constant 0 : index
    %3 = vector.load %arg4[%c0_3, %c0_4] : memref<1x32xf32, #tpu.memory_space<vmem>>, vector<1x32xf32>
    %4 = vector.broadcast %3 : vector<1x32xf32> to vector<256x32xf32>
    %5 = arith.addf %2, %4 : vector<256x32xf32>
    %cst_5 = arith.constant 0.000000e+00 : f32
    %6 = vector.broadcast %cst_5 : f32 to vector<256x32xf32>
    %7 = arith.cmpf oge, %5, %6 : vector<256x32xf32>
    %cst_6 = arith.constant 1.000000e-01 : f32
    %8 = vector.broadcast %cst_6 : f32 to vector<256x32xf32>
    %9 = arith.mulf %8, %5 : vector<256x32xf32>
    %10 = arith.select %7, %5, %9 : vector<256x32xi1>, vector<256x32xf32>
    %11 = arith.truncf %10 : vector<256x32xf32> to vector<256x32xbf16>
    %c0_7 = arith.constant 0 : index
    %c0_8 = arith.constant 0 : index
    %12 = vector.load %arg5[%c0_7, %c0_8] : memref<256x32xbf16, #tpu.memory_space<vmem>>, vector<256x32xbf16>
    tpu.vector_store %arg5[%c0_7, %c0_8], %11 {strides = array<i32>} : memref<256x32xbf16, #tpu.memory_space<vmem>>, vector<256x32xbf16>,
    return
  }
  func.func @transform_0(%arg0: i32, %arg1: i32) -> (i32, i32) {
    %c0_i32 = arith.constant 0 : i32
    %c0_i32_0 = arith.constant 0 : i32
    return %arg0, %c0_i32 : i32, i32
  }
  func.func @transform_1(%arg0: i32, %arg1: i32) -> (i32, i32) {
    %c0_i32 = arith.constant 0 : i32
    %c0_i32_0 = arith.constant 0 : i32
    return %c0_i32, %arg1 : i32, i32
  }
  func.func @transform_2(%arg0: i32, %arg1: i32) -> (i32, i32) {
    %c0_i32 = arith.constant 0 : i32
    %c0_i32_0 = arith.constant 0 : i32
    return %c0_i32, %arg1 : i32, i32
  }
  func.func @transform_3(%arg0: i32, %arg1: i32) -> (i32, i32) {
    %c0_i32 = arith.constant 0 : i32
    return %arg0, %arg1 : i32, i32
  }
}

module attributes {stable_mosaic.version = 11 : i64} {
  func.func @_mm_kernel_1k(%arg0: i32, %arg1: i32, %arg2: memref<256x288xbf16, #tpu.memory_space<vmem>>, %arg3: memref<288x32xbf16, #tpu.memory_space<vmem>>, %arg4: memref<1x32xf32, #tpu.memory_space<vmem>>, %arg5: memref<256x32xbf16, #tpu.memory_space<vmem>>, %arg6: memref<256x32xbf16, #tpu.memory_space<vmem>>) attributes {dimension_semantics = [#tpu.dimension_semantics<parallel>, #tpu.dimension_semantics<parallel>], iteration_bounds = array<i64: 1, 1>, scalar_prefetch = 0 : i64, scratch_operands = 0 : i64, tpu.core_type = #tpu.core_type<tc>, window_params = [{transform_indices = @transform_0, window_bounds = array<i64: 256, 288>}, {transform_indices = @transform_1, window_bounds = array<i64: 288, 32>}, {transform_indices = @transform_2, window_bounds = array<i64: 1, 32>}, {transform_indices = @transform_3, window_bounds = array<i64: 256, 32>}, {transform_indices = @transform_4, window_bounds = array<i64: 256, 32>}]} {
    %c0 = arith.constant 0 : index
    %c0_0 = arith.constant 0 : index
    %0 = vector.load %arg2[%c0, %c0_0] : memref<256x288xbf16, #tpu.memory_space<vmem>>, vector<256x288xbf16>
    %c0_1 = arith.constant 0 : index
    %c0_2 = arith.constant 0 : index
    %1 = vector.load %arg3[%c0_1, %c0_2] : memref<288x32xbf16, #tpu.memory_space<vmem>>, vector<288x32xbf16>
    %cst = arith.constant dense<0.000000e+00> : vector<256x32xf32>
    %2 = tpu.matmul %0, %1, %cst {dimension_numbers = #tpu.dot_dimension_numbers<[1], [0], [0], [1], [0, 0, 1, 1], [], []>} : vector<256x288xbf16>, vector<288x32xbf16>, vector<256x32xf32> -> vector<256x32xf32>
    %c0_3 = arith.constant 0 : index
    %c0_4 = arith.constant 0 : index
    %3 = vector.load %arg4[%c0_3, %c0_4] : memref<1x32xf32, #tpu.memory_space<vmem>>, vector<1x32xf32>
    %4 = vector.broadcast %3 : vector<1x32xf32> to vector<256x32xf32>
    %5 = arith.addf %2, %4 : vector<256x32xf32>
    %c0_5 = arith.constant 0 : index
    %c0_6 = arith.constant 0 : index
    %6 = vector.load %arg5[%c0_5, %c0_6] : memref<256x32xbf16, #tpu.memory_space<vmem>>, vector<256x32xbf16>
    %7 = arith.extf %6 : vector<256x32xbf16> to vector<256x32xf32>
    %8 = arith.addf %5, %7 : vector<256x32xf32>
    %9 = arith.truncf %8 : vector<256x32xf32> to vector<256x32xbf16>
    %c0_7 = arith.constant 0 : index
    %c0_8 = arith.constant 0 : index
    %10 = vector.load %arg6[%c0_7, %c0_8] : memref<256x32xbf16, #tpu.memory_space<vmem>>, vector<256x32xbf16>
    tpu.vector_store %arg6[%c0_7, %c0_8], %9 {strides = array<i32>} : memref<256x32xbf16, #tpu.memory_space<vmem>>, vector<256x32xbf16>,
    return
  }
  func.func @transform_0(%arg0: i32, %arg1: i32) -> (i32, i32) {
    %c0_i32 = arith.constant 0 : i32
    %c0_i32_0 = arith.constant 0 : i32
    return %arg0, %c0_i32 : i32, i32
  }
  func.func @transform_1(%arg0: i32, %arg1: i32) -> (i32, i32) {
    %c0_i32 = arith.constant 0 : i32
    %c0_i32_0 = arith.constant 0 : i32
    return %c0_i32, %arg1 : i32, i32
  }
  func.func @transform_2(%arg0: i32, %arg1: i32) -> (i32, i32) {
    %c0_i32 = arith.constant 0 : i32
    %c0_i32_0 = arith.constant 0 : i32
    return %c0_i32, %arg1 : i32, i32
  }
  func.func @transform_3(%arg0: i32, %arg1: i32) -> (i32, i32) {
    %c0_i32 = arith.constant 0 : i32
    return %arg0, %arg1 : i32, i32
  }
  func.func @transform_4(%arg0: i32, %arg1: i32) -> (i32, i32) {
    %c0_i32 = arith.constant 0 : i32
    return %arg0, %arg1 : i32, i32
  }
}

module attributes {stable_mosaic.version = 11 : i64} {
  func.func @_mm_kernel_1k(%arg0: i32, %arg1: i32, %arg2: memref<64x288xbf16, #tpu.memory_space<vmem>>, %arg3: memref<288x64xbf16, #tpu.memory_space<vmem>>, %arg4: memref<1x64xf32, #tpu.memory_space<vmem>>, %arg5: memref<64x64xbf16, #tpu.memory_space<vmem>>) attributes {dimension_semantics = [#tpu.dimension_semantics<parallel>, #tpu.dimension_semantics<parallel>], iteration_bounds = array<i64: 1, 1>, scalar_prefetch = 0 : i64, scratch_operands = 0 : i64, tpu.core_type = #tpu.core_type<tc>, window_params = [{transform_indices = @transform_0, window_bounds = array<i64: 64, 288>}, {transform_indices = @transform_1, window_bounds = array<i64: 288, 64>}, {transform_indices = @transform_2, window_bounds = array<i64: 1, 64>}, {transform_indices = @transform_3, window_bounds = array<i64: 64, 64>}]} {
    %c0 = arith.constant 0 : index
    %c0_0 = arith.constant 0 : index
    %0 = vector.load %arg2[%c0, %c0_0] : memref<64x288xbf16, #tpu.memory_space<vmem>>, vector<64x288xbf16>
    %c0_1 = arith.constant 0 : index
    %c0_2 = arith.constant 0 : index
    %1 = vector.load %arg3[%c0_1, %c0_2] : memref<288x64xbf16, #tpu.memory_space<vmem>>, vector<288x64xbf16>
    %cst = arith.constant dense<0.000000e+00> : vector<64x64xf32>
    %2 = tpu.matmul %0, %1, %cst {dimension_numbers = #tpu.dot_dimension_numbers<[1], [0], [0], [1], [0, 0, 1, 1], [], []>} : vector<64x288xbf16>, vector<288x64xbf16>, vector<64x64xf32> -> vector<64x64xf32>
    %c0_3 = arith.constant 0 : index
    %c0_4 = arith.constant 0 : index
    %3 = vector.load %arg4[%c0_3, %c0_4] : memref<1x64xf32, #tpu.memory_space<vmem>>, vector<1x64xf32>
    %4 = vector.broadcast %3 : vector<1x64xf32> to vector<64x64xf32>
    %5 = arith.addf %2, %4 : vector<64x64xf32>
    %cst_5 = arith.constant 0.000000e+00 : f32
    %6 = vector.broadcast %cst_5 : f32 to vector<64x64xf32>
    %7 = arith.cmpf oge, %5, %6 : vector<64x64xf32>
    %cst_6 = arith.constant 1.000000e-01 : f32
    %8 = vector.broadcast %cst_6 : f32 to vector<64x64xf32>
    %9 = arith.mulf %8, %5 : vector<64x64xf32>
    %10 = arith.select %7, %5, %9 : vector<64x64xi1>, vector<64x64xf32>
    %11 = arith.truncf %10 : vector<64x64xf32> to vector<64x64xbf16>
    %c0_7 = arith.constant 0 : index
    %c0_8 = arith.constant 0 : index
    %12 = vector.load %arg5[%c0_7, %c0_8] : memref<64x64xbf16, #tpu.memory_space<vmem>>, vector<64x64xbf16>
    tpu.vector_store %arg5[%c0_7, %c0_8], %11 {strides = array<i32>} : memref<64x64xbf16, #tpu.memory_space<vmem>>, vector<64x64xbf16>,
    return
  }
  func.func @transform_0(%arg0: i32, %arg1: i32) -> (i32, i32) {
    %c0_i32 = arith.constant 0 : i32
    %c0_i32_0 = arith.constant 0 : i32
    return %arg0, %c0_i32 : i32, i32
  }
  func.func @transform_1(%arg0: i32, %arg1: i32) -> (i32, i32) {
    %c0_i32 = arith.constant 0 : i32
    %c0_i32_0 = arith.constant 0 : i32
    return %c0_i32, %arg1 : i32, i32
  }
  func.func @transform_2(%arg0: i32, %arg1: i32) -> (i32, i32) {
    %c0_i32 = arith.constant 0 : i32
    %c0_i32_0 = arith.constant 0 : i32
    return %c0_i32, %arg1 : i32, i32
  }
  func.func @transform_3(%arg0: i32, %arg1: i32) -> (i32, i32) {
    %c0_i32 = arith.constant 0 : i32
    return %arg0, %arg1 : i32, i32
  }
}

module attributes {stable_mosaic.version = 11 : i64} {
  func.func @_mm_kernel_1k(%arg0: i32, %arg1: i32, %arg2: memref<64x576xbf16, #tpu.memory_space<vmem>>, %arg3: memref<576x64xbf16, #tpu.memory_space<vmem>>, %arg4: memref<1x64xf32, #tpu.memory_space<vmem>>, %arg5: memref<64x64xbf16, #tpu.memory_space<vmem>>) attributes {dimension_semantics = [#tpu.dimension_semantics<parallel>, #tpu.dimension_semantics<parallel>], iteration_bounds = array<i64: 1, 1>, scalar_prefetch = 0 : i64, scratch_operands = 0 : i64, tpu.core_type = #tpu.core_type<tc>, window_params = [{transform_indices = @transform_0, window_bounds = array<i64: 64, 576>}, {transform_indices = @transform_1, window_bounds = array<i64: 576, 64>}, {transform_indices = @transform_2, window_bounds = array<i64: 1, 64>}, {transform_indices = @transform_3, window_bounds = array<i64: 64, 64>}]} {
    %c0 = arith.constant 0 : index
    %c0_0 = arith.constant 0 : index
    %0 = vector.load %arg2[%c0, %c0_0] : memref<64x576xbf16, #tpu.memory_space<vmem>>, vector<64x576xbf16>
    %c0_1 = arith.constant 0 : index
    %c0_2 = arith.constant 0 : index
    %1 = vector.load %arg3[%c0_1, %c0_2] : memref<576x64xbf16, #tpu.memory_space<vmem>>, vector<576x64xbf16>
    %cst = arith.constant dense<0.000000e+00> : vector<64x64xf32>
    %2 = tpu.matmul %0, %1, %cst {dimension_numbers = #tpu.dot_dimension_numbers<[1], [0], [0], [1], [0, 0, 1, 1], [], []>} : vector<64x576xbf16>, vector<576x64xbf16>, vector<64x64xf32> -> vector<64x64xf32>
    %c0_3 = arith.constant 0 : index
    %c0_4 = arith.constant 0 : index
    %3 = vector.load %arg4[%c0_3, %c0_4] : memref<1x64xf32, #tpu.memory_space<vmem>>, vector<1x64xf32>
    %4 = vector.broadcast %3 : vector<1x64xf32> to vector<64x64xf32>
    %5 = arith.addf %2, %4 : vector<64x64xf32>
    %cst_5 = arith.constant 0.000000e+00 : f32
    %6 = vector.broadcast %cst_5 : f32 to vector<64x64xf32>
    %7 = arith.cmpf oge, %5, %6 : vector<64x64xf32>
    %cst_6 = arith.constant 1.000000e-01 : f32
    %8 = vector.broadcast %cst_6 : f32 to vector<64x64xf32>
    %9 = arith.mulf %8, %5 : vector<64x64xf32>
    %10 = arith.select %7, %5, %9 : vector<64x64xi1>, vector<64x64xf32>
    %11 = arith.truncf %10 : vector<64x64xf32> to vector<64x64xbf16>
    %c0_7 = arith.constant 0 : index
    %c0_8 = arith.constant 0 : index
    %12 = vector.load %arg5[%c0_7, %c0_8] : memref<64x64xbf16, #tpu.memory_space<vmem>>, vector<64x64xbf16>
    tpu.vector_store %arg5[%c0_7, %c0_8], %11 {strides = array<i32>} : memref<64x64xbf16, #tpu.memory_space<vmem>>, vector<64x64xbf16>,
    return
  }
  func.func @transform_0(%arg0: i32, %arg1: i32) -> (i32, i32) {
    %c0_i32 = arith.constant 0 : i32
    %c0_i32_0 = arith.constant 0 : i32
    return %arg0, %c0_i32 : i32, i32
  }
  func.func @transform_1(%arg0: i32, %arg1: i32) -> (i32, i32) {
    %c0_i32 = arith.constant 0 : i32
    %c0_i32_0 = arith.constant 0 : i32
    return %c0_i32, %arg1 : i32, i32
  }
  func.func @transform_2(%arg0: i32, %arg1: i32) -> (i32, i32) {
    %c0_i32 = arith.constant 0 : i32
    %c0_i32_0 = arith.constant 0 : i32
    return %c0_i32, %arg1 : i32, i32
  }
  func.func @transform_3(%arg0: i32, %arg1: i32) -> (i32, i32) {
    %c0_i32 = arith.constant 0 : i32
    return %arg0, %arg1 : i32, i32
  }
}

module attributes {stable_mosaic.version = 11 : i64} {
  func.func @_mm_kernel_1k(%arg0: i32, %arg1: i32, %arg2: memref<64x576xbf16, #tpu.memory_space<vmem>>, %arg3: memref<576x64xbf16, #tpu.memory_space<vmem>>, %arg4: memref<1x64xf32, #tpu.memory_space<vmem>>, %arg5: memref<64x64xbf16, #tpu.memory_space<vmem>>, %arg6: memref<64x64xbf16, #tpu.memory_space<vmem>>) attributes {dimension_semantics = [#tpu.dimension_semantics<parallel>, #tpu.dimension_semantics<parallel>], iteration_bounds = array<i64: 1, 1>, scalar_prefetch = 0 : i64, scratch_operands = 0 : i64, tpu.core_type = #tpu.core_type<tc>, window_params = [{transform_indices = @transform_0, window_bounds = array<i64: 64, 576>}, {transform_indices = @transform_1, window_bounds = array<i64: 576, 64>}, {transform_indices = @transform_2, window_bounds = array<i64: 1, 64>}, {transform_indices = @transform_3, window_bounds = array<i64: 64, 64>}, {transform_indices = @transform_4, window_bounds = array<i64: 64, 64>}]} {
    %c0 = arith.constant 0 : index
    %c0_0 = arith.constant 0 : index
    %0 = vector.load %arg2[%c0, %c0_0] : memref<64x576xbf16, #tpu.memory_space<vmem>>, vector<64x576xbf16>
    %c0_1 = arith.constant 0 : index
    %c0_2 = arith.constant 0 : index
    %1 = vector.load %arg3[%c0_1, %c0_2] : memref<576x64xbf16, #tpu.memory_space<vmem>>, vector<576x64xbf16>
    %cst = arith.constant dense<0.000000e+00> : vector<64x64xf32>
    %2 = tpu.matmul %0, %1, %cst {dimension_numbers = #tpu.dot_dimension_numbers<[1], [0], [0], [1], [0, 0, 1, 1], [], []>} : vector<64x576xbf16>, vector<576x64xbf16>, vector<64x64xf32> -> vector<64x64xf32>
    %c0_3 = arith.constant 0 : index
    %c0_4 = arith.constant 0 : index
    %3 = vector.load %arg4[%c0_3, %c0_4] : memref<1x64xf32, #tpu.memory_space<vmem>>, vector<1x64xf32>
    %4 = vector.broadcast %3 : vector<1x64xf32> to vector<64x64xf32>
    %5 = arith.addf %2, %4 : vector<64x64xf32>
    %c0_5 = arith.constant 0 : index
    %c0_6 = arith.constant 0 : index
    %6 = vector.load %arg5[%c0_5, %c0_6] : memref<64x64xbf16, #tpu.memory_space<vmem>>, vector<64x64xbf16>
    %7 = arith.extf %6 : vector<64x64xbf16> to vector<64x64xf32>
    %8 = arith.addf %5, %7 : vector<64x64xf32>
    %9 = arith.truncf %8 : vector<64x64xf32> to vector<64x64xbf16>
    %c0_7 = arith.constant 0 : index
    %c0_8 = arith.constant 0 : index
    %10 = vector.load %arg6[%c0_7, %c0_8] : memref<64x64xbf16, #tpu.memory_space<vmem>>, vector<64x64xbf16>
    tpu.vector_store %arg6[%c0_7, %c0_8], %9 {strides = array<i32>} : memref<64x64xbf16, #tpu.memory_space<vmem>>, vector<64x64xbf16>,
    return
  }
  func.func @transform_0(%arg0: i32, %arg1: i32) -> (i32, i32) {
    %c0_i32 = arith.constant 0 : i32
    %c0_i32_0 = arith.constant 0 : i32
    return %arg0, %c0_i32 : i32, i32
  }
  func.func @transform_1(%arg0: i32, %arg1: i32) -> (i32, i32) {
    %c0_i32 = arith.constant 0 : i32
    %c0_i32_0 = arith.constant 0 : i32
    return %c0_i32, %arg1 : i32, i32
  }
  func.func @transform_2(%arg0: i32, %arg1: i32) -> (i32, i32) {
    %c0_i32 = arith.constant 0 : i32
    %c0_i32_0 = arith.constant 0 : i32
    return %c0_i32, %arg1 : i32, i32
  }
  func.func @transform_3(%arg0: i32, %arg1: i32) -> (i32, i32) {
    %c0_i32 = arith.constant 0 : i32
    return %arg0, %arg1 : i32, i32
  }
  func.func @transform_4(%arg0: i32, %arg1: i32) -> (i32, i32) {
    %c0_i32 = arith.constant 0 : i32
    return %arg0, %arg1 : i32, i32
  }
}

module attributes {stable_mosaic.version = 11 : i64} {
  func.func @_mm_kernel_1k(%arg0: i32, %arg1: i32, %arg2: memref<16x576xbf16, #tpu.memory_space<vmem>>, %arg3: memref<576x128xbf16, #tpu.memory_space<vmem>>, %arg4: memref<1x128xf32, #tpu.memory_space<vmem>>, %arg5: memref<16x128xbf16, #tpu.memory_space<vmem>>) attributes {dimension_semantics = [#tpu.dimension_semantics<parallel>, #tpu.dimension_semantics<parallel>], iteration_bounds = array<i64: 1, 1>, scalar_prefetch = 0 : i64, scratch_operands = 0 : i64, tpu.core_type = #tpu.core_type<tc>, window_params = [{transform_indices = @transform_0, window_bounds = array<i64: 16, 576>}, {transform_indices = @transform_1, window_bounds = array<i64: 576, 128>}, {transform_indices = @transform_2, window_bounds = array<i64: 1, 128>}, {transform_indices = @transform_3, window_bounds = array<i64: 16, 128>}]} {
    %c0 = arith.constant 0 : index
    %c0_0 = arith.constant 0 : index
    %0 = vector.load %arg2[%c0, %c0_0] : memref<16x576xbf16, #tpu.memory_space<vmem>>, vector<16x576xbf16>
    %c0_1 = arith.constant 0 : index
    %c0_2 = arith.constant 0 : index
    %1 = vector.load %arg3[%c0_1, %c0_2] : memref<576x128xbf16, #tpu.memory_space<vmem>>, vector<576x128xbf16>
    %cst = arith.constant dense<0.000000e+00> : vector<16x128xf32>
    %2 = tpu.matmul %0, %1, %cst {dimension_numbers = #tpu.dot_dimension_numbers<[1], [0], [0], [1], [0, 0, 1, 1], [], []>} : vector<16x576xbf16>, vector<576x128xbf16>, vector<16x128xf32> -> vector<16x128xf32>
    %c0_3 = arith.constant 0 : index
    %c0_4 = arith.constant 0 : index
    %3 = vector.load %arg4[%c0_3, %c0_4] : memref<1x128xf32, #tpu.memory_space<vmem>>, vector<1x128xf32>
    %4 = vector.broadcast %3 : vector<1x128xf32> to vector<16x128xf32>
    %5 = arith.addf %2, %4 : vector<16x128xf32>
    %cst_5 = arith.constant 0.000000e+00 : f32
    %6 = vector.broadcast %cst_5 : f32 to vector<16x128xf32>
    %7 = arith.cmpf oge, %5, %6 : vector<16x128xf32>
    %cst_6 = arith.constant 1.000000e-01 : f32
    %8 = vector.broadcast %cst_6 : f32 to vector<16x128xf32>
    %9 = arith.mulf %8, %5 : vector<16x128xf32>
    %10 = arith.select %7, %5, %9 : vector<16x128xi1>, vector<16x128xf32>
    %11 = arith.truncf %10 : vector<16x128xf32> to vector<16x128xbf16>
    %c0_7 = arith.constant 0 : index
    %c0_8 = arith.constant 0 : index
    %12 = vector.load %arg5[%c0_7, %c0_8] : memref<16x128xbf16, #tpu.memory_space<vmem>>, vector<16x128xbf16>
    tpu.vector_store %arg5[%c0_7, %c0_8], %11 {strides = array<i32>} : memref<16x128xbf16, #tpu.memory_space<vmem>>, vector<16x128xbf16>,
    return
  }
  func.func @transform_0(%arg0: i32, %arg1: i32) -> (i32, i32) {
    %c0_i32 = arith.constant 0 : i32
    %c0_i32_0 = arith.constant 0 : i32
    return %arg0, %c0_i32 : i32, i32
  }
  func.func @transform_1(%arg0: i32, %arg1: i32) -> (i32, i32) {
    %c0_i32 = arith.constant 0 : i32
    %c0_i32_0 = arith.constant 0 : i32
    return %c0_i32, %arg1 : i32, i32
  }
  func.func @transform_2(%arg0: i32, %arg1: i32) -> (i32, i32) {
    %c0_i32 = arith.constant 0 : i32
    %c0_i32_0 = arith.constant 0 : i32
    return %c0_i32, %arg1 : i32, i32
  }
  func.func @transform_3(%arg0: i32, %arg1: i32) -> (i32, i32) {
    %c0_i32 = arith.constant 0 : i32
    return %arg0, %arg1 : i32, i32
  }
}

module attributes {stable_mosaic.version = 11 : i64} {
  func.func @_mm_kernel_nk(%arg0: i32, %arg1: i32, %arg2: i32, %arg3: memref<16x384xbf16, #tpu.memory_space<vmem>>, %arg4: memref<384x128xbf16, #tpu.memory_space<vmem>>, %arg5: memref<1x128xf32, #tpu.memory_space<vmem>>, %arg6: memref<16x128xbf16, #tpu.memory_space<vmem>>, %arg7: memref<16x128xf32, #tpu.memory_space<vmem>>) attributes {dimension_semantics = [#tpu.dimension_semantics<parallel>, #tpu.dimension_semantics<parallel>, #tpu.dimension_semantics<arbitrary>], iteration_bounds = array<i64: 1, 1, 3>, scalar_prefetch = 0 : i64, scratch_operands = 1 : i64, tpu.core_type = #tpu.core_type<tc>, window_params = [{transform_indices = @transform_0, window_bounds = array<i64: 16, 384>}, {transform_indices = @transform_1, window_bounds = array<i64: 384, 128>}, {transform_indices = @transform_2, window_bounds = array<i64: 1, 128>}, {transform_indices = @transform_3, window_bounds = array<i64: 16, 128>}]} {
    %c0_i32 = arith.constant 0 : i32
    %0 = arith.cmpi eq, %arg2, %c0_i32 : i32
    %1 = arith.extui %0 : i1 to i32
    %c0_i32_0 = arith.constant 0 : i32
    %2 = arith.cmpi ne, %1, %c0_i32_0 : i32
    scf.if %2 {
      %cst_9 = arith.constant 0.000000e+00 : f32
      %12 = vector.broadcast %cst_9 : f32 to vector<16x128xf32>
      %c0_10 = arith.constant 0 : index
      %c0_11 = arith.constant 0 : index
      %13 = vector.load %arg7[%c0_10, %c0_11] : memref<16x128xf32, #tpu.memory_space<vmem>>, vector<16x128xf32>
      tpu.vector_store %arg7[%c0_10, %c0_11], %12 {strides = array<i32>} : memref<16x128xf32, #tpu.memory_space<vmem>>, vector<16x128xf32>,
    } else {
    }
    %c0 = arith.constant 0 : index
    %c0_1 = arith.constant 0 : index
    %3 = vector.load %arg7[%c0, %c0_1] : memref<16x128xf32, #tpu.memory_space<vmem>>, vector<16x128xf32>
    %c0_2 = arith.constant 0 : index
    %c0_3 = arith.constant 0 : index
    %4 = vector.load %arg3[%c0_2, %c0_3] : memref<16x384xbf16, #tpu.memory_space<vmem>>, vector<16x384xbf16>
    %c0_4 = arith.constant 0 : index
    %c0_5 = arith.constant 0 : index
    %5 = vector.load %arg4[%c0_4, %c0_5] : memref<384x128xbf16, #tpu.memory_space<vmem>>, vector<384x128xbf16>
    %cst = arith.constant dense<0.000000e+00> : vector<16x128xf32>
    %6 = tpu.matmul %4, %5, %cst {dimension_numbers = #tpu.dot_dimension_numbers<[1], [0], [0], [1], [0, 0, 1, 1], [], []>} : vector<16x384xbf16>, vector<384x128xbf16>, vector<16x128xf32> -> vector<16x128xf32>
    %7 = arith.addf %3, %6 : vector<16x128xf32>
    %c0_6 = arith.constant 0 : index
    %c0_7 = arith.constant 0 : index
    %8 = vector.load %arg7[%c0_6, %c0_7] : memref<16x128xf32, #tpu.memory_space<vmem>>, vector<16x128xf32>
    tpu.vector_store %arg7[%c0_6, %c0_7], %7 {strides = array<i32>} : memref<16x128xf32, #tpu.memory_space<vmem>>, vector<16x128xf32>,
    %c2_i32 = arith.constant 2 : i32
    %9 = arith.cmpi eq, %arg2, %c2_i32 : i32
    %10 = arith.extui %9 : i1 to i32
    %c0_i32_8 = arith.constant 0 : i32
    %11 = arith.cmpi ne, %10, %c0_i32_8 : i32
    scf.if %11 {
      %c0_9 = arith.constant 0 : index
      %c0_10 = arith.constant 0 : index
      %12 = vector.load %arg7[%c0_9, %c0_10] : memref<16x128xf32, #tpu.memory_space<vmem>>, vector<16x128xf32>
      %c0_11 = arith.constant 0 : index
      %c0_12 = arith.constant 0 : index
      %13 = vector.load %arg5[%c0_11, %c0_12] : memref<1x128xf32, #tpu.memory_space<vmem>>, vector<1x128xf32>
      %14 = vector.broadcast %13 : vector<1x128xf32> to vector<16x128xf32>
      %15 = arith.addf %12, %14 : vector<16x128xf32>
      %cst_13 = arith.constant 0.000000e+00 : f32
      %16 = vector.broadcast %cst_13 : f32 to vector<16x128xf32>
      %17 = arith.cmpf oge, %15, %16 : vector<16x128xf32>
      %cst_14 = arith.constant 1.000000e-01 : f32
      %18 = vector.broadcast %cst_14 : f32 to vector<16x128xf32>
      %19 = arith.mulf %18, %15 : vector<16x128xf32>
      %20 = arith.select %17, %15, %19 : vector<16x128xi1>, vector<16x128xf32>
      %21 = arith.truncf %20 : vector<16x128xf32> to vector<16x128xbf16>
      %c0_15 = arith.constant 0 : index
      %c0_16 = arith.constant 0 : index
      %22 = vector.load %arg6[%c0_15, %c0_16] : memref<16x128xbf16, #tpu.memory_space<vmem>>, vector<16x128xbf16>
      tpu.vector_store %arg6[%c0_15, %c0_16], %21 {strides = array<i32>} : memref<16x128xbf16, #tpu.memory_space<vmem>>, vector<16x128xbf16>,
    } else {
    }
    return
  }
  func.func @transform_0(%arg0: i32, %arg1: i32, %arg2: i32) -> (i32, i32) {
    %c0_i32 = arith.constant 0 : i32
    return %arg0, %arg2 : i32, i32
  }
  func.func @transform_1(%arg0: i32, %arg1: i32, %arg2: i32) -> (i32, i32) {
    %c0_i32 = arith.constant 0 : i32
    return %arg2, %arg1 : i32, i32
  }
  func.func @transform_2(%arg0: i32, %arg1: i32, %arg2: i32) -> (i32, i32) {
    %c0_i32 = arith.constant 0 : i32
    %c0_i32_0 = arith.constant 0 : i32
    return %c0_i32, %arg1 : i32, i32
  }
  func.func @transform_3(%arg0: i32, %arg1: i32, %arg2: i32) -> (i32, i32) {
    %c0_i32 = arith.constant 0 : i32
    return %arg0, %arg1 : i32, i32
  }
}

module attributes {stable_mosaic.version = 11 : i64} {
  func.func @_mm_kernel_nk(%arg0: i32, %arg1: i32, %arg2: i32, %arg3: memref<16x384xbf16, #tpu.memory_space<vmem>>, %arg4: memref<384x128xbf16, #tpu.memory_space<vmem>>, %arg5: memref<1x128xf32, #tpu.memory_space<vmem>>, %arg6: memref<16x128xbf16, #tpu.memory_space<vmem>>, %arg7: memref<16x128xbf16, #tpu.memory_space<vmem>>, %arg8: memref<16x128xf32, #tpu.memory_space<vmem>>) attributes {dimension_semantics = [#tpu.dimension_semantics<parallel>, #tpu.dimension_semantics<parallel>, #tpu.dimension_semantics<arbitrary>], iteration_bounds = array<i64: 1, 1, 3>, scalar_prefetch = 0 : i64, scratch_operands = 1 : i64, tpu.core_type = #tpu.core_type<tc>, window_params = [{transform_indices = @transform_0, window_bounds = array<i64: 16, 384>}, {transform_indices = @transform_1, window_bounds = array<i64: 384, 128>}, {transform_indices = @transform_2, window_bounds = array<i64: 1, 128>}, {transform_indices = @transform_3, window_bounds = array<i64: 16, 128>}, {transform_indices = @transform_4, window_bounds = array<i64: 16, 128>}]} {
    %c0_i32 = arith.constant 0 : i32
    %0 = arith.cmpi eq, %arg2, %c0_i32 : i32
    %1 = arith.extui %0 : i1 to i32
    %c0_i32_0 = arith.constant 0 : i32
    %2 = arith.cmpi ne, %1, %c0_i32_0 : i32
    scf.if %2 {
      %cst_9 = arith.constant 0.000000e+00 : f32
      %12 = vector.broadcast %cst_9 : f32 to vector<16x128xf32>
      %c0_10 = arith.constant 0 : index
      %c0_11 = arith.constant 0 : index
      %13 = vector.load %arg8[%c0_10, %c0_11] : memref<16x128xf32, #tpu.memory_space<vmem>>, vector<16x128xf32>
      tpu.vector_store %arg8[%c0_10, %c0_11], %12 {strides = array<i32>} : memref<16x128xf32, #tpu.memory_space<vmem>>, vector<16x128xf32>,
    } else {
    }
    %c0 = arith.constant 0 : index
    %c0_1 = arith.constant 0 : index
    %3 = vector.load %arg8[%c0, %c0_1] : memref<16x128xf32, #tpu.memory_space<vmem>>, vector<16x128xf32>
    %c0_2 = arith.constant 0 : index
    %c0_3 = arith.constant 0 : index
    %4 = vector.load %arg3[%c0_2, %c0_3] : memref<16x384xbf16, #tpu.memory_space<vmem>>, vector<16x384xbf16>
    %c0_4 = arith.constant 0 : index
    %c0_5 = arith.constant 0 : index
    %5 = vector.load %arg4[%c0_4, %c0_5] : memref<384x128xbf16, #tpu.memory_space<vmem>>, vector<384x128xbf16>
    %cst = arith.constant dense<0.000000e+00> : vector<16x128xf32>
    %6 = tpu.matmul %4, %5, %cst {dimension_numbers = #tpu.dot_dimension_numbers<[1], [0], [0], [1], [0, 0, 1, 1], [], []>} : vector<16x384xbf16>, vector<384x128xbf16>, vector<16x128xf32> -> vector<16x128xf32>
    %7 = arith.addf %3, %6 : vector<16x128xf32>
    %c0_6 = arith.constant 0 : index
    %c0_7 = arith.constant 0 : index
    %8 = vector.load %arg8[%c0_6, %c0_7] : memref<16x128xf32, #tpu.memory_space<vmem>>, vector<16x128xf32>
    tpu.vector_store %arg8[%c0_6, %c0_7], %7 {strides = array<i32>} : memref<16x128xf32, #tpu.memory_space<vmem>>, vector<16x128xf32>,
    %c2_i32 = arith.constant 2 : i32
    %9 = arith.cmpi eq, %arg2, %c2_i32 : i32
    %10 = arith.extui %9 : i1 to i32
    %c0_i32_8 = arith.constant 0 : i32
    %11 = arith.cmpi ne, %10, %c0_i32_8 : i32
    scf.if %11 {
      %c0_9 = arith.constant 0 : index
      %c0_10 = arith.constant 0 : index
      %12 = vector.load %arg8[%c0_9, %c0_10] : memref<16x128xf32, #tpu.memory_space<vmem>>, vector<16x128xf32>
      %c0_11 = arith.constant 0 : index
      %c0_12 = arith.constant 0 : index
      %13 = vector.load %arg5[%c0_11, %c0_12] : memref<1x128xf32, #tpu.memory_space<vmem>>, vector<1x128xf32>
      %14 = vector.broadcast %13 : vector<1x128xf32> to vector<16x128xf32>
      %15 = arith.addf %12, %14 : vector<16x128xf32>
      %c0_13 = arith.constant 0 : index
      %c0_14 = arith.constant 0 : index
      %16 = vector.load %arg6[%c0_13, %c0_14] : memref<16x128xbf16, #tpu.memory_space<vmem>>, vector<16x128xbf16>
      %17 = arith.extf %16 : vector<16x128xbf16> to vector<16x128xf32>
      %18 = arith.addf %15, %17 : vector<16x128xf32>
      %19 = arith.truncf %18 : vector<16x128xf32> to vector<16x128xbf16>
      %c0_15 = arith.constant 0 : index
      %c0_16 = arith.constant 0 : index
      %20 = vector.load %arg7[%c0_15, %c0_16] : memref<16x128xbf16, #tpu.memory_space<vmem>>, vector<16x128xbf16>
      tpu.vector_store %arg7[%c0_15, %c0_16], %19 {strides = array<i32>} : memref<16x128xbf16, #tpu.memory_space<vmem>>, vector<16x128xbf16>,
    } else {
    }
    return
  }
  func.func @transform_0(%arg0: i32, %arg1: i32, %arg2: i32) -> (i32, i32) {
    %c0_i32 = arith.constant 0 : i32
    return %arg0, %arg2 : i32, i32
  }
  func.func @transform_1(%arg0: i32, %arg1: i32, %arg2: i32) -> (i32, i32) {
    %c0_i32 = arith.constant 0 : i32
    return %arg2, %arg1 : i32, i32
  }
  func.func @transform_2(%arg0: i32, %arg1: i32, %arg2: i32) -> (i32, i32) {
    %c0_i32 = arith.constant 0 : i32
    %c0_i32_0 = arith.constant 0 : i32
    return %c0_i32, %arg1 : i32, i32
  }
  func.func @transform_3(%arg0: i32, %arg1: i32, %arg2: i32) -> (i32, i32) {
    %c0_i32 = arith.constant 0 : i32
    return %arg0, %arg1 : i32, i32
  }
  func.func @transform_4(%arg0: i32, %arg1: i32, %arg2: i32) -> (i32, i32) {
    %c0_i32 = arith.constant 0 : i32
    return %arg0, %arg1 : i32, i32
  }
}

module attributes {stable_mosaic.version = 11 : i64} {
  func.func @_mm_kernel_nk(%arg0: i32, %arg1: i32, %arg2: i32, %arg3: memref<16x384xbf16, #tpu.memory_space<vmem>>, %arg4: memref<384x128xbf16, #tpu.memory_space<vmem>>, %arg5: memref<1x128xf32, #tpu.memory_space<vmem>>, %arg6: memref<16x128xbf16, #tpu.memory_space<vmem>>, %arg7: memref<16x128xf32, #tpu.memory_space<vmem>>) attributes {dimension_semantics = [#tpu.dimension_semantics<parallel>, #tpu.dimension_semantics<parallel>, #tpu.dimension_semantics<arbitrary>], iteration_bounds = array<i64: 1, 1, 6>, scalar_prefetch = 0 : i64, scratch_operands = 1 : i64, tpu.core_type = #tpu.core_type<tc>, window_params = [{transform_indices = @transform_0, window_bounds = array<i64: 16, 384>}, {transform_indices = @transform_1, window_bounds = array<i64: 384, 128>}, {transform_indices = @transform_2, window_bounds = array<i64: 1, 128>}, {transform_indices = @transform_3, window_bounds = array<i64: 16, 128>}]} {
    %c0_i32 = arith.constant 0 : i32
    %0 = arith.cmpi eq, %arg2, %c0_i32 : i32
    %1 = arith.extui %0 : i1 to i32
    %c0_i32_0 = arith.constant 0 : i32
    %2 = arith.cmpi ne, %1, %c0_i32_0 : i32
    scf.if %2 {
      %cst_9 = arith.constant 0.000000e+00 : f32
      %12 = vector.broadcast %cst_9 : f32 to vector<16x128xf32>
      %c0_10 = arith.constant 0 : index
      %c0_11 = arith.constant 0 : index
      %13 = vector.load %arg7[%c0_10, %c0_11] : memref<16x128xf32, #tpu.memory_space<vmem>>, vector<16x128xf32>
      tpu.vector_store %arg7[%c0_10, %c0_11], %12 {strides = array<i32>} : memref<16x128xf32, #tpu.memory_space<vmem>>, vector<16x128xf32>,
    } else {
    }
    %c0 = arith.constant 0 : index
    %c0_1 = arith.constant 0 : index
    %3 = vector.load %arg7[%c0, %c0_1] : memref<16x128xf32, #tpu.memory_space<vmem>>, vector<16x128xf32>
    %c0_2 = arith.constant 0 : index
    %c0_3 = arith.constant 0 : index
    %4 = vector.load %arg3[%c0_2, %c0_3] : memref<16x384xbf16, #tpu.memory_space<vmem>>, vector<16x384xbf16>
    %c0_4 = arith.constant 0 : index
    %c0_5 = arith.constant 0 : index
    %5 = vector.load %arg4[%c0_4, %c0_5] : memref<384x128xbf16, #tpu.memory_space<vmem>>, vector<384x128xbf16>
    %cst = arith.constant dense<0.000000e+00> : vector<16x128xf32>
    %6 = tpu.matmul %4, %5, %cst {dimension_numbers = #tpu.dot_dimension_numbers<[1], [0], [0], [1], [0, 0, 1, 1], [], []>} : vector<16x384xbf16>, vector<384x128xbf16>, vector<16x128xf32> -> vector<16x128xf32>
    %7 = arith.addf %3, %6 : vector<16x128xf32>
    %c0_6 = arith.constant 0 : index
    %c0_7 = arith.constant 0 : index
    %8 = vector.load %arg7[%c0_6, %c0_7] : memref<16x128xf32, #tpu.memory_space<vmem>>, vector<16x128xf32>
    tpu.vector_store %arg7[%c0_6, %c0_7], %7 {strides = array<i32>} : memref<16x128xf32, #tpu.memory_space<vmem>>, vector<16x128xf32>,
    %c5_i32 = arith.constant 5 : i32
    %9 = arith.cmpi eq, %arg2, %c5_i32 : i32
    %10 = arith.extui %9 : i1 to i32
    %c0_i32_8 = arith.constant 0 : i32
    %11 = arith.cmpi ne, %10, %c0_i32_8 : i32
    scf.if %11 {
      %c0_9 = arith.constant 0 : index
      %c0_10 = arith.constant 0 : index
      %12 = vector.load %arg7[%c0_9, %c0_10] : memref<16x128xf32, #tpu.memory_space<vmem>>, vector<16x128xf32>
      %c0_11 = arith.constant 0 : index
      %c0_12 = arith.constant 0 : index
      %13 = vector.load %arg5[%c0_11, %c0_12] : memref<1x128xf32, #tpu.memory_space<vmem>>, vector<1x128xf32>
      %14 = vector.broadcast %13 : vector<1x128xf32> to vector<16x128xf32>
      %15 = arith.addf %12, %14 : vector<16x128xf32>
      %cst_13 = arith.constant 0.000000e+00 : f32
      %16 = vector.broadcast %cst_13 : f32 to vector<16x128xf32>
      %17 = arith.cmpf oge, %15, %16 : vector<16x128xf32>
      %cst_14 = arith.constant 1.000000e-01 : f32
      %18 = vector.broadcast %cst_14 : f32 to vector<16x128xf32>
      %19 = arith.mulf %18, %15 : vector<16x128xf32>
      %20 = arith.select %17, %15, %19 : vector<16x128xi1>, vector<16x128xf32>
      %21 = arith.truncf %20 : vector<16x128xf32> to vector<16x128xbf16>
      %c0_15 = arith.constant 0 : index
      %c0_16 = arith.constant 0 : index
      %22 = vector.load %arg6[%c0_15, %c0_16] : memref<16x128xbf16, #tpu.memory_space<vmem>>, vector<16x128xbf16>
      tpu.vector_store %arg6[%c0_15, %c0_16], %21 {strides = array<i32>} : memref<16x128xbf16, #tpu.memory_space<vmem>>, vector<16x128xbf16>,
    } else {
    }
    return
  }
  func.func @transform_0(%arg0: i32, %arg1: i32, %arg2: i32) -> (i32, i32) {
    %c0_i32 = arith.constant 0 : i32
    return %arg0, %arg2 : i32, i32
  }
  func.func @transform_1(%arg0: i32, %arg1: i32, %arg2: i32) -> (i32, i32) {
    %c0_i32 = arith.constant 0 : i32
    return %arg2, %arg1 : i32, i32
  }
  func.func @transform_2(%arg0: i32, %arg1: i32, %arg2: i32) -> (i32, i32) {
    %c0_i32 = arith.constant 0 : i32
    %c0_i32_0 = arith.constant 0 : i32
    return %c0_i32, %arg1 : i32, i32
  }
  func.func @transform_3(%arg0: i32, %arg1: i32, %arg2: i32) -> (i32, i32) {
    %c0_i32 = arith.constant 0 : i32
    return %arg0, %arg1 : i32, i32
  }
}

module attributes {stable_mosaic.version = 11 : i64} {
  func.func @_mm_kernel_1k(%arg0: i32, %arg1: i32, %arg2: memref<256x81xbf16, #tpu.memory_space<vmem>>, %arg3: memref<81x32xbf16, #tpu.memory_space<vmem>>, %arg4: memref<1x32xf32, #tpu.memory_space<vmem>>, %arg5: memref<256x32xbf16, #tpu.memory_space<vmem>>) attributes {dimension_semantics = [#tpu.dimension_semantics<parallel>, #tpu.dimension_semantics<parallel>], iteration_bounds = array<i64: 1, 1>, scalar_prefetch = 0 : i64, scratch_operands = 0 : i64, tpu.core_type = #tpu.core_type<tc>, window_params = [{transform_indices = @transform_0, window_bounds = array<i64: 256, 81>}, {transform_indices = @transform_1, window_bounds = array<i64: 81, 32>}, {transform_indices = @transform_2, window_bounds = array<i64: 1, 32>}, {transform_indices = @transform_3, window_bounds = array<i64: 256, 32>}]} {
    %c0 = arith.constant 0 : index
    %c0_0 = arith.constant 0 : index
    %0 = vector.load %arg2[%c0, %c0_0] : memref<256x81xbf16, #tpu.memory_space<vmem>>, vector<256x81xbf16>
    %c0_1 = arith.constant 0 : index
    %c0_2 = arith.constant 0 : index
    %1 = vector.load %arg3[%c0_1, %c0_2] : memref<81x32xbf16, #tpu.memory_space<vmem>>, vector<81x32xbf16>
    %cst = arith.constant dense<0.000000e+00> : vector<256x32xf32>
    %2 = tpu.matmul %0, %1, %cst {dimension_numbers = #tpu.dot_dimension_numbers<[1], [0], [0], [1], [0, 0, 1, 1], [], []>} : vector<256x81xbf16>, vector<81x32xbf16>, vector<256x32xf32> -> vector<256x32xf32>
    %c0_3 = arith.constant 0 : index
    %c0_4 = arith.constant 0 : index
    %3 = vector.load %arg4[%c0_3, %c0_4] : memref<1x32xf32, #tpu.memory_space<vmem>>, vector<1x32xf32>
    %4 = vector.broadcast %3 : vector<1x32xf32> to vector<256x32xf32>
    %5 = arith.addf %2, %4 : vector<256x32xf32>
    %cst_5 = arith.constant 0.000000e+00 : f32
    %6 = vector.broadcast %cst_5 : f32 to vector<256x32xf32>
    %7 = arith.cmpf oge, %5, %6 : vector<256x32xf32>
    %cst_6 = arith.constant 1.000000e-01 : f32
    %8 = vector.broadcast %cst_6 : f32 to vector<256x32xf32>
    %9 = arith.mulf %8, %5 : vector<256x32xf32>
    %10 = arith.select %7, %5, %9 : vector<256x32xi1>, vector<256x32xf32>
    %11 = arith.truncf %10 : vector<256x32xf32> to vector<256x32xbf16>
    %c0_7 = arith.constant 0 : index
    %c0_8 = arith.constant 0 : index
    %12 = vector.load %arg5[%c0_7, %c0_8] : memref<256x32xbf16, #tpu.memory_space<vmem>>, vector<256x32xbf16>
    tpu.vector_store %arg5[%c0_7, %c0_8], %11 {strides = array<i32>} : memref<256x32xbf16, #tpu.memory_space<vmem>>, vector<256x32xbf16>,
    return
  }
  func.func @transform_0(%arg0: i32, %arg1: i32) -> (i32, i32) {
    %c0_i32 = arith.constant 0 : i32
    %c0_i32_0 = arith.constant 0 : i32
    return %arg0, %c0_i32 : i32, i32
  }
  func.func @transform_1(%arg0: i32, %arg1: i32) -> (i32, i32) {
    %c0_i32 = arith.constant 0 : i32
    %c0_i32_0 = arith.constant 0 : i32
    return %c0_i32, %arg1 : i32, i32
  }
  func.func @transform_2(%arg0: i32, %arg1: i32) -> (i32, i32) {
    %c0_i32 = arith.constant 0 : i32
    %c0_i32_0 = arith.constant 0 : i32
    return %c0_i32, %arg1 : i32, i32
  }
  func.func @transform_3(%arg0: i32, %arg1: i32) -> (i32, i32) {
    %c0_i32 = arith.constant 0 : i32
    return %arg0, %arg1 : i32, i32
  }
}

module attributes {stable_mosaic.version = 11 : i64} {
  func.func @_mm_kernel_1k(%arg0: i32, %arg1: i32, %arg2: memref<16x128xbf16, #tpu.memory_space<vmem>>, %arg3: memref<128x640xbf16, #tpu.memory_space<vmem>>, %arg4: memref<1x640xf32, #tpu.memory_space<vmem>>, %arg5: memref<16x640xbf16, #tpu.memory_space<vmem>>) attributes {dimension_semantics = [#tpu.dimension_semantics<parallel>, #tpu.dimension_semantics<parallel>], iteration_bounds = array<i64: 1, 5>, scalar_prefetch = 0 : i64, scratch_operands = 0 : i64, tpu.core_type = #tpu.core_type<tc>, window_params = [{transform_indices = @transform_0, window_bounds = array<i64: 16, 128>}, {transform_indices = @transform_1, window_bounds = array<i64: 128, 640>}, {transform_indices = @transform_2, window_bounds = array<i64: 1, 640>}, {transform_indices = @transform_3, window_bounds = array<i64: 16, 640>}]} {
    %c0 = arith.constant 0 : index
    %c0_0 = arith.constant 0 : index
    %0 = vector.load %arg2[%c0, %c0_0] : memref<16x128xbf16, #tpu.memory_space<vmem>>, vector<16x128xbf16>
    %c0_1 = arith.constant 0 : index
    %c0_2 = arith.constant 0 : index
    %1 = vector.load %arg3[%c0_1, %c0_2] : memref<128x640xbf16, #tpu.memory_space<vmem>>, vector<128x640xbf16>
    %cst = arith.constant dense<0.000000e+00> : vector<16x640xf32>
    %2 = tpu.matmul %0, %1, %cst {dimension_numbers = #tpu.dot_dimension_numbers<[1], [0], [0], [1], [0, 0, 1, 1], [], []>} : vector<16x128xbf16>, vector<128x640xbf16>, vector<16x640xf32> -> vector<16x640xf32>
    %c0_3 = arith.constant 0 : index
    %c0_4 = arith.constant 0 : index
    %3 = vector.load %arg4[%c0_3, %c0_4] : memref<1x640xf32, #tpu.memory_space<vmem>>, vector<1x640xf32>
    %4 = vector.broadcast %3 : vector<1x640xf32> to vector<16x640xf32>
    %5 = arith.addf %2, %4 : vector<16x640xf32>
    %cst_5 = arith.constant 0.000000e+00 : f32
    %6 = vector.broadcast %cst_5 : f32 to vector<16x640xf32>
    %7 = arith.cmpf oge, %5, %6 : vector<16x640xf32>
    %cst_6 = arith.constant 1.000000e-01 : f32
    %8 = vector.broadcast %cst_6 : f32 to vector<16x640xf32>
    %9 = arith.mulf %8, %5 : vector<16x640xf32>
    %10 = arith.select %7, %5, %9 : vector<16x640xi1>, vector<16x640xf32>
    %11 = arith.truncf %10 : vector<16x640xf32> to vector<16x640xbf16>
    %c0_7 = arith.constant 0 : index
    %c0_8 = arith.constant 0 : index
    %12 = vector.load %arg5[%c0_7, %c0_8] : memref<16x640xbf16, #tpu.memory_space<vmem>>, vector<16x640xbf16>
    tpu.vector_store %arg5[%c0_7, %c0_8], %11 {strides = array<i32>} : memref<16x640xbf16, #tpu.memory_space<vmem>>, vector<16x640xbf16>,
    return
  }
  func.func @transform_0(%arg0: i32, %arg1: i32) -> (i32, i32) {
    %c0_i32 = arith.constant 0 : i32
    %c0_i32_0 = arith.constant 0 : i32
    return %arg0, %c0_i32 : i32, i32
  }
  func.func @transform_1(%arg0: i32, %arg1: i32) -> (i32, i32) {
    %c0_i32 = arith.constant 0 : i32
    %c0_i32_0 = arith.constant 0 : i32
    return %c0_i32, %arg1 : i32, i32
  }
  func.func @transform_2(%arg0: i32, %arg1: i32) -> (i32, i32) {
    %c0_i32 = arith.constant 0 : i32
    %c0_i32_0 = arith.constant 0 : i32
    return %c0_i32, %arg1 : i32, i32
  }
  func.func @transform_3(%arg0: i32, %arg1: i32) -> (i32, i32) {
    %c0_i32 = arith.constant 0 : i32
    return %arg0, %arg1 : i32, i32
  }
}

module attributes {stable_mosaic.version = 11 : i64} {
  func.func @_fac_kernel(%arg0: i32, %arg1: i32, %arg2: memref<1x8x8x128xbf16, #tpu.memory_space<any>>, %arg3: memref<1x4x4x3200xbf16, #tpu.memory_space<vmem>>, %arg4: memref<1x4x4x128xbf16, #tpu.memory_space<vmem>>, %arg5: memref<1x8x8x128xbf16, #tpu.memory_space<vmem>>, %arg6: memref<!tpu.dma_semaphore, #tpu.memory_space<semaphore_mem>>) attributes {dimension_semantics = [#tpu.dimension_semantics<parallel>, #tpu.dimension_semantics<parallel>], iteration_bounds = array<i64: 1, 1>, scalar_prefetch = 0 : i64, scratch_operands = 2 : i64, tpu.core_type = #tpu.core_type<tc>, window_params = [{}, {transform_indices = @transform_1, window_bounds = array<i64: 1, 4, 4, 3200>}, {transform_indices = @transform_2, window_bounds = array<i64: 1, 4, 4, 128>}]} {
    %c4_i32 = arith.constant 4 : i32
    %0 = arith.muli %arg1, %c4_i32 : i32
    %c0_i32 = arith.constant 0 : i32
    %c0_i32_0 = arith.constant 0 : i32
    %1 = tpu.memref_slice %arg2[%arg0, %0, %c0_i32, %c0_i32_0] : memref<1x8x8x128xbf16, #tpu.memory_space<any>> -> memref<1x8x8x128xbf16, #tpu.memory_space<any>>
    tpu.enqueue_dma source(%1 : memref<1x8x8x128xbf16, #tpu.memory_space<any>>) target(%arg5 : memref<1x8x8x128xbf16, #tpu.memory_space<vmem>>) target_semaphore(%arg6 : memref<!tpu.dma_semaphore, #tpu.memory_space<semaphore_mem>>)
    %c0_i32_1 = arith.constant 0 : i32
    %c0_i32_2 = arith.constant 0 : i32
    %2 = tpu.memref_slice %arg2[%arg0, %0, %c0_i32_1, %c0_i32_2] : memref<1x8x8x128xbf16, #tpu.memory_space<any>> -> memref<1x8x8x128xbf16, #tpu.memory_space<any>>
    tpu.wait_dma2 semaphore(%arg6 : memref<!tpu.dma_semaphore, #tpu.memory_space<semaphore_mem>>) src(%2 : memref<1x8x8x128xbf16, #tpu.memory_space<any>>) dst(%arg5 : memref<1x8x8x128xbf16, #tpu.memory_space<vmem>>)
    %cst = arith.constant 0.000000e+00 : f32
    %3 = vector.broadcast %cst : f32 to vector<1x4x4x128xf32>
    %c0 = arith.constant 0 : index
    %c0_3 = arith.constant 0 : index
    %c0_4 = arith.constant 0 : index
    %c0_5 = arith.constant 0 : index
    %4 = vector.load %arg5[%c0, %c0_3, %c0_4, %c0_5] : memref<1x8x8x128xbf16, #tpu.memory_space<vmem>>, vector<1x4x4x128xbf16>
    %5 = arith.extf %4 : vector<1x4x4x128xbf16> to vector<1x4x4x128xf32>
    %c0_6 = arith.constant 0 : index
    %c0_7 = arith.constant 0 : index
    %c0_8 = arith.constant 0 : index
    %c0_9 = arith.constant 0 : index
    %6 = vector.load %arg3[%c0_6, %c0_7, %c0_8, %c0_9] : memref<1x4x4x3200xbf16, #tpu.memory_space<vmem>>, vector<1x4x4x128xbf16>
    %7 = arith.extf %6 : vector<1x4x4x128xbf16> to vector<1x4x4x128xf32>
    %8 = arith.mulf %5, %7 : vector<1x4x4x128xf32>
    %9 = arith.addf %3, %8 : vector<1x4x4x128xf32>
    %c0_10 = arith.constant 0 : index
    %c0_11 = arith.constant 0 : index
    %c1 = arith.constant 1 : index
    %c0_12 = arith.constant 0 : index
    %10 = vector.load %arg5[%c0_10, %c0_11, %c1, %c0_12] : memref<1x8x8x128xbf16, #tpu.memory_space<vmem>>, vector<1x4x4x128xbf16>
    %11 = arith.extf %10 : vector<1x4x4x128xbf16> to vector<1x4x4x128xf32>
    %c0_13 = arith.constant 0 : index
    %c0_14 = arith.constant 0 : index
    %c0_15 = arith.constant 0 : index
    %c128 = arith.constant 128 : index
    %12 = vector.load %arg3[%c0_13, %c0_14, %c0_15, %c128] : memref<1x4x4x3200xbf16, #tpu.memory_space<vmem>>, vector<1x4x4x128xbf16>
    %13 = arith.extf %12 : vector<1x4x4x128xbf16> to vector<1x4x4x128xf32>
    %14 = arith.mulf %11, %13 : vector<1x4x4x128xf32>
    %15 = arith.addf %9, %14 : vector<1x4x4x128xf32>
    %c0_16 = arith.constant 0 : index
    %c0_17 = arith.constant 0 : index
    %c2 = arith.constant 2 : index
    %c0_18 = arith.constant 0 : index
    %16 = vector.load %arg5[%c0_16, %c0_17, %c2, %c0_18] : memref<1x8x8x128xbf16, #tpu.memory_space<vmem>>, vector<1x4x4x128xbf16>
    %17 = arith.extf %16 : vector<1x4x4x128xbf16> to vector<1x4x4x128xf32>
    %c0_19 = arith.constant 0 : index
    %c0_20 = arith.constant 0 : index
    %c0_21 = arith.constant 0 : index
    %c256 = arith.constant 256 : index
    %18 = vector.load %arg3[%c0_19, %c0_20, %c0_21, %c256] : memref<1x4x4x3200xbf16, #tpu.memory_space<vmem>>, vector<1x4x4x128xbf16>
    %19 = arith.extf %18 : vector<1x4x4x128xbf16> to vector<1x4x4x128xf32>
    %20 = arith.mulf %17, %19 : vector<1x4x4x128xf32>
    %21 = arith.addf %15, %20 : vector<1x4x4x128xf32>
    %c0_22 = arith.constant 0 : index
    %c0_23 = arith.constant 0 : index
    %c3 = arith.constant 3 : index
    %c0_24 = arith.constant 0 : index
    %22 = vector.load %arg5[%c0_22, %c0_23, %c3, %c0_24] : memref<1x8x8x128xbf16, #tpu.memory_space<vmem>>, vector<1x4x4x128xbf16>
    %23 = arith.extf %22 : vector<1x4x4x128xbf16> to vector<1x4x4x128xf32>
    %c0_25 = arith.constant 0 : index
    %c0_26 = arith.constant 0 : index
    %c0_27 = arith.constant 0 : index
    %c384 = arith.constant 384 : index
    %24 = vector.load %arg3[%c0_25, %c0_26, %c0_27, %c384] : memref<1x4x4x3200xbf16, #tpu.memory_space<vmem>>, vector<1x4x4x128xbf16>
    %25 = arith.extf %24 : vector<1x4x4x128xbf16> to vector<1x4x4x128xf32>
    %26 = arith.mulf %23, %25 : vector<1x4x4x128xf32>
    %27 = arith.addf %21, %26 : vector<1x4x4x128xf32>
    %c0_28 = arith.constant 0 : index
    %c0_29 = arith.constant 0 : index
    %c4 = arith.constant 4 : index
    %c0_30 = arith.constant 0 : index
    %28 = vector.load %arg5[%c0_28, %c0_29, %c4, %c0_30] : memref<1x8x8x128xbf16, #tpu.memory_space<vmem>>, vector<1x4x4x128xbf16>
    %29 = arith.extf %28 : vector<1x4x4x128xbf16> to vector<1x4x4x128xf32>
    %c0_31 = arith.constant 0 : index
    %c0_32 = arith.constant 0 : index
    %c0_33 = arith.constant 0 : index
    %c512 = arith.constant 512 : index
    %30 = vector.load %arg3[%c0_31, %c0_32, %c0_33, %c512] : memref<1x4x4x3200xbf16, #tpu.memory_space<vmem>>, vector<1x4x4x128xbf16>
    %31 = arith.extf %30 : vector<1x4x4x128xbf16> to vector<1x4x4x128xf32>
    %32 = arith.mulf %29, %31 : vector<1x4x4x128xf32>
    %33 = arith.addf %27, %32 : vector<1x4x4x128xf32>
    %c0_34 = arith.constant 0 : index
    %c1_35 = arith.constant 1 : index
    %c0_36 = arith.constant 0 : index
    %c0_37 = arith.constant 0 : index
    %34 = vector.load %arg5[%c0_34, %c1_35, %c0_36, %c0_37] : memref<1x8x8x128xbf16, #tpu.memory_space<vmem>>, vector<1x4x4x128xbf16>
    %35 = arith.extf %34 : vector<1x4x4x128xbf16> to vector<1x4x4x128xf32>
    %c0_38 = arith.constant 0 : index
    %c0_39 = arith.constant 0 : index
    %c0_40 = arith.constant 0 : index
    %c640 = arith.constant 640 : index
    %36 = vector.load %arg3[%c0_38, %c0_39, %c0_40, %c640] : memref<1x4x4x3200xbf16, #tpu.memory_space<vmem>>, vector<1x4x4x128xbf16>
    %37 = arith.extf %36 : vector<1x4x4x128xbf16> to vector<1x4x4x128xf32>
    %38 = arith.mulf %35, %37 : vector<1x4x4x128xf32>
    %39 = arith.addf %33, %38 : vector<1x4x4x128xf32>
    %c0_41 = arith.constant 0 : index
    %c1_42 = arith.constant 1 : index
    %c1_43 = arith.constant 1 : index
    %c0_44 = arith.constant 0 : index
    %40 = vector.load %arg5[%c0_41, %c1_42, %c1_43, %c0_44] : memref<1x8x8x128xbf16, #tpu.memory_space<vmem>>, vector<1x4x4x128xbf16>
    %41 = arith.extf %40 : vector<1x4x4x128xbf16> to vector<1x4x4x128xf32>
    %c0_45 = arith.constant 0 : index
    %c0_46 = arith.constant 0 : index
    %c0_47 = arith.constant 0 : index
    %c768 = arith.constant 768 : index
    %42 = vector.load %arg3[%c0_45, %c0_46, %c0_47, %c768] : memref<1x4x4x3200xbf16, #tpu.memory_space<vmem>>, vector<1x4x4x128xbf16>
    %43 = arith.extf %42 : vector<1x4x4x128xbf16> to vector<1x4x4x128xf32>
    %44 = arith.mulf %41, %43 : vector<1x4x4x128xf32>
    %45 = arith.addf %39, %44 : vector<1x4x4x128xf32>
    %c0_48 = arith.constant 0 : index
    %c1_49 = arith.constant 1 : index
    %c2_50 = arith.constant 2 : index
    %c0_51 = arith.constant 0 : index
    %46 = vector.load %arg5[%c0_48, %c1_49, %c2_50, %c0_51] : memref<1x8x8x128xbf16, #tpu.memory_space<vmem>>, vector<1x4x4x128xbf16>
    %47 = arith.extf %46 : vector<1x4x4x128xbf16> to vector<1x4x4x128xf32>
    %c0_52 = arith.constant 0 : index
    %c0_53 = arith.constant 0 : index
    %c0_54 = arith.constant 0 : index
    %c896 = arith.constant 896 : index
    %48 = vector.load %arg3[%c0_52, %c0_53, %c0_54, %c896] : memref<1x4x4x3200xbf16, #tpu.memory_space<vmem>>, vector<1x4x4x128xbf16>
    %49 = arith.extf %48 : vector<1x4x4x128xbf16> to vector<1x4x4x128xf32>
    %50 = arith.mulf %47, %49 : vector<1x4x4x128xf32>
    %51 = arith.addf %45, %50 : vector<1x4x4x128xf32>
    %c0_55 = arith.constant 0 : index
    %c1_56 = arith.constant 1 : index
    %c3_57 = arith.constant 3 : index
    %c0_58 = arith.constant 0 : index
    %52 = vector.load %arg5[%c0_55, %c1_56, %c3_57, %c0_58] : memref<1x8x8x128xbf16, #tpu.memory_space<vmem>>, vector<1x4x4x128xbf16>
    %53 = arith.extf %52 : vector<1x4x4x128xbf16> to vector<1x4x4x128xf32>
    %c0_59 = arith.constant 0 : index
    %c0_60 = arith.constant 0 : index
    %c0_61 = arith.constant 0 : index
    %c1024 = arith.constant 1024 : index
    %54 = vector.load %arg3[%c0_59, %c0_60, %c0_61, %c1024] : memref<1x4x4x3200xbf16, #tpu.memory_space<vmem>>, vector<1x4x4x128xbf16>
    %55 = arith.extf %54 : vector<1x4x4x128xbf16> to vector<1x4x4x128xf32>
    %56 = arith.mulf %53, %55 : vector<1x4x4x128xf32>
    %57 = arith.addf %51, %56 : vector<1x4x4x128xf32>
    %c0_62 = arith.constant 0 : index
    %c1_63 = arith.constant 1 : index
    %c4_64 = arith.constant 4 : index
    %c0_65 = arith.constant 0 : index
    %58 = vector.load %arg5[%c0_62, %c1_63, %c4_64, %c0_65] : memref<1x8x8x128xbf16, #tpu.memory_space<vmem>>, vector<1x4x4x128xbf16>
    %59 = arith.extf %58 : vector<1x4x4x128xbf16> to vector<1x4x4x128xf32>
    %c0_66 = arith.constant 0 : index
    %c0_67 = arith.constant 0 : index
    %c0_68 = arith.constant 0 : index
    %c1152 = arith.constant 1152 : index
    %60 = vector.load %arg3[%c0_66, %c0_67, %c0_68, %c1152] : memref<1x4x4x3200xbf16, #tpu.memory_space<vmem>>, vector<1x4x4x128xbf16>
    %61 = arith.extf %60 : vector<1x4x4x128xbf16> to vector<1x4x4x128xf32>
    %62 = arith.mulf %59, %61 : vector<1x4x4x128xf32>
    %63 = arith.addf %57, %62 : vector<1x4x4x128xf32>
    %c0_69 = arith.constant 0 : index
    %c2_70 = arith.constant 2 : index
    %c0_71 = arith.constant 0 : index
    %c0_72 = arith.constant 0 : index
    %64 = vector.load %arg5[%c0_69, %c2_70, %c0_71, %c0_72] : memref<1x8x8x128xbf16, #tpu.memory_space<vmem>>, vector<1x4x4x128xbf16>
    %65 = arith.extf %64 : vector<1x4x4x128xbf16> to vector<1x4x4x128xf32>
    %c0_73 = arith.constant 0 : index
    %c0_74 = arith.constant 0 : index
    %c0_75 = arith.constant 0 : index
    %c1280 = arith.constant 1280 : index
    %66 = vector.load %arg3[%c0_73, %c0_74, %c0_75, %c1280] : memref<1x4x4x3200xbf16, #tpu.memory_space<vmem>>, vector<1x4x4x128xbf16>
    %67 = arith.extf %66 : vector<1x4x4x128xbf16> to vector<1x4x4x128xf32>
    %68 = arith.mulf %65, %67 : vector<1x4x4x128xf32>
    %69 = arith.addf %63, %68 : vector<1x4x4x128xf32>
    %c0_76 = arith.constant 0 : index
    %c2_77 = arith.constant 2 : index
    %c1_78 = arith.constant 1 : index
    %c0_79 = arith.constant 0 : index
    %70 = vector.load %arg5[%c0_76, %c2_77, %c1_78, %c0_79] : memref<1x8x8x128xbf16, #tpu.memory_space<vmem>>, vector<1x4x4x128xbf16>
    %71 = arith.extf %70 : vector<1x4x4x128xbf16> to vector<1x4x4x128xf32>
    %c0_80 = arith.constant 0 : index
    %c0_81 = arith.constant 0 : index
    %c0_82 = arith.constant 0 : index
    %c1408 = arith.constant 1408 : index
    %72 = vector.load %arg3[%c0_80, %c0_81, %c0_82, %c1408] : memref<1x4x4x3200xbf16, #tpu.memory_space<vmem>>, vector<1x4x4x128xbf16>
    %73 = arith.extf %72 : vector<1x4x4x128xbf16> to vector<1x4x4x128xf32>
    %74 = arith.mulf %71, %73 : vector<1x4x4x128xf32>
    %75 = arith.addf %69, %74 : vector<1x4x4x128xf32>
    %c0_83 = arith.constant 0 : index
    %c2_84 = arith.constant 2 : index
    %c2_85 = arith.constant 2 : index
    %c0_86 = arith.constant 0 : index
    %76 = vector.load %arg5[%c0_83, %c2_84, %c2_85, %c0_86] : memref<1x8x8x128xbf16, #tpu.memory_space<vmem>>, vector<1x4x4x128xbf16>
    %77 = arith.extf %76 : vector<1x4x4x128xbf16> to vector<1x4x4x128xf32>
    %c0_87 = arith.constant 0 : index
    %c0_88 = arith.constant 0 : index
    %c0_89 = arith.constant 0 : index
    %c1536 = arith.constant 1536 : index
    %78 = vector.load %arg3[%c0_87, %c0_88, %c0_89, %c1536] : memref<1x4x4x3200xbf16, #tpu.memory_space<vmem>>, vector<1x4x4x128xbf16>
    %79 = arith.extf %78 : vector<1x4x4x128xbf16> to vector<1x4x4x128xf32>
    %80 = arith.mulf %77, %79 : vector<1x4x4x128xf32>
    %81 = arith.addf %75, %80 : vector<1x4x4x128xf32>
    %c0_90 = arith.constant 0 : index
    %c2_91 = arith.constant 2 : index
    %c3_92 = arith.constant 3 : index
    %c0_93 = arith.constant 0 : index
    %82 = vector.load %arg5[%c0_90, %c2_91, %c3_92, %c0_93] : memref<1x8x8x128xbf16, #tpu.memory_space<vmem>>, vector<1x4x4x128xbf16>
    %83 = arith.extf %82 : vector<1x4x4x128xbf16> to vector<1x4x4x128xf32>
    %c0_94 = arith.constant 0 : index
    %c0_95 = arith.constant 0 : index
    %c0_96 = arith.constant 0 : index
    %c1664 = arith.constant 1664 : index
    %84 = vector.load %arg3[%c0_94, %c0_95, %c0_96, %c1664] : memref<1x4x4x3200xbf16, #tpu.memory_space<vmem>>, vector<1x4x4x128xbf16>
    %85 = arith.extf %84 : vector<1x4x4x128xbf16> to vector<1x4x4x128xf32>
    %86 = arith.mulf %83, %85 : vector<1x4x4x128xf32>
    %87 = arith.addf %81, %86 : vector<1x4x4x128xf32>
    %c0_97 = arith.constant 0 : index
    %c2_98 = arith.constant 2 : index
    %c4_99 = arith.constant 4 : index
    %c0_100 = arith.constant 0 : index
    %88 = vector.load %arg5[%c0_97, %c2_98, %c4_99, %c0_100] : memref<1x8x8x128xbf16, #tpu.memory_space<vmem>>, vector<1x4x4x128xbf16>
    %89 = arith.extf %88 : vector<1x4x4x128xbf16> to vector<1x4x4x128xf32>
    %c0_101 = arith.constant 0 : index
    %c0_102 = arith.constant 0 : index
    %c0_103 = arith.constant 0 : index
    %c1792 = arith.constant 1792 : index
    %90 = vector.load %arg3[%c0_101, %c0_102, %c0_103, %c1792] : memref<1x4x4x3200xbf16, #tpu.memory_space<vmem>>, vector<1x4x4x128xbf16>
    %91 = arith.extf %90 : vector<1x4x4x128xbf16> to vector<1x4x4x128xf32>
    %92 = arith.mulf %89, %91 : vector<1x4x4x128xf32>
    %93 = arith.addf %87, %92 : vector<1x4x4x128xf32>
    %c0_104 = arith.constant 0 : index
    %c3_105 = arith.constant 3 : index
    %c0_106 = arith.constant 0 : index
    %c0_107 = arith.constant 0 : index
    %94 = vector.load %arg5[%c0_104, %c3_105, %c0_106, %c0_107] : memref<1x8x8x128xbf16, #tpu.memory_space<vmem>>, vector<1x4x4x128xbf16>
    %95 = arith.extf %94 : vector<1x4x4x128xbf16> to vector<1x4x4x128xf32>
    %c0_108 = arith.constant 0 : index
    %c0_109 = arith.constant 0 : index
    %c0_110 = arith.constant 0 : index
    %c1920 = arith.constant 1920 : index
    %96 = vector.load %arg3[%c0_108, %c0_109, %c0_110, %c1920] : memref<1x4x4x3200xbf16, #tpu.memory_space<vmem>>, vector<1x4x4x128xbf16>
    %97 = arith.extf %96 : vector<1x4x4x128xbf16> to vector<1x4x4x128xf32>
    %98 = arith.mulf %95, %97 : vector<1x4x4x128xf32>
    %99 = arith.addf %93, %98 : vector<1x4x4x128xf32>
    %c0_111 = arith.constant 0 : index
    %c3_112 = arith.constant 3 : index
    %c1_113 = arith.constant 1 : index
    %c0_114 = arith.constant 0 : index
    %100 = vector.load %arg5[%c0_111, %c3_112, %c1_113, %c0_114] : memref<1x8x8x128xbf16, #tpu.memory_space<vmem>>, vector<1x4x4x128xbf16>
    %101 = arith.extf %100 : vector<1x4x4x128xbf16> to vector<1x4x4x128xf32>
    %c0_115 = arith.constant 0 : index
    %c0_116 = arith.constant 0 : index
    %c0_117 = arith.constant 0 : index
    %c2048 = arith.constant 2048 : index
    %102 = vector.load %arg3[%c0_115, %c0_116, %c0_117, %c2048] : memref<1x4x4x3200xbf16, #tpu.memory_space<vmem>>, vector<1x4x4x128xbf16>
    %103 = arith.extf %102 : vector<1x4x4x128xbf16> to vector<1x4x4x128xf32>
    %104 = arith.mulf %101, %103 : vector<1x4x4x128xf32>
    %105 = arith.addf %99, %104 : vector<1x4x4x128xf32>
    %c0_118 = arith.constant 0 : index
    %c3_119 = arith.constant 3 : index
    %c2_120 = arith.constant 2 : index
    %c0_121 = arith.constant 0 : index
    %106 = vector.load %arg5[%c0_118, %c3_119, %c2_120, %c0_121] : memref<1x8x8x128xbf16, #tpu.memory_space<vmem>>, vector<1x4x4x128xbf16>
    %107 = arith.extf %106 : vector<1x4x4x128xbf16> to vector<1x4x4x128xf32>
    %c0_122 = arith.constant 0 : index
    %c0_123 = arith.constant 0 : index
    %c0_124 = arith.constant 0 : index
    %c2176 = arith.constant 2176 : index
    %108 = vector.load %arg3[%c0_122, %c0_123, %c0_124, %c2176] : memref<1x4x4x3200xbf16, #tpu.memory_space<vmem>>, vector<1x4x4x128xbf16>
    %109 = arith.extf %108 : vector<1x4x4x128xbf16> to vector<1x4x4x128xf32>
    %110 = arith.mulf %107, %109 : vector<1x4x4x128xf32>
    %111 = arith.addf %105, %110 : vector<1x4x4x128xf32>
    %c0_125 = arith.constant 0 : index
    %c3_126 = arith.constant 3 : index
    %c3_127 = arith.constant 3 : index
    %c0_128 = arith.constant 0 : index
    %112 = vector.load %arg5[%c0_125, %c3_126, %c3_127, %c0_128] : memref<1x8x8x128xbf16, #tpu.memory_space<vmem>>, vector<1x4x4x128xbf16>
    %113 = arith.extf %112 : vector<1x4x4x128xbf16> to vector<1x4x4x128xf32>
    %c0_129 = arith.constant 0 : index
    %c0_130 = arith.constant 0 : index
    %c0_131 = arith.constant 0 : index
    %c2304 = arith.constant 2304 : index
    %114 = vector.load %arg3[%c0_129, %c0_130, %c0_131, %c2304] : memref<1x4x4x3200xbf16, #tpu.memory_space<vmem>>, vector<1x4x4x128xbf16>
    %115 = arith.extf %114 : vector<1x4x4x128xbf16> to vector<1x4x4x128xf32>
    %116 = arith.mulf %113, %115 : vector<1x4x4x128xf32>
    %117 = arith.addf %111, %116 : vector<1x4x4x128xf32>
    %c0_132 = arith.constant 0 : index
    %c3_133 = arith.constant 3 : index
    %c4_134 = arith.constant 4 : index
    %c0_135 = arith.constant 0 : index
    %118 = vector.load %arg5[%c0_132, %c3_133, %c4_134, %c0_135] : memref<1x8x8x128xbf16, #tpu.memory_space<vmem>>, vector<1x4x4x128xbf16>
    %119 = arith.extf %118 : vector<1x4x4x128xbf16> to vector<1x4x4x128xf32>
    %c0_136 = arith.constant 0 : index
    %c0_137 = arith.constant 0 : index
    %c0_138 = arith.constant 0 : index
    %c2432 = arith.constant 2432 : index
    %120 = vector.load %arg3[%c0_136, %c0_137, %c0_138, %c2432] : memref<1x4x4x3200xbf16, #tpu.memory_space<vmem>>, vector<1x4x4x128xbf16>
    %121 = arith.extf %120 : vector<1x4x4x128xbf16> to vector<1x4x4x128xf32>
    %122 = arith.mulf %119, %121 : vector<1x4x4x128xf32>
    %123 = arith.addf %117, %122 : vector<1x4x4x128xf32>
    %c0_139 = arith.constant 0 : index
    %c4_140 = arith.constant 4 : index
    %c0_141 = arith.constant 0 : index
    %c0_142 = arith.constant 0 : index
    %124 = vector.load %arg5[%c0_139, %c4_140, %c0_141, %c0_142] : memref<1x8x8x128xbf16, #tpu.memory_space<vmem>>, vector<1x4x4x128xbf16>
    %125 = arith.extf %124 : vector<1x4x4x128xbf16> to vector<1x4x4x128xf32>
    %c0_143 = arith.constant 0 : index
    %c0_144 = arith.constant 0 : index
    %c0_145 = arith.constant 0 : index
    %c2560 = arith.constant 2560 : index
    %126 = vector.load %arg3[%c0_143, %c0_144, %c0_145, %c2560] : memref<1x4x4x3200xbf16, #tpu.memory_space<vmem>>, vector<1x4x4x128xbf16>
    %127 = arith.extf %126 : vector<1x4x4x128xbf16> to vector<1x4x4x128xf32>
    %128 = arith.mulf %125, %127 : vector<1x4x4x128xf32>
    %129 = arith.addf %123, %128 : vector<1x4x4x128xf32>
    %c0_146 = arith.constant 0 : index
    %c4_147 = arith.constant 4 : index
    %c1_148 = arith.constant 1 : index
    %c0_149 = arith.constant 0 : index
    %130 = vector.load %arg5[%c0_146, %c4_147, %c1_148, %c0_149] : memref<1x8x8x128xbf16, #tpu.memory_space<vmem>>, vector<1x4x4x128xbf16>
    %131 = arith.extf %130 : vector<1x4x4x128xbf16> to vector<1x4x4x128xf32>
    %c0_150 = arith.constant 0 : index
    %c0_151 = arith.constant 0 : index
    %c0_152 = arith.constant 0 : index
    %c2688 = arith.constant 2688 : index
    %132 = vector.load %arg3[%c0_150, %c0_151, %c0_152, %c2688] : memref<1x4x4x3200xbf16, #tpu.memory_space<vmem>>, vector<1x4x4x128xbf16>
    %133 = arith.extf %132 : vector<1x4x4x128xbf16> to vector<1x4x4x128xf32>
    %134 = arith.mulf %131, %133 : vector<1x4x4x128xf32>
    %135 = arith.addf %129, %134 : vector<1x4x4x128xf32>
    %c0_153 = arith.constant 0 : index
    %c4_154 = arith.constant 4 : index
    %c2_155 = arith.constant 2 : index
    %c0_156 = arith.constant 0 : index
    %136 = vector.load %arg5[%c0_153, %c4_154, %c2_155, %c0_156] : memref<1x8x8x128xbf16, #tpu.memory_space<vmem>>, vector<1x4x4x128xbf16>
    %137 = arith.extf %136 : vector<1x4x4x128xbf16> to vector<1x4x4x128xf32>
    %c0_157 = arith.constant 0 : index
    %c0_158 = arith.constant 0 : index
    %c0_159 = arith.constant 0 : index
    %c2816 = arith.constant 2816 : index
    %138 = vector.load %arg3[%c0_157, %c0_158, %c0_159, %c2816] : memref<1x4x4x3200xbf16, #tpu.memory_space<vmem>>, vector<1x4x4x128xbf16>
    %139 = arith.extf %138 : vector<1x4x4x128xbf16> to vector<1x4x4x128xf32>
    %140 = arith.mulf %137, %139 : vector<1x4x4x128xf32>
    %141 = arith.addf %135, %140 : vector<1x4x4x128xf32>
    %c0_160 = arith.constant 0 : index
    %c4_161 = arith.constant 4 : index
    %c3_162 = arith.constant 3 : index
    %c0_163 = arith.constant 0 : index
    %142 = vector.load %arg5[%c0_160, %c4_161, %c3_162, %c0_163] : memref<1x8x8x128xbf16, #tpu.memory_space<vmem>>, vector<1x4x4x128xbf16>
    %143 = arith.extf %142 : vector<1x4x4x128xbf16> to vector<1x4x4x128xf32>
    %c0_164 = arith.constant 0 : index
    %c0_165 = arith.constant 0 : index
    %c0_166 = arith.constant 0 : index
    %c2944 = arith.constant 2944 : index
    %144 = vector.load %arg3[%c0_164, %c0_165, %c0_166, %c2944] : memref<1x4x4x3200xbf16, #tpu.memory_space<vmem>>, vector<1x4x4x128xbf16>
    %145 = arith.extf %144 : vector<1x4x4x128xbf16> to vector<1x4x4x128xf32>
    %146 = arith.mulf %143, %145 : vector<1x4x4x128xf32>
    %147 = arith.addf %141, %146 : vector<1x4x4x128xf32>
    %c0_167 = arith.constant 0 : index
    %c4_168 = arith.constant 4 : index
    %c4_169 = arith.constant 4 : index
    %c0_170 = arith.constant 0 : index
    %148 = vector.load %arg5[%c0_167, %c4_168, %c4_169, %c0_170] : memref<1x8x8x128xbf16, #tpu.memory_space<vmem>>, vector<1x4x4x128xbf16>
    %149 = arith.extf %148 : vector<1x4x4x128xbf16> to vector<1x4x4x128xf32>
    %c0_171 = arith.constant 0 : index
    %c0_172 = arith.constant 0 : index
    %c0_173 = arith.constant 0 : index
    %c3072 = arith.constant 3072 : index
    %150 = vector.load %arg3[%c0_171, %c0_172, %c0_173, %c3072] : memref<1x4x4x3200xbf16, #tpu.memory_space<vmem>>, vector<1x4x4x128xbf16>
    %151 = arith.extf %150 : vector<1x4x4x128xbf16> to vector<1x4x4x128xf32>
    %152 = arith.mulf %149, %151 : vector<1x4x4x128xf32>
    %153 = arith.addf %147, %152 : vector<1x4x4x128xf32>
    %154 = arith.truncf %153 : vector<1x4x4x128xf32> to vector<1x4x4x128xbf16>
    %c0_174 = arith.constant 0 : index
    %c0_175 = arith.constant 0 : index
    %c0_176 = arith.constant 0 : index
    %c0_177 = arith.constant 0 : index
    %155 = vector.load %arg4[%c0_174, %c0_175, %c0_176, %c0_177] : memref<1x4x4x128xbf16, #tpu.memory_space<vmem>>, vector<1x4x4x128xbf16>
    tpu.vector_store %arg4[%c0_174, %c0_175, %c0_176, %c0_177], %154 {strides = array<i32>} : memref<1x4x4x128xbf16, #tpu.memory_space<vmem>>, vector<1x4x4x128xbf16>,
    return
  }
  func.func @transform_1(%arg0: i32, %arg1: i32) -> (i32, i32, i32, i32) {
    %c0_i32 = arith.constant 0 : i32
    %c0_i32_0 = arith.constant 0 : i32
    %c0_i32_1 = arith.constant 0 : i32
    return %arg0, %arg1, %c0_i32, %c0_i32_0 : i32, i32, i32, i32
  }
  func.func @transform_2(%arg0: i32, %arg1: i32) -> (i32, i32, i32, i32) {
    %c0_i32 = arith.constant 0 : i32
    %c0_i32_0 = arith.constant 0 : i32
    %c0_i32_1 = arith.constant 0 : i32
    return %arg0, %arg1, %c0_i32, %c0_i32_0 : i32, i32, i32, i32
  }
}

module attributes {stable_mosaic.version = 11 : i64} {
  func.func @_mm_kernel_nk(%arg0: i32, %arg1: i32, %arg2: i32, %arg3: memref<16x640xbf16, #tpu.memory_space<vmem>>, %arg4: memref<640x128xbf16, #tpu.memory_space<vmem>>, %arg5: memref<1x128xf32, #tpu.memory_space<vmem>>, %arg6: memref<16x128xbf16, #tpu.memory_space<vmem>>, %arg7: memref<16x128xf32, #tpu.memory_space<vmem>>) attributes {dimension_semantics = [#tpu.dimension_semantics<parallel>, #tpu.dimension_semantics<parallel>, #tpu.dimension_semantics<arbitrary>], iteration_bounds = array<i64: 1, 1, 5>, scalar_prefetch = 0 : i64, scratch_operands = 1 : i64, tpu.core_type = #tpu.core_type<tc>, window_params = [{transform_indices = @transform_0, window_bounds = array<i64: 16, 640>}, {transform_indices = @transform_1, window_bounds = array<i64: 640, 128>}, {transform_indices = @transform_2, window_bounds = array<i64: 1, 128>}, {transform_indices = @transform_3, window_bounds = array<i64: 16, 128>}]} {
    %c0_i32 = arith.constant 0 : i32
    %0 = arith.cmpi eq, %arg2, %c0_i32 : i32
    %1 = arith.extui %0 : i1 to i32
    %c0_i32_0 = arith.constant 0 : i32
    %2 = arith.cmpi ne, %1, %c0_i32_0 : i32
    scf.if %2 {
      %cst_9 = arith.constant 0.000000e+00 : f32
      %12 = vector.broadcast %cst_9 : f32 to vector<16x128xf32>
      %c0_10 = arith.constant 0 : index
      %c0_11 = arith.constant 0 : index
      %13 = vector.load %arg7[%c0_10, %c0_11] : memref<16x128xf32, #tpu.memory_space<vmem>>, vector<16x128xf32>
      tpu.vector_store %arg7[%c0_10, %c0_11], %12 {strides = array<i32>} : memref<16x128xf32, #tpu.memory_space<vmem>>, vector<16x128xf32>,
    } else {
    }
    %c0 = arith.constant 0 : index
    %c0_1 = arith.constant 0 : index
    %3 = vector.load %arg7[%c0, %c0_1] : memref<16x128xf32, #tpu.memory_space<vmem>>, vector<16x128xf32>
    %c0_2 = arith.constant 0 : index
    %c0_3 = arith.constant 0 : index
    %4 = vector.load %arg3[%c0_2, %c0_3] : memref<16x640xbf16, #tpu.memory_space<vmem>>, vector<16x640xbf16>
    %c0_4 = arith.constant 0 : index
    %c0_5 = arith.constant 0 : index
    %5 = vector.load %arg4[%c0_4, %c0_5] : memref<640x128xbf16, #tpu.memory_space<vmem>>, vector<640x128xbf16>
    %cst = arith.constant dense<0.000000e+00> : vector<16x128xf32>
    %6 = tpu.matmul %4, %5, %cst {dimension_numbers = #tpu.dot_dimension_numbers<[1], [0], [0], [1], [0, 0, 1, 1], [], []>} : vector<16x640xbf16>, vector<640x128xbf16>, vector<16x128xf32> -> vector<16x128xf32>
    %7 = arith.addf %3, %6 : vector<16x128xf32>
    %c0_6 = arith.constant 0 : index
    %c0_7 = arith.constant 0 : index
    %8 = vector.load %arg7[%c0_6, %c0_7] : memref<16x128xf32, #tpu.memory_space<vmem>>, vector<16x128xf32>
    tpu.vector_store %arg7[%c0_6, %c0_7], %7 {strides = array<i32>} : memref<16x128xf32, #tpu.memory_space<vmem>>, vector<16x128xf32>,
    %c4_i32 = arith.constant 4 : i32
    %9 = arith.cmpi eq, %arg2, %c4_i32 : i32
    %10 = arith.extui %9 : i1 to i32
    %c0_i32_8 = arith.constant 0 : i32
    %11 = arith.cmpi ne, %10, %c0_i32_8 : i32
    scf.if %11 {
      %c0_9 = arith.constant 0 : index
      %c0_10 = arith.constant 0 : index
      %12 = vector.load %arg7[%c0_9, %c0_10] : memref<16x128xf32, #tpu.memory_space<vmem>>, vector<16x128xf32>
      %c0_11 = arith.constant 0 : index
      %c0_12 = arith.constant 0 : index
      %13 = vector.load %arg5[%c0_11, %c0_12] : memref<1x128xf32, #tpu.memory_space<vmem>>, vector<1x128xf32>
      %14 = vector.broadcast %13 : vector<1x128xf32> to vector<16x128xf32>
      %15 = arith.addf %12, %14 : vector<16x128xf32>
      %cst_13 = arith.constant 0.000000e+00 : f32
      %16 = vector.broadcast %cst_13 : f32 to vector<16x128xf32>
      %17 = arith.cmpf oge, %15, %16 : vector<16x128xf32>
      %cst_14 = arith.constant 1.000000e-01 : f32
      %18 = vector.broadcast %cst_14 : f32 to vector<16x128xf32>
      %19 = arith.mulf %18, %15 : vector<16x128xf32>
      %20 = arith.select %17, %15, %19 : vector<16x128xi1>, vector<16x128xf32>
      %21 = arith.truncf %20 : vector<16x128xf32> to vector<16x128xbf16>
      %c0_15 = arith.constant 0 : index
      %c0_16 = arith.constant 0 : index
      %22 = vector.load %arg6[%c0_15, %c0_16] : memref<16x128xbf16, #tpu.memory_space<vmem>>, vector<16x128xbf16>
      tpu.vector_store %arg6[%c0_15, %c0_16], %21 {strides = array<i32>} : memref<16x128xbf16, #tpu.memory_space<vmem>>, vector<16x128xbf16>,
    } else {
    }
    return
  }
  func.func @transform_0(%arg0: i32, %arg1: i32, %arg2: i32) -> (i32, i32) {
    %c0_i32 = arith.constant 0 : i32
    return %arg0, %arg2 : i32, i32
  }
  func.func @transform_1(%arg0: i32, %arg1: i32, %arg2: i32) -> (i32, i32) {
    %c0_i32 = arith.constant 0 : i32
    return %arg2, %arg1 : i32, i32
  }
  func.func @transform_2(%arg0: i32, %arg1: i32, %arg2: i32) -> (i32, i32) {
    %c0_i32 = arith.constant 0 : i32
    %c0_i32_0 = arith.constant 0 : i32
    return %c0_i32, %arg1 : i32, i32
  }
  func.func @transform_3(%arg0: i32, %arg1: i32, %arg2: i32) -> (i32, i32) {
    %c0_i32 = arith.constant 0 : i32
    return %arg0, %arg1 : i32, i32
  }
}

module attributes {stable_mosaic.version = 11 : i64} {
  func.func @_mm_kernel_nk(%arg0: i32, %arg1: i32, %arg2: i32, %arg3: memref<16x512xbf16, #tpu.memory_space<vmem>>, %arg4: memref<512x64xbf16, #tpu.memory_space<vmem>>, %arg5: memref<1x64xf32, #tpu.memory_space<vmem>>, %arg6: memref<16x64xbf16, #tpu.memory_space<vmem>>, %arg7: memref<16x64xf32, #tpu.memory_space<vmem>>) attributes {dimension_semantics = [#tpu.dimension_semantics<parallel>, #tpu.dimension_semantics<parallel>, #tpu.dimension_semantics<arbitrary>], iteration_bounds = array<i64: 1, 1, 2>, scalar_prefetch = 0 : i64, scratch_operands = 1 : i64, tpu.core_type = #tpu.core_type<tc>, window_params = [{transform_indices = @transform_0, window_bounds = array<i64: 16, 512>}, {transform_indices = @transform_1, window_bounds = array<i64: 512, 64>}, {transform_indices = @transform_2, window_bounds = array<i64: 1, 64>}, {transform_indices = @transform_3, window_bounds = array<i64: 16, 64>}]} {
    %c0_i32 = arith.constant 0 : i32
    %0 = arith.cmpi eq, %arg2, %c0_i32 : i32
    %1 = arith.extui %0 : i1 to i32
    %c0_i32_0 = arith.constant 0 : i32
    %2 = arith.cmpi ne, %1, %c0_i32_0 : i32
    scf.if %2 {
      %cst_9 = arith.constant 0.000000e+00 : f32
      %12 = vector.broadcast %cst_9 : f32 to vector<16x64xf32>
      %c0_10 = arith.constant 0 : index
      %c0_11 = arith.constant 0 : index
      %13 = vector.load %arg7[%c0_10, %c0_11] : memref<16x64xf32, #tpu.memory_space<vmem>>, vector<16x64xf32>
      tpu.vector_store %arg7[%c0_10, %c0_11], %12 {strides = array<i32>} : memref<16x64xf32, #tpu.memory_space<vmem>>, vector<16x64xf32>,
    } else {
    }
    %c0 = arith.constant 0 : index
    %c0_1 = arith.constant 0 : index
    %3 = vector.load %arg7[%c0, %c0_1] : memref<16x64xf32, #tpu.memory_space<vmem>>, vector<16x64xf32>
    %c0_2 = arith.constant 0 : index
    %c0_3 = arith.constant 0 : index
    %4 = vector.load %arg3[%c0_2, %c0_3] : memref<16x512xbf16, #tpu.memory_space<vmem>>, vector<16x512xbf16>
    %c0_4 = arith.constant 0 : index
    %c0_5 = arith.constant 0 : index
    %5 = vector.load %arg4[%c0_4, %c0_5] : memref<512x64xbf16, #tpu.memory_space<vmem>>, vector<512x64xbf16>
    %cst = arith.constant dense<0.000000e+00> : vector<16x64xf32>
    %6 = tpu.matmul %4, %5, %cst {dimension_numbers = #tpu.dot_dimension_numbers<[1], [0], [0], [1], [0, 0, 1, 1], [], []>} : vector<16x512xbf16>, vector<512x64xbf16>, vector<16x64xf32> -> vector<16x64xf32>
    %7 = arith.addf %3, %6 : vector<16x64xf32>
    %c0_6 = arith.constant 0 : index
    %c0_7 = arith.constant 0 : index
    %8 = vector.load %arg7[%c0_6, %c0_7] : memref<16x64xf32, #tpu.memory_space<vmem>>, vector<16x64xf32>
    tpu.vector_store %arg7[%c0_6, %c0_7], %7 {strides = array<i32>} : memref<16x64xf32, #tpu.memory_space<vmem>>, vector<16x64xf32>,
    %c1_i32 = arith.constant 1 : i32
    %9 = arith.cmpi eq, %arg2, %c1_i32 : i32
    %10 = arith.extui %9 : i1 to i32
    %c0_i32_8 = arith.constant 0 : i32
    %11 = arith.cmpi ne, %10, %c0_i32_8 : i32
    scf.if %11 {
      %c0_9 = arith.constant 0 : index
      %c0_10 = arith.constant 0 : index
      %12 = vector.load %arg7[%c0_9, %c0_10] : memref<16x64xf32, #tpu.memory_space<vmem>>, vector<16x64xf32>
      %c0_11 = arith.constant 0 : index
      %c0_12 = arith.constant 0 : index
      %13 = vector.load %arg5[%c0_11, %c0_12] : memref<1x64xf32, #tpu.memory_space<vmem>>, vector<1x64xf32>
      %14 = vector.broadcast %13 : vector<1x64xf32> to vector<16x64xf32>
      %15 = arith.addf %12, %14 : vector<16x64xf32>
      %cst_13 = arith.constant 0.000000e+00 : f32
      %16 = vector.broadcast %cst_13 : f32 to vector<16x64xf32>
      %17 = arith.cmpf oge, %15, %16 : vector<16x64xf32>
      %cst_14 = arith.constant 1.000000e-01 : f32
      %18 = vector.broadcast %cst_14 : f32 to vector<16x64xf32>
      %19 = arith.mulf %18, %15 : vector<16x64xf32>
      %20 = arith.select %17, %15, %19 : vector<16x64xi1>, vector<16x64xf32>
      %21 = arith.truncf %20 : vector<16x64xf32> to vector<16x64xbf16>
      %c0_15 = arith.constant 0 : index
      %c0_16 = arith.constant 0 : index
      %22 = vector.load %arg6[%c0_15, %c0_16] : memref<16x64xbf16, #tpu.memory_space<vmem>>, vector<16x64xbf16>
      tpu.vector_store %arg6[%c0_15, %c0_16], %21 {strides = array<i32>} : memref<16x64xbf16, #tpu.memory_space<vmem>>, vector<16x64xbf16>,
    } else {
    }
    return
  }
  func.func @transform_0(%arg0: i32, %arg1: i32, %arg2: i32) -> (i32, i32) {
    %c0_i32 = arith.constant 0 : i32
    return %arg0, %arg2 : i32, i32
  }
  func.func @transform_1(%arg0: i32, %arg1: i32, %arg2: i32) -> (i32, i32) {
    %c0_i32 = arith.constant 0 : i32
    return %arg2, %arg1 : i32, i32
  }
  func.func @transform_2(%arg0: i32, %arg1: i32, %arg2: i32) -> (i32, i32) {
    %c0_i32 = arith.constant 0 : i32
    %c0_i32_0 = arith.constant 0 : i32
    return %c0_i32, %arg1 : i32, i32
  }
  func.func @transform_3(%arg0: i32, %arg1: i32, %arg2: i32) -> (i32, i32) {
    %c0_i32 = arith.constant 0 : i32
    return %arg0, %arg1 : i32, i32
  }
}

module attributes {stable_mosaic.version = 11 : i64} {
  func.func @_mm_kernel_1k(%arg0: i32, %arg1: i32, %arg2: memref<64x256xbf16, #tpu.memory_space<vmem>>, %arg3: memref<256x32xbf16, #tpu.memory_space<vmem>>, %arg4: memref<1x32xf32, #tpu.memory_space<vmem>>, %arg5: memref<64x32xbf16, #tpu.memory_space<vmem>>) attributes {dimension_semantics = [#tpu.dimension_semantics<parallel>, #tpu.dimension_semantics<parallel>], iteration_bounds = array<i64: 1, 1>, scalar_prefetch = 0 : i64, scratch_operands = 0 : i64, tpu.core_type = #tpu.core_type<tc>, window_params = [{transform_indices = @transform_0, window_bounds = array<i64: 64, 256>}, {transform_indices = @transform_1, window_bounds = array<i64: 256, 32>}, {transform_indices = @transform_2, window_bounds = array<i64: 1, 32>}, {transform_indices = @transform_3, window_bounds = array<i64: 64, 32>}]} {
    %c0 = arith.constant 0 : index
    %c0_0 = arith.constant 0 : index
    %0 = vector.load %arg2[%c0, %c0_0] : memref<64x256xbf16, #tpu.memory_space<vmem>>, vector<64x256xbf16>
    %c0_1 = arith.constant 0 : index
    %c0_2 = arith.constant 0 : index
    %1 = vector.load %arg3[%c0_1, %c0_2] : memref<256x32xbf16, #tpu.memory_space<vmem>>, vector<256x32xbf16>
    %cst = arith.constant dense<0.000000e+00> : vector<64x32xf32>
    %2 = tpu.matmul %0, %1, %cst {dimension_numbers = #tpu.dot_dimension_numbers<[1], [0], [0], [1], [0, 0, 1, 1], [], []>} : vector<64x256xbf16>, vector<256x32xbf16>, vector<64x32xf32> -> vector<64x32xf32>
    %c0_3 = arith.constant 0 : index
    %c0_4 = arith.constant 0 : index
    %3 = vector.load %arg4[%c0_3, %c0_4] : memref<1x32xf32, #tpu.memory_space<vmem>>, vector<1x32xf32>
    %4 = vector.broadcast %3 : vector<1x32xf32> to vector<64x32xf32>
    %5 = arith.addf %2, %4 : vector<64x32xf32>
    %cst_5 = arith.constant 0.000000e+00 : f32
    %6 = vector.broadcast %cst_5 : f32 to vector<64x32xf32>
    %7 = arith.cmpf oge, %5, %6 : vector<64x32xf32>
    %cst_6 = arith.constant 1.000000e-01 : f32
    %8 = vector.broadcast %cst_6 : f32 to vector<64x32xf32>
    %9 = arith.mulf %8, %5 : vector<64x32xf32>
    %10 = arith.select %7, %5, %9 : vector<64x32xi1>, vector<64x32xf32>
    %11 = arith.truncf %10 : vector<64x32xf32> to vector<64x32xbf16>
    %c0_7 = arith.constant 0 : index
    %c0_8 = arith.constant 0 : index
    %12 = vector.load %arg5[%c0_7, %c0_8] : memref<64x32xbf16, #tpu.memory_space<vmem>>, vector<64x32xbf16>
    tpu.vector_store %arg5[%c0_7, %c0_8], %11 {strides = array<i32>} : memref<64x32xbf16, #tpu.memory_space<vmem>>, vector<64x32xbf16>,
    return
  }
  func.func @transform_0(%arg0: i32, %arg1: i32) -> (i32, i32) {
    %c0_i32 = arith.constant 0 : i32
    %c0_i32_0 = arith.constant 0 : i32
    return %arg0, %c0_i32 : i32, i32
  }
  func.func @transform_1(%arg0: i32, %arg1: i32) -> (i32, i32) {
    %c0_i32 = arith.constant 0 : i32
    %c0_i32_0 = arith.constant 0 : i32
    return %c0_i32, %arg1 : i32, i32
  }
  func.func @transform_2(%arg0: i32, %arg1: i32) -> (i32, i32) {
    %c0_i32 = arith.constant 0 : i32
    %c0_i32_0 = arith.constant 0 : i32
    return %c0_i32, %arg1 : i32, i32
  }
  func.func @transform_3(%arg0: i32, %arg1: i32) -> (i32, i32) {
    %c0_i32 = arith.constant 0 : i32
    return %arg0, %arg1 : i32, i32
  }
}

module attributes {stable_mosaic.version = 11 : i64} {
  func.func @_mm_kernel_1k(%arg0: i32, %arg1: i32, %arg2: memref<256x288xbf16, #tpu.memory_space<vmem>>, %arg3: memref<288x3xbf16, #tpu.memory_space<vmem>>, %arg4: memref<1x3xf32, #tpu.memory_space<vmem>>, %arg5: memref<256x3xf32, #tpu.memory_space<vmem>>, %arg6: memref<256x3xf32, #tpu.memory_space<vmem>>) attributes {dimension_semantics = [#tpu.dimension_semantics<parallel>, #tpu.dimension_semantics<parallel>], iteration_bounds = array<i64: 1, 1>, scalar_prefetch = 0 : i64, scratch_operands = 0 : i64, tpu.core_type = #tpu.core_type<tc>, window_params = [{transform_indices = @transform_0, window_bounds = array<i64: 256, 288>}, {transform_indices = @transform_1, window_bounds = array<i64: 288, 3>}, {transform_indices = @transform_2, window_bounds = array<i64: 1, 3>}, {transform_indices = @transform_3, window_bounds = array<i64: 256, 3>}, {transform_indices = @transform_4, window_bounds = array<i64: 256, 3>}]} {
    %c0 = arith.constant 0 : index
    %c0_0 = arith.constant 0 : index
    %0 = vector.load %arg2[%c0, %c0_0] : memref<256x288xbf16, #tpu.memory_space<vmem>>, vector<256x288xbf16>
    %c0_1 = arith.constant 0 : index
    %c0_2 = arith.constant 0 : index
    %1 = vector.load %arg3[%c0_1, %c0_2] : memref<288x3xbf16, #tpu.memory_space<vmem>>, vector<288x3xbf16>
    %cst = arith.constant dense<0.000000e+00> : vector<256x3xf32>
    %2 = tpu.matmul %0, %1, %cst {dimension_numbers = #tpu.dot_dimension_numbers<[1], [0], [0], [1], [0, 0, 1, 1], [], []>} : vector<256x288xbf16>, vector<288x3xbf16>, vector<256x3xf32> -> vector<256x3xf32>
    %c0_3 = arith.constant 0 : index
    %c0_4 = arith.constant 0 : index
    %3 = vector.load %arg4[%c0_3, %c0_4] : memref<1x3xf32, #tpu.memory_space<vmem>>, vector<1x3xf32>
    %4 = vector.broadcast %3 : vector<1x3xf32> to vector<256x3xf32>
    %5 = arith.addf %2, %4 : vector<256x3xf32>
    %cst_5 = arith.constant 0.000000e+00 : f32
    %6 = vector.broadcast %cst_5 : f32 to vector<256x3xf32>
    %7 = arith.cmpf oge, %5, %6 : vector<256x3xf32>
    %cst_6 = arith.constant 1.000000e-01 : f32
    %8 = vector.broadcast %cst_6 : f32 to vector<256x3xf32>
    %9 = arith.mulf %8, %5 : vector<256x3xf32>
    %10 = arith.select %7, %5, %9 : vector<256x3xi1>, vector<256x3xf32>
    %c0_7 = arith.constant 0 : index
    %c0_8 = arith.constant 0 : index
    %11 = vector.load %arg5[%c0_7, %c0_8] : memref<256x3xf32, #tpu.memory_space<vmem>>, vector<256x3xf32>
    %12 = arith.addf %10, %11 : vector<256x3xf32>
    %c0_9 = arith.constant 0 : index
    %c0_10 = arith.constant 0 : index
    %13 = vector.load %arg6[%c0_9, %c0_10] : memref<256x3xf32, #tpu.memory_space<vmem>>, vector<256x3xf32>
    tpu.vector_store %arg6[%c0_9, %c0_10], %12 {strides = array<i32>} : memref<256x3xf32, #tpu.memory_space<vmem>>, vector<256x3xf32>,
    return
  }
  func.func @transform_0(%arg0: i32, %arg1: i32) -> (i32, i32) {
    %c0_i32 = arith.constant 0 : i32
    %c0_i32_0 = arith.constant 0 : i32
    return %arg0, %c0_i32 : i32, i32
  }
  func.func @transform_1(%arg0: i32, %arg1: i32) -> (i32, i32) {
    %c0_i32 = arith.constant 0 : i32
    %c0_i32_0 = arith.constant 0 : i32
    return %c0_i32, %arg1 : i32, i32
  }
  func.func @transform_2(%arg0: i32, %arg1: i32) -> (i32, i32) {
    %c0_i32 = arith.constant 0 : i32
    %c0_i32_0 = arith.constant 0 : i32
    return %c0_i32, %arg1 : i32, i32
  }
  func.func @transform_3(%arg0: i32, %arg1: i32) -> (i32, i32) {
    %c0_i32 = arith.constant 0 : i32
    return %arg0, %arg1 : i32, i32
  }
  func.func @transform_4(%arg0: i32, %arg1: i32) -> (i32, i32) {
    %c0_i32 = arith.constant 0 : i32
    return %arg0, %arg1 : i32, i32
  }
}

</mosaic_0001>

<bundles_post_ra>
// kernel: stfan_forward.154
= control target key start
LH: loop header
LB: loop body
LE: loop exit
PB: predicated region body
PF: predicated region fallthrough
CT: control target
= control target key end

     0   :  { %vm198_vm0 = vcmask 1044480   ;;  %vm199_vm1 = vcmask 1045504   ;;  %vm149_vm2 = vcmask 220160   ;;  %v803_v1 = vmov 65535   ;;  %s1060_s1 = inlined_call_operand.vmem [shape: bf16[27,32], index: 1, kind: input, shape index: {}]   ;;  %s1061_s0 = inlined_call_operand.vmem [shape: bf16[256,27], index: 0, kind: input, shape index: {}]   ;;  %s1062_s2 = inlined_call_operand.vmem [shape: f32[1,32], index: 2, kind: input, shape index: {}]   ;;  %s1063_s3 = inlined_call_operand.vmem [shape: bf16[256,32], index: 3, kind: output, shape index: {}]  }
   0x1   :  { %v785_v0 = vld [vmem:[%s1060_s1] sm:$0xff]   ;;  %v200_v2 = vsel %vm198_vm0, 4294967295, %v803_v1  ;;  %v786_v3 = vld [vmem:[%s1060_s1 + $0x8] sm:$0x3f]   ;;  %v791_v10 = vld [vmem:[%s1061_s0 + $0x10] sm:$0xff]   ;;  %vm590_vm3 = vcmask 257024  }
   0x2   :  { %744 = vmatprep.subr.bf16.mxu0 %v785_v0  ;;  %780 = vmatprep.subr.bf16.mxu1 %v785_v0  ;;  %v201_v4 = vsel %vm199_vm1, %v200_v2, 0  ;;  %v787_v5 = vld [vmem:[%s1061_s0] sm:$0xff]   ;;  %v789_v8 = vld [vmem:[%s1061_s0 + $0x8] sm:$0xff]   ;;  %v792_v11 = vld [vmem:[%s1061_s0 + $0x50] sm:$0xff]  }
   0x3   :  { %745 = vmatpush3.bf16.msra.mxu0 %v785_v0  ;;  %782 = vmatpush3.bf16.msra.mxu1 %v785_v0  ;;  %v203_v6 = vand.u32 %v786_v3, %v201_v4  ;;  %v788_v7 = vld [vmem:[%s1061_s0 + $0x40] sm:$0xff]   ;;  %v790_v9 = vld [vmem:[%s1061_s0 + $0x48] sm:$0xff]   ;;  %v793_v12 = vld [vmem:[%s1061_s0 + $0x18] sm:$0xff]  }
   0x4   :  { %748 = vmatprep.mubr.msk.bf16.mxu0 %vm149_vm2, %v787_v5  ;;  %764 = vmatprep.mubr.msk.bf16.mxu1 %vm149_vm2, %v788_v7  ;;  %v794_v13 = vld [vmem:[%s1061_s0 + $0x58] sm:$0xff]   ;;  %v795_v14 = vld [vmem:[%s1061_s0 + $0x20] sm:$0xff]   ;;  %v797_v16 = vld [vmem:[%s1061_s0 + $0x28] sm:$0xff]  }
   0x5   :  { %746 = vmatprep.subr.bf16.mxu0 %v203_v6  ;;  %781 = vmatprep.subr.bf16.mxu1 %v203_v6  ;;  %v796_v15 = vld [vmem:[%s1061_s0 + $0x60] sm:$0xff]   ;;  %v798_v17 = vld [vmem:[%s1061_s0 + $0x68] sm:$0xff]   ;;  %v799_v18 = vld [vmem:[%s1061_s0 + $0x30] sm:$0xff]  }
   0x6   :  { %v800_v19 = vld [vmem:[%s1061_s0 + $0x70] sm:$0xff]   ;;  %v801_v20 = vld [vmem:[%s1061_s0 + $0x38] sm:$0xff]   ;;  %v897_v22 = vld [vmem:[%s1062_s2] ss:$0 sm:$0xff] }
   0x7   :  { %747 = vmatpush3.bf16.msra.mxu0 %v203_v6  ;;  %783 = vmatpush3.bf16.msra.mxu1 %v203_v6  ;;  %v802_v21 = vld [vmem:[%s1061_s0 + $0x78] sm:$0xff]  }
   0xa   :  { %749 = vmatmul.mubr.msk.bf16.vlgmr.msra.gmra.mrb[0].mxu0 %vm149_vm2, %v789_v8  ;;  %765 = vmatmul.mubr.msk.bf16.vlgmr.msra.gmra.mrb[0].mxu1 %vm149_vm2, %v790_v9 }
   0xb   :  { %752 = vmatprep.mubr.msk.bf16.mxu0 %vm149_vm2, %v791_v10  ;;  %768 = vmatprep.mubr.msk.bf16.mxu1 %vm149_vm2, %v792_v11 }
  0x12   :  { %753 = vmatmul.mubr.msk.bf16.gmra.mrb[4].mxu0 %vm149_vm2, %v793_v12  ;;  %769 = vmatmul.mubr.msk.bf16.gmra.mrb[4].mxu1 %vm149_vm2, %v794_v13 }
  0x13   :  { %756 = vmatprep.mubr.msk.bf16.mxu0 %vm149_vm2, %v795_v14  ;;  %772 = vmatprep.mubr.msk.bf16.mxu1 %vm149_vm2, %v796_v15 }
  0x1a   :  { %757 = vmatmul.mubr.msk.bf16.gmra.mrb[8].mxu0 %vm149_vm2, %v797_v16  ;;  %773 = vmatmul.mubr.msk.bf16.gmra.mrb[8].mxu1 %vm149_vm2, %v798_v17 }
  0x1b   :  { %760 = vmatprep.mubr.msk.bf16.mxu0 %vm149_vm2, %v799_v18  ;;  %776 = vmatprep.mubr.msk.bf16.mxu1 %vm149_vm2, %v800_v19 }
  0x22   :  { %761 = vmatmul.mubr.msk.bf16.gmra.mrb[12].mxu0 %vm149_vm2, %v801_v20  ;;  %777 = vmatmul.mubr.msk.bf16.gmra.mrb[12].mxu1 %vm149_vm2, %v802_v21 }
  0xdd   :  { %v750_v23 = vpop.f32.mrb[0].mxu0  ;;  %v766_v24 = vpop.f32.mrb[0].mxu1 }
  0xde   :  { %v248_v25 = vadd.f32 %v750_v23, %v897_v22  ;;  %v312_v26 = vadd.f32 %v766_v24, %v897_v22  ;;  %v239_v27 = vpop.f32.mrb[1].mxu0  ;;  %v303_v28 = vpop.f32.mrb[1].mxu1 }
  0xdf   :  { %v240_v29 = vadd.f32 %v897_v22, %v239_v27  ;;  %v304_v30 = vadd.f32 %v897_v22, %v303_v28  ;;  %v751_v31 = vpop.f32.mrb[2].mxu0  ;;  %v767_v32 = vpop.f32.mrb[2].mxu1 }
  0xe0   :  { %vm368_vm4 = vcmp.ge.f32.partialorder %v248_v25, 0.0  ;;  %v400_v33 = vmul.f32 0.1, %v248_v25  ;;  %vm384_vm5 = vcmp.ge.f32.partialorder %v312_v26, 0.0  ;;  %v416_v34 = vmul.f32 0.1, %v312_v26 }
  0xe1   :  { %vm366_vm6 = vcmp.ge.f32.partialorder %v240_v29, 0.0  ;;  %v398_v35 = vmul.f32 0.1, %v240_v29  ;;  %vm382_vm7 = vcmp.ge.f32.partialorder %v304_v30, 0.0  ;;  %v414_v36 = vmul.f32 0.1, %v304_v30 }
  0xe2   :  { %v432_v37 = vsel %vm368_vm4, %v248_v25, %v400_v33  ;;  %v448_v38 = vsel %vm384_vm5, %v312_v26, %v416_v34  ;;  %v251_v39 = vadd.f32 %v751_v31, %v897_v22  ;;  %v315_v40 = vadd.f32 %v767_v32, %v897_v22  ;;  %v242_v41 = vpop.f32.mrb[3].mxu0  ;;  %v306_v42 = vpop.f32.mrb[3].mxu1 }
  0xe3   :  { %v696_v43 = vpack.c.bf16 %v432_v37, %v432_v37  ;;  %v712_v44 = vpack.c.bf16 %v448_v38, %v448_v38  ;;  %v430_v45 = vsel %vm366_vm6, %v240_v29, %v398_v35  ;;  %v446_v46 = vsel %vm382_vm7, %v304_v30, %v414_v36 }
  0xe4   :  { %v694_v47 = vpack.c.bf16 %v430_v45, %v430_v45  ;;  %v710_v48 = vpack.c.bf16 %v446_v46, %v446_v46  ;;  %vm369_vm8 = vcmp.ge.f32.partialorder %v251_v39, 0.0  ;;  %v401_v49 = vmul.f32 0.1, %v251_v39 }
  0xe5   :  { %593 = vst.msk [vmem:[%s1063_s3 + $0x8] sm:$0xf] %vm590_vm3, %v696_v43  ;;  %609 = vst.msk [vmem:[%s1063_s3 + $0x48] sm:$0xf] %vm590_vm3, %v712_v44  ;;  %vm385_vm9 = vcmp.ge.f32.partialorder %v315_v40, 0.0  ;;  %v243_v51 = vadd.f32 %v897_v22, %v242_v41  ;;  %v307_v52 = vadd.f32 %v897_v22, %v306_v42  ;;  %v754_v53 = vpop.f32.mrb[4].mxu0 }
  0xe6   :  { %v417_v50 = vmul.f32 0.1, %v315_v40  ;;  %v770_v54 = vpop.f32.mrb[4].mxu1  ;;  %591 = vst.msk [vmem:[%s1063_s3] sm:$0xf] %vm590_vm3, %v694_v47  ;;  %v433_v55 = vsel %vm369_vm8, %v251_v39, %v401_v49  ;;  %v264_v56 = vadd.f32 %v754_v53, %v897_v22  ;;  %v255_v58 = vpop.f32.mrb[5].mxu0 }
  0xe7   :  { %607 = vst.msk [vmem:[%s1063_s3 + $0x40] sm:$0xf] %vm590_vm3, %v710_v48  ;;  %v328_v57 = vadd.f32 %v770_v54, %v897_v22  ;;  %v319_v59 = vpop.f32.mrb[5].mxu1  ;;  %v697_v60 = vpack.c.bf16 %v433_v55, %v433_v55  ;;  %vm367_vm10 = vcmp.ge.f32.partialorder %v243_v51, 0.0  ;;  %v399_v62 = vmul.f32 0.1, %v243_v51 }
  0xe8   :  { %v449_v61 = vsel %vm385_vm9, %v315_v40, %v417_v50  ;;  %v755_v63 = vpop.f32.mrb[6].mxu0  ;;  %v771_v0 = vpop.f32.mrb[6].mxu1  ;;  %vm383_vm11 = vcmp.ge.f32.partialorder %v307_v52, 0.0  ;;  %v415_v2 = vmul.f32 0.1, %v307_v52  ;;  %vm372_vm12 = vcmp.ge.f32.partialorder %v264_v56, 0.0 }
  0xe9   :  { %v713_v1 = vpack.c.bf16 %v449_v61, %v449_v61  ;;  %v258_v3 = vpop.f32.mrb[7].mxu0  ;;  %v322_v4 = vpop.f32.mrb[7].mxu1  ;;  %594 = vst.msk [vmem:[%s1063_s3 + $0xc] sm:$0xf] %vm590_vm3, %v697_v60  ;;  %v431_v5 = vsel %vm367_vm10, %v243_v51, %v399_v62  ;;  %v404_v6 = vmul.f32 0.1, %v264_v56  ;;  %v256_v10 = vadd.f32 %v897_v22, %v255_v58 }
  0xea   :  { %vm388_vm13 = vcmp.ge.f32.partialorder %v328_v57, 0.0  ;;  %v420_v7 = vmul.f32 0.1, %v328_v57  ;;  %v695_v8 = vpack.c.bf16 %v431_v5, %v431_v5  ;;  %v447_v9 = vsel %vm383_vm11, %v307_v52, %v415_v2 }
  0xeb   :  { %610 = vst.msk [vmem:[%s1063_s3 + $0x4c] sm:$0xf] %vm590_vm3, %v713_v1  ;;  %v320_v11 = vadd.f32 %v897_v22, %v319_v59  ;;  %v711_v12 = vpack.c.bf16 %v447_v9, %v447_v9  ;;  %v436_v13 = vsel %vm372_vm12, %v264_v56, %v404_v6  ;;  %v267_v15 = vadd.f32 %v755_v63, %v897_v22 }
  0xec   :  { %v452_v14 = vsel %vm388_vm13, %v328_v57, %v420_v7  ;;  %592 = vst.msk [vmem:[%s1063_s3 + $0x4] sm:$0xf] %vm590_vm3, %v695_v8  ;;  %v700_v16 = vpack.c.bf16 %v436_v13, %v436_v13  ;;  %vm370_vm14 = vcmp.ge.f32.partialorder %v256_v10, 0.0  ;;  %v402_v18 = vmul.f32 0.1, %v256_v10 }
  0xed   :  { %v716_v17 = vpack.c.bf16 %v452_v14, %v452_v14  ;;  %608 = vst.msk [vmem:[%s1063_s3 + $0x44] sm:$0xf] %vm590_vm3, %v711_v12  ;;  %vm386_vm15 = vcmp.ge.f32.partialorder %v320_v11, 0.0  ;;  %v418_v19 = vmul.f32 0.1, %v320_v11  ;;  %vm373_vm0 = vcmp.ge.f32.partialorder %v267_v15, 0.0 }
  0xee   :  { %v405_v20 = vmul.f32 0.1, %v267_v15  ;;  %597 = vst.msk [vmem:[%s1063_s3 + $0x18] sm:$0xf] %vm590_vm3, %v700_v16  ;;  %v434_v21 = vsel %vm370_vm14, %v256_v10, %v402_v18  ;;  %v331_v23 = vadd.f32 %v771_v0, %v897_v22  ;;  %v259_v24 = vadd.f32 %v897_v22, %v258_v3  ;;  %v758_v26 = vpop.f32.mrb[8].mxu0  ;;  %v774_v27 = vpop.f32.mrb[8].mxu1 }
  0xef   :  { %613 = vst.msk [vmem:[%s1063_s3 + $0x58] sm:$0xf] %vm590_vm3, %v716_v17  ;;  %v323_v25 = vadd.f32 %v897_v22, %v322_v4  ;;  %v698_v28 = vpack.c.bf16 %v434_v21, %v434_v21  ;;  %v450_v29 = vsel %vm386_vm15, %v320_v11, %v418_v19  ;;  %v280_v31 = vadd.f32 %v758_v26, %v897_v22  ;;  %v271_v32 = vpop.f32.mrb[9].mxu0  ;;  %v335_v33 = vpop.f32.mrb[9].mxu1 }
  0xf0   :  { %v437_v30 = vsel %vm373_vm0, %v267_v15, %v405_v20  ;;  %v714_v34 = vpack.c.bf16 %v450_v29, %v450_v29  ;;  %vm389_vm1 = vcmp.ge.f32.partialorder %v331_v23, 0.0  ;;  %v421_v36 = vmul.f32 0.1, %v331_v23  ;;  %v759_v37 = vpop.f32.mrb[10].mxu0  ;;  %v775_v38 = vpop.f32.mrb[10].mxu1 }
  0xf1   :  { %v701_v35 = vpack.c.bf16 %v437_v30, %v437_v30  ;;  %595 = vst.msk [vmem:[%s1063_s3 + $0x10] sm:$0xf] %vm590_vm3, %v698_v28  ;;  %vm371_vm2 = vcmp.ge.f32.partialorder %v259_v24, 0.0  ;;  %v403_v39 = vmul.f32 0.1, %v259_v24  ;;  %vm387_vm4 = vcmp.ge.f32.partialorder %v323_v25, 0.0 }
  0xf2   :  { %v419_v40 = vmul.f32 0.1, %v323_v25  ;;  %611 = vst.msk [vmem:[%s1063_s3 + $0x50] sm:$0xf] %vm590_vm3, %v714_v34  ;;  %v453_v41 = vsel %vm389_vm1, %v331_v23, %v421_v36  ;;  %vm376_vm5 = vcmp.ge.f32.partialorder %v280_v31, 0.0  ;;  %v344_v43 = vadd.f32 %v774_v27, %v897_v22  ;;  %v274_v44 = vpop.f32.mrb[11].mxu0 }
  0xf3   :  { %598 = vst.msk [vmem:[%s1063_s3 + $0x1c] sm:$0xf] %vm590_vm3, %v701_v35  ;;  %v408_v42 = vmul.f32 0.1, %v280_v31  ;;  %v338_v45 = vpop.f32.mrb[11].mxu1  ;;  %v717_v46 = vpack.c.bf16 %v453_v41, %v453_v41  ;;  %v435_v47 = vsel %vm371_vm2, %v259_v24, %v403_v39  ;;  %v272_v49 = vadd.f32 %v897_v22, %v271_v32 }
  0xf4   :  { %v451_v48 = vsel %vm387_vm4, %v323_v25, %v419_v40  ;;  %v699_v50 = vpack.c.bf16 %v435_v47, %v435_v47  ;;  %vm392_vm6 = vcmp.ge.f32.partialorder %v344_v43, 0.0  ;;  %v424_v54 = vmul.f32 0.1, %v344_v43 }
  0xf5   :  { %v715_v51 = vpack.c.bf16 %v451_v48, %v451_v48  ;;  %v440_v52 = vsel %vm376_vm5, %v280_v31, %v408_v42  ;;  %614 = vst.msk [vmem:[%s1063_s3 + $0x5c] sm:$0xf] %vm590_vm3, %v717_v46  ;;  %vm374_vm7 = vcmp.ge.f32.partialorder %v272_v49, 0.0  ;;  %v406_v55 = vmul.f32 0.1, %v272_v49  ;;  %v762_v56 = vpop.f32.mrb[12].mxu0 }
  0xf6   :  { %v704_v53 = vpack.c.bf16 %v440_v52, %v440_v52  ;;  %596 = vst.msk [vmem:[%s1063_s3 + $0x14] sm:$0xf] %vm590_vm3, %v699_v50  ;;  %v336_v57 = vadd.f32 %v897_v22, %v335_v33  ;;  %v283_v58 = vadd.f32 %v759_v37, %v897_v22  ;;  %v347_v59 = vadd.f32 %v775_v38, %v897_v22  ;;  %v778_v61 = vpop.f32.mrb[12].mxu1  ;;  %v287_v62 = vpop.f32.mrb[13].mxu0 }
  0xf7   :  { %612 = vst.msk [vmem:[%s1063_s3 + $0x54] sm:$0xf] %vm590_vm3, %v715_v51  ;;  %v275_v60 = vadd.f32 %v897_v22, %v274_v44  ;;  %v456_v63 = vsel %vm392_vm6, %v344_v43, %v424_v54  ;;  %v438_v0 = vsel %vm374_vm7, %v272_v49, %v406_v55  ;;  %v339_v1 = vadd.f32 %v897_v22, %v338_v45  ;;  %v351_v3 = vpop.f32.mrb[13].mxu1  ;;  %v763_v4 = vpop.f32.mrb[14].mxu0 }
  0xf8   :  { %601 = vst.msk [vmem:[%s1063_s3 + $0x28] sm:$0xf] %vm590_vm3, %v704_v53  ;;  %v296_v2 = vadd.f32 %v762_v56, %v897_v22  ;;  %v720_v5 = vpack.c.bf16 %v456_v63, %v456_v63  ;;  %v702_v6 = vpack.c.bf16 %v438_v0, %v438_v0  ;;  %vm390_vm8 = vcmp.ge.f32.partialorder %v336_v57, 0.0  ;;  %v779_v8 = vpop.f32.mrb[14].mxu1  ;;  %v290_v9 = vpop.f32.mrb[15].mxu0 }
  0xf9   :  { %v422_v7 = vmul.f32 0.1, %v336_v57  ;;  %vm377_vm9 = vcmp.ge.f32.partialorder %v283_v58, 0.0  ;;  %v409_v10 = vmul.f32 0.1, %v283_v58  ;;  %vm393_vm10 = vcmp.ge.f32.partialorder %v347_v59, 0.0 }
  0xfa   :  { %v425_v11 = vmul.f32 0.1, %v347_v59  ;;  %617 = vst.msk [vmem:[%s1063_s3 + $0x68] sm:$0xf] %vm590_vm3, %v720_v5  ;;  %599 = vst.msk [vmem:[%s1063_s3 + $0x20] sm:$0xf] %vm590_vm3, %v702_v6  ;;  %v360_v26 = vadd.f32 %v778_v61, %v897_v22  ;;  %v288_v28 = vadd.f32 %v897_v22, %v287_v62  ;;  %v352_v29 = vadd.f32 %v897_v22, %v351_v3 }
  0xfb   :  { %v454_v12 = vsel %vm390_vm8, %v336_v57, %v422_v7  ;;  %vm375_vm11 = vcmp.ge.f32.partialorder %v275_v60, 0.0  ;;  %v407_v13 = vmul.f32 0.1, %v275_v60  ;;  %vm391_vm12 = vcmp.ge.f32.partialorder %v339_v1, 0.0  ;;  %v354_v14 = vpop.f32.mrb[15].mxu1 }
  0xfc   :  { %v718_v15 = vpack.c.bf16 %v454_v12, %v454_v12  ;;  %v441_v16 = vsel %vm377_vm9, %v283_v58, %v409_v10  ;;  %v457_v17 = vsel %vm393_vm10, %v347_v59, %v425_v11  ;;  %v423_v18 = vmul.f32 0.1, %v339_v1 }
  0xfd   :  { %v705_v19 = vpack.c.bf16 %v441_v16, %v441_v16  ;;  %v721_v20 = vpack.c.bf16 %v457_v17, %v457_v17  ;;  %v439_v21 = vsel %vm375_vm11, %v275_v60, %v407_v13  ;;  %vm380_vm13 = vcmp.ge.f32.partialorder %v296_v2, 0.0 }
  0xfe   :  { %615 = vst.msk [vmem:[%s1063_s3 + $0x60] sm:$0xf] %vm590_vm3, %v718_v15  ;;  %v703_v23 = vpack.c.bf16 %v439_v21, %v439_v21  ;;  %v455_v24 = vsel %vm391_vm12, %v339_v1, %v423_v18  ;;  %v412_v25 = vmul.f32 0.1, %v296_v2  ;;  %v299_v30 = vadd.f32 %v763_v4, %v897_v22 }
  0xff   :  { %602 = vst.msk [vmem:[%s1063_s3 + $0x2c] sm:$0xf] %vm590_vm3, %v705_v19  ;;  %618 = vst.msk [vmem:[%s1063_s3 + $0x6c] sm:$0xf] %vm590_vm3, %v721_v20  ;;  %v719_v27 = vpack.c.bf16 %v455_v24, %v455_v24  ;;  %vm396_vm14 = vcmp.ge.f32.partialorder %v360_v26, 0.0  ;;  %v363_v33 = vadd.f32 %v779_v8, %v897_v22  ;;  %vm378_vm15 = vcmp.ge.f32.partialorder %v288_v28, 0.0 }
 0x100   :  { %600 = vst.msk [vmem:[%s1063_s3 + $0x24] sm:$0xf] %vm590_vm3, %v703_v23  ;;  %v444_v31 = vsel %vm380_vm13, %v296_v2, %v412_v25  ;;  %v428_v32 = vmul.f32 0.1, %v360_v26  ;;  %v410_v35 = vmul.f32 0.1, %v288_v28  ;;  %v291_v45 = vadd.f32 %v897_v22, %v290_v9 }
 0x101   :  { %616 = vst.msk [vmem:[%s1063_s3 + $0x64] sm:$0xf] %vm590_vm3, %v719_v27  ;;  %v708_v34 = vpack.c.bf16 %v444_v31, %v444_v31  ;;  %vm394_vm0 = vcmp.ge.f32.partialorder %v352_v29, 0.0  ;;  %v426_v37 = vmul.f32 0.1, %v352_v29  ;;  %vm381_vm1 = vcmp.ge.f32.partialorder %v299_v30, 0.0 }
 0x102   :  { %v460_v36 = vsel %vm396_vm14, %v360_v26, %v428_v32  ;;  %v413_v38 = vmul.f32 0.1, %v299_v30  ;;  %v442_v40 = vsel %vm378_vm15, %v288_v28, %v410_v35  ;;  %vm397_vm2 = vcmp.ge.f32.partialorder %v363_v33, 0.0 }
 0x103   :  { %605 = vst.msk [vmem:[%s1063_s3 + $0x38] sm:$0xf] %vm590_vm3, %v708_v34  ;;  %v724_v39 = vpack.c.bf16 %v460_v36, %v460_v36  ;;  %v429_v41 = vmul.f32 0.1, %v363_v33  ;;  %v706_v42 = vpack.c.bf16 %v442_v40, %v442_v40  ;;  %v458_v43 = vsel %vm394_vm0, %v352_v29, %v426_v37 }
 0x104   :  { %v445_v44 = vsel %vm381_vm1, %v299_v30, %v413_v38  ;;  %v722_v46 = vpack.c.bf16 %v458_v43, %v458_v43  ;;  %v355_v49 = vadd.f32 %v897_v22, %v354_v14  ;;  %vm379_vm4 = vcmp.ge.f32.partialorder %v291_v45, 0.0 }
 0x105   :  { %621 = vst.msk [vmem:[%s1063_s3 + $0x78] sm:$0xf] %vm590_vm3, %v724_v39  ;;  %v709_v47 = vpack.c.bf16 %v445_v44, %v445_v44  ;;  %v461_v48 = vsel %vm397_vm2, %v363_v33, %v429_v41  ;;  %603 = vst.msk [vmem:[%s1063_s3 + $0x30] sm:$0xf] %vm590_vm3, %v706_v42  ;;  %v411_v51 = vmul.f32 0.1, %v291_v45 }
 0x106   :  { %v725_v50 = vpack.c.bf16 %v461_v48, %v461_v48  ;;  %619 = vst.msk [vmem:[%s1063_s3 + $0x70] sm:$0xf] %vm590_vm3, %v722_v46  ;;  %vm395_vm5 = vcmp.ge.f32.partialorder %v355_v49, 0.0  ;;  %v427_v22 = vmul.f32 0.1, %v355_v49 }
 0x107   :  { %606 = vst.msk [vmem:[%s1063_s3 + $0x3c] sm:$0xf] %vm590_vm3, %v709_v47  ;;  %v443_v52 = vsel %vm379_vm4, %v291_v45, %v411_v51 }
 0x108   :  { %622 = vst.msk [vmem:[%s1063_s3 + $0x7c] sm:$0xf] %vm590_vm3, %v725_v50  ;;  %v707_v53 = vpack.c.bf16 %v443_v52, %v443_v52  ;;  %v459_v54 = vsel %vm395_vm5, %v355_v49, %v427_v22 }
 0x109   :  { %v723_v55 = vpack.c.bf16 %v459_v54, %v459_v54 }
 0x10a   :  { %604 = vst.msk [vmem:[%s1063_s3 + $0x34] sm:$0xf] %vm590_vm3, %v707_v53 }
 0x10b   :  { %620 = vst.msk [vmem:[%s1063_s3 + $0x74] sm:$0xf] %vm590_vm3, %v723_v55 }

// kernel: stfan_forward.155
= control target key start
LH: loop header
LB: loop body
LE: loop exit
PB: predicated region body
PF: predicated region fallthrough
CT: control target
= control target key end

     0   :  { %vm470_vm0 = vcmask 261120   ;;  %vm1065_vm3 = vcmask 257024   ;;  %s1957_s1 = inlined_call_operand.vmem [shape: bf16[288,32], index: 1, kind: input, shape index: {}]   ;;  %s1958_s0 = inlined_call_operand.vmem [shape: bf16[256,288], index: 0, kind: input, shape index: {}]   ;;  %s1959_s2 = inlined_call_operand.vmem [shape: f32[1,32], index: 2, kind: input, shape index: {}]   ;;  %s1960_s3 = inlined_call_operand.vmem [shape: bf16[256,32], index: 3, kind: output, shape index: {}]  }
   0x1   :  { %v1431_v0 = vld [vmem:[%s1957_s1 + $0x40] sm:$0xff]   ;;  %v1433_v2 = vld [vmem:[%s1957_s1 + $0x48] sm:$0xff]   ;;  %v1435_v4 = vld [vmem:[%s1957_s1 + $0x50] sm:$0xff]  }
   0x2   :  { %v1432_v1 = vld [vmem:[%s1957_s1] sm:$0xff]   ;;  %1249 = vmatprep.subr.bf16.mxu0 %v1431_v0  ;;  %1415 = vmatprep.subr.bf16.mxu1 %v1431_v0  ;;  %v1434_v3 = vld [vmem:[%s1957_s1 + $0x8] sm:$0xff]   ;;  %v1436_v5 = vld [vmem:[%s1957_s1 + $0x10] sm:$0xff]  }
   0x3   :  { %1250 = vmatpush3.bf16.msra.mxu0 %v1432_v1  ;;  %1423 = vmatpush3.bf16.msra.mxu1 %v1432_v1  ;;  %v1437_v6 = vld [vmem:[%s1957_s1 + $0x58] sm:$0xff]   ;;  %v1439_v8 = vld [vmem:[%s1957_s1 + $0x60] sm:$0xff]   ;;  %v1441_v10 = vld [vmem:[%s1957_s1 + $0x68] sm:$0xff]  }
   0x4   :  { %1251 = vmatprep.subr.bf16.mxu0 %v1433_v2  ;;  %1416 = vmatprep.subr.bf16.mxu1 %v1433_v2  ;;  %v1438_v7 = vld [vmem:[%s1957_s1 + $0x18] sm:$0xff]   ;;  %v1440_v9 = vld [vmem:[%s1957_s1 + $0x20] sm:$0xff]   ;;  %v1442_v13 = vld [vmem:[%s1957_s1 + $0x28] sm:$0xff]  }
   0x5   :  { %v1449_v11 = vld [vmem:[%s1958_s0 + $0x4] ss:$12 sps:$4 sm:$0xff]   ;;  %v1445_v16 = vld [vmem:[%s1957_s1 + $0x78] sm:$0xff]   ;;  %v1447_v19 = vld [vmem:[%s1958_s0] ss:$12 sps:$4 sm:$0xff]  }
   0x6   :  { %v1452_v12 = vld [vmem:[%s1958_s0 + $0x124] ss:$12 sps:$4 sm:$0xff]   ;;  %551 = vmatprep.mubr.bf16.mxu0 %v1449_v11  ;;  %v1446_v17 = vld [vmem:[%s1957_s1 + $0x38] sm:$0xff]   ;;  %v1450_v20 = vld [vmem:[%s1958_s0 + $0x120] ss:$12 sps:$4 sm:$0xff]  }
   0x7   :  { %1252 = vmatpush3.bf16.msra.mxu0 %v1434_v3  ;;  %1424 = vmatpush3.bf16.msra.mxu1 %v1434_v3  ;;  %v1443_v14 = vld [vmem:[%s1957_s1 + $0x70] sm:$0xff]   ;;  %v1453_v18 = vld [vmem:[%s1957_s1 + $0x80] sm:$0xff]   ;;  %v1454_v21 = vld [vmem:[%s1958_s0 + $0x1c] ss:$12 sps:$4 sm:$0xff]  }
   0x8   :  { %1253 = vmatprep.subr.bf16.mxu0 %v1435_v4  ;;  %1417 = vmatprep.subr.bf16.mxu1 %v1435_v4  ;;  %v1444_v15 = vld [vmem:[%s1957_s1 + $0x30] sm:$0xff]   ;;  %v1456_v22 = vld [vmem:[%s1958_s0 + $0x13c] ss:$12 sps:$4 sm:$0xff]   ;;  %v1458_v24 = vld [vmem:[%s1958_s0 + $0x18] ss:$12 sps:$4 sm:$0xff]  }
   0x9   :  { %647 = vmatprep.mubr.bf16.mxu1 %v1452_v12  ;;  %v1466_v23 = vld [vmem:[%s1957_s1 + $0x88] sm:$0xff]   ;;  %v1459_v25 = vld [vmem:[%s1958_s0 + $0x138] ss:$12 sps:$4 sm:$0xff]   ;;  %v1460_v26 = vld [vmem:[%s1958_s0 + $0x34] ss:$12 sps:$4 sm:$0xff]  }
   0xa   :  { %v1462_v27 = vld [vmem:[%s1958_s0 + $0x154] ss:$12 sps:$4 sm:$0xff]   ;;  %v1464_v28 = vld [vmem:[%s1958_s0 + $0x30] ss:$12 sps:$4 sm:$0xff]   ;;  %v1467_v30 = vld [vmem:[%s1958_s0 + $0x4c] ss:$12 sps:$4 sm:$0xff]  }
   0xb   :  { %1254 = vmatpush3.bf16.msra.mxu0 %v1436_v5  ;;  %1425 = vmatpush3.bf16.msra.mxu1 %v1436_v5  ;;  %v1465_v29 = vld [vmem:[%s1958_s0 + $0x150] ss:$12 sps:$4 sm:$0xff]   ;;  %v1469_v31 = vld [vmem:[%s1958_s0 + $0x16c] ss:$12 sps:$4 sm:$0xff]   ;;  %v1471_v32 = vld [vmem:[%s1958_s0 + $0x48] ss:$12 sps:$4 sm:$0xff]  }
   0xc   :  { %1255 = vmatprep.subr.bf16.mxu0 %v1437_v6  ;;  %1418 = vmatprep.subr.bf16.mxu1 %v1437_v6  ;;  %v1472_v33 = vld [vmem:[%s1958_s0 + $0x168] ss:$12 sps:$4 sm:$0xff]   ;;  %v1473_v34 = vld [vmem:[%s1958_s0 + $0x64] ss:$12 sps:$4 sm:$0xff]   ;;  %v1476_v36 = vld [vmem:[%s1958_s0 + $0x60] ss:$12 sps:$4 sm:$0xff]  }
   0xd   :  { %v1475_v35 = vld [vmem:[%s1958_s0 + $0x8] ss:$12 sps:$4 sm:$0xff]   ;;  %v1477_v37 = vld [vmem:[%s1958_s0 + $0x20] ss:$12 sps:$4 sm:$0xff]   ;;  %v1480_v39 = vld [vmem:[%s1958_s0 + $0x38] ss:$12 sps:$4 sm:$0xff]  }
   0xe   :  { %v1478_v38 = vld [vmem:[%s1958_s0 + $0x7c] ss:$12 sps:$4 sm:$0xff]   ;;  %v1481_v40 = vld [vmem:[%s1958_s0 + $0x78] ss:$12 sps:$4 sm:$0xff]   ;;  %v1483_v42 = vld [vmem:[%s1958_s0 + $0x94] ss:$12 sps:$4 sm:$0xff]  }
   0xf   :  { %1256 = vmatpush3.bf16.msra.mxu0 %v1438_v7  ;;  %1426 = vmatpush3.bf16.msra.mxu1 %v1438_v7  ;;  %v1482_v41 = vld [vmem:[%s1958_s0 + $0x50] ss:$12 sps:$4 sm:$0xff]   ;;  %v1485_v43 = vld [vmem:[%s1958_s0 + $0x68] ss:$12 sps:$4 sm:$0xff]   ;;  %v1487_v45 = vld [vmem:[%s1958_s0 + $0x80] ss:$12 sps:$4 sm:$0xff]  }
  0x10   :  { %1257 = vmatprep.subr.bf16.mxu0 %v1439_v8  ;;  %1419 = vmatprep.subr.bf16.mxu1 %v1439_v8  ;;  %v1486_v44 = vld [vmem:[%s1958_s0 + $0x90] ss:$12 sps:$4 sm:$0xff]   ;;  %v1488_v46 = vld [vmem:[%s1958_s0 + $0xac] ss:$12 sps:$4 sm:$0xff]   ;;  %v1491_v48 = vld [vmem:[%s1958_s0 + $0xa8] ss:$12 sps:$4 sm:$0xff]  }
  0x11   :  { %v1490_v47 = vld [vmem:[%s1958_s0 + $0x98] ss:$12 sps:$4 sm:$0xff]   ;;  %v1492_v49 = vld [vmem:[%s1958_s0 + $0xb0] ss:$12 sps:$4 sm:$0xff]   ;;  %v1495_v51 = vld [vmem:[%s1958_s0 + $0xc8] ss:$12 sps:$4 sm:$0xff]  }
  0x12   :  { %v1493_v50 = vld [vmem:[%s1958_s0 + $0xc4] ss:$12 sps:$4 sm:$0xff]   ;;  %v1496_v52 = vld [vmem:[%s1958_s0 + $0xc0] ss:$12 sps:$4 sm:$0xff]   ;;  %v1498_v54 = vld [vmem:[%s1958_s0 + $0xdc] ss:$12 sps:$4 sm:$0xff]  }
  0x13   :  { %1258 = vmatpush3.bf16.msra.mxu0 %v1440_v9  ;;  %1427 = vmatpush3.bf16.msra.mxu1 %v1440_v9  ;;  %v1497_v53 = vld [vmem:[%s1958_s0 + $0xe0] ss:$12 sps:$4 sm:$0xff]   ;;  %v1500_v55 = vld [vmem:[%s1958_s0 + $0xf8] ss:$12 sps:$4 sm:$0xff]   ;;  %v1502_v57 = vld [vmem:[%s1958_s0 + $0x110] ss:$12 sps:$4 sm:$0xff]  }
  0x14   :  { %1259 = vmatprep.subr.bf16.mxu0 %v1441_v10  ;;  %1420 = vmatprep.subr.bf16.mxu1 %v1441_v10  ;;  %v1501_v56 = vld [vmem:[%s1958_s0 + $0xd8] ss:$12 sps:$4 sm:$0xff]   ;;  %v1503_v58 = vld [vmem:[%s1958_s0 + $0xf4] ss:$12 sps:$4 sm:$0xff]   ;;  %v1506_v60 = vld [vmem:[%s1958_s0 + $0xf0] ss:$12 sps:$4 sm:$0xff]  }
  0x15   :  { %v1505_v59 = vld [vmem:[%s1958_s0 + $0x128] ss:$12 sps:$4 sm:$0xff]   ;;  %v1507_v61 = vld [vmem:[%s1958_s0 + $0x140] ss:$12 sps:$4 sm:$0xff]   ;;  %v1510_v63 = vld [vmem:[%s1958_s0 + $0x158] ss:$12 sps:$4 sm:$0xff]  }
  0x16   :  { %v1508_v62 = vld [vmem:[%s1958_s0 + $0x10c] ss:$12 sps:$4 sm:$0xff]   ;;  %v1511_v0 = vld [vmem:[%s1958_s0 + $0x108] ss:$12 sps:$4 sm:$0xff]   ;;  %v1512_v1 = vld [vmem:[%s1958_s0 + $0x170] ss:$12 sps:$4 sm:$0xff]  }
  0x17   :  { %1260 = vmatpush3.bf16.msra.mxu0 %v1442_v13  ;;  %1428 = vmatpush3.bf16.msra.mxu1 %v1442_v13 }
  0x18   :  { %1261 = vmatprep.subr.bf16.mxu0 %v1443_v14  ;;  %1421 = vmatprep.subr.bf16.mxu1 %v1443_v14 }
  0x1b   :  { %1262 = vmatpush3.bf16.msra.mxu0 %v1444_v15  ;;  %1429 = vmatpush3.bf16.msra.mxu1 %v1444_v15 }
  0x1c   :  { %1263 = vmatprep.subr.bf16.mxu0 %v1445_v16  ;;  %1422 = vmatprep.subr.bf16.mxu1 %v1445_v16 }
  0x1f   :  { %1264 = vmatpush3.bf16.msra.mxu0 %v1446_v17  ;;  %1430 = vmatpush3.bf16.msra.mxu1 %v1446_v17 }
  0x20   :  { %1379 = vmatprep.subr.bf16.mxu1 %v1453_v18 }
  0x22   :  { %552 = vmatmul.mubr.bf16.vlgmr.msra.gmra.mrb[0].mxu0 %v1447_v19  ;;  %648 = vmatmul.mubr.bf16.vlgmr.msra.gmra.mrb[0].mxu1 %v1450_v20 }
  0x23   :  { %1380 = vmatpush3.bf16.msra.mxu1 %v1453_v18  ;;  %559 = vmatprep.mubr.bf16.mxu0 %v1454_v21 }
  0x24   :  { %655 = vmatprep.mubr.bf16.mxu1 %v1456_v22  ;;  %1381 = vmatprep.subr.bf16.mxu1 %v1466_v23 }
  0x27   :  { %1382 = vmatpush3.bf16.msra.mxu1 %v1466_v23 }
  0x2a   :  { %560 = vmatmul.mubr.bf16.gmra.mrb[4].mxu0 %v1458_v24  ;;  %656 = vmatmul.mubr.bf16.gmra.mrb[4].mxu1 %v1459_v25 }
  0x2b   :  { %567 = vmatprep.mubr.bf16.mxu0 %v1460_v26  ;;  %663 = vmatprep.mubr.bf16.mxu1 %v1462_v27 }
  0x32   :  { %568 = vmatmul.mubr.bf16.gmra.mrb[8].mxu0 %v1464_v28  ;;  %664 = vmatmul.mubr.bf16.gmra.mrb[8].mxu1 %v1465_v29 }
  0x33   :  { %575 = vmatprep.mubr.bf16.mxu0 %v1467_v30  ;;  %671 = vmatprep.mubr.bf16.mxu1 %v1469_v31 }
  0x3a   :  { %576 = vmatmul.mubr.bf16.gmra.mrb[12].mxu0 %v1471_v32  ;;  %672 = vmatmul.mubr.bf16.gmra.mrb[12].mxu1 %v1472_v33 }
  0x3b   :  { %583 = vmatprep.mubr.bf16.mxu0 %v1473_v34  ;;  %1383 = vmatprep.mubr.msk.bf16.mxu1 %vm470_vm0, %v1475_v35 }
  0x42   :  { %584 = vmatmul.mubr.bf16.gmra.mrb[16].mxu0 %v1476_v36  ;;  %1384 = vmatmul.mubr.msk.bf16.vlgmr.msra.gmra.mrb[16].mxu1 %vm470_vm0, %v1477_v37 }
  0x43   :  { %591 = vmatprep.mubr.bf16.mxu0 %v1478_v38  ;;  %1387 = vmatprep.mubr.msk.bf16.mxu1 %vm470_vm0, %v1480_v39 }
  0x4a   :  { %592 = vmatmul.mubr.bf16.gmra.mrb[20].mxu0 %v1481_v40  ;;  %1388 = vmatmul.mubr.msk.bf16.gmra.mrb[20].mxu1 %vm470_vm0, %v1482_v41 }
  0x4b   :  { %599 = vmatprep.mubr.bf16.mxu0 %v1483_v42  ;;  %1391 = vmatprep.mubr.msk.bf16.mxu1 %vm470_vm0, %v1485_v43 }
  0x52   :  { %600 = vmatmul.mubr.bf16.gmra.mrb[24].mxu0 %v1486_v44  ;;  %1392 = vmatmul.mubr.msk.bf16.gmra.mrb[24].mxu1 %vm470_vm0, %v1487_v45 }
  0x53   :  { %607 = vmatprep.mubr.bf16.mxu0 %v1488_v46  ;;  %1395 = vmatprep.mubr.msk.bf16.mxu1 %vm470_vm0, %v1490_v47 }
  0x5a   :  { %608 = vmatmul.mubr.bf16.gmra.mrb[28].mxu0 %v1491_v48  ;;  %1396 = vmatmul.mubr.msk.bf16.gmra.mrb[28].mxu1 %vm470_vm0, %v1492_v49 }
  0x5b   :  { %615 = vmatprep.mubr.bf16.mxu0 %v1493_v50  ;;  %1399 = vmatprep.mubr.msk.bf16.mxu1 %vm470_vm0, %v1495_v51  ;;  %v1768_v50 = vld [vmem:[%s1959_s2] ss:$0 sm:$0xff] }
  0x62   :  { %616 = vmatmul.mubr.bf16.gmra.mrb[32].mxu0 %v1496_v52  ;;  %1400 = vmatmul.mubr.msk.bf16.gmra.mrb[32].mxu1 %vm470_vm0, %v1497_v53 }
  0x63   :  { %623 = vmatprep.mubr.bf16.mxu0 %v1498_v54  ;;  %1403 = vmatprep.mubr.msk.bf16.mxu1 %vm470_vm0, %v1500_v55 }
  0x6a   :  { %624 = vmatmul.mubr.bf16.gmra.mrb[36].mxu0 %v1501_v56  ;;  %1404 = vmatmul.mubr.msk.bf16.gmra.mrb[36].mxu1 %vm470_vm0, %v1502_v57 }
  0x6b   :  { %631 = vmatprep.mubr.bf16.mxu0 %v1503_v58  ;;  %1407 = vmatprep.mubr.msk.bf16.mxu1 %vm470_vm0, %v1505_v59 }
  0x72   :  { %632 = vmatmul.mubr.bf16.gmra.mrb[40].mxu0 %v1506_v60  ;;  %1408 = vmatmul.mubr.msk.bf16.gmra.mrb[40].mxu1 %vm470_vm0, %v1507_v61 }
  0x73   :  { %639 = vmatprep.mubr.bf16.mxu0 %v1508_v62  ;;  %1411 = vmatprep.mubr.msk.bf16.mxu1 %vm470_vm0, %v1510_v63 }
  0x7a   :  { %640 = vmatmul.mubr.bf16.gmra.mrb[44].mxu0 %v1511_v0  ;;  %1412 = vmatmul.mubr.msk.bf16.gmra.mrb[44].mxu1 %vm470_vm0, %v1512_v1 }
  0xf5   :  { %v1265_v2 = vpop.f32.mrb[0].mxu0  ;;  %v1337_v3 = vpop.f32.mrb[0].mxu1 }
  0xf6   :  { %v1266_v4 = vpop.f32.mrb[1].mxu0  ;;  %v1338_v5 = vpop.f32.mrb[1].mxu1 }
  0xf7   :  { %v1267_v6 = vadd.f32 %v1266_v4, %v1265_v2  ;;  %v1268_v7 = vpop.f32.mrb[2].mxu0  ;;  %v1747_v8 = vadd.f32 %v1338_v5, %v1337_v3  ;;  %v1340_v9 = vpop.f32.mrb[2].mxu1 }
  0xf8   :  { %v1269_v10 = vpop.f32.mrb[3].mxu0  ;;  %v1341_v11 = vpop.f32.mrb[3].mxu1 }
  0xf9   :  { %v1270_v12 = vadd.f32 %v1269_v10, %v1268_v7  ;;  %v1749_v13 = vadd.f32 %v1341_v11, %v1340_v9  ;;  %v554_v54 = vadd.f32 %v1267_v6, %v1768_v50 }
  0xfb   :  { %v557_v63 = vadd.f32 %v1270_v12, %v1768_v50 }
  0xfd   :  { %v1271_v14 = vpop.f32.mrb[4].mxu0  ;;  %v1343_v15 = vpop.f32.mrb[4].mxu1 }
  0xfe   :  { %v1272_v16 = vpop.f32.mrb[5].mxu0  ;;  %v1344_v17 = vpop.f32.mrb[5].mxu1 }
  0xff   :  { %v1273_v18 = vadd.f32 %v1272_v16, %v1271_v14  ;;  %v1274_v19 = vpop.f32.mrb[6].mxu0  ;;  %v1751_v20 = vadd.f32 %v1344_v17, %v1343_v15  ;;  %v1346_v21 = vpop.f32.mrb[6].mxu1 }
 0x100   :  { %v1275_v22 = vpop.f32.mrb[7].mxu0  ;;  %v1347_v23 = vpop.f32.mrb[7].mxu1 }
 0x101   :  { %v1276_v24 = vadd.f32 %v1275_v22, %v1274_v19  ;;  %v1753_v25 = vadd.f32 %v1347_v23, %v1346_v21  ;;  %v562_v51 = vadd.f32 %v1273_v18, %v1768_v50 }
 0x103   :  { %v565_v58 = vadd.f32 %v1276_v24, %v1768_v50 }
 0x105   :  { %v1277_v26 = vpop.f32.mrb[8].mxu0  ;;  %v1349_v27 = vpop.f32.mrb[8].mxu1 }
 0x106   :  { %v1278_v28 = vpop.f32.mrb[9].mxu0  ;;  %v1350_v29 = vpop.f32.mrb[9].mxu1 }
 0x107   :  { %v1279_v30 = vadd.f32 %v1278_v28, %v1277_v26  ;;  %v1280_v31 = vpop.f32.mrb[10].mxu0  ;;  %v1755_v32 = vadd.f32 %v1350_v29, %v1349_v27  ;;  %v1352_v33 = vpop.f32.mrb[10].mxu1 }
 0x108   :  { %v1281_v34 = vpop.f32.mrb[11].mxu0  ;;  %v1353_v35 = vpop.f32.mrb[11].mxu1 }
 0x109   :  { %v1757_v36 = vadd.f32 %v1281_v34, %v1280_v31  ;;  %v1759_v37 = vadd.f32 %v1353_v35, %v1352_v33  ;;  %v570_v22 = vadd.f32 %v1279_v30, %v1768_v50 }
 0x10b   :  { %v573_v34 = vadd.f32 %v1757_v36, %v1768_v50 }
 0x10d   :  { %v1283_v38 = vpop.f32.mrb[12].mxu0  ;;  %v1355_v39 = vpop.f32.mrb[12].mxu1 }
 0x10e   :  { %v1284_v40 = vpop.f32.mrb[13].mxu0  ;;  %v1356_v41 = vpop.f32.mrb[13].mxu1 }
 0x10f   :  { %v1285_v42 = vadd.f32 %v1284_v40, %v1283_v38  ;;  %v1286_v43 = vpop.f32.mrb[14].mxu0  ;;  %v1761_v44 = vadd.f32 %v1356_v41, %v1355_v39  ;;  %v1358_v45 = vpop.f32.mrb[14].mxu1 }
 0x110   :  { %v1287_v46 = vpop.f32.mrb[15].mxu0  ;;  %v1359_v47 = vpop.f32.mrb[15].mxu1 }
 0x111   :  { %v1288_v48 = vadd.f32 %v1287_v46, %v1286_v43  ;;  %v1763_v49 = vadd.f32 %v1359_v47, %v1358_v45  ;;  %v578_v16 = vadd.f32 %v1285_v42, %v1768_v50 }
 0x113   :  { %v581_v28 = vadd.f32 %v1288_v48, %v1768_v50 }
 0x115   :  { %v1289_v52 = vpop.f32.mrb[16].mxu0  ;;  %v1385_v53 = vpop.f32.mrb[16].mxu1 }
 0x116   :  { %v723_v55 = vadd.f32 %v1385_v53, %v562_v51  ;;  %v1290_v56 = vpop.f32.mrb[17].mxu0  ;;  %v714_v57 = vpop.f32.mrb[17].mxu1 }
 0x117   :  { %v1773_v59 = vadd.f32 %v1290_v56, %v1289_v52  ;;  %v715_v60 = vadd.f32 %v714_v57, %v554_v54  ;;  %v1292_v61 = vpop.f32.mrb[18].mxu0  ;;  %v1386_v62 = vpop.f32.mrb[18].mxu1 }
 0x118   :  { %vm843_vm1 = vcmp.ge.f32.partialorder %v723_v55, 0.0  ;;  %v875_v0 = vmul.f32 0.1, %v723_v55  ;;  %v726_v1 = vadd.f32 %v1386_v62, %v565_v58  ;;  %v1293_v2 = vpop.f32.mrb[19].mxu0  ;;  %v717_v3 = vpop.f32.mrb[19].mxu1 }
 0x119   :  { %vm841_vm2 = vcmp.ge.f32.partialorder %v715_v60, 0.0  ;;  %v873_v4 = vmul.f32 0.1, %v715_v60  ;;  %v1776_v5 = vadd.f32 %v1293_v2, %v1292_v61  ;;  %v718_v6 = vadd.f32 %v717_v3, %v557_v63 }
 0x11a   :  { %v907_v7 = vsel %vm843_vm1, %v723_v55, %v875_v0  ;;  %vm844_vm4 = vcmp.ge.f32.partialorder %v726_v1, 0.0  ;;  %v876_v9 = vmul.f32 0.1, %v726_v1  ;;  %v586_v58 = vadd.f32 %v1773_v59, %v1768_v50 }
 0x11b   :  { %v1219_v10 = vpack.c.bf16 %v907_v7, %v907_v7  ;;  %v905_v11 = vsel %vm841_vm2, %v715_v60, %v873_v4  ;;  %vm842_vm5 = vcmp.ge.f32.partialorder %v718_v6, 0.0  ;;  %v874_v14 = vmul.f32 0.1, %v718_v6 }
 0x11c   :  { %v1217_v15 = vpack.c.bf16 %v905_v11, %v905_v11  ;;  %v908_v12 = vsel %vm844_vm4, %v726_v1, %v876_v9  ;;  %v589_v4 = vadd.f32 %v1776_v5, %v1768_v50 }
 0x11d   :  { %1068 = vst.msk [vmem:[%s1960_s3 + $0x8] sm:$0xf] %vm1065_vm3, %v1219_v10  ;;  %v1220_v17 = vpack.c.bf16 %v908_v12, %v908_v12  ;;  %v906_v18 = vsel %vm842_vm5, %v718_v6, %v874_v14  ;;  %v1295_v19 = vpop.f32.mrb[20].mxu0  ;;  %v1389_v21 = vpop.f32.mrb[20].mxu1 }
 0x11e   :  { %1066 = vst.msk [vmem:[%s1960_s3] sm:$0xf] %vm1065_vm3, %v1217_v15  ;;  %v1218_v23 = vpack.c.bf16 %v906_v18, %v906_v18  ;;  %v739_v24 = vadd.f32 %v1389_v21, %v578_v16  ;;  %v1296_v26 = vpop.f32.mrb[21].mxu0  ;;  %v730_v27 = vpop.f32.mrb[21].mxu1 }
 0x11f   :  { %1069 = vst.msk [vmem:[%s1960_s3 + $0xc] sm:$0xf] %vm1065_vm3, %v1220_v17  ;;  %v1297_v29 = vadd.f32 %v1296_v26, %v1295_v19  ;;  %v731_v31 = vadd.f32 %v730_v27, %v570_v22  ;;  %v1298_v33 = vpop.f32.mrb[22].mxu0  ;;  %v1390_v30 = vpop.f32.mrb[22].mxu1 }
 0x120   :  { %1067 = vst.msk [vmem:[%s1960_s3 + $0x4] sm:$0xf] %vm1065_vm3, %v1218_v23  ;;  %vm847_vm6 = vcmp.ge.f32.partialorder %v739_v24, 0.0  ;;  %v879_v35 = vmul.f32 0.1, %v739_v24  ;;  %v742_v38 = vadd.f32 %v1390_v30, %v581_v28  ;;  %v1299_v39 = vpop.f32.mrb[23].mxu0 }
 0x121   :  { %v733_v40 = vpop.f32.mrb[23].mxu1  ;;  %vm845_vm7 = vcmp.ge.f32.partialorder %v731_v31, 0.0  ;;  %v877_v41 = vmul.f32 0.1, %v731_v31  ;;  %v1300_v42 = vadd.f32 %v1299_v39, %v1298_v33  ;;  %v594_v53 = vadd.f32 %v1297_v29, %v1768_v50 }
 0x122   :  { %v734_v43 = vadd.f32 %v733_v40, %v573_v34  ;;  %v911_v45 = vsel %vm847_vm6, %v739_v24, %v879_v35  ;;  %vm848_vm8 = vcmp.ge.f32.partialorder %v742_v38, 0.0  ;;  %v880_v46 = vmul.f32 0.1, %v742_v38 }
 0x123   :  { %v1223_v47 = vpack.c.bf16 %v911_v45, %v911_v45  ;;  %v909_v48 = vsel %vm845_vm7, %v731_v31, %v877_v41  ;;  %v597_v0 = vadd.f32 %v1300_v42, %v1768_v50 }
 0x124   :  { %vm846_vm9 = vcmp.ge.f32.partialorder %v734_v43, 0.0  ;;  %v878_v36 = vmul.f32 0.1, %v734_v43  ;;  %v1221_v51 = vpack.c.bf16 %v909_v48, %v909_v48  ;;  %v912_v52 = vsel %vm848_vm8, %v742_v38, %v880_v46 }
 0x125   :  { %1072 = vst.msk [vmem:[%s1960_s3 + $0x18] sm:$0xf] %vm1065_vm3, %v1223_v47  ;;  %v1224_v54 = vpack.c.bf16 %v912_v52, %v912_v52  ;;  %v1301_v56 = vpop.f32.mrb[24].mxu0  ;;  %v1393_v57 = vpop.f32.mrb[24].mxu1 }
 0x126   :  { %v910_v55 = vsel %vm846_vm9, %v734_v43, %v878_v36  ;;  %1070 = vst.msk [vmem:[%s1960_s3 + $0x10] sm:$0xf] %vm1065_vm3, %v1221_v51  ;;  %v755_v61 = vadd.f32 %v1393_v57, %v594_v53  ;;  %v1302_v62 = vpop.f32.mrb[25].mxu0  ;;  %v746_v63 = vpop.f32.mrb[25].mxu1 }
 0x127   :  { %v1222_v60 = vpack.c.bf16 %v910_v55, %v910_v55  ;;  %1073 = vst.msk [vmem:[%s1960_s3 + $0x1c] sm:$0xf] %vm1065_vm3, %v1224_v54  ;;  %v1303_v1 = vadd.f32 %v1302_v62, %v1301_v56  ;;  %v747_v2 = vadd.f32 %v746_v63, %v586_v58  ;;  %v1304_v3 = vpop.f32.mrb[26].mxu0  ;;  %v1394_v59 = vpop.f32.mrb[26].mxu1 }
 0x128   :  { %vm851_vm10 = vcmp.ge.f32.partialorder %v755_v61, 0.0  ;;  %v883_v6 = vmul.f32 0.1, %v755_v61  ;;  %v758_v7 = vadd.f32 %v1394_v59, %v597_v0  ;;  %v1305_v9 = vpop.f32.mrb[27].mxu0  ;;  %v749_v10 = vpop.f32.mrb[27].mxu1 }
 0x129   :  { %1071 = vst.msk [vmem:[%s1960_s3 + $0x14] sm:$0xf] %vm1065_vm3, %v1222_v60  ;;  %vm849_vm11 = vcmp.ge.f32.partialorder %v747_v2, 0.0  ;;  %v881_v11 = vmul.f32 0.1, %v747_v2  ;;  %v1306_v14 = vadd.f32 %v1305_v9, %v1304_v3  ;;  %v750_v15 = vadd.f32 %v749_v10, %v589_v4 }
 0x12a   :  { %v915_v12 = vsel %vm851_vm10, %v755_v61, %v883_v6  ;;  %vm852_vm12 = vcmp.ge.f32.partialorder %v758_v7, 0.0  ;;  %v884_v16 = vmul.f32 0.1, %v758_v7  ;;  %v602_v27 = vadd.f32 %v1303_v1, %v1768_v50 }
 0x12b   :  { %v1227_v17 = vpack.c.bf16 %v915_v12, %v915_v12  ;;  %v913_v18 = vsel %vm849_vm11, %v747_v2, %v881_v11  ;;  %vm850_vm13 = vcmp.ge.f32.partialorder %v750_v15, 0.0  ;;  %v882_v5 = vmul.f32 0.1, %v750_v15 }
 0x12c   :  { %v1225_v19 = vpack.c.bf16 %v913_v18, %v913_v18  ;;  %v916_v21 = vsel %vm852_vm12, %v758_v7, %v884_v16  ;;  %v605_v39 = vadd.f32 %v1306_v14, %v1768_v50 }
 0x12d   :  { %1076 = vst.msk [vmem:[%s1960_s3 + $0x28] sm:$0xf] %vm1065_vm3, %v1227_v17  ;;  %v1228_v22 = vpack.c.bf16 %v916_v21, %v916_v21  ;;  %v914_v23 = vsel %vm850_vm13, %v750_v15, %v882_v5  ;;  %v1307_v24 = vpop.f32.mrb[28].mxu0  ;;  %v1397_v26 = vpop.f32.mrb[28].mxu1 }
 0x12e   :  { %1074 = vst.msk [vmem:[%s1960_s3 + $0x20] sm:$0xf] %vm1065_vm3, %v1225_v19  ;;  %v1226_v28 = vpack.c.bf16 %v914_v23, %v914_v23  ;;  %v1308_v29 = vpop.f32.mrb[29].mxu0  ;;  %v762_v31 = vpop.f32.mrb[29].mxu1 }
 0x12f   :  { %1077 = vst.msk [vmem:[%s1960_s3 + $0x2c] sm:$0xf] %vm1065_vm3, %v1228_v22  ;;  %v1309_v33 = vadd.f32 %v1308_v29, %v1307_v24  ;;  %v763_v30 = vadd.f32 %v762_v31, %v602_v27  ;;  %v1310_v34 = vpop.f32.mrb[30].mxu0  ;;  %v1398_v35 = vpop.f32.mrb[30].mxu1 }
 0x130   :  { %1075 = vst.msk [vmem:[%s1960_s3 + $0x24] sm:$0xf] %vm1065_vm3, %v1226_v28  ;;  %v1311_v38 = vpop.f32.mrb[31].mxu0  ;;  %v765_v40 = vpop.f32.mrb[31].mxu1 }
 0x131   :  { %v610_v41 = vadd.f32 %v1309_v33, %v1768_v50  ;;  %vm853_vm14 = vcmp.ge.f32.partialorder %v763_v30, 0.0  ;;  %v885_v42 = vmul.f32 0.1, %v763_v30  ;;  %v1312_v43 = vadd.f32 %v1311_v38, %v1310_v34 }
 0x132   :  { %v766_v45 = vadd.f32 %v765_v40, %v605_v39  ;;  %v650_v38 = vadd.f32 %v1747_v8, %v1768_v50  ;;  %v653_v39 = vadd.f32 %v1749_v13, %v1768_v50  ;;  %v666_v8 = vadd.f32 %v1755_v32, %v1768_v50 }
 0x133   :  { %v771_v46 = vadd.f32 %v1397_v26, %v610_v41  ;;  %v917_v47 = vsel %vm853_vm14, %v763_v30, %v885_v42  ;;  %v613_v48 = vadd.f32 %v1312_v43, %v1768_v50  ;;  %v1889_v13 = vadd.f32 %v1759_v37, %v1768_v50 }
 0x134   :  { %v1229_v36 = vpack.c.bf16 %v917_v47, %v917_v47  ;;  %vm854_vm15 = vcmp.ge.f32.partialorder %v766_v45, 0.0  ;;  %v886_v51 = vmul.f32 0.1, %v766_v45 }
 0x135   :  { %vm855_vm0 = vcmp.ge.f32.partialorder %v771_v46, 0.0  ;;  %v887_v52 = vmul.f32 0.1, %v771_v46  ;;  %v774_v53 = vadd.f32 %v1398_v35, %v613_v48  ;;  %v1313_v54 = vpop.f32.mrb[32].mxu0  ;;  %v1401_v55 = vpop.f32.mrb[32].mxu1  ;;  %v658_v35 = vadd.f32 %v1751_v20, %v1768_v50 }
 0x136   :  { %1078 = vst.msk [vmem:[%s1960_s3 + $0x30] sm:$0xf] %vm1065_vm3, %v1229_v36  ;;  %v918_v56 = vsel %vm854_vm15, %v766_v45, %v886_v51  ;;  %v1314_v57 = vpop.f32.mrb[33].mxu0  ;;  %v778_v58 = vpop.f32.mrb[33].mxu1  ;;  %v661_v45 = vadd.f32 %v1753_v25, %v1768_v50  ;;  %v674_v20 = vadd.f32 %v1761_v44, %v1768_v50 }
 0x137   :  { %v919_v60 = vsel %vm855_vm0, %v771_v46, %v887_v52  ;;  %vm856_vm1 = vcmp.ge.f32.partialorder %v774_v53, 0.0  ;;  %v888_v61 = vmul.f32 0.1, %v774_v53  ;;  %v1230_v62 = vpack.c.bf16 %v918_v56, %v918_v56  ;;  %v1316_v63 = vpop.f32.mrb[34].mxu0  ;;  %v1402_v0 = vpop.f32.mrb[34].mxu1 }
 0x138   :  { %v1231_v1 = vpack.c.bf16 %v919_v60, %v919_v60  ;;  %v1315_v2 = vadd.f32 %v1314_v57, %v1313_v54  ;;  %v1317_v3 = vpop.f32.mrb[35].mxu0  ;;  %v781_v59 = vpop.f32.mrb[35].mxu1 }
 0x139   :  { %v920_v4 = vsel %vm856_vm1, %v774_v53, %v888_v61  ;;  %1079 = vst.msk [vmem:[%s1960_s3 + $0x34] sm:$0xf] %vm1065_vm3, %v1230_v62  ;;  %v1318_v6 = vadd.f32 %v1317_v3, %v1316_v63 }
 0x13a   :  { %1080 = vst.msk [vmem:[%s1960_s3 + $0x38] sm:$0xf] %vm1065_vm3, %v1231_v1  ;;  %v1232_v7 = vpack.c.bf16 %v920_v4, %v920_v4  ;;  %v618_v9 = vadd.f32 %v1315_v2, %v1768_v50 }
 0x13b   :  { %v621_v10 = vadd.f32 %v1318_v6, %v1768_v50  ;;  %v677_v6 = vadd.f32 %v1763_v49, %v1768_v50 }
 0x13c   :  { %1081 = vst.msk [vmem:[%s1960_s3 + $0x3c] sm:$0xf] %vm1065_vm3, %v1232_v7  ;;  %v779_v11 = vadd.f32 %v778_v58, %v618_v9 }
 0x13d   :  { %v782_v14 = vadd.f32 %v781_v59, %v621_v10  ;;  %v1319_v15 = vpop.f32.mrb[36].mxu0  ;;  %v1859_v12 = vpop.f32.mrb[36].mxu1 }
 0x13e   :  { %vm857_vm2 = vcmp.ge.f32.partialorder %v779_v11, 0.0  ;;  %v889_v16 = vmul.f32 0.1, %v779_v11  ;;  %v1320_v17 = vpop.f32.mrb[37].mxu0  ;;  %v794_v18 = vpop.f32.mrb[37].mxu1 }
 0x13f   :  { %vm858_vm4 = vcmp.ge.f32.partialorder %v782_v14, 0.0  ;;  %v890_v5 = vmul.f32 0.1, %v782_v14  ;;  %v1321_v19 = vadd.f32 %v1320_v17, %v1319_v15  ;;  %v1322_v21 = vpop.f32.mrb[38].mxu0  ;;  %v1861_v22 = vpop.f32.mrb[38].mxu1 }
 0x140   :  { %v921_v23 = vsel %vm857_vm2, %v779_v11, %v889_v16  ;;  %v1323_v24 = vpop.f32.mrb[39].mxu0  ;;  %v1863_v26 = vpop.f32.mrb[39].mxu1 }
 0x141   :  { %v1233_v27 = vpack.c.bf16 %v921_v23, %v921_v23  ;;  %v922_v28 = vsel %vm858_vm4, %v782_v14, %v890_v5  ;;  %v626_v29 = vadd.f32 %v1321_v19, %v1768_v50  ;;  %v1324_v31 = vadd.f32 %v1323_v24, %v1322_v21 }
 0x142   :  { %v1234_v33 = vpack.c.bf16 %v922_v28, %v922_v28 }
 0x143   :  { %1082 = vst.msk [vmem:[%s1960_s3 + $0x40] sm:$0xf] %vm1065_vm3, %v1233_v27  ;;  %v787_v30 = vadd.f32 %v1401_v55, %v626_v29  ;;  %v629_v34 = vadd.f32 %v1324_v31, %v1768_v50 }
 0x144   :  { %1083 = vst.msk [vmem:[%s1960_s3 + $0x44] sm:$0xf] %vm1065_vm3, %v1234_v33 }
 0x145   :  { %vm859_vm5 = vcmp.ge.f32.partialorder %v787_v30, 0.0  ;;  %v891_v40 = vmul.f32 0.1, %v787_v30  ;;  %v790_v41 = vadd.f32 %v1402_v0, %v629_v34  ;;  %v1325_v42 = vpop.f32.mrb[40].mxu0  ;;  %v1409_v43 = vpop.f32.mrb[40].mxu1 }
 0x146   :  { %v819_v46 = vadd.f32 %v1409_v43, %v658_v35  ;;  %v1326_v47 = vpop.f32.mrb[41].mxu0  ;;  %v810_v48 = vpop.f32.mrb[41].mxu1 }
 0x147   :  { %v923_v36 = vsel %vm859_vm5, %v787_v30, %v891_v40  ;;  %vm860_vm6 = vcmp.ge.f32.partialorder %v790_v41, 0.0  ;;  %v892_v51 = vmul.f32 0.1, %v790_v41  ;;  %v1327_v52 = vadd.f32 %v1326_v47, %v1325_v42  ;;  %v1328_v53 = vpop.f32.mrb[42].mxu0  ;;  %v1410_v54 = vpop.f32.mrb[42].mxu1 }
 0x148   :  { %v1235_v25 = vpack.c.bf16 %v923_v36, %v923_v36  ;;  %vm867_vm7 = vcmp.ge.f32.partialorder %v819_v46, 0.0  ;;  %v899_v55 = vmul.f32 0.1, %v819_v46  ;;  %v811_v56 = vadd.f32 %v810_v48, %v650_v38  ;;  %v1329_v57 = vpop.f32.mrb[43].mxu0  ;;  %v813_v58 = vpop.f32.mrb[43].mxu1 }
 0x149   :  { %v924_v44 = vsel %vm860_vm6, %v790_v41, %v892_v51  ;;  %v634_v60 = vadd.f32 %v1327_v52, %v1768_v50  ;;  %v822_v32 = vadd.f32 %v1410_v54, %v661_v45  ;;  %v1330_v61 = vadd.f32 %v1329_v57, %v1328_v53 }
 0x14a   :  { %1084 = vst.msk [vmem:[%s1960_s3 + $0x48] sm:$0xf] %vm1065_vm3, %v1235_v25  ;;  %v1236_v37 = vpack.c.bf16 %v924_v44, %v924_v44  ;;  %v931_v62 = vsel %vm867_vm7, %v819_v46, %v899_v55  ;;  %vm865_vm8 = vcmp.ge.f32.partialorder %v811_v56, 0.0  ;;  %v897_v63 = vmul.f32 0.1, %v811_v56 }
 0x14b   :  { %v1243_v0 = vpack.c.bf16 %v931_v62, %v931_v62  ;;  %v795_v1 = vadd.f32 %v794_v18, %v634_v60  ;;  %vm868_vm9 = vcmp.ge.f32.partialorder %v822_v32, 0.0  ;;  %v900_v2 = vmul.f32 0.1, %v822_v32 }
 0x14c   :  { %1085 = vst.msk [vmem:[%s1960_s3 + $0x4c] sm:$0xf] %vm1065_vm3, %v1236_v37  ;;  %v929_v3 = vsel %vm865_vm8, %v811_v56, %v897_v63  ;;  %v637_v59 = vadd.f32 %v1330_v61, %v1768_v50  ;;  %v814_v4 = vadd.f32 %v813_v58, %v653_v39 }
 0x14d   :  { %1092 = vst.msk [vmem:[%s1960_s3 + $0x68] sm:$0xf] %vm1065_vm3, %v1243_v0  ;;  %vm861_vm10 = vcmp.ge.f32.partialorder %v795_v1, 0.0  ;;  %v893_v7 = vmul.f32 0.1, %v795_v1  ;;  %v1241_v9 = vpack.c.bf16 %v929_v3, %v929_v3  ;;  %v932_v10 = vsel %vm868_vm9, %v822_v32, %v900_v2  ;;  %v1331_v11 = vpop.f32.mrb[44].mxu0 }
 0x14e   :  { %v1413_v14 = vpop.f32.mrb[44].mxu1  ;;  %v1244_v15 = vpack.c.bf16 %v932_v10, %v932_v10  ;;  %v798_v16 = vadd.f32 %v1863_v26, %v637_v59  ;;  %vm866_vm11 = vcmp.ge.f32.partialorder %v814_v4, 0.0  ;;  %v898_v17 = vmul.f32 0.1, %v814_v4  ;;  %v1332_v18 = vpop.f32.mrb[45].mxu0 }
 0x14f   :  { %v826_v5 = vpop.f32.mrb[45].mxu1  ;;  %v925_v19 = vsel %vm861_vm10, %v795_v1, %v893_v7  ;;  %1090 = vst.msk [vmem:[%s1960_s3 + $0x60] sm:$0xf] %vm1065_vm3, %v1241_v9  ;;  %v835_v49 = vadd.f32 %v1413_v14, %v674_v20  ;;  %v1333_v21 = vadd.f32 %v1332_v18, %v1331_v11  ;;  %v1334_v24 = vpop.f32.mrb[46].mxu0 }
 0x150   :  { %v827_v23 = vadd.f32 %v826_v5, %v666_v8  ;;  %v1414_v27 = vpop.f32.mrb[46].mxu1  ;;  %v1237_v28 = vpack.c.bf16 %v925_v19, %v925_v19  ;;  %1093 = vst.msk [vmem:[%s1960_s3 + $0x6c] sm:$0xf] %vm1065_vm3, %v1244_v15  ;;  %vm862_vm12 = vcmp.ge.f32.partialorder %v798_v16, 0.0  ;;  %v894_v26 = vmul.f32 0.1, %v798_v16 }
 0x151   :  { %v930_v29 = vsel %vm866_vm11, %v814_v4, %v898_v17  ;;  %v1335_v31 = vpop.f32.mrb[47].mxu0  ;;  %v829_v33 = vpop.f32.mrb[47].mxu1  ;;  %vm871_vm13 = vcmp.ge.f32.partialorder %v835_v49, 0.0  ;;  %v903_v34 = vmul.f32 0.1, %v835_v49  ;;  %v642_v35 = vadd.f32 %v1333_v21, %v1768_v50 }
 0x152   :  { %v1242_v30 = vpack.c.bf16 %v930_v29, %v930_v29  ;;  %1086 = vst.msk [vmem:[%s1960_s3 + $0x50] sm:$0xf] %vm1065_vm3, %v1237_v28  ;;  %v926_v38 = vsel %vm862_vm12, %v798_v16, %v894_v26  ;;  %vm869_vm14 = vcmp.ge.f32.partialorder %v827_v23, 0.0  ;;  %v901_v39 = vmul.f32 0.1, %v827_v23 }
 0x153   :  { %v838_v40 = vadd.f32 %v1414_v27, %v677_v6  ;;  %v1238_v41 = vpack.c.bf16 %v926_v38, %v926_v38  ;;  %v935_v42 = vsel %vm871_vm13, %v835_v49, %v903_v34  ;;  %v803_v43 = vadd.f32 %v1859_v12, %v642_v35 }
 0x154   :  { %1091 = vst.msk [vmem:[%s1960_s3 + $0x64] sm:$0xf] %vm1065_vm3, %v1242_v30  ;;  %v1336_v45 = vadd.f32 %v1335_v31, %v1334_v24  ;;  %v1247_v46 = vpack.c.bf16 %v935_v42, %v935_v42  ;;  %v933_v47 = vsel %vm869_vm14, %v827_v23, %v901_v39  ;;  %v830_v51 = vadd.f32 %v829_v33, %v1889_v13 }
 0x155   :  { %vm872_vm15 = vcmp.ge.f32.partialorder %v838_v40, 0.0  ;;  %v904_v48 = vmul.f32 0.1, %v838_v40  ;;  %1087 = vst.msk [vmem:[%s1960_s3 + $0x54] sm:$0xf] %vm1065_vm3, %v1238_v41  ;;  %vm863_vm0 = vcmp.ge.f32.partialorder %v803_v43, 0.0  ;;  %v1245_v8 = vpack.c.bf16 %v933_v47, %v933_v47 }
 0x156   :  { %v895_v20 = vmul.f32 0.1, %v803_v43  ;;  %v645_v36 = vadd.f32 %v1336_v45, %v1768_v50  ;;  %1096 = vst.msk [vmem:[%s1960_s3 + $0x78] sm:$0xf] %vm1065_vm3, %v1247_v46  ;;  %vm870_vm1 = vcmp.ge.f32.partialorder %v830_v51, 0.0 }
 0x157   :  { %v936_v12 = vsel %vm872_vm15, %v838_v40, %v904_v48  ;;  %1094 = vst.msk [vmem:[%s1960_s3 + $0x70] sm:$0xf] %vm1065_vm3, %v1245_v8  ;;  %v902_v50 = vmul.f32 0.1, %v830_v51 }
 0x158   :  { %v927_v52 = vsel %vm863_vm0, %v803_v43, %v895_v20  ;;  %v1248_v53 = vpack.c.bf16 %v936_v12, %v936_v12  ;;  %v806_v54 = vadd.f32 %v1861_v22, %v645_v36 }
 0x159   :  { %v1239_v25 = vpack.c.bf16 %v927_v52, %v927_v52  ;;  %v934_v13 = vsel %vm870_vm1, %v830_v51, %v902_v50 }
 0x15a   :  { %1097 = vst.msk [vmem:[%s1960_s3 + $0x7c] sm:$0xf] %vm1065_vm3, %v1248_v53  ;;  %vm864_vm2 = vcmp.ge.f32.partialorder %v806_v54, 0.0  ;;  %v896_v55 = vmul.f32 0.1, %v806_v54  ;;  %v1246_v57 = vpack.c.bf16 %v934_v13, %v934_v13 }
 0x15b   :  { %1088 = vst.msk [vmem:[%s1960_s3 + $0x58] sm:$0xf] %vm1065_vm3, %v1239_v25 }
 0x15c   :  { %v928_v56 = vsel %vm864_vm2, %v806_v54, %v896_v55  ;;  %1095 = vst.msk [vmem:[%s1960_s3 + $0x74] sm:$0xf] %vm1065_vm3, %v1246_v57 }
 0x15d   :  { %v1240_v58 = vpack.c.bf16 %v928_v56, %v928_v56 }
 0x15f   :  { %1089 = vst.msk [vmem:[%s1960_s3 + $0x5c] sm:$0xf] %vm1065_vm3, %v1240_v58 }

// kernel: stfan_forward.156
= control target key start
LH: loop header
LB: loop body
LE: loop exit
PB: predicated region body
PF: predicated region fallthrough
CT: control target
= control target key end

     0   :  { %vm473_vm0 = vcmask 261120   ;;  %vm1068_vm1 = vcmask 257024   ;;  %s2089_s1 = inlined_call_operand.vmem [shape: bf16[288,32], index: 1, kind: input, shape index: {}]   ;;  %s2090_s0 = inlined_call_operand.vmem [shape: bf16[256,288], index: 0, kind: input, shape index: {}]   ;;  %s2091_s3 = inlined_call_operand.vmem [shape: bf16[256,32], index: 3, kind: input, shape index: {}]   ;;  %s2092_s2 = inlined_call_operand.vmem [shape: f32[1,32], index: 2, kind: input, shape index: {}]   ;;  %s2093_s4 = inlined_call_operand.vmem [shape: bf16[256,32], index: 4, kind: output, shape index: {}]  }
   0x1   :  { %v1513_v0 = vld [vmem:[%s2089_s1 + $0x40] sm:$0xff]   ;;  %v1515_v2 = vld [vmem:[%s2089_s1 + $0x48] sm:$0xff]   ;;  %v1517_v4 = vld [vmem:[%s2089_s1 + $0x50] sm:$0xff]  }
   0x2   :  { %v1514_v1 = vld [vmem:[%s2089_s1] sm:$0xff]   ;;  %1331 = vmatprep.subr.bf16.mxu0 %v1513_v0  ;;  %1497 = vmatprep.subr.bf16.mxu1 %v1513_v0  ;;  %v1516_v3 = vld [vmem:[%s2089_s1 + $0x8] sm:$0xff]   ;;  %v1518_v5 = vld [vmem:[%s2089_s1 + $0x10] sm:$0xff]  }
   0x3   :  { %1332 = vmatpush3.bf16.msra.mxu0 %v1514_v1  ;;  %1505 = vmatpush3.bf16.msra.mxu1 %v1514_v1  ;;  %v1519_v6 = vld [vmem:[%s2089_s1 + $0x58] sm:$0xff]   ;;  %v1521_v8 = vld [vmem:[%s2089_s1 + $0x60] sm:$0xff]   ;;  %v1523_v10 = vld [vmem:[%s2089_s1 + $0x68] sm:$0xff]  }
   0x4   :  { %1333 = vmatprep.subr.bf16.mxu0 %v1515_v2  ;;  %1498 = vmatprep.subr.bf16.mxu1 %v1515_v2  ;;  %v1520_v7 = vld [vmem:[%s2089_s1 + $0x18] sm:$0xff]   ;;  %v1522_v9 = vld [vmem:[%s2089_s1 + $0x20] sm:$0xff]   ;;  %v1524_v13 = vld [vmem:[%s2089_s1 + $0x28] sm:$0xff]  }
   0x5   :  { %v1531_v11 = vld [vmem:[%s2090_s0 + $0x4] ss:$12 sps:$4 sm:$0xff]   ;;  %v1527_v16 = vld [vmem:[%s2089_s1 + $0x78] sm:$0xff]   ;;  %v1529_v19 = vld [vmem:[%s2090_s0] ss:$12 sps:$4 sm:$0xff]  }
   0x6   :  { %v1534_v12 = vld [vmem:[%s2090_s0 + $0x124] ss:$12 sps:$4 sm:$0xff]   ;;  %554 = vmatprep.mubr.bf16.mxu0 %v1531_v11  ;;  %v1528_v17 = vld [vmem:[%s2089_s1 + $0x38] sm:$0xff]   ;;  %v1532_v20 = vld [vmem:[%s2090_s0 + $0x120] ss:$12 sps:$4 sm:$0xff]  }
   0x7   :  { %1334 = vmatpush3.bf16.msra.mxu0 %v1516_v3  ;;  %1506 = vmatpush3.bf16.msra.mxu1 %v1516_v3  ;;  %v1525_v14 = vld [vmem:[%s2089_s1 + $0x70] sm:$0xff]   ;;  %v1535_v18 = vld [vmem:[%s2089_s1 + $0x80] sm:$0xff]   ;;  %v1536_v21 = vld [vmem:[%s2090_s0 + $0x1c] ss:$12 sps:$4 sm:$0xff]  }
   0x8   :  { %1335 = vmatprep.subr.bf16.mxu0 %v1517_v4  ;;  %1499 = vmatprep.subr.bf16.mxu1 %v1517_v4  ;;  %v1526_v15 = vld [vmem:[%s2089_s1 + $0x30] sm:$0xff]   ;;  %v1538_v22 = vld [vmem:[%s2090_s0 + $0x13c] ss:$12 sps:$4 sm:$0xff]   ;;  %v1540_v24 = vld [vmem:[%s2090_s0 + $0x18] ss:$12 sps:$4 sm:$0xff]  }
   0x9   :  { %650 = vmatprep.mubr.bf16.mxu1 %v1534_v12  ;;  %v1548_v23 = vld [vmem:[%s2089_s1 + $0x88] sm:$0xff]   ;;  %v1541_v25 = vld [vmem:[%s2090_s0 + $0x138] ss:$12 sps:$4 sm:$0xff]   ;;  %v1542_v26 = vld [vmem:[%s2090_s0 + $0x34] ss:$12 sps:$4 sm:$0xff]  }
   0xa   :  { %v1544_v27 = vld [vmem:[%s2090_s0 + $0x154] ss:$12 sps:$4 sm:$0xff]   ;;  %v1546_v28 = vld [vmem:[%s2090_s0 + $0x30] ss:$12 sps:$4 sm:$0xff]   ;;  %v1549_v30 = vld [vmem:[%s2090_s0 + $0x4c] ss:$12 sps:$4 sm:$0xff]  }
   0xb   :  { %1336 = vmatpush3.bf16.msra.mxu0 %v1518_v5  ;;  %1507 = vmatpush3.bf16.msra.mxu1 %v1518_v5  ;;  %v1547_v29 = vld [vmem:[%s2090_s0 + $0x150] ss:$12 sps:$4 sm:$0xff]   ;;  %v1551_v31 = vld [vmem:[%s2090_s0 + $0x16c] ss:$12 sps:$4 sm:$0xff]   ;;  %v1553_v32 = vld [vmem:[%s2090_s0 + $0x48] ss:$12 sps:$4 sm:$0xff]  }
   0xc   :  { %1337 = vmatprep.subr.bf16.mxu0 %v1519_v6  ;;  %1500 = vmatprep.subr.bf16.mxu1 %v1519_v6  ;;  %v1554_v33 = vld [vmem:[%s2090_s0 + $0x168] ss:$12 sps:$4 sm:$0xff]   ;;  %v1555_v34 = vld [vmem:[%s2090_s0 + $0x64] ss:$12 sps:$4 sm:$0xff]   ;;  %v1558_v36 = vld [vmem:[%s2090_s0 + $0x60] ss:$12 sps:$4 sm:$0xff]  }
   0xd   :  { %v1557_v35 = vld [vmem:[%s2090_s0 + $0x8] ss:$12 sps:$4 sm:$0xff]   ;;  %v1559_v37 = vld [vmem:[%s2090_s0 + $0x20] ss:$12 sps:$4 sm:$0xff]   ;;  %v1562_v39 = vld [vmem:[%s2090_s0 + $0x38] ss:$12 sps:$4 sm:$0xff]  }
   0xe   :  { %v1560_v38 = vld [vmem:[%s2090_s0 + $0x7c] ss:$12 sps:$4 sm:$0xff]   ;;  %v1563_v40 = vld [vmem:[%s2090_s0 + $0x78] ss:$12 sps:$4 sm:$0xff]   ;;  %v1565_v42 = vld [vmem:[%s2090_s0 + $0x94] ss:$12 sps:$4 sm:$0xff]  }
   0xf   :  { %1338 = vmatpush3.bf16.msra.mxu0 %v1520_v7  ;;  %1508 = vmatpush3.bf16.msra.mxu1 %v1520_v7  ;;  %v1564_v41 = vld [vmem:[%s2090_s0 + $0x50] ss:$12 sps:$4 sm:$0xff]   ;;  %v1567_v43 = vld [vmem:[%s2090_s0 + $0x68] ss:$12 sps:$4 sm:$0xff]   ;;  %v1569_v45 = vld [vmem:[%s2090_s0 + $0x80] ss:$12 sps:$4 sm:$0xff]  }
  0x10   :  { %1339 = vmatprep.subr.bf16.mxu0 %v1521_v8  ;;  %1501 = vmatprep.subr.bf16.mxu1 %v1521_v8  ;;  %v1568_v44 = vld [vmem:[%s2090_s0 + $0x90] ss:$12 sps:$4 sm:$0xff]   ;;  %v1570_v46 = vld [vmem:[%s2090_s0 + $0xac] ss:$12 sps:$4 sm:$0xff]   ;;  %v1573_v48 = vld [vmem:[%s2090_s0 + $0xa8] ss:$12 sps:$4 sm:$0xff]  }
  0x11   :  { %v1572_v47 = vld [vmem:[%s2090_s0 + $0x98] ss:$12 sps:$4 sm:$0xff]   ;;  %v1574_v49 = vld [vmem:[%s2090_s0 + $0xb0] ss:$12 sps:$4 sm:$0xff]   ;;  %v1577_v51 = vld [vmem:[%s2090_s0 + $0xc8] ss:$12 sps:$4 sm:$0xff]  }
  0x12   :  { %v1575_v50 = vld [vmem:[%s2090_s0 + $0xc4] ss:$12 sps:$4 sm:$0xff]   ;;  %v1578_v52 = vld [vmem:[%s2090_s0 + $0xc0] ss:$12 sps:$4 sm:$0xff]   ;;  %v1580_v54 = vld [vmem:[%s2090_s0 + $0xdc] ss:$12 sps:$4 sm:$0xff]  }
  0x13   :  { %1340 = vmatpush3.bf16.msra.mxu0 %v1522_v9  ;;  %1509 = vmatpush3.bf16.msra.mxu1 %v1522_v9  ;;  %v1579_v53 = vld [vmem:[%s2090_s0 + $0xe0] ss:$12 sps:$4 sm:$0xff]   ;;  %v1582_v55 = vld [vmem:[%s2090_s0 + $0xf8] ss:$12 sps:$4 sm:$0xff]   ;;  %v1584_v57 = vld [vmem:[%s2090_s0 + $0x110] ss:$12 sps:$4 sm:$0xff]  }
  0x14   :  { %1341 = vmatprep.subr.bf16.mxu0 %v1523_v10  ;;  %1502 = vmatprep.subr.bf16.mxu1 %v1523_v10  ;;  %v1583_v56 = vld [vmem:[%s2090_s0 + $0xd8] ss:$12 sps:$4 sm:$0xff]   ;;  %v1585_v58 = vld [vmem:[%s2090_s0 + $0xf4] ss:$12 sps:$4 sm:$0xff]   ;;  %v1588_v60 = vld [vmem:[%s2090_s0 + $0xf0] ss:$12 sps:$4 sm:$0xff]  }
  0x15   :  { %v1587_v59 = vld [vmem:[%s2090_s0 + $0x128] ss:$12 sps:$4 sm:$0xff]   ;;  %v1589_v61 = vld [vmem:[%s2090_s0 + $0x140] ss:$12 sps:$4 sm:$0xff]   ;;  %v1592_v63 = vld [vmem:[%s2090_s0 + $0x158] ss:$12 sps:$4 sm:$0xff]  }
  0x16   :  { %v1590_v62 = vld [vmem:[%s2090_s0 + $0x10c] ss:$12 sps:$4 sm:$0xff]   ;;  %v1593_v0 = vld [vmem:[%s2090_s0 + $0x108] ss:$12 sps:$4 sm:$0xff]   ;;  %v1594_v1 = vld [vmem:[%s2090_s0 + $0x170] ss:$12 sps:$4 sm:$0xff]  }
  0x17   :  { %1342 = vmatpush3.bf16.msra.mxu0 %v1524_v13  ;;  %1510 = vmatpush3.bf16.msra.mxu1 %v1524_v13 }
  0x18   :  { %1343 = vmatprep.subr.bf16.mxu0 %v1525_v14  ;;  %1503 = vmatprep.subr.bf16.mxu1 %v1525_v14 }
  0x1b   :  { %1344 = vmatpush3.bf16.msra.mxu0 %v1526_v15  ;;  %1511 = vmatpush3.bf16.msra.mxu1 %v1526_v15 }
  0x1c   :  { %1345 = vmatprep.subr.bf16.mxu0 %v1527_v16  ;;  %1504 = vmatprep.subr.bf16.mxu1 %v1527_v16 }
  0x1f   :  { %1346 = vmatpush3.bf16.msra.mxu0 %v1528_v17  ;;  %1512 = vmatpush3.bf16.msra.mxu1 %v1528_v17 }
  0x20   :  { %1461 = vmatprep.subr.bf16.mxu1 %v1535_v18 }
  0x22   :  { %555 = vmatmul.mubr.bf16.vlgmr.msra.gmra.mrb[0].mxu0 %v1529_v19  ;;  %651 = vmatmul.mubr.bf16.vlgmr.msra.gmra.mrb[0].mxu1 %v1532_v20 }
  0x23   :  { %1462 = vmatpush3.bf16.msra.mxu1 %v1535_v18  ;;  %562 = vmatprep.mubr.bf16.mxu0 %v1536_v21 }
  0x24   :  { %658 = vmatprep.mubr.bf16.mxu1 %v1538_v22  ;;  %1463 = vmatprep.subr.bf16.mxu1 %v1548_v23 }
  0x27   :  { %1464 = vmatpush3.bf16.msra.mxu1 %v1548_v23 }
  0x2a   :  { %563 = vmatmul.mubr.bf16.gmra.mrb[4].mxu0 %v1540_v24  ;;  %659 = vmatmul.mubr.bf16.gmra.mrb[4].mxu1 %v1541_v25 }
  0x2b   :  { %570 = vmatprep.mubr.bf16.mxu0 %v1542_v26  ;;  %666 = vmatprep.mubr.bf16.mxu1 %v1544_v27 }
  0x32   :  { %571 = vmatmul.mubr.bf16.gmra.mrb[8].mxu0 %v1546_v28  ;;  %667 = vmatmul.mubr.bf16.gmra.mrb[8].mxu1 %v1547_v29 }
  0x33   :  { %578 = vmatprep.mubr.bf16.mxu0 %v1549_v30  ;;  %674 = vmatprep.mubr.bf16.mxu1 %v1551_v31 }
  0x3a   :  { %579 = vmatmul.mubr.bf16.gmra.mrb[12].mxu0 %v1553_v32  ;;  %675 = vmatmul.mubr.bf16.gmra.mrb[12].mxu1 %v1554_v33 }
  0x3b   :  { %586 = vmatprep.mubr.bf16.mxu0 %v1555_v34  ;;  %1465 = vmatprep.mubr.msk.bf16.mxu1 %vm473_vm0, %v1557_v35 }
  0x42   :  { %587 = vmatmul.mubr.bf16.gmra.mrb[16].mxu0 %v1558_v36  ;;  %1466 = vmatmul.mubr.msk.bf16.vlgmr.msra.gmra.mrb[16].mxu1 %vm473_vm0, %v1559_v37 }
  0x43   :  { %594 = vmatprep.mubr.bf16.mxu0 %v1560_v38  ;;  %1469 = vmatprep.mubr.msk.bf16.mxu1 %vm473_vm0, %v1562_v39 }
  0x4a   :  { %595 = vmatmul.mubr.bf16.gmra.mrb[20].mxu0 %v1563_v40  ;;  %1470 = vmatmul.mubr.msk.bf16.gmra.mrb[20].mxu1 %vm473_vm0, %v1564_v41 }
  0x4b   :  { %602 = vmatprep.mubr.bf16.mxu0 %v1565_v42  ;;  %1473 = vmatprep.mubr.msk.bf16.mxu1 %vm473_vm0, %v1567_v43 }
  0x52   :  { %603 = vmatmul.mubr.bf16.gmra.mrb[24].mxu0 %v1568_v44  ;;  %1474 = vmatmul.mubr.msk.bf16.gmra.mrb[24].mxu1 %vm473_vm0, %v1569_v45 }
  0x53   :  { %610 = vmatprep.mubr.bf16.mxu0 %v1570_v46  ;;  %1477 = vmatprep.mubr.msk.bf16.mxu1 %vm473_vm0, %v1572_v47 }
  0x5a   :  { %611 = vmatmul.mubr.bf16.gmra.mrb[28].mxu0 %v1573_v48  ;;  %1478 = vmatmul.mubr.msk.bf16.gmra.mrb[28].mxu1 %vm473_vm0, %v1574_v49 }
  0x5b   :  { %618 = vmatprep.mubr.bf16.mxu0 %v1575_v50  ;;  %1481 = vmatprep.mubr.msk.bf16.mxu1 %vm473_vm0, %v1577_v51  ;;  %v1316_v50 = vld [vmem:[%s2091_s3 + $0x8] sm:$0xff]   ;;  %v1860_v51 = vld [vmem:[%s2092_s2] ss:$0 sm:$0xff] }
  0x62   :  { %619 = vmatmul.mubr.bf16.gmra.mrb[32].mxu0 %v1578_v52  ;;  %1482 = vmatmul.mubr.msk.bf16.gmra.mrb[32].mxu1 %vm473_vm0, %v1579_v53  ;;  %v1253_v52 = vld [vmem:[%s2091_s3] sm:$0xff]  }
  0x63   :  { %626 = vmatprep.mubr.bf16.mxu0 %v1580_v54  ;;  %1485 = vmatprep.mubr.msk.bf16.mxu1 %vm473_vm0, %v1582_v55  ;;  %v1258_v54 = vunpack.c.l.bf16 %v1316_v50 }
  0x6a   :  { %627 = vmatmul.mubr.bf16.gmra.mrb[36].mxu0 %v1583_v56  ;;  %1486 = vmatmul.mubr.msk.bf16.gmra.mrb[36].mxu1 %vm473_vm0, %v1584_v57 }
  0x6b   :  { %634 = vmatprep.mubr.bf16.mxu0 %v1585_v58  ;;  %1489 = vmatprep.mubr.msk.bf16.mxu1 %vm473_vm0, %v1587_v59  ;;  %v1254_v58 = vunpack.c.l.bf16 %v1253_v52 }
  0x72   :  { %635 = vmatmul.mubr.bf16.gmra.mrb[40].mxu0 %v1588_v60  ;;  %1490 = vmatmul.mubr.msk.bf16.gmra.mrb[40].mxu1 %vm473_vm0, %v1589_v61 }
  0x73   :  { %642 = vmatprep.mubr.bf16.mxu0 %v1590_v62  ;;  %1493 = vmatprep.mubr.msk.bf16.mxu1 %vm473_vm0, %v1592_v63  ;;  %v1259_v63 = vunpack.c.h.bf16 %v1316_v50 }
  0x7a   :  { %643 = vmatmul.mubr.bf16.gmra.mrb[44].mxu0 %v1593_v0  ;;  %1494 = vmatmul.mubr.msk.bf16.gmra.mrb[44].mxu1 %vm473_vm0, %v1594_v1 }
  0xf5   :  { %v1347_v2 = vpop.f32.mrb[0].mxu0  ;;  %v1419_v3 = vpop.f32.mrb[0].mxu1 }
  0xf6   :  { %v1348_v4 = vpop.f32.mrb[1].mxu0  ;;  %v1420_v5 = vpop.f32.mrb[1].mxu1 }
  0xf7   :  { %v1349_v6 = vadd.f32 %v1348_v4, %v1347_v2  ;;  %v1350_v7 = vpop.f32.mrb[2].mxu0  ;;  %v1834_v8 = vadd.f32 %v1420_v5, %v1419_v3  ;;  %v1422_v9 = vpop.f32.mrb[2].mxu1  ;;  %v1255_v5 = vunpack.c.h.bf16 %v1253_v52 }
  0xf8   :  { %v1351_v10 = vpop.f32.mrb[3].mxu0  ;;  %v1423_v11 = vpop.f32.mrb[3].mxu1 }
  0xf9   :  { %v1352_v12 = vadd.f32 %v1351_v10, %v1350_v7  ;;  %v1836_v13 = vadd.f32 %v1423_v11, %v1422_v9  ;;  %v557_v57 = vadd.f32 %v1349_v6, %v1860_v51 }
  0xfb   :  { %v560_v4 = vadd.f32 %v1352_v12, %v1860_v51  ;;  %v1317_v12 = vld [vmem:[%s2091_s3 + $0x10] sm:$0xff]  }
  0xfd   :  { %v1353_v14 = vpop.f32.mrb[4].mxu0  ;;  %v1425_v15 = vpop.f32.mrb[4].mxu1 }
  0xfe   :  { %v1354_v16 = vpop.f32.mrb[5].mxu0  ;;  %v1426_v17 = vpop.f32.mrb[5].mxu1 }
  0xff   :  { %v1355_v18 = vadd.f32 %v1354_v16, %v1353_v14  ;;  %v1356_v19 = vpop.f32.mrb[6].mxu0  ;;  %v1838_v20 = vadd.f32 %v1426_v17, %v1425_v15  ;;  %v1428_v21 = vpop.f32.mrb[6].mxu1  ;;  %v1318_v16 = vld [vmem:[%s2091_s3 + $0x18] sm:$0xff]  }
 0x100   :  { %v1357_v22 = vpop.f32.mrb[7].mxu0  ;;  %v1429_v23 = vpop.f32.mrb[7].mxu1 }
 0x101   :  { %v1358_v24 = vadd.f32 %v1357_v22, %v1356_v19  ;;  %v1840_v25 = vadd.f32 %v1429_v23, %v1428_v21  ;;  %v565_v53 = vadd.f32 %v1355_v18, %v1860_v51 }
 0x103   :  { %v568_v62 = vadd.f32 %v1358_v24, %v1860_v51  ;;  %v1266_v24 = vunpack.c.l.bf16 %v1318_v16 }
 0x105   :  { %v1359_v26 = vpop.f32.mrb[8].mxu0  ;;  %v1431_v27 = vpop.f32.mrb[8].mxu1 }
 0x106   :  { %v1360_v28 = vpop.f32.mrb[9].mxu0  ;;  %v1432_v29 = vpop.f32.mrb[9].mxu1 }
 0x107   :  { %v1842_v30 = vadd.f32 %v1360_v28, %v1359_v26  ;;  %v1362_v31 = vpop.f32.mrb[10].mxu0  ;;  %v1844_v32 = vadd.f32 %v1432_v29, %v1431_v27  ;;  %v1434_v33 = vpop.f32.mrb[10].mxu1 }
 0x108   :  { %v1363_v34 = vpop.f32.mrb[11].mxu0  ;;  %v1435_v35 = vpop.f32.mrb[11].mxu1 }
 0x109   :  { %v1846_v36 = vadd.f32 %v1363_v34, %v1362_v31  ;;  %v1848_v37 = vadd.f32 %v1435_v35, %v1434_v33  ;;  %v573_v29 = vadd.f32 %v1842_v30, %v1860_v51  ;;  %v1262_v31 = vunpack.c.l.bf16 %v1317_v12 }
 0x10d   :  { %v1365_v38 = vpop.f32.mrb[12].mxu0  ;;  %v1437_v39 = vpop.f32.mrb[12].mxu1 }
 0x10e   :  { %v1366_v40 = vpop.f32.mrb[13].mxu0  ;;  %v1438_v41 = vpop.f32.mrb[13].mxu1 }
 0x10f   :  { %v1367_v42 = vadd.f32 %v1366_v40, %v1365_v38  ;;  %v1368_v43 = vpop.f32.mrb[14].mxu0  ;;  %v1850_v44 = vadd.f32 %v1438_v41, %v1437_v39  ;;  %v1440_v45 = vpop.f32.mrb[14].mxu1  ;;  %v1267_v39 = vunpack.c.h.bf16 %v1318_v16 }
 0x110   :  { %v1369_v46 = vpop.f32.mrb[15].mxu0  ;;  %v1441_v47 = vpop.f32.mrb[15].mxu1 }
 0x111   :  { %v1370_v48 = vadd.f32 %v1369_v46, %v1368_v43  ;;  %v1852_v49 = vadd.f32 %v1441_v47, %v1440_v45  ;;  %v581_v23 = vadd.f32 %v1367_v42, %v1860_v51  ;;  %v576_v43 = vadd.f32 %v1846_v36, %v1860_v51 }
 0x112   :  { %v1263_v45 = vunpack.c.h.bf16 %v1317_v12 }
 0x113   :  { %v584_v38 = vadd.f32 %v1370_v48, %v1860_v51 }
 0x115   :  { %v1371_v55 = vpop.f32.mrb[16].mxu0  ;;  %v1467_v56 = vpop.f32.mrb[16].mxu1 }
 0x116   :  { %v726_v59 = vadd.f32 %v1467_v56, %v565_v53  ;;  %v1372_v60 = vpop.f32.mrb[17].mxu0  ;;  %v717_v61 = vpop.f32.mrb[17].mxu1 }
 0x117   :  { %v1868_v0 = vadd.f32 %v1372_v60, %v1371_v55  ;;  %v718_v1 = vadd.f32 %v717_v61, %v557_v57  ;;  %v1374_v2 = vpop.f32.mrb[18].mxu0  ;;  %v1468_v3 = vpop.f32.mrb[18].mxu1  ;;  %v1320_v55 = vld [vmem:[%s2091_s3 + $0x28] sm:$0xff]  }
 0x118   :  { %v910_v7 = vadd.f32 %v1258_v54, %v726_v59  ;;  %v729_v9 = vadd.f32 %v1468_v3, %v568_v62  ;;  %v1375_v10 = vpop.f32.mrb[19].mxu0  ;;  %v720_v11 = vpop.f32.mrb[19].mxu1  ;;  %v1274_v62 = vunpack.c.l.bf16 %v1320_v55 }
 0x119   :  { %v908_v6 = vadd.f32 %v1254_v58, %v718_v1  ;;  %v1871_v14 = vadd.f32 %v1375_v10, %v1374_v2  ;;  %v721_v15 = vadd.f32 %v720_v11, %v560_v4  ;;  %v1319_v58 = vld [vmem:[%s2091_s3 + $0x20] sm:$0xff]   ;;  %v589_v3 = vadd.f32 %v1868_v0, %v1860_v51 }
 0x11a   :  { %v1222_v17 = vpack.c.bf16 %v910_v7, %v910_v7  ;;  %v911_v18 = vadd.f32 %v1259_v63, %v729_v9  ;;  %v1270_v4 = vunpack.c.l.bf16 %v1319_v58  ;;  %v1275_v11 = vunpack.c.h.bf16 %v1320_v55 }
 0x11b   :  { %v1220_v19 = vpack.c.bf16 %v908_v6, %v908_v6  ;;  %v909_v21 = vadd.f32 %v1255_v5, %v721_v15 }
 0x11c   :  { %1071 = vst.msk [vmem:[%s2093_s4 + $0x8] sm:$0xf] %vm1068_vm1, %v1222_v17  ;;  %v1223_v22 = vpack.c.bf16 %v911_v18, %v911_v18  ;;  %v592_v17 = vadd.f32 %v1871_v14, %v1860_v51  ;;  %v1271_v18 = vunpack.c.h.bf16 %v1319_v58 }
 0x11d   :  { %1069 = vst.msk [vmem:[%s2093_s4] sm:$0xf] %vm1068_vm1, %v1220_v19  ;;  %v1221_v26 = vpack.c.bf16 %v909_v21, %v909_v21  ;;  %v1377_v27 = vpop.f32.mrb[20].mxu0  ;;  %v1471_v28 = vpop.f32.mrb[20].mxu1 }
 0x11e   :  { %1072 = vst.msk [vmem:[%s2093_s4 + $0xc] sm:$0xf] %vm1068_vm1, %v1223_v22  ;;  %v742_v33 = vadd.f32 %v1471_v28, %v581_v23  ;;  %v1378_v34 = vpop.f32.mrb[21].mxu0  ;;  %v733_v35 = vpop.f32.mrb[21].mxu1 }
 0x11f   :  { %1070 = vst.msk [vmem:[%s2093_s4 + $0x4] sm:$0xf] %vm1068_vm1, %v1221_v26  ;;  %v1379_v40 = vadd.f32 %v1378_v34, %v1377_v27  ;;  %v734_v41 = vadd.f32 %v733_v35, %v573_v29  ;;  %v1380_v30 = vpop.f32.mrb[22].mxu0  ;;  %v1472_v42 = vpop.f32.mrb[22].mxu1  ;;  %v1321_v29 = vld [vmem:[%s2091_s3 + $0x30] sm:$0xff]  }
 0x120   :  { %v914_v46 = vadd.f32 %v1266_v24, %v742_v33  ;;  %v745_v47 = vadd.f32 %v1472_v42, %v584_v38  ;;  %v1381_v50 = vpop.f32.mrb[23].mxu0  ;;  %v736_v52 = vpop.f32.mrb[23].mxu1 }
 0x121   :  { %v912_v53 = vadd.f32 %v1262_v31, %v734_v41  ;;  %v1382_v48 = vadd.f32 %v1381_v50, %v1380_v30  ;;  %v737_v54 = vadd.f32 %v736_v52, %v576_v43  ;;  %v597_v61 = vadd.f32 %v1379_v40, %v1860_v51 }
 0x122   :  { %v1226_v56 = vpack.c.bf16 %v914_v46, %v914_v46  ;;  %v915_v57 = vadd.f32 %v1267_v39, %v745_v47  ;;  %v1322_v39 = vld [vmem:[%s2091_s3 + $0x38] sm:$0xff]   ;;  %v1278_v41 = vunpack.c.l.bf16 %v1321_v29  ;;  %v1279_v52 = vunpack.c.h.bf16 %v1321_v29 }
 0x123   :  { %v1224_v59 = vpack.c.bf16 %v912_v53, %v912_v53  ;;  %v913_v36 = vadd.f32 %v1263_v45, %v737_v54  ;;  %v600_v10 = vadd.f32 %v1382_v48, %v1860_v51  ;;  %v1282_v53 = vunpack.c.l.bf16 %v1322_v39 }
 0x124   :  { %1075 = vst.msk [vmem:[%s2093_s4 + $0x18] sm:$0xf] %vm1068_vm1, %v1226_v56  ;;  %v1227_v60 = vpack.c.bf16 %v915_v57, %v915_v57 }
 0x125   :  { %1073 = vst.msk [vmem:[%s2093_s4 + $0x10] sm:$0xf] %vm1068_vm1, %v1224_v59  ;;  %v1225_v63 = vpack.c.bf16 %v913_v36, %v913_v36  ;;  %v1383_v1 = vpop.f32.mrb[24].mxu0  ;;  %v1475_v2 = vpop.f32.mrb[24].mxu1  ;;  %v1283_v59 = vunpack.c.h.bf16 %v1322_v39 }
 0x126   :  { %1076 = vst.msk [vmem:[%s2093_s4 + $0x1c] sm:$0xf] %vm1068_vm1, %v1227_v60  ;;  %v758_v5 = vadd.f32 %v1475_v2, %v597_v61  ;;  %v1384_v7 = vpop.f32.mrb[25].mxu0  ;;  %v749_v9 = vpop.f32.mrb[25].mxu1 }
 0x127   :  { %1074 = vst.msk [vmem:[%s2093_s4 + $0x14] sm:$0xf] %vm1068_vm1, %v1225_v63  ;;  %v1385_v6 = vadd.f32 %v1384_v7, %v1383_v1  ;;  %v750_v15 = vadd.f32 %v749_v9, %v589_v3  ;;  %v1386_v0 = vpop.f32.mrb[26].mxu0  ;;  %v1476_v16 = vpop.f32.mrb[26].mxu1  ;;  %v1323_v9 = vld [vmem:[%s2091_s3 + $0x40] sm:$0xff]  }
 0x128   :  { %v918_v12 = vadd.f32 %v1274_v62, %v758_v5  ;;  %v761_v19 = vadd.f32 %v1476_v16, %v600_v10  ;;  %v1387_v21 = vpop.f32.mrb[27].mxu0  ;;  %v752_v22 = vpop.f32.mrb[27].mxu1 }
 0x129   :  { %v916_v23 = vadd.f32 %v1270_v4, %v750_v15  ;;  %v1388_v24 = vadd.f32 %v1387_v21, %v1386_v0  ;;  %v753_v26 = vadd.f32 %v752_v22, %v592_v17  ;;  %v605_v40 = vadd.f32 %v1385_v6, %v1860_v51 }
 0x12a   :  { %v1230_v27 = vpack.c.bf16 %v918_v12, %v918_v12  ;;  %v919_v28 = vadd.f32 %v1275_v11, %v761_v19  ;;  %v1286_v19 = vunpack.c.l.bf16 %v1323_v9 }
 0x12b   :  { %v1228_v31 = vpack.c.bf16 %v916_v23, %v916_v23  ;;  %v917_v33 = vadd.f32 %v1271_v18, %v753_v26  ;;  %v608_v50 = vadd.f32 %v1388_v24, %v1860_v51  ;;  %v1287_v24 = vunpack.c.h.bf16 %v1323_v9 }
 0x12c   :  { %1079 = vst.msk [vmem:[%s2093_s4 + $0x28] sm:$0xf] %vm1068_vm1, %v1230_v27  ;;  %v1231_v14 = vpack.c.bf16 %v919_v28, %v919_v28 }
 0x12d   :  { %1077 = vst.msk [vmem:[%s2093_s4 + $0x20] sm:$0xf] %vm1068_vm1, %v1228_v31  ;;  %v1229_v34 = vpack.c.bf16 %v917_v33, %v917_v33  ;;  %v1389_v35 = vpop.f32.mrb[28].mxu0  ;;  %v1479_v38 = vpop.f32.mrb[28].mxu1  ;;  %v1324_v33 = vld [vmem:[%s2091_s3 + $0x48] sm:$0xff]  }
 0x12e   :  { %1080 = vst.msk [vmem:[%s2093_s4 + $0x2c] sm:$0xf] %vm1068_vm1, %v1231_v14  ;;  %v1390_v30 = vpop.f32.mrb[29].mxu0  ;;  %v765_v42 = vpop.f32.mrb[29].mxu1 }
 0x12f   :  { %1078 = vst.msk [vmem:[%s2093_s4 + $0x24] sm:$0xf] %vm1068_vm1, %v1229_v34  ;;  %v1391_v43 = vadd.f32 %v1390_v30, %v1389_v35  ;;  %v766_v45 = vadd.f32 %v765_v42, %v605_v40  ;;  %v1392_v46 = vpop.f32.mrb[30].mxu0  ;;  %v1480_v47 = vpop.f32.mrb[30].mxu1 }
 0x130   :  { %v1393_v48 = vpop.f32.mrb[31].mxu0  ;;  %v768_v54 = vpop.f32.mrb[31].mxu1 }
 0x131   :  { %v613_v55 = vadd.f32 %v1391_v43, %v1860_v51  ;;  %v920_v56 = vadd.f32 %v1278_v41, %v766_v45  ;;  %v1394_v57 = vadd.f32 %v1393_v48, %v1392_v46  ;;  %v769_v58 = vadd.f32 %v768_v54, %v608_v50  ;;  %v1327_v50 = vld [vmem:[%s2091_s3 + $0x60] sm:$0xff]  }
 0x132   :  { %v1290_v45 = vunpack.c.l.bf16 %v1324_v33  ;;  %v1291_v48 = vunpack.c.h.bf16 %v1324_v33  ;;  %v661_v54 = vadd.f32 %v1838_v20, %v1860_v51 }
 0x133   :  { %v774_v36 = vadd.f32 %v1479_v38, %v613_v55  ;;  %v1232_v60 = vpack.c.bf16 %v920_v56, %v920_v56  ;;  %v616_v61 = vadd.f32 %v1394_v57, %v1860_v51  ;;  %v921_v62 = vadd.f32 %v1279_v52, %v769_v58 }
 0x135   :  { %v922_v63 = vadd.f32 %v1282_v53, %v774_v36  ;;  %1081 = vst.msk [vmem:[%s2093_s4 + $0x30] sm:$0xf] %vm1068_vm1, %v1232_v60  ;;  %v777_v1 = vadd.f32 %v1480_v47, %v616_v61  ;;  %v1233_v2 = vpack.c.bf16 %v921_v62, %v921_v62  ;;  %v1395_v3 = vpop.f32.mrb[32].mxu0  ;;  %v1483_v4 = vpop.f32.mrb[32].mxu1  ;;  %v1328_v47 = vld [vmem:[%s2091_s3 + $0x68] sm:$0xff]   ;;  %v1325_v36 = vld [vmem:[%s2091_s3 + $0x50] sm:$0xff]   ;;  %v653_v60 = vadd.f32 %v1834_v8, %v1860_v51 }
 0x136   :  { %v1396_v5 = vpop.f32.mrb[33].mxu0  ;;  %v781_v7 = vpop.f32.mrb[33].mxu1  ;;  %v1306_v55 = vunpack.c.l.bf16 %v1328_v47  ;;  %v1302_v61 = vunpack.c.l.bf16 %v1327_v50  ;;  %v1307_v20 = vunpack.c.h.bf16 %v1328_v47  ;;  %v656_v8 = vadd.f32 %v1836_v13, %v1860_v51 }
 0x137   :  { %v1234_v10 = vpack.c.bf16 %v922_v63, %v922_v63  ;;  %v923_v11 = vadd.f32 %v1283_v59, %v777_v1  ;;  %1082 = vst.msk [vmem:[%s2093_s4 + $0x34] sm:$0xf] %vm1068_vm1, %v1233_v2  ;;  %v1397_v6 = vadd.f32 %v1396_v5, %v1395_v3  ;;  %v1398_v15 = vpop.f32.mrb[34].mxu0  ;;  %v1484_v0 = vpop.f32.mrb[34].mxu1  ;;  %v664_v2 = vadd.f32 %v1840_v25, %v1860_v51  ;;  %v1330_v25 = vld [vmem:[%s2091_s3 + $0x78] sm:$0xff]  }
 0x138   :  { %v1399_v16 = vpop.f32.mrb[35].mxu0  ;;  %v784_v17 = vpop.f32.mrb[35].mxu1  ;;  %v1303_v3 = vunpack.c.h.bf16 %v1327_v50  ;;  %v1314_v33 = vunpack.c.l.bf16 %v1330_v25  ;;  %v1315_v47 = vunpack.c.h.bf16 %v1330_v25 }
 0x139   :  { %1083 = vst.msk [vmem:[%s2093_s4 + $0x38] sm:$0xf] %vm1068_vm1, %v1234_v10  ;;  %v1235_v18 = vpack.c.bf16 %v923_v11, %v923_v11  ;;  %v621_v12 = vadd.f32 %v1397_v6, %v1860_v51  ;;  %v1400_v21 = vadd.f32 %v1399_v16, %v1398_v15  ;;  %v1294_v15 = vunpack.c.l.bf16 %v1325_v36 }
 0x13b   :  { %1084 = vst.msk [vmem:[%s2093_s4 + $0x3c] sm:$0xf] %vm1068_vm1, %v1235_v18  ;;  %v782_v22 = vadd.f32 %v781_v7, %v621_v12  ;;  %v624_v23 = vadd.f32 %v1400_v21, %v1860_v51 }
 0x13d   :  { %v924_v26 = vadd.f32 %v1286_v19, %v782_v22  ;;  %v785_v27 = vadd.f32 %v784_v17, %v624_v23  ;;  %v1401_v28 = vpop.f32.mrb[36].mxu0  ;;  %v1976_v29 = vpop.f32.mrb[36].mxu1  ;;  %v1329_v22 = vld [vmem:[%s2091_s3 + $0x70] sm:$0xff]  }
 0x13e   :  { %v1402_v31 = vpop.f32.mrb[37].mxu0  ;;  %v797_v14 = vpop.f32.mrb[37].mxu1 }
 0x13f   :  { %v1236_v34 = vpack.c.bf16 %v924_v26, %v924_v26  ;;  %v925_v35 = vadd.f32 %v1287_v24, %v785_v27  ;;  %v1403_v38 = vadd.f32 %v1402_v31, %v1401_v28  ;;  %v1404_v39 = vpop.f32.mrb[38].mxu0  ;;  %v1981_v40 = vpop.f32.mrb[38].mxu1  ;;  %v1295_v24 = vunpack.c.h.bf16 %v1325_v36 }
 0x140   :  { %v1405_v41 = vpop.f32.mrb[39].mxu0  ;;  %v800_v30 = vpop.f32.mrb[39].mxu1 }
 0x141   :  { %1085 = vst.msk [vmem:[%s2093_s4 + $0x40] sm:$0xf] %vm1068_vm1, %v1236_v34  ;;  %v1237_v42 = vpack.c.bf16 %v925_v35, %v925_v35  ;;  %v629_v43 = vadd.f32 %v1403_v38, %v1860_v51  ;;  %v1406_v46 = vadd.f32 %v1405_v41, %v1404_v39  ;;  %v677_v38 = vadd.f32 %v1850_v44, %v1860_v51 }
 0x142   :  { %v1310_v39 = vunpack.c.l.bf16 %v1329_v22 }
 0x143   :  { %1086 = vst.msk [vmem:[%s2093_s4 + $0x44] sm:$0xf] %vm1068_vm1, %v1237_v42  ;;  %v790_v52 = vadd.f32 %v1483_v4, %v629_v43  ;;  %v632_v53 = vadd.f32 %v1406_v46, %v1860_v51  ;;  %v669_v46 = vadd.f32 %v1844_v32, %v1860_v51 }
 0x145   :  { %v926_v56 = vadd.f32 %v1290_v45, %v790_v52  ;;  %v793_v57 = vadd.f32 %v1484_v0, %v632_v53  ;;  %v1407_v58 = vpop.f32.mrb[40].mxu0  ;;  %v1491_v59 = vpop.f32.mrb[40].mxu1  ;;  %v1326_v45 = vld [vmem:[%s2091_s3 + $0x58] sm:$0xff]  }
 0x146   :  { %v822_v62 = vadd.f32 %v1491_v59, %v661_v54  ;;  %v1408_v63 = vpop.f32.mrb[41].mxu0  ;;  %v813_v1 = vpop.f32.mrb[41].mxu1  ;;  %v1298_v36 = vunpack.c.l.bf16 %v1326_v45 }
 0x147   :  { %v1238_v4 = vpack.c.bf16 %v926_v56, %v926_v56  ;;  %v927_v5 = vadd.f32 %v1291_v48, %v793_v57  ;;  %v1409_v7 = vadd.f32 %v1408_v63, %v1407_v58  ;;  %v814_v9 = vadd.f32 %v813_v1, %v653_v60  ;;  %v1410_v10 = vpop.f32.mrb[42].mxu0  ;;  %v1492_v11 = vpop.f32.mrb[42].mxu1 }
 0x148   :  { %v934_v6 = vadd.f32 %v1306_v55, %v822_v62  ;;  %v825_v0 = vadd.f32 %v1492_v11, %v664_v2  ;;  %v1411_v16 = vpop.f32.mrb[43].mxu0  ;;  %v816_v17 = vpop.f32.mrb[43].mxu1  ;;  %v1311_v48 = vunpack.c.h.bf16 %v1329_v22  ;;  %v672_v62 = vadd.f32 %v1848_v37, %v1860_v51 }
 0x149   :  { %1087 = vst.msk [vmem:[%s2093_s4 + $0x48] sm:$0xf] %vm1068_vm1, %v1238_v4  ;;  %v1239_v18 = vpack.c.bf16 %v927_v5, %v927_v5  ;;  %v637_v12 = vadd.f32 %v1409_v7, %v1860_v51  ;;  %v932_v19 = vadd.f32 %v1302_v61, %v814_v9  ;;  %v1412_v21 = vadd.f32 %v1411_v16, %v1410_v10 }
 0x14a   :  { %v1246_v13 = vpack.c.bf16 %v934_v6, %v934_v6  ;;  %v935_v23 = vadd.f32 %v1307_v20, %v825_v0  ;;  %v817_v26 = vadd.f32 %v816_v17, %v656_v8  ;;  %v1299_v10 = vunpack.c.h.bf16 %v1326_v45 }
 0x14b   :  { %1088 = vst.msk [vmem:[%s2093_s4 + $0x4c] sm:$0xf] %vm1068_vm1, %v1239_v18  ;;  %v798_v27 = vadd.f32 %v797_v14, %v637_v12  ;;  %v1244_v28 = vpack.c.bf16 %v932_v19, %v932_v19  ;;  %v640_v31 = vadd.f32 %v1412_v21, %v1860_v51 }
 0x14c   :  { %1095 = vst.msk [vmem:[%s2093_s4 + $0x68] sm:$0xf] %vm1068_vm1, %v1246_v13  ;;  %v1247_v34 = vpack.c.bf16 %v935_v23, %v935_v23  ;;  %v933_v35 = vadd.f32 %v1303_v3, %v817_v26 }
 0x14d   :  { %v928_v41 = vadd.f32 %v1294_v15, %v798_v27  ;;  %1093 = vst.msk [vmem:[%s2093_s4 + $0x60] sm:$0xf] %vm1068_vm1, %v1244_v28  ;;  %v801_v14 = vadd.f32 %v800_v30, %v640_v31  ;;  %v1413_v42 = vpop.f32.mrb[44].mxu0  ;;  %v1495_v43 = vpop.f32.mrb[44].mxu1  ;;  %v680_v30 = vadd.f32 %v1852_v49, %v1860_v51 }
 0x14e   :  { %1096 = vst.msk [vmem:[%s2093_s4 + $0x6c] sm:$0xf] %vm1068_vm1, %v1247_v34  ;;  %v1245_v44 = vpack.c.bf16 %v933_v35, %v933_v35  ;;  %v838_v50 = vadd.f32 %v1495_v43, %v677_v38  ;;  %v1414_v52 = vpop.f32.mrb[45].mxu0  ;;  %v829_v53 = vpop.f32.mrb[45].mxu1 }
 0x14f   :  { %v1240_v54 = vpack.c.bf16 %v928_v41, %v928_v41  ;;  %v929_v55 = vadd.f32 %v1295_v24, %v801_v14  ;;  %v1415_v56 = vadd.f32 %v1414_v52, %v1413_v42  ;;  %v830_v57 = vadd.f32 %v829_v53, %v669_v46  ;;  %v1416_v58 = vpop.f32.mrb[46].mxu0  ;;  %v1496_v32 = vpop.f32.mrb[46].mxu1 }
 0x150   :  { %1094 = vst.msk [vmem:[%s2093_s4 + $0x64] sm:$0xf] %vm1068_vm1, %v1245_v44  ;;  %v938_v59 = vadd.f32 %v1314_v33, %v838_v50  ;;  %v841_v60 = vadd.f32 %v1496_v32, %v680_v30  ;;  %v1417_v61 = vpop.f32.mrb[47].mxu0  ;;  %v832_v49 = vpop.f32.mrb[47].mxu1 }
 0x151   :  { %1089 = vst.msk [vmem:[%s2093_s4 + $0x50] sm:$0xf] %vm1068_vm1, %v1240_v54  ;;  %v1241_v63 = vpack.c.bf16 %v929_v55, %v929_v55  ;;  %v645_v1 = vadd.f32 %v1415_v56, %v1860_v51  ;;  %v936_v2 = vadd.f32 %v1310_v39, %v830_v57  ;;  %v1418_v20 = vadd.f32 %v1417_v61, %v1416_v58 }
 0x152   :  { %v1250_v3 = vpack.c.bf16 %v938_v59, %v938_v59  ;;  %v939_v4 = vadd.f32 %v1315_v47, %v841_v60  ;;  %v833_v5 = vadd.f32 %v832_v49, %v672_v62 }
 0x153   :  { %1090 = vst.msk [vmem:[%s2093_s4 + $0x54] sm:$0xf] %vm1068_vm1, %v1241_v63  ;;  %v806_v37 = vadd.f32 %v1976_v29, %v645_v1  ;;  %v1248_v7 = vpack.c.bf16 %v936_v2, %v936_v2  ;;  %v648_v9 = vadd.f32 %v1418_v20, %v1860_v51 }
 0x154   :  { %1099 = vst.msk [vmem:[%s2093_s4 + $0x78] sm:$0xf] %vm1068_vm1, %v1250_v3  ;;  %v1251_v11 = vpack.c.bf16 %v939_v4, %v939_v4  ;;  %v937_v6 = vadd.f32 %v1311_v48, %v833_v5 }
 0x155   :  { %v930_v15 = vadd.f32 %v1298_v36, %v806_v37  ;;  %1097 = vst.msk [vmem:[%s2093_s4 + $0x70] sm:$0xf] %vm1068_vm1, %v1248_v7  ;;  %v809_v0 = vadd.f32 %v1981_v40, %v648_v9 }
 0x156   :  { %1100 = vst.msk [vmem:[%s2093_s4 + $0x7c] sm:$0xf] %vm1068_vm1, %v1251_v11  ;;  %v1249_v51 = vpack.c.bf16 %v937_v6, %v937_v6 }
 0x157   :  { %v1242_v29 = vpack.c.bf16 %v930_v15, %v930_v15  ;;  %v931_v16 = vadd.f32 %v1299_v10, %v809_v0 }
 0x158   :  { %1098 = vst.msk [vmem:[%s2093_s4 + $0x74] sm:$0xf] %vm1068_vm1, %v1249_v51 }
 0x159   :  { %1091 = vst.msk [vmem:[%s2093_s4 + $0x58] sm:$0xf] %vm1068_vm1, %v1242_v29  ;;  %v1243_v8 = vpack.c.bf16 %v931_v16, %v931_v16 }
 0x15b   :  { %1092 = vst.msk [vmem:[%s2093_s4 + $0x5c] sm:$0xf] %vm1068_vm1, %v1243_v8 }

// kernel: stfan_forward.159
= control target key start
LH: loop header
LB: loop body
LE: loop exit
PB: predicated region body
PF: predicated region fallthrough
CT: control target
= control target key end

     0   :  { %vm242_vm0 = vcmask 261120   ;;  %vm441_vm2 = vcmask 519168   ;;  %s762_s1 = inlined_call_operand.vmem [shape: bf16[288,64], index: 1, kind: input, shape index: {}]   ;;  %s763_s0 = inlined_call_operand.vmem [shape: bf16[64,288], index: 0, kind: input, shape index: {}]   ;;  %s764_s2 = inlined_call_operand.vmem [shape: f32[1,64], index: 2, kind: input, shape index: {}]   ;;  %s765_s3 = inlined_call_operand.vmem [shape: bf16[64,64], index: 3, kind: output, shape index: {}]  }
   0x1   :  { %v579_v0 = vld [vmem:[%s762_s1 + $0x40] sm:$0xff]   ;;  %v581_v2 = vld [vmem:[%s762_s1 + $0x48] sm:$0xff]   ;;  %v583_v4 = vld [vmem:[%s762_s1 + $0x50] sm:$0xff]  }
   0x2   :  { %v580_v1 = vld [vmem:[%s762_s1] sm:$0xff]   ;;  %505 = vmatprep.subr.bf16.mxu0 %v579_v0  ;;  %563 = vmatprep.subr.bf16.mxu1 %v579_v0  ;;  %v582_v3 = vld [vmem:[%s762_s1 + $0x8] sm:$0xff]   ;;  %v584_v5 = vld [vmem:[%s762_s1 + $0x10] sm:$0xff]  }
   0x3   :  { %506 = vmatpush3.bf16.msra.mxu0 %v580_v1  ;;  %571 = vmatpush3.bf16.msra.mxu1 %v580_v1  ;;  %v585_v6 = vld [vmem:[%s762_s1 + $0x58] sm:$0xff]   ;;  %v587_v8 = vld [vmem:[%s762_s1 + $0x60] sm:$0xff]   ;;  %v589_v10 = vld [vmem:[%s762_s1 + $0x68] sm:$0xff]  }
   0x4   :  { %507 = vmatprep.subr.bf16.mxu0 %v581_v2  ;;  %564 = vmatprep.subr.bf16.mxu1 %v581_v2  ;;  %v586_v7 = vld [vmem:[%s762_s1 + $0x18] sm:$0xff]   ;;  %v588_v9 = vld [vmem:[%s762_s1 + $0x20] sm:$0xff]   ;;  %v590_v13 = vld [vmem:[%s762_s1 + $0x28] sm:$0xff]  }
   0x5   :  { %v597_v11 = vld [vmem:[%s763_s0 + $0x4] ss:$12 sps:$4 sm:$0xff]   ;;  %v600_v12 = vld [vmem:[%s763_s0 + $0x4c] ss:$12 sps:$4 sm:$0xff]   ;;  %v598_v20 = vld [vmem:[%s763_s0 + $0x48] ss:$12 sps:$4 sm:$0xff]  }
   0x6   :  { %v591_v14 = vld [vmem:[%s762_s1 + $0x70] sm:$0xff]   ;;  %287 = vmatprep.mubr.bf16.mxu0 %v597_v11  ;;  %311 = vmatprep.mubr.bf16.mxu1 %v600_v12  ;;  %v593_v16 = vld [vmem:[%s762_s1 + $0x78] sm:$0xff]   ;;  %v601_v18 = vld [vmem:[%s762_s1 + $0x80] sm:$0xff]  }
   0x7   :  { %508 = vmatpush3.bf16.msra.mxu0 %v582_v3  ;;  %572 = vmatpush3.bf16.msra.mxu1 %v582_v3  ;;  %v592_v15 = vld [vmem:[%s762_s1 + $0x30] sm:$0xff]   ;;  %v594_v17 = vld [vmem:[%s762_s1 + $0x38] sm:$0xff]   ;;  %v595_v19 = vld [vmem:[%s763_s0] ss:$12 sps:$4 sm:$0xff]  }
   0x8   :  { %509 = vmatprep.subr.bf16.mxu0 %v583_v4  ;;  %565 = vmatprep.subr.bf16.mxu1 %v583_v4  ;;  %v603_v21 = vld [vmem:[%s763_s0 + $0x1c] ss:$12 sps:$4 sm:$0xff]   ;;  %v606_v24 = vld [vmem:[%s763_s0 + $0x18] ss:$12 sps:$4 sm:$0xff]   ;;  %v607_v25 = vld [vmem:[%s763_s0 + $0x20] ss:$12 sps:$4 sm:$0xff]  }
   0x9   :  { %v602_v22 = vld [vmem:[%s762_s1 + $0x88] sm:$0xff]   ;;  %v608_v26 = vld [vmem:[%s763_s0 + $0x34] ss:$12 sps:$4 sm:$0xff]   ;;  %v610_v27 = vld [vmem:[%s763_s0 + $0x38] ss:$12 sps:$4 sm:$0xff]  }
   0xa   :  { %v605_v23 = vld [vmem:[%s763_s0 + $0x8] ss:$12 sps:$4 sm:$0xff]   ;;  %v611_v28 = vld [vmem:[%s763_s0 + $0x30] ss:$12 sps:$4 sm:$0xff]   ;;  %v454_v42 = vld [vmem:[%s764_s2] ss:$0 sm:$0xff] }
   0xb   :  { %510 = vmatpush3.bf16.msra.mxu0 %v584_v5  ;;  %573 = vmatpush3.bf16.msra.mxu1 %v584_v5  ;;  %v612_v29 = vld [vmem:[%s763_s0 + $0x50] ss:$12 sps:$4 sm:$0xff]  }
   0xc   :  { %511 = vmatprep.subr.bf16.mxu0 %v585_v6  ;;  %566 = vmatprep.subr.bf16.mxu1 %v585_v6 }
   0xf   :  { %512 = vmatpush3.bf16.msra.mxu0 %v586_v7  ;;  %574 = vmatpush3.bf16.msra.mxu1 %v586_v7 }
  0x10   :  { %513 = vmatprep.subr.bf16.mxu0 %v587_v8  ;;  %567 = vmatprep.subr.bf16.mxu1 %v587_v8 }
  0x13   :  { %514 = vmatpush3.bf16.msra.mxu0 %v588_v9  ;;  %575 = vmatpush3.bf16.msra.mxu1 %v588_v9 }
  0x14   :  { %515 = vmatprep.subr.bf16.mxu0 %v589_v10  ;;  %568 = vmatprep.subr.bf16.mxu1 %v589_v10 }
  0x17   :  { %516 = vmatpush3.bf16.msra.mxu0 %v590_v13  ;;  %576 = vmatpush3.bf16.msra.mxu1 %v590_v13 }
  0x18   :  { %517 = vmatprep.subr.bf16.mxu0 %v591_v14  ;;  %569 = vmatprep.subr.bf16.mxu1 %v591_v14 }
  0x1b   :  { %518 = vmatpush3.bf16.msra.mxu0 %v592_v15  ;;  %577 = vmatpush3.bf16.msra.mxu1 %v592_v15 }
  0x1c   :  { %519 = vmatprep.subr.bf16.mxu0 %v593_v16  ;;  %570 = vmatprep.subr.bf16.mxu1 %v593_v16 }
  0x1f   :  { %520 = vmatpush3.bf16.msra.mxu0 %v594_v17  ;;  %578 = vmatpush3.bf16.msra.mxu1 %v594_v17 }
  0x20   :  { %551 = vmatprep.subr.bf16.mxu1 %v601_v18 }
  0x22   :  { %288 = vmatmul.mubr.bf16.vlgmr.msra.gmra.mrb[0].mxu0 %v595_v19  ;;  %312 = vmatmul.mubr.bf16.vlgmr.msra.gmra.mrb[0].mxu1 %v598_v20 }
  0x23   :  { %552 = vmatpush3.bf16.msra.mxu1 %v601_v18  ;;  %295 = vmatprep.mubr.bf16.mxu0 %v603_v21 }
  0x24   :  { %553 = vmatprep.subr.bf16.mxu1 %v602_v22  ;;  %555 = vmatprep.mubr.msk.bf16.mxu1 %vm242_vm0, %v605_v23 }
  0x27   :  { %554 = vmatpush3.bf16.msra.mxu1 %v602_v22 }
  0x2a   :  { %296 = vmatmul.mubr.bf16.gmra.mrb[4].mxu0 %v606_v24  ;;  %556 = vmatmul.mubr.msk.bf16.vlgmr.msra.gmra.mrb[4].mxu1 %vm242_vm0, %v607_v25 }
  0x2b   :  { %303 = vmatprep.mubr.bf16.mxu0 %v608_v26  ;;  %559 = vmatprep.mubr.msk.bf16.mxu1 %vm242_vm0, %v610_v27 }
  0x32   :  { %304 = vmatmul.mubr.bf16.gmra.mrb[8].mxu0 %v611_v28  ;;  %560 = vmatmul.mubr.msk.bf16.gmra.mrb[8].mxu1 %vm242_vm0, %v612_v29 }
  0xf5   :  { %v521_v30 = vpop.f32.mrb[0].mxu0  ;;  %v539_v31 = vpop.f32.mrb[0].mxu1 }
  0xf6   :  { %v522_v32 = vpop.f32.mrb[1].mxu0  ;;  %v540_v33 = vpop.f32.mrb[1].mxu1 }
  0xf7   :  { %v523_v34 = vadd.f32 %v522_v32, %v521_v30  ;;  %v524_v35 = vpop.f32.mrb[2].mxu0  ;;  %v541_v36 = vadd.f32 %v540_v33, %v539_v31  ;;  %v542_v37 = vpop.f32.mrb[2].mxu1 }
  0xf8   :  { %v525_v38 = vpop.f32.mrb[3].mxu0  ;;  %v543_v39 = vpop.f32.mrb[3].mxu1 }
  0xf9   :  { %v526_v40 = vadd.f32 %v525_v38, %v524_v35  ;;  %v544_v41 = vadd.f32 %v543_v39, %v542_v37  ;;  %v290_v45 = vadd.f32 %v523_v34, %v454_v42  ;;  %v314_v0 = vadd.f32 %v541_v36, %v454_v42 }
  0xfb   :  { %v293_v53 = vadd.f32 %v526_v40, %v454_v42  ;;  %v317_v9 = vadd.f32 %v544_v41, %v454_v42 }
  0xfd   :  { %v527_v43 = vpop.f32.mrb[4].mxu0  ;;  %v557_v44 = vpop.f32.mrb[4].mxu1 }
  0xfe   :  { %v528_v46 = vpop.f32.mrb[5].mxu0  ;;  %v354_v47 = vpop.f32.mrb[5].mxu1 }
  0xff   :  { %v529_v48 = vadd.f32 %v528_v46, %v527_v43  ;;  %v355_v49 = vadd.f32 %v354_v47, %v290_v45  ;;  %v530_v50 = vpop.f32.mrb[6].mxu0  ;;  %v558_v51 = vpop.f32.mrb[6].mxu1 }
 0x100   :  { %v531_v52 = vpop.f32.mrb[7].mxu0  ;;  %v357_v54 = vpop.f32.mrb[7].mxu1 }
 0x101   :  { %v298_v55 = vadd.f32 %v529_v48, %v454_v42  ;;  %vm385_vm1 = vcmp.ge.f32.partialorder %v355_v49, 0.0  ;;  %v393_v56 = vmul.f32 0.1, %v355_v49  ;;  %v532_v57 = vadd.f32 %v531_v52, %v530_v50 }
 0x102   :  { %v358_v58 = vadd.f32 %v357_v54, %v293_v53 }
 0x103   :  { %v363_v59 = vadd.f32 %v557_v44, %v298_v55  ;;  %v401_v60 = vsel %vm385_vm1, %v355_v49, %v393_v56  ;;  %v301_v61 = vadd.f32 %v532_v57, %v454_v42 }
 0x104   :  { %v497_v62 = vpack.c.bf16 %v401_v60, %v401_v60  ;;  %vm386_vm3 = vcmp.ge.f32.partialorder %v358_v58, 0.0  ;;  %v394_v63 = vmul.f32 0.1, %v358_v58 }
 0x105   :  { %vm387_vm4 = vcmp.ge.f32.partialorder %v363_v59, 0.0  ;;  %v395_v1 = vmul.f32 0.1, %v363_v59  ;;  %v366_v2 = vadd.f32 %v558_v51, %v301_v61  ;;  %v533_v3 = vpop.f32.mrb[8].mxu0  ;;  %v561_v4 = vpop.f32.mrb[8].mxu1 }
 0x106   :  { %442 = vst.msk [vmem:[%s765_s3] sm:$0xf] %vm441_vm2, %v497_v62  ;;  %v402_v5 = vsel %vm386_vm3, %v358_v58, %v394_v63  ;;  %v379_v6 = vadd.f32 %v561_v4, %v314_v0  ;;  %v534_v7 = vpop.f32.mrb[9].mxu0  ;;  %v370_v8 = vpop.f32.mrb[9].mxu1 }
 0x107   :  { %v403_v10 = vsel %vm387_vm4, %v363_v59, %v395_v1  ;;  %vm388_vm5 = vcmp.ge.f32.partialorder %v366_v2, 0.0  ;;  %v396_v11 = vmul.f32 0.1, %v366_v2  ;;  %v498_v12 = vpack.c.bf16 %v402_v5, %v402_v5  ;;  %v536_v13 = vpop.f32.mrb[10].mxu0  ;;  %v562_v14 = vpop.f32.mrb[10].mxu1 }
 0x108   :  { %v499_v15 = vpack.c.bf16 %v403_v10, %v403_v10  ;;  %vm391_vm6 = vcmp.ge.f32.partialorder %v379_v6, 0.0  ;;  %v399_v16 = vmul.f32 0.1, %v379_v6  ;;  %v535_v17 = vadd.f32 %v534_v7, %v533_v3  ;;  %v537_v18 = vpop.f32.mrb[11].mxu0  ;;  %v373_v19 = vpop.f32.mrb[11].mxu1 }
 0x109   :  { %v404_v20 = vsel %vm388_vm5, %v366_v2, %v396_v11  ;;  %443 = vst.msk [vmem:[%s765_s3 + $0x4] sm:$0xf] %vm441_vm2, %v498_v12  ;;  %v382_v21 = vadd.f32 %v562_v14, %v317_v9  ;;  %v538_v22 = vadd.f32 %v537_v18, %v536_v13 }
 0x10a   :  { %444 = vst.msk [vmem:[%s765_s3 + $0x8] sm:$0xf] %vm441_vm2, %v499_v15  ;;  %v500_v23 = vpack.c.bf16 %v404_v20, %v404_v20  ;;  %v407_v24 = vsel %vm391_vm6, %v379_v6, %v399_v16  ;;  %v306_v25 = vadd.f32 %v535_v17, %v454_v42 }
 0x10b   :  { %v503_v26 = vpack.c.bf16 %v407_v24, %v407_v24  ;;  %vm392_vm7 = vcmp.ge.f32.partialorder %v382_v21, 0.0  ;;  %v400_v27 = vmul.f32 0.1, %v382_v21  ;;  %v309_v28 = vadd.f32 %v538_v22, %v454_v42 }
 0x10c   :  { %445 = vst.msk [vmem:[%s765_s3 + $0xc] sm:$0xf] %vm441_vm2, %v500_v23  ;;  %v371_v29 = vadd.f32 %v370_v8, %v306_v25 }
 0x10d   :  { %448 = vst.msk [vmem:[%s765_s3 + $0x18] sm:$0xf] %vm441_vm2, %v503_v26  ;;  %v408_v30 = vsel %vm392_vm7, %v382_v21, %v400_v27  ;;  %v374_v31 = vadd.f32 %v373_v19, %v309_v28 }
 0x10e   :  { %vm389_vm8 = vcmp.ge.f32.partialorder %v371_v29, 0.0  ;;  %v397_v32 = vmul.f32 0.1, %v371_v29  ;;  %v504_v33 = vpack.c.bf16 %v408_v30, %v408_v30 }
 0x10f   :  { %vm390_vm9 = vcmp.ge.f32.partialorder %v374_v31, 0.0  ;;  %v398_v34 = vmul.f32 0.1, %v374_v31 }
 0x110   :  { %v405_v35 = vsel %vm389_vm8, %v371_v29, %v397_v32  ;;  %449 = vst.msk [vmem:[%s765_s3 + $0x1c] sm:$0xf] %vm441_vm2, %v504_v33 }
 0x111   :  { %v501_v36 = vpack.c.bf16 %v405_v35, %v405_v35  ;;  %v406_v37 = vsel %vm390_vm9, %v374_v31, %v398_v34 }
 0x112   :  { %v502_v38 = vpack.c.bf16 %v406_v37, %v406_v37 }
 0x113   :  { %446 = vst.msk [vmem:[%s765_s3 + $0x10] sm:$0xf] %vm441_vm2, %v501_v36 }
 0x114   :  { %447 = vst.msk [vmem:[%s765_s3 + $0x14] sm:$0xf] %vm441_vm2, %v502_v38 }

// kernel: stfan_forward.160
= control target key start
LH: loop header
LB: loop body
LE: loop exit
PB: predicated region body
PF: predicated region fallthrough
CT: control target
= control target key end

     0   :  { %vm434_vm0 = vcmask 523264   ;;  %vm698_vm1 = vcmask 519168   ;;  %s1190_s1 = inlined_call_operand.vmem [shape: bf16[576,64], index: 1, kind: input, shape index: {}]   ;;  %s1191_s0 = inlined_call_operand.vmem [shape: bf16[64,576], index: 0, kind: input, shape index: {}]   ;;  %s1192_s2 = inlined_call_operand.vmem [shape: f32[1,64], index: 2, kind: input, shape index: {}]   ;;  %s1193_s3 = inlined_call_operand.vmem [shape: bf16[64,64], index: 3, kind: output, shape index: {}]  }
   0x1   :  { %v900_v0 = vld [vmem:[%s1190_s1 + $0x40] sm:$0xff]   ;;  %v904_v4 = vld [vmem:[%s1190_s1 + $0x48] sm:$0xff]   ;;  %v908_v8 = vld [vmem:[%s1190_s1 + $0x50] sm:$0xff]  }
   0x2   :  { %v901_v1 = vld [vmem:[%s1190_s1 + $0xc0] sm:$0xff]   ;;  %788 = vmatprep.subr.bf16.mxu0 %v900_v0  ;;  %v905_v5 = vld [vmem:[%s1190_s1 + $0xc8] sm:$0xff]   ;;  %v909_v9 = vld [vmem:[%s1190_s1 + $0xd0] sm:$0xff]  }
   0x3   :  { %v902_v2 = vld [vmem:[%s1190_s1] sm:$0xff]   ;;  %828 = vmatprep.subr.bf16.mxu1 %v901_v1  ;;  %v906_v6 = vld [vmem:[%s1190_s1 + $0x8] sm:$0xff]   ;;  %v910_v10 = vld [vmem:[%s1190_s1 + $0x10] sm:$0xff]  }
   0x4   :  { %v903_v3 = vld [vmem:[%s1190_s1 + $0x80] sm:$0xff]   ;;  %789 = vmatpush3.bf16.msra.mxu0 %v902_v2  ;;  %v907_v7 = vld [vmem:[%s1190_s1 + $0x88] sm:$0xff]   ;;  %v911_v11 = vld [vmem:[%s1190_s1 + $0x90] sm:$0xff]  }
   0x5   :  { %829 = vmatpush3.bf16.msra.mxu1 %v903_v3  ;;  %790 = vmatprep.subr.bf16.mxu0 %v904_v4  ;;  %v912_v12 = vld [vmem:[%s1190_s1 + $0x58] sm:$0xff]   ;;  %v916_v16 = vld [vmem:[%s1190_s1 + $0x60] sm:$0xff]   ;;  %v920_v20 = vld [vmem:[%s1190_s1 + $0x68] sm:$0xff]  }
   0x6   :  { %830 = vmatprep.subr.bf16.mxu1 %v905_v5  ;;  %v913_v13 = vld [vmem:[%s1190_s1 + $0xd8] sm:$0xff]   ;;  %v917_v17 = vld [vmem:[%s1190_s1 + $0xe0] sm:$0xff]   ;;  %v921_v21 = vld [vmem:[%s1190_s1 + $0xe8] sm:$0xff]  }
   0x7   :  { %v914_v14 = vld [vmem:[%s1190_s1 + $0x18] sm:$0xff]   ;;  %v918_v18 = vld [vmem:[%s1190_s1 + $0x20] sm:$0xff]   ;;  %v922_v22 = vld [vmem:[%s1190_s1 + $0x28] sm:$0xff]  }
   0x8   :  { %791 = vmatpush3.bf16.msra.mxu0 %v906_v6  ;;  %v915_v15 = vld [vmem:[%s1190_s1 + $0x98] sm:$0xff]   ;;  %v919_v19 = vld [vmem:[%s1190_s1 + $0xa0] sm:$0xff]   ;;  %v923_v23 = vld [vmem:[%s1190_s1 + $0xa8] sm:$0xff]  }
   0x9   :  { %831 = vmatpush3.bf16.msra.mxu1 %v907_v7  ;;  %792 = vmatprep.subr.bf16.mxu0 %v908_v8  ;;  %v924_v24 = vld [vmem:[%s1190_s1 + $0x70] sm:$0xff]   ;;  %v928_v28 = vld [vmem:[%s1190_s1 + $0x78] sm:$0xff]   ;;  %v937_v35 = vld [vmem:[%s1191_s0 + $0xc] ss:$20 sps:$4 sm:$0xff]  }
   0xa   :  { %832 = vmatprep.subr.bf16.mxu1 %v909_v9  ;;  %v925_v25 = vld [vmem:[%s1190_s1 + $0xf0] sm:$0xff]   ;;  %v929_v29 = vld [vmem:[%s1190_s1 + $0xf8] sm:$0xff]   ;;  %v938_v36 = vld [vmem:[%s1190_s1 + $0x100] sm:$0xff]   ;;  %544 = vmatprep.mubr.bf16.mxu1 %v937_v35 }
   0xb   :  { %v926_v26 = vld [vmem:[%s1190_s1 + $0x30] sm:$0xff]   ;;  %v930_v30 = vld [vmem:[%s1190_s1 + $0x38] sm:$0xff]   ;;  %v939_v37 = vld [vmem:[%s1191_s0 + $0x2c] ss:$20 sps:$4 sm:$0xff]  }
   0xc   :  { %793 = vmatpush3.bf16.msra.mxu0 %v910_v10  ;;  %v927_v27 = vld [vmem:[%s1190_s1 + $0xb0] sm:$0xff]   ;;  %v931_v31 = vld [vmem:[%s1190_s1 + $0xb8] sm:$0xff]   ;;  %v945_v39 = vld [vmem:[%s1190_s1 + $0x108] sm:$0xff]  }
   0xd   :  { %833 = vmatpush3.bf16.msra.mxu1 %v911_v11  ;;  %794 = vmatprep.subr.bf16.mxu0 %v912_v12  ;;  %v932_v32 = vld [vmem:[%s1191_s0] ss:$20 sps:$4 sm:$0xff]   ;;  %v934_v33 = vld [vmem:[%s1191_s0 + $0x4] ss:$20 sps:$4 sm:$0xff]   ;;  %v935_v34 = vld [vmem:[%s1191_s0 + $0x8] ss:$20 sps:$4 sm:$0xff]  }
   0xe   :  { %834 = vmatprep.subr.bf16.mxu1 %v913_v13  ;;  %479 = vmatprep.mubr.bf16.mxu0 %v934_v33  ;;  %v941_v38 = vld [vmem:[%s1191_s0 + $0x34] ss:$20 sps:$4 sm:$0xff]   ;;  %v944_v41 = vld [vmem:[%s1191_s0 + $0x30] ss:$20 sps:$4 sm:$0xff]   ;;  %v959_v45 = vld [vmem:[%s1190_s1 + $0x118] sm:$0xff]  }
   0xf   :  { %v943_v40 = vld [vmem:[%s1191_s0 + $0x28] ss:$20 sps:$4 sm:$0xff]   ;;  %v952_v44 = vld [vmem:[%s1190_s1 + $0x110] sm:$0xff]   ;;  %v951_v47 = vld [vmem:[%s1191_s0 + $0x58] ss:$20 sps:$4 sm:$0xff]  }
  0x10   :  { %795 = vmatpush3.bf16.msra.mxu0 %v914_v14  ;;  %v946_v42 = vld [vmem:[%s1191_s0 + $0x54] ss:$20 sps:$4 sm:$0xff]   ;;  %v948_v43 = vld [vmem:[%s1191_s0 + $0x5c] ss:$20 sps:$4 sm:$0xff]   ;;  %v955_v49 = vld [vmem:[%s1191_s0 + $0x84] ss:$20 sps:$4 sm:$0xff]  }
  0x11   :  { %835 = vmatpush3.bf16.msra.mxu1 %v915_v15  ;;  %796 = vmatprep.subr.bf16.mxu0 %v916_v16  ;;  %v950_v46 = vld [vmem:[%s1191_s0 + $0x50] ss:$20 sps:$4 sm:$0xff]   ;;  %v957_v50 = vld [vmem:[%s1191_s0 + $0x78] ss:$20 sps:$4 sm:$0xff]   ;;  %v958_v51 = vld [vmem:[%s1191_s0 + $0x80] ss:$20 sps:$4 sm:$0xff]  }
  0x12   :  { %836 = vmatprep.subr.bf16.mxu1 %v917_v17  ;;  %v953_v48 = vld [vmem:[%s1191_s0 + $0x7c] ss:$20 sps:$4 sm:$0xff]   ;;  %v961_v53 = vld [vmem:[%s1191_s0 + $0x60] ss:$20 sps:$4 sm:$0xff]   ;;  %v962_v54 = vld [vmem:[%s1191_s0 + $0x38] ss:$20 sps:$4 sm:$0xff]  }
  0x13   :  { %v960_v52 = vld [vmem:[%s1191_s0 + $0x10] ss:$20 sps:$4 sm:$0xff]   ;;  %v963_v55 = vld [vmem:[%s1191_s0 + $0x88] ss:$20 sps:$4 sm:$0xff]   ;;  %v711_v58 = vld [vmem:[%s1192_s2] ss:$0 sm:$0xff] }
  0x14   :  { %797 = vmatpush3.bf16.msra.mxu0 %v918_v18 }
  0x15   :  { %837 = vmatpush3.bf16.msra.mxu1 %v919_v19  ;;  %798 = vmatprep.subr.bf16.mxu0 %v920_v20 }
  0x16   :  { %838 = vmatprep.subr.bf16.mxu1 %v921_v21 }
  0x18   :  { %799 = vmatpush3.bf16.msra.mxu0 %v922_v22 }
  0x19   :  { %839 = vmatpush3.bf16.msra.mxu1 %v923_v23  ;;  %800 = vmatprep.subr.bf16.mxu0 %v924_v24 }
  0x1a   :  { %840 = vmatprep.subr.bf16.mxu1 %v925_v25 }
  0x1c   :  { %801 = vmatpush3.bf16.msra.mxu0 %v926_v26 }
  0x1d   :  { %841 = vmatpush3.bf16.msra.mxu1 %v927_v27  ;;  %802 = vmatprep.subr.bf16.mxu0 %v928_v28 }
  0x1e   :  { %842 = vmatprep.subr.bf16.mxu1 %v929_v29 }
  0x20   :  { %803 = vmatpush3.bf16.msra.mxu0 %v930_v30 }
  0x21   :  { %843 = vmatpush3.bf16.msra.mxu1 %v931_v31  ;;  %876 = vmatprep.subr.bf16.mxu0 %v938_v36 }
  0x22   :  { %892 = vmatprep.subr.bf16.mxu1 %v938_v36 }
  0x23   :  { %480 = vmatmul.mubr.bf16.vlgmr.msra.gmra.mrb[0].mxu0 %v932_v32 }
  0x24   :  { %545 = vmatmul.mubr.bf16.vlgmr.msra.gmra.mrb[0].mxu1 %v935_v34  ;;  %877 = vmatpush3.bf16.msra.mxu0 %v938_v36 }
  0x25   :  { %896 = vmatpush3.bf16.msra.mxu1 %v938_v36  ;;  %487 = vmatprep.mubr.bf16.mxu0 %v939_v37 }
  0x26   :  { %552 = vmatprep.mubr.bf16.mxu1 %v941_v38  ;;  %878 = vmatprep.subr.bf16.mxu0 %v945_v39 }
  0x27   :  { %893 = vmatprep.subr.bf16.mxu1 %v945_v39 }
  0x28   :  { %879 = vmatpush3.bf16.msra.mxu0 %v945_v39 }
  0x29   :  { %897 = vmatpush3.bf16.msra.mxu1 %v945_v39  ;;  %880 = vmatprep.subr.bf16.mxu0 %v952_v44 }
  0x2a   :  { %894 = vmatprep.subr.bf16.mxu1 %v952_v44 }
  0x2b   :  { %488 = vmatmul.mubr.bf16.gmra.mrb[4].mxu0 %v943_v40 }
  0x2c   :  { %553 = vmatmul.mubr.bf16.gmra.mrb[4].mxu1 %v944_v41  ;;  %495 = vmatprep.mubr.bf16.mxu0 %v946_v42 }
  0x2d   :  { %560 = vmatprep.mubr.bf16.mxu1 %v948_v43  ;;  %881 = vmatpush3.bf16.msra.mxu0 %v952_v44 }
  0x2e   :  { %898 = vmatpush3.bf16.msra.mxu1 %v952_v44  ;;  %882 = vmatprep.subr.bf16.mxu0 %v959_v45 }
  0x2f   :  { %895 = vmatprep.subr.bf16.mxu1 %v959_v45 }
  0x31   :  { %883 = vmatpush3.bf16.msra.mxu0 %v959_v45 }
  0x32   :  { %899 = vmatpush3.bf16.msra.mxu1 %v959_v45 }
  0x33   :  { %496 = vmatmul.mubr.bf16.gmra.mrb[8].mxu0 %v950_v46 }
  0x34   :  { %561 = vmatmul.mubr.bf16.gmra.mrb[8].mxu1 %v951_v47  ;;  %503 = vmatprep.mubr.bf16.mxu0 %v953_v48 }
  0x35   :  { %568 = vmatprep.mubr.bf16.mxu1 %v955_v49 }
  0x3b   :  { %504 = vmatmul.mubr.bf16.gmra.mrb[12].mxu0 %v957_v50 }
  0x3c   :  { %569 = vmatmul.mubr.bf16.gmra.mrb[12].mxu1 %v958_v51  ;;  %884 = vmatprep.mubr.msk.bf16.mxu0 %vm434_vm0, %v960_v52 }
  0x3d   :  { %888 = vmatprep.mubr.msk.bf16.mxu1 %vm434_vm0, %v961_v53 }
  0x43   :  { %885 = vmatmul.mubr.msk.bf16.vlgmr.msra.gmra.mrb[16].mxu0 %vm434_vm0, %v962_v54 }
  0x44   :  { %889 = vmatmul.mubr.msk.bf16.vlgmr.msra.gmra.mrb[16].mxu1 %vm434_vm0, %v963_v55 }
  0xf6   :  { %v804_v56 = vpop.f32.mrb[0].mxu0 }
  0xf7   :  { %v844_v57 = vpop.f32.mrb[0].mxu1  ;;  %v805_v59 = vpop.f32.mrb[1].mxu0 }
  0xf8   :  { %v806_v60 = vadd.f32 %v805_v59, %v804_v56  ;;  %v845_v61 = vpop.f32.mrb[1].mxu1  ;;  %v807_v62 = vpop.f32.mrb[2].mxu0 }
  0xf9   :  { %v846_v63 = vadd.f32 %v845_v61, %v844_v57  ;;  %v847_v0 = vpop.f32.mrb[2].mxu1  ;;  %v808_v1 = vpop.f32.mrb[3].mxu0 }
  0xfa   :  { %v482_v2 = vadd.f32 %v806_v60, %v711_v58  ;;  %v809_v3 = vadd.f32 %v808_v1, %v807_v62  ;;  %v848_v4 = vpop.f32.mrb[3].mxu1 }
  0xfb   :  { %v849_v5 = vadd.f32 %v848_v4, %v847_v0 }
  0xfc   :  { %v485_v6 = vadd.f32 %v809_v3, %v711_v58  ;;  %v547_v7 = vadd.f32 %v846_v63, %v482_v2 }
  0xfe   :  { %v810_v8 = vpop.f32.mrb[4].mxu0  ;;  %v1155_v9 = vadd.f32 %v849_v5, %v485_v6 }
  0xff   :  { %v850_v10 = vpop.f32.mrb[4].mxu1  ;;  %v811_v11 = vpop.f32.mrb[5].mxu0 }
 0x100   :  { %v812_v12 = vadd.f32 %v811_v11, %v810_v8  ;;  %v851_v13 = vpop.f32.mrb[5].mxu1  ;;  %v813_v14 = vpop.f32.mrb[6].mxu0 }
 0x101   :  { %v852_v15 = vadd.f32 %v851_v13, %v850_v10  ;;  %v853_v16 = vpop.f32.mrb[6].mxu1  ;;  %v814_v17 = vpop.f32.mrb[7].mxu0 }
 0x102   :  { %v490_v18 = vadd.f32 %v812_v12, %v711_v58  ;;  %v815_v19 = vadd.f32 %v814_v17, %v813_v14  ;;  %v854_v20 = vpop.f32.mrb[7].mxu1 }
 0x103   :  { %v855_v21 = vadd.f32 %v854_v20, %v853_v16 }
 0x104   :  { %v493_v22 = vadd.f32 %v815_v19, %v711_v58  ;;  %v555_v23 = vadd.f32 %v852_v15, %v490_v18 }
 0x106   :  { %v816_v24 = vpop.f32.mrb[8].mxu0  ;;  %v558_v25 = vadd.f32 %v855_v21, %v493_v22 }
 0x107   :  { %v856_v26 = vpop.f32.mrb[8].mxu1  ;;  %v817_v27 = vpop.f32.mrb[9].mxu0 }
 0x108   :  { %v818_v28 = vadd.f32 %v817_v27, %v816_v24  ;;  %v857_v29 = vpop.f32.mrb[9].mxu1  ;;  %v819_v30 = vpop.f32.mrb[10].mxu0 }
 0x109   :  { %v858_v31 = vadd.f32 %v857_v29, %v856_v26  ;;  %v859_v32 = vpop.f32.mrb[10].mxu1  ;;  %v820_v33 = vpop.f32.mrb[11].mxu0 }
 0x10a   :  { %v498_v34 = vadd.f32 %v818_v28, %v711_v58  ;;  %v821_v35 = vadd.f32 %v820_v33, %v819_v30  ;;  %v860_v36 = vpop.f32.mrb[11].mxu1 }
 0x10b   :  { %v861_v37 = vadd.f32 %v860_v36, %v859_v32 }
 0x10c   :  { %v501_v38 = vadd.f32 %v821_v35, %v711_v58  ;;  %v563_v39 = vadd.f32 %v858_v31, %v498_v34 }
 0x10e   :  { %v822_v40 = vpop.f32.mrb[12].mxu0  ;;  %v566_v41 = vadd.f32 %v861_v37, %v501_v38 }
 0x10f   :  { %v862_v42 = vpop.f32.mrb[12].mxu1  ;;  %v823_v43 = vpop.f32.mrb[13].mxu0 }
 0x110   :  { %v824_v44 = vadd.f32 %v823_v43, %v822_v40  ;;  %v863_v45 = vpop.f32.mrb[13].mxu1  ;;  %v825_v46 = vpop.f32.mrb[14].mxu0 }
 0x111   :  { %v864_v47 = vadd.f32 %v863_v45, %v862_v42  ;;  %v865_v48 = vpop.f32.mrb[14].mxu1  ;;  %v826_v49 = vpop.f32.mrb[15].mxu0 }
 0x112   :  { %v506_v50 = vadd.f32 %v824_v44, %v711_v58  ;;  %v827_v51 = vadd.f32 %v826_v49, %v825_v46  ;;  %v866_v52 = vpop.f32.mrb[15].mxu1 }
 0x113   :  { %v867_v53 = vadd.f32 %v866_v52, %v865_v48 }
 0x114   :  { %v509_v54 = vadd.f32 %v827_v51, %v711_v58  ;;  %v571_v55 = vadd.f32 %v864_v47, %v506_v50 }
 0x116   :  { %v886_v56 = vpop.f32.mrb[16].mxu0  ;;  %v574_v57 = vadd.f32 %v867_v53, %v509_v54 }
 0x117   :  { %v620_v59 = vadd.f32 %v886_v56, %v555_v23  ;;  %v890_v60 = vpop.f32.mrb[16].mxu1  ;;  %v611_v61 = vpop.f32.mrb[17].mxu0 }
 0x118   :  { %v636_v62 = vadd.f32 %v890_v60, %v571_v55  ;;  %v612_v63 = vadd.f32 %v611_v61, %v547_v7  ;;  %v627_v0 = vpop.f32.mrb[17].mxu1  ;;  %v887_v1 = vpop.f32.mrb[18].mxu0 }
 0x119   :  { %vm644_vm2 = vcmp.ge.f32.partialorder %v620_v59, 0.0  ;;  %v652_v2 = vmul.f32 0.1, %v620_v59  ;;  %v628_v3 = vadd.f32 %v627_v0, %v563_v39  ;;  %v623_v4 = vadd.f32 %v887_v1, %v558_v25  ;;  %v891_v5 = vpop.f32.mrb[18].mxu1  ;;  %v614_v6 = vpop.f32.mrb[19].mxu0 }
 0x11a   :  { %vm648_vm3 = vcmp.ge.f32.partialorder %v636_v62, 0.0  ;;  %v656_v8 = vmul.f32 0.1, %v636_v62  ;;  %vm642_vm4 = vcmp.ge.f32.partialorder %v612_v63, 0.0  ;;  %v650_v58 = vmul.f32 0.1, %v612_v63 }
 0x11b   :  { %v660_v10 = vsel %vm644_vm2, %v620_v59, %v652_v2  ;;  %vm646_vm5 = vcmp.ge.f32.partialorder %v628_v3, 0.0  ;;  %v654_v11 = vmul.f32 0.1, %v628_v3  ;;  %vm645_vm6 = vcmp.ge.f32.partialorder %v623_v4, 0.0  ;;  %v630_v12 = vpop.f32.mrb[19].mxu1 }
 0x11c   :  { %v782_v13 = vpack.c.bf16 %v660_v10, %v660_v10  ;;  %v664_v14 = vsel %vm648_vm3, %v636_v62, %v656_v8  ;;  %v658_v7 = vsel %vm642_vm4, %v612_v63, %v650_v58  ;;  %v653_v15 = vmul.f32 0.1, %v623_v4 }
 0x11d   :  { %v786_v16 = vpack.c.bf16 %v664_v14, %v664_v14  ;;  %v780_v17 = vpack.c.bf16 %v658_v7, %v658_v7  ;;  %v662_v18 = vsel %vm646_vm5, %v628_v3, %v654_v11  ;;  %v639_v19 = vadd.f32 %v891_v5, %v574_v57 }
 0x11e   :  { %701 = vst.msk [vmem:[%s1193_s3 + $0x8] sm:$0xf] %vm698_vm1, %v782_v13  ;;  %v784_v20 = vpack.c.bf16 %v662_v18, %v662_v18  ;;  %v661_v21 = vsel %vm645_vm6, %v623_v4, %v653_v15  ;;  %v615_v22 = vadd.f32 %v614_v6, %v1155_v9  ;;  %v631_v23 = vadd.f32 %v630_v12, %v566_v41 }
 0x11f   :  { %705 = vst.msk [vmem:[%s1193_s3 + $0x18] sm:$0xf] %vm698_vm1, %v786_v16  ;;  %699 = vst.msk [vmem:[%s1193_s3] sm:$0xf] %vm698_vm1, %v780_v17  ;;  %v783_v24 = vpack.c.bf16 %v661_v21, %v661_v21  ;;  %vm649_vm7 = vcmp.ge.f32.partialorder %v639_v19, 0.0 }
 0x120   :  { %v657_v25 = vmul.f32 0.1, %v639_v19  ;;  %703 = vst.msk [vmem:[%s1193_s3 + $0x10] sm:$0xf] %vm698_vm1, %v784_v20  ;;  %vm643_vm8 = vcmp.ge.f32.partialorder %v615_v22, 0.0  ;;  %vm647_vm9 = vcmp.ge.f32.partialorder %v631_v23, 0.0 }
 0x121   :  { %v651_v9 = vmul.f32 0.1, %v615_v22  ;;  %v655_v26 = vmul.f32 0.1, %v631_v23  ;;  %702 = vst.msk [vmem:[%s1193_s3 + $0xc] sm:$0xf] %vm698_vm1, %v783_v24 }
 0x122   :  { %v665_v27 = vsel %vm649_vm7, %v639_v19, %v657_v25 }
 0x123   :  { %v787_v28 = vpack.c.bf16 %v665_v27, %v665_v27  ;;  %v659_v29 = vsel %vm643_vm8, %v615_v22, %v651_v9  ;;  %v663_v30 = vsel %vm647_vm9, %v631_v23, %v655_v26 }
 0x124   :  { %v781_v31 = vpack.c.bf16 %v659_v29, %v659_v29  ;;  %v785_v32 = vpack.c.bf16 %v663_v30, %v663_v30 }
 0x125   :  { %706 = vst.msk [vmem:[%s1193_s3 + $0x1c] sm:$0xf] %vm698_vm1, %v787_v28 }
 0x126   :  { %700 = vst.msk [vmem:[%s1193_s3 + $0x4] sm:$0xf] %vm698_vm1, %v781_v31  ;;  %704 = vst.msk [vmem:[%s1193_s3 + $0x14] sm:$0xf] %vm698_vm1, %v785_v32 }

// kernel: stfan_forward.161
= control target key start
LH: loop header
LB: loop body
LE: loop exit
PB: predicated region body
PF: predicated region fallthrough
CT: control target
= control target key end

     0   :  { %vm437_vm0 = vcmask 523264   ;;  %vm701_vm1 = vcmask 519168   ;;  %s1242_s1 = inlined_call_operand.vmem [shape: bf16[576,64], index: 1, kind: input, shape index: {}]   ;;  %s1243_s0 = inlined_call_operand.vmem [shape: bf16[64,576], index: 0, kind: input, shape index: {}]   ;;  %s1244_s2 = inlined_call_operand.vmem [shape: f32[1,64], index: 2, kind: input, shape index: {}]   ;;  %s1245_s3 = inlined_call_operand.vmem [shape: bf16[64,64], index: 3, kind: input, shape index: {}]   ;;  %s1246_s4 = inlined_call_operand.vmem [shape: bf16[64,64], index: 4, kind: output, shape index: {}]  }
   0x1   :  { %v922_v0 = vld [vmem:[%s1242_s1 + $0x40] sm:$0xff]   ;;  %v926_v4 = vld [vmem:[%s1242_s1 + $0x48] sm:$0xff]   ;;  %v930_v8 = vld [vmem:[%s1242_s1 + $0x50] sm:$0xff]  }
   0x2   :  { %v923_v1 = vld [vmem:[%s1242_s1 + $0xc0] sm:$0xff]   ;;  %810 = vmatprep.subr.bf16.mxu0 %v922_v0  ;;  %v927_v5 = vld [vmem:[%s1242_s1 + $0xc8] sm:$0xff]   ;;  %v931_v9 = vld [vmem:[%s1242_s1 + $0xd0] sm:$0xff]  }
   0x3   :  { %v924_v2 = vld [vmem:[%s1242_s1] sm:$0xff]   ;;  %850 = vmatprep.subr.bf16.mxu1 %v923_v1  ;;  %v928_v6 = vld [vmem:[%s1242_s1 + $0x8] sm:$0xff]   ;;  %v932_v10 = vld [vmem:[%s1242_s1 + $0x10] sm:$0xff]  }
   0x4   :  { %v925_v3 = vld [vmem:[%s1242_s1 + $0x80] sm:$0xff]   ;;  %811 = vmatpush3.bf16.msra.mxu0 %v924_v2  ;;  %v929_v7 = vld [vmem:[%s1242_s1 + $0x88] sm:$0xff]   ;;  %v933_v11 = vld [vmem:[%s1242_s1 + $0x90] sm:$0xff]  }
   0x5   :  { %851 = vmatpush3.bf16.msra.mxu1 %v925_v3  ;;  %812 = vmatprep.subr.bf16.mxu0 %v926_v4  ;;  %v934_v12 = vld [vmem:[%s1242_s1 + $0x58] sm:$0xff]   ;;  %v938_v16 = vld [vmem:[%s1242_s1 + $0x60] sm:$0xff]   ;;  %v942_v20 = vld [vmem:[%s1242_s1 + $0x68] sm:$0xff]  }
   0x6   :  { %852 = vmatprep.subr.bf16.mxu1 %v927_v5  ;;  %v935_v13 = vld [vmem:[%s1242_s1 + $0xd8] sm:$0xff]   ;;  %v939_v17 = vld [vmem:[%s1242_s1 + $0xe0] sm:$0xff]   ;;  %v943_v21 = vld [vmem:[%s1242_s1 + $0xe8] sm:$0xff]  }
   0x7   :  { %v936_v14 = vld [vmem:[%s1242_s1 + $0x18] sm:$0xff]   ;;  %v940_v18 = vld [vmem:[%s1242_s1 + $0x20] sm:$0xff]   ;;  %v944_v22 = vld [vmem:[%s1242_s1 + $0x28] sm:$0xff]  }
   0x8   :  { %813 = vmatpush3.bf16.msra.mxu0 %v928_v6  ;;  %v937_v15 = vld [vmem:[%s1242_s1 + $0x98] sm:$0xff]   ;;  %v941_v19 = vld [vmem:[%s1242_s1 + $0xa0] sm:$0xff]   ;;  %v945_v23 = vld [vmem:[%s1242_s1 + $0xa8] sm:$0xff]  }
   0x9   :  { %853 = vmatpush3.bf16.msra.mxu1 %v929_v7  ;;  %814 = vmatprep.subr.bf16.mxu0 %v930_v8  ;;  %v946_v24 = vld [vmem:[%s1242_s1 + $0x70] sm:$0xff]   ;;  %v950_v28 = vld [vmem:[%s1242_s1 + $0x78] sm:$0xff]   ;;  %v959_v35 = vld [vmem:[%s1243_s0 + $0xc] ss:$20 sps:$4 sm:$0xff]  }
   0xa   :  { %854 = vmatprep.subr.bf16.mxu1 %v931_v9  ;;  %v947_v25 = vld [vmem:[%s1242_s1 + $0xf0] sm:$0xff]   ;;  %v951_v29 = vld [vmem:[%s1242_s1 + $0xf8] sm:$0xff]   ;;  %v960_v36 = vld [vmem:[%s1242_s1 + $0x100] sm:$0xff]   ;;  %547 = vmatprep.mubr.bf16.mxu1 %v959_v35 }
   0xb   :  { %v948_v26 = vld [vmem:[%s1242_s1 + $0x30] sm:$0xff]   ;;  %v952_v30 = vld [vmem:[%s1242_s1 + $0x38] sm:$0xff]   ;;  %v961_v37 = vld [vmem:[%s1243_s0 + $0x2c] ss:$20 sps:$4 sm:$0xff]  }
   0xc   :  { %815 = vmatpush3.bf16.msra.mxu0 %v932_v10  ;;  %v949_v27 = vld [vmem:[%s1242_s1 + $0xb0] sm:$0xff]   ;;  %v953_v31 = vld [vmem:[%s1242_s1 + $0xb8] sm:$0xff]   ;;  %v967_v39 = vld [vmem:[%s1242_s1 + $0x108] sm:$0xff]  }
   0xd   :  { %855 = vmatpush3.bf16.msra.mxu1 %v933_v11  ;;  %816 = vmatprep.subr.bf16.mxu0 %v934_v12  ;;  %v954_v32 = vld [vmem:[%s1243_s0] ss:$20 sps:$4 sm:$0xff]   ;;  %v956_v33 = vld [vmem:[%s1243_s0 + $0x4] ss:$20 sps:$4 sm:$0xff]   ;;  %v957_v34 = vld [vmem:[%s1243_s0 + $0x8] ss:$20 sps:$4 sm:$0xff]  }
   0xe   :  { %856 = vmatprep.subr.bf16.mxu1 %v935_v13  ;;  %482 = vmatprep.mubr.bf16.mxu0 %v956_v33  ;;  %v963_v38 = vld [vmem:[%s1243_s0 + $0x34] ss:$20 sps:$4 sm:$0xff]   ;;  %v966_v41 = vld [vmem:[%s1243_s0 + $0x30] ss:$20 sps:$4 sm:$0xff]   ;;  %v981_v45 = vld [vmem:[%s1242_s1 + $0x118] sm:$0xff]  }
   0xf   :  { %v965_v40 = vld [vmem:[%s1243_s0 + $0x28] ss:$20 sps:$4 sm:$0xff]   ;;  %v974_v44 = vld [vmem:[%s1242_s1 + $0x110] sm:$0xff]   ;;  %v973_v47 = vld [vmem:[%s1243_s0 + $0x58] ss:$20 sps:$4 sm:$0xff]  }
  0x10   :  { %817 = vmatpush3.bf16.msra.mxu0 %v936_v14  ;;  %v968_v42 = vld [vmem:[%s1243_s0 + $0x54] ss:$20 sps:$4 sm:$0xff]   ;;  %v970_v43 = vld [vmem:[%s1243_s0 + $0x5c] ss:$20 sps:$4 sm:$0xff]   ;;  %v977_v49 = vld [vmem:[%s1243_s0 + $0x84] ss:$20 sps:$4 sm:$0xff]  }
  0x11   :  { %857 = vmatpush3.bf16.msra.mxu1 %v937_v15  ;;  %818 = vmatprep.subr.bf16.mxu0 %v938_v16  ;;  %v972_v46 = vld [vmem:[%s1243_s0 + $0x50] ss:$20 sps:$4 sm:$0xff]   ;;  %v979_v50 = vld [vmem:[%s1243_s0 + $0x78] ss:$20 sps:$4 sm:$0xff]   ;;  %v980_v51 = vld [vmem:[%s1243_s0 + $0x80] ss:$20 sps:$4 sm:$0xff]  }
  0x12   :  { %858 = vmatprep.subr.bf16.mxu1 %v939_v17  ;;  %v975_v48 = vld [vmem:[%s1243_s0 + $0x7c] ss:$20 sps:$4 sm:$0xff]   ;;  %v983_v53 = vld [vmem:[%s1243_s0 + $0x60] ss:$20 sps:$4 sm:$0xff]   ;;  %v984_v54 = vld [vmem:[%s1243_s0 + $0x38] ss:$20 sps:$4 sm:$0xff]  }
  0x13   :  { %v982_v52 = vld [vmem:[%s1243_s0 + $0x10] ss:$20 sps:$4 sm:$0xff]   ;;  %v985_v55 = vld [vmem:[%s1243_s0 + $0x88] ss:$20 sps:$4 sm:$0xff]   ;;  %v1182_v58 = vld [vmem:[%s1244_s2] ss:$0 sm:$0xff] }
  0x14   :  { %819 = vmatpush3.bf16.msra.mxu0 %v940_v18 }
  0x15   :  { %859 = vmatpush3.bf16.msra.mxu1 %v941_v19  ;;  %820 = vmatprep.subr.bf16.mxu0 %v942_v20 }
  0x16   :  { %860 = vmatprep.subr.bf16.mxu1 %v943_v21 }
  0x18   :  { %821 = vmatpush3.bf16.msra.mxu0 %v944_v22 }
  0x19   :  { %861 = vmatpush3.bf16.msra.mxu1 %v945_v23  ;;  %822 = vmatprep.subr.bf16.mxu0 %v946_v24 }
  0x1a   :  { %862 = vmatprep.subr.bf16.mxu1 %v947_v25 }
  0x1c   :  { %823 = vmatpush3.bf16.msra.mxu0 %v948_v26 }
  0x1d   :  { %863 = vmatpush3.bf16.msra.mxu1 %v949_v27  ;;  %824 = vmatprep.subr.bf16.mxu0 %v950_v28 }
  0x1e   :  { %864 = vmatprep.subr.bf16.mxu1 %v951_v29 }
  0x20   :  { %825 = vmatpush3.bf16.msra.mxu0 %v952_v30 }
  0x21   :  { %865 = vmatpush3.bf16.msra.mxu1 %v953_v31  ;;  %898 = vmatprep.subr.bf16.mxu0 %v960_v36 }
  0x22   :  { %914 = vmatprep.subr.bf16.mxu1 %v960_v36 }
  0x23   :  { %483 = vmatmul.mubr.bf16.vlgmr.msra.gmra.mrb[0].mxu0 %v954_v32 }
  0x24   :  { %548 = vmatmul.mubr.bf16.vlgmr.msra.gmra.mrb[0].mxu1 %v957_v34  ;;  %899 = vmatpush3.bf16.msra.mxu0 %v960_v36 }
  0x25   :  { %918 = vmatpush3.bf16.msra.mxu1 %v960_v36  ;;  %490 = vmatprep.mubr.bf16.mxu0 %v961_v37 }
  0x26   :  { %555 = vmatprep.mubr.bf16.mxu1 %v963_v38  ;;  %900 = vmatprep.subr.bf16.mxu0 %v967_v39 }
  0x27   :  { %915 = vmatprep.subr.bf16.mxu1 %v967_v39 }
  0x28   :  { %901 = vmatpush3.bf16.msra.mxu0 %v967_v39 }
  0x29   :  { %919 = vmatpush3.bf16.msra.mxu1 %v967_v39  ;;  %902 = vmatprep.subr.bf16.mxu0 %v974_v44 }
  0x2a   :  { %916 = vmatprep.subr.bf16.mxu1 %v974_v44 }
  0x2b   :  { %491 = vmatmul.mubr.bf16.gmra.mrb[4].mxu0 %v965_v40 }
  0x2c   :  { %556 = vmatmul.mubr.bf16.gmra.mrb[4].mxu1 %v966_v41  ;;  %498 = vmatprep.mubr.bf16.mxu0 %v968_v42 }
  0x2d   :  { %563 = vmatprep.mubr.bf16.mxu1 %v970_v43  ;;  %903 = vmatpush3.bf16.msra.mxu0 %v974_v44 }
  0x2e   :  { %920 = vmatpush3.bf16.msra.mxu1 %v974_v44  ;;  %904 = vmatprep.subr.bf16.mxu0 %v981_v45 }
  0x2f   :  { %917 = vmatprep.subr.bf16.mxu1 %v981_v45 }
  0x31   :  { %905 = vmatpush3.bf16.msra.mxu0 %v981_v45 }
  0x32   :  { %921 = vmatpush3.bf16.msra.mxu1 %v981_v45 }
  0x33   :  { %499 = vmatmul.mubr.bf16.gmra.mrb[8].mxu0 %v972_v46 }
  0x34   :  { %564 = vmatmul.mubr.bf16.gmra.mrb[8].mxu1 %v973_v47  ;;  %506 = vmatprep.mubr.bf16.mxu0 %v975_v48 }
  0x35   :  { %571 = vmatprep.mubr.bf16.mxu1 %v977_v49 }
  0x3b   :  { %507 = vmatmul.mubr.bf16.gmra.mrb[12].mxu0 %v979_v50 }
  0x3c   :  { %572 = vmatmul.mubr.bf16.gmra.mrb[12].mxu1 %v980_v51  ;;  %906 = vmatprep.mubr.msk.bf16.mxu0 %vm437_vm0, %v982_v52 }
  0x3d   :  { %910 = vmatprep.mubr.msk.bf16.mxu1 %vm437_vm0, %v983_v53  ;;  %v807_v53 = vld [vmem:[%s1245_s3 + $0x8] sm:$0xff]  }
  0x43   :  { %907 = vmatmul.mubr.msk.bf16.vlgmr.msra.gmra.mrb[16].mxu0 %vm437_vm0, %v984_v54 }
  0x44   :  { %911 = vmatmul.mubr.msk.bf16.vlgmr.msra.gmra.mrb[16].mxu1 %vm437_vm0, %v985_v55  ;;  %v809_v55 = vld [vmem:[%s1245_s3 + $0x18] sm:$0xff]  }
  0xf6   :  { %v826_v56 = vpop.f32.mrb[0].mxu0 }
  0xf7   :  { %v866_v57 = vpop.f32.mrb[0].mxu1  ;;  %v827_v59 = vpop.f32.mrb[1].mxu0 }
  0xf8   :  { %v828_v60 = vadd.f32 %v827_v59, %v826_v56  ;;  %v867_v61 = vpop.f32.mrb[1].mxu1  ;;  %v829_v62 = vpop.f32.mrb[2].mxu0  ;;  %v792_v56 = vld [vmem:[%s1245_s3] sm:$0xff]  }
  0xf9   :  { %v868_v63 = vadd.f32 %v867_v61, %v866_v57  ;;  %v869_v0 = vpop.f32.mrb[2].mxu1  ;;  %v830_v1 = vpop.f32.mrb[3].mxu0  ;;  %v797_v61 = vunpack.c.l.bf16 %v807_v53 }
  0xfa   :  { %v485_v2 = vadd.f32 %v828_v60, %v1182_v58  ;;  %v831_v3 = vadd.f32 %v830_v1, %v829_v62  ;;  %v870_v4 = vpop.f32.mrb[3].mxu1  ;;  %v808_v60 = vld [vmem:[%s1245_s3 + $0x10] sm:$0xff]  }
  0xfb   :  { %v871_v5 = vadd.f32 %v870_v4, %v869_v0  ;;  %v793_v0 = vunpack.c.l.bf16 %v792_v56 }
  0xfc   :  { %v488_v6 = vadd.f32 %v831_v3, %v1182_v58  ;;  %v1186_v7 = vadd.f32 %v868_v63, %v485_v2  ;;  %v805_v63 = vunpack.c.l.bf16 %v809_v55 }
  0xfe   :  { %v832_v8 = vpop.f32.mrb[4].mxu0  ;;  %v1188_v9 = vadd.f32 %v871_v5, %v488_v6  ;;  %v801_v5 = vunpack.c.l.bf16 %v808_v60  ;;  %v798_v6 = vunpack.c.h.bf16 %v807_v53 }
  0xff   :  { %v872_v10 = vpop.f32.mrb[4].mxu1  ;;  %v833_v11 = vpop.f32.mrb[5].mxu0 }
 0x100   :  { %v834_v12 = vadd.f32 %v833_v11, %v832_v8  ;;  %v873_v13 = vpop.f32.mrb[5].mxu1  ;;  %v835_v14 = vpop.f32.mrb[6].mxu0  ;;  %v806_v8 = vunpack.c.h.bf16 %v809_v55 }
 0x101   :  { %v874_v15 = vadd.f32 %v873_v13, %v872_v10  ;;  %v875_v16 = vpop.f32.mrb[6].mxu1  ;;  %v836_v17 = vpop.f32.mrb[7].mxu0  ;;  %v794_v13 = vunpack.c.h.bf16 %v792_v56 }
 0x102   :  { %v493_v18 = vadd.f32 %v834_v12, %v1182_v58  ;;  %v837_v19 = vadd.f32 %v836_v17, %v835_v14  ;;  %v876_v20 = vpop.f32.mrb[7].mxu1 }
 0x103   :  { %v877_v21 = vadd.f32 %v876_v20, %v875_v16 }
 0x104   :  { %v496_v22 = vadd.f32 %v837_v19, %v1182_v58  ;;  %v558_v23 = vadd.f32 %v874_v15, %v493_v18  ;;  %v802_v19 = vunpack.c.h.bf16 %v808_v60 }
 0x106   :  { %v838_v24 = vpop.f32.mrb[8].mxu0  ;;  %v561_v25 = vadd.f32 %v877_v21, %v496_v22 }
 0x107   :  { %v878_v26 = vpop.f32.mrb[8].mxu1  ;;  %v839_v27 = vpop.f32.mrb[9].mxu0 }
 0x108   :  { %v840_v28 = vadd.f32 %v839_v27, %v838_v24  ;;  %v879_v29 = vpop.f32.mrb[9].mxu1  ;;  %v841_v30 = vpop.f32.mrb[10].mxu0 }
 0x109   :  { %v880_v31 = vadd.f32 %v879_v29, %v878_v26  ;;  %v881_v32 = vpop.f32.mrb[10].mxu1  ;;  %v842_v33 = vpop.f32.mrb[11].mxu0 }
 0x10a   :  { %v501_v34 = vadd.f32 %v840_v28, %v1182_v58  ;;  %v843_v35 = vadd.f32 %v842_v33, %v841_v30  ;;  %v882_v36 = vpop.f32.mrb[11].mxu1 }
 0x10b   :  { %v883_v37 = vadd.f32 %v882_v36, %v881_v32 }
 0x10c   :  { %v504_v38 = vadd.f32 %v843_v35, %v1182_v58  ;;  %v566_v39 = vadd.f32 %v880_v31, %v501_v34 }
 0x10e   :  { %v844_v40 = vpop.f32.mrb[12].mxu0  ;;  %v569_v41 = vadd.f32 %v883_v37, %v504_v38 }
 0x10f   :  { %v884_v42 = vpop.f32.mrb[12].mxu1  ;;  %v845_v43 = vpop.f32.mrb[13].mxu0 }
 0x110   :  { %v846_v44 = vadd.f32 %v845_v43, %v844_v40  ;;  %v885_v45 = vpop.f32.mrb[13].mxu1  ;;  %v847_v46 = vpop.f32.mrb[14].mxu0 }
 0x111   :  { %v886_v47 = vadd.f32 %v885_v45, %v884_v42  ;;  %v887_v48 = vpop.f32.mrb[14].mxu1  ;;  %v848_v49 = vpop.f32.mrb[15].mxu0 }
 0x112   :  { %v509_v50 = vadd.f32 %v846_v44, %v1182_v58  ;;  %v849_v51 = vadd.f32 %v848_v49, %v847_v46  ;;  %v888_v52 = vpop.f32.mrb[15].mxu1 }
 0x113   :  { %v889_v54 = vadd.f32 %v888_v52, %v887_v48 }
 0x114   :  { %v512_v57 = vadd.f32 %v849_v51, %v1182_v58  ;;  %v574_v59 = vadd.f32 %v886_v47, %v509_v50 }
 0x116   :  { %v908_v62 = vpop.f32.mrb[16].mxu0  ;;  %v577_v1 = vadd.f32 %v889_v54, %v512_v57 }
 0x117   :  { %v623_v2 = vadd.f32 %v908_v62, %v558_v23  ;;  %v912_v3 = vpop.f32.mrb[16].mxu1  ;;  %v614_v4 = vpop.f32.mrb[17].mxu0 }
 0x118   :  { %v639_v10 = vadd.f32 %v912_v3, %v574_v59  ;;  %v615_v58 = vadd.f32 %v614_v4, %v1186_v7  ;;  %v630_v11 = vpop.f32.mrb[17].mxu1  ;;  %v909_v12 = vpop.f32.mrb[18].mxu0 }
 0x119   :  { %v663_v14 = vadd.f32 %v797_v61, %v623_v2  ;;  %v631_v15 = vadd.f32 %v630_v11, %v566_v39  ;;  %v626_v16 = vadd.f32 %v909_v12, %v561_v25  ;;  %v913_v17 = vpop.f32.mrb[18].mxu1  ;;  %v617_v18 = vpop.f32.mrb[19].mxu0 }
 0x11a   :  { %v667_v20 = vadd.f32 %v805_v63, %v639_v10  ;;  %v661_v21 = vadd.f32 %v793_v0, %v615_v58  ;;  %v642_v22 = vadd.f32 %v913_v17, %v577_v1  ;;  %v618_v23 = vadd.f32 %v617_v18, %v1188_v9  ;;  %v633_v24 = vpop.f32.mrb[19].mxu1 }
 0x11b   :  { %v785_v26 = vpack.c.bf16 %v663_v14, %v663_v14  ;;  %v665_v27 = vadd.f32 %v801_v5, %v631_v15  ;;  %v664_v28 = vadd.f32 %v798_v6, %v626_v16  ;;  %v634_v29 = vadd.f32 %v633_v24, %v569_v41 }
 0x11c   :  { %v789_v7 = vpack.c.bf16 %v667_v20, %v667_v20  ;;  %v783_v30 = vpack.c.bf16 %v661_v21, %v661_v21  ;;  %v668_v31 = vadd.f32 %v806_v8, %v642_v22  ;;  %v662_v32 = vadd.f32 %v794_v13, %v618_v23 }
 0x11d   :  { %704 = vst.msk [vmem:[%s1246_s4 + $0x8] sm:$0xf] %vm701_vm1, %v785_v26  ;;  %v787_v25 = vpack.c.bf16 %v665_v27, %v665_v27  ;;  %v786_v33 = vpack.c.bf16 %v664_v28, %v664_v28  ;;  %v666_v34 = vadd.f32 %v802_v19, %v634_v29 }
 0x11e   :  { %708 = vst.msk [vmem:[%s1246_s4 + $0x18] sm:$0xf] %vm701_vm1, %v789_v7  ;;  %702 = vst.msk [vmem:[%s1246_s4] sm:$0xf] %vm701_vm1, %v783_v30  ;;  %v790_v9 = vpack.c.bf16 %v668_v31, %v668_v31  ;;  %v784_v35 = vpack.c.bf16 %v662_v32, %v662_v32 }
 0x11f   :  { %706 = vst.msk [vmem:[%s1246_s4 + $0x10] sm:$0xf] %vm701_vm1, %v787_v25  ;;  %705 = vst.msk [vmem:[%s1246_s4 + $0xc] sm:$0xf] %vm701_vm1, %v786_v33  ;;  %v788_v36 = vpack.c.bf16 %v666_v34, %v666_v34 }
 0x120   :  { %709 = vst.msk [vmem:[%s1246_s4 + $0x1c] sm:$0xf] %vm701_vm1, %v790_v9  ;;  %703 = vst.msk [vmem:[%s1246_s4 + $0x4] sm:$0xf] %vm701_vm1, %v784_v35 }
 0x121   :  { %707 = vst.msk [vmem:[%s1246_s4 + $0x14] sm:$0xf] %vm701_vm1, %v788_v36 }

// kernel: stfan_forward.164
= control target key start
LH: loop header
LB: loop body
LE: loop exit
PB: predicated region body
PF: predicated region fallthrough
CT: control target
= control target key end

     0   :  { %v646_v33 = vmov 0.0   ;;  %vm647_vm0 = vmmov 0   ;;  %vm341_vm1 = vcmask 523264   ;;  %s797_s1 = inlined_call_operand.vmem [shape: bf16[576,128], index: 1, kind: input, shape index: {}]   ;;  %s798_s0 = inlined_call_operand.vmem [shape: bf16[16,576], index: 0, kind: input, shape index: {}]   ;;  %s799_s2 = inlined_call_operand.vmem [shape: f32[1,128], index: 2, kind: input, shape index: {}]   ;;  %s800_s3 = inlined_call_operand.vmem [shape: bf16[16,128], index: 3, kind: output, shape index: {}]  }
   0x1   :  { %v603_v0 = vld [vmem:[%s797_s1 + $0x40] sm:$0xff]   ;;  %v607_v4 = vld [vmem:[%s797_s1 + $0x48] sm:$0xff]   ;;  %v611_v8 = vld [vmem:[%s797_s1 + $0x50] sm:$0xff]  }
   0x2   :  { %v604_v1 = vld [vmem:[%s797_s1] sm:$0xff]   ;;  %540 = vmatprep.subr.bf16.mxu0 %v603_v0  ;;  %v608_v5 = vld [vmem:[%s797_s1 + $0x8] sm:$0xff]   ;;  %v612_v9 = vld [vmem:[%s797_s1 + $0x10] sm:$0xff]  }
   0x3   :  { %v605_v2 = vld [vmem:[%s797_s1 + $0xc0] sm:$0xff]   ;;  %541 = vmatpush3.bf16.msra.mxu0 %v604_v1  ;;  %v609_v6 = vld [vmem:[%s797_s1 + $0xc8] sm:$0xff]   ;;  %v613_v10 = vld [vmem:[%s797_s1 + $0xd0] sm:$0xff]  }
   0x4   :  { %v606_v3 = vld [vmem:[%s797_s1 + $0x80] sm:$0xff]   ;;  %562 = vmatprep.subr.bf16.mxu1 %v605_v2  ;;  %542 = vmatprep.subr.bf16.mxu0 %v607_v4  ;;  %v610_v7 = vld [vmem:[%s797_s1 + $0x88] sm:$0xff]   ;;  %v614_v11 = vld [vmem:[%s797_s1 + $0x90] sm:$0xff]  }
   0x5   :  { %563 = vmatpush3.bf16.msra.mxu1 %v606_v3  ;;  %v615_v12 = vld [vmem:[%s797_s1 + $0x58] sm:$0xff]   ;;  %v619_v16 = vld [vmem:[%s797_s1 + $0x60] sm:$0xff]   ;;  %v623_v20 = vld [vmem:[%s797_s1 + $0x68] sm:$0xff]  }
   0x6   :  { %564 = vmatprep.subr.bf16.mxu1 %v609_v6  ;;  %v616_v13 = vld [vmem:[%s797_s1 + $0x18] sm:$0xff]   ;;  %v620_v17 = vld [vmem:[%s797_s1 + $0x20] sm:$0xff]   ;;  %v624_v21 = vld [vmem:[%s797_s1 + $0x28] sm:$0xff]  }
   0x7   :  { %543 = vmatpush3.bf16.msra.mxu0 %v608_v5  ;;  %v617_v14 = vld [vmem:[%s797_s1 + $0xd8] sm:$0xff]   ;;  %v621_v18 = vld [vmem:[%s797_s1 + $0xe0] sm:$0xff]   ;;  %v625_v22 = vld [vmem:[%s797_s1 + $0xe8] sm:$0xff]  }
   0x8   :  { %544 = vmatprep.subr.bf16.mxu0 %v611_v8  ;;  %v618_v15 = vld [vmem:[%s797_s1 + $0x98] sm:$0xff]   ;;  %v622_v19 = vld [vmem:[%s797_s1 + $0xa0] sm:$0xff]   ;;  %v626_v23 = vld [vmem:[%s797_s1 + $0xa8] sm:$0xff]  }
   0x9   :  { %565 = vmatpush3.bf16.msra.mxu1 %v610_v7  ;;  %v627_v24 = vld [vmem:[%s797_s1 + $0x70] sm:$0xff]   ;;  %v631_v28 = vld [vmem:[%s797_s1 + $0x78] sm:$0xff]   ;;  %v640_v36 = vld [vmem:[%s798_s0 + $0xc] ss:$20 sps:$4 sm:$0xff]  }
   0xa   :  { %566 = vmatprep.subr.bf16.mxu1 %v613_v10  ;;  %v628_v25 = vld [vmem:[%s797_s1 + $0x30] sm:$0xff]   ;;  %v632_v29 = vld [vmem:[%s797_s1 + $0x38] sm:$0xff]   ;;  %v641_v37 = vld [vmem:[%s797_s1 + $0x100] sm:$0xff]   ;;  %418 = vmatprep.mubr.bf16.mxu1 %v640_v36 }
   0xb   :  { %545 = vmatpush3.bf16.msra.mxu0 %v612_v9  ;;  %v629_v26 = vld [vmem:[%s797_s1 + $0xf0] sm:$0xff]   ;;  %v633_v30 = vld [vmem:[%s797_s1 + $0xf8] sm:$0xff]   ;;  %v642_v38 = vld [vmem:[%s797_s1 + $0x108] sm:$0xff]  }
   0xc   :  { %546 = vmatprep.subr.bf16.mxu0 %v615_v12  ;;  %v630_v27 = vld [vmem:[%s797_s1 + $0xb0] sm:$0xff]   ;;  %v636_v32 = vld [vmem:[%s798_s0 + $0x4] ss:$20 sps:$4 sm:$0xff]   ;;  %v638_v35 = vld [vmem:[%s798_s0 + $0x8] ss:$20 sps:$4 sm:$0xff]  }
   0xd   :  { %567 = vmatpush3.bf16.msra.mxu1 %v614_v11  ;;  %v634_v31 = vld [vmem:[%s798_s0] ss:$20 sps:$4 sm:$0xff]   ;;  %v637_v34 = vld [vmem:[%s797_s1 + $0xb8] sm:$0xff]   ;;  %377 = vmatprep.mubr.bf16.mxu0 %v636_v32  ;;  %v645_v41 = vld [vmem:[%s798_s0 + $0x10] ss:$20 sps:$4 sm:$0xff]  }
   0xe   :  { %568 = vmatprep.subr.bf16.mxu1 %v617_v14  ;;  %v643_v39 = vld [vmem:[%s797_s1 + $0x110] sm:$0xff]   ;;  %v644_v40 = vld [vmem:[%s797_s1 + $0x118] sm:$0xff]   ;;  %v488_v43 = vld [vmem:[%s799_s2] ss:$0 sm:$0xff] }
   0xf   :  { %547 = vmatpush3.bf16.msra.mxu0 %v616_v13 }
  0x10   :  { %548 = vmatprep.subr.bf16.mxu0 %v619_v16 }
  0x11   :  { %569 = vmatpush3.bf16.msra.mxu1 %v618_v15 }
  0x12   :  { %570 = vmatprep.subr.bf16.mxu1 %v621_v18 }
  0x13   :  { %549 = vmatpush3.bf16.msra.mxu0 %v620_v17 }
  0x14   :  { %550 = vmatprep.subr.bf16.mxu0 %v623_v20 }
  0x15   :  { %571 = vmatpush3.bf16.msra.mxu1 %v622_v19 }
  0x16   :  { %572 = vmatprep.subr.bf16.mxu1 %v625_v22 }
  0x17   :  { %551 = vmatpush3.bf16.msra.mxu0 %v624_v21 }
  0x18   :  { %552 = vmatprep.subr.bf16.mxu0 %v627_v24 }
  0x19   :  { %573 = vmatpush3.bf16.msra.mxu1 %v626_v23 }
  0x1a   :  { %574 = vmatprep.subr.bf16.mxu1 %v629_v26 }
  0x1b   :  { %553 = vmatpush3.bf16.msra.mxu0 %v628_v25 }
  0x1c   :  { %554 = vmatprep.subr.bf16.mxu0 %v631_v28 }
  0x1d   :  { %575 = vmatpush3.bf16.msra.mxu1 %v630_v27 }
  0x1e   :  { %576 = vmatprep.subr.bf16.mxu1 %v633_v30 }
  0x1f   :  { %555 = vmatpush3.bf16.msra.mxu0 %v632_v29 }
  0x20   :  { %589 = vmatprep.subr.bf16.mxu0 %v646_v33 }
  0x21   :  { %577 = vmatpush3.bf16.msra.mxu1 %v637_v34 }
  0x22   :  { %378 = vmatmul.mubr.bf16.vlgmr.msra.gmra.mrb[0].mxu0 %v634_v31 }
  0x23   :  { %597 = vmatprep.mubr.msk.bf16.mxu0 %vm647_vm0, %v646_v33  ;;  %590 = vmatpush3.bf16.msra.mxu0 %v641_v37 }
  0x24   :  { %419 = vmatmul.mubr.bf16.vlgmr.msra.gmra.mrb[0].mxu1 %v638_v35  ;;  %591 = vmatprep.subr.bf16.mxu0 %v646_v33 }
  0x27   :  { %592 = vmatpush3.bf16.msra.mxu0 %v642_v38 }
  0x28   :  { %593 = vmatprep.subr.bf16.mxu0 %v646_v33 }
  0x2b   :  { %594 = vmatpush3.bf16.msra.mxu0 %v643_v39 }
  0x2c   :  { %595 = vmatprep.subr.bf16.mxu0 %v646_v33 }
  0x2f   :  { %596 = vmatpush3.bf16.msra.mxu0 %v644_v40 }
  0x32   :  { %598 = vmatmul.mubr.msk.bf16.vlgmr.msra.gmra.mrb[4].mxu0 %vm341_vm1, %v645_v41 }
  0xf5   :  { %v556_v42 = vpop.f32.mrb[0].mxu0 }
  0xf6   :  { %v557_v44 = vpop.f32.mrb[1].mxu0 }
  0xf7   :  { %v558_v45 = vadd.f32 %v557_v44, %v556_v42  ;;  %v559_v46 = vpop.f32.mrb[2].mxu0  ;;  %v578_v47 = vpop.f32.mrb[0].mxu1 }
  0xf8   :  { %v560_v48 = vpop.f32.mrb[3].mxu0  ;;  %v579_v51 = vpop.f32.mrb[1].mxu1 }
  0xf9   :  { %v380_v49 = vadd.f32 %v558_v45, %v488_v43  ;;  %v561_v50 = vadd.f32 %v560_v48, %v559_v46  ;;  %v580_v52 = vadd.f32 %v579_v51, %v578_v47  ;;  %v581_v53 = vpop.f32.mrb[2].mxu1 }
  0xfa   :  { %v582_v55 = vpop.f32.mrb[3].mxu1 }
  0xfb   :  { %v383_v54 = vadd.f32 %v561_v50, %v488_v43  ;;  %v583_v56 = vadd.f32 %v582_v55, %v581_v53  ;;  %v421_v57 = vadd.f32 %v580_v52, %v380_v49 }
  0xfd   :  { %v424_v58 = vadd.f32 %v583_v56, %v383_v54 }
 0x105   :  { %v461_v59 = vpop.f32.mrb[4].mxu0 }
 0x106   :  { %v462_v60 = vadd.f32 %v461_v59, %v421_v57  ;;  %v599_v61 = vpop.f32.mrb[5].mxu0 }
 0x107   :  { %v464_v62 = vpop.f32.mrb[6].mxu0 }
 0x108   :  { %v470_v63 = vmul.f32 0.1, %v462_v60  ;;  %v465_v0 = vadd.f32 %v464_v62, %v424_v58  ;;  %v600_v1 = vpop.f32.mrb[7].mxu0  ;;  %vm468_vm2 = vcmp.ge.f32.partialorder %v462_v60, 0.0 }
 0x10a   :  { %vm469_vm3 = vcmp.ge.f32.partialorder %v465_v0, 0.0  ;;  %v471_v2 = vmul.f32 0.1, %v465_v0  ;;  %v472_v3 = vsel %vm468_vm2, %v462_v60, %v470_v63 }
 0x10c   :  { %v473_v4 = vsel %vm469_vm3, %v465_v0, %v471_v2 }
 0x10d   :  { %v538_v5 = vpack.c.bf16 %v473_v4, %v472_v3 }
 0x10f   :  { %539 = vst [vmem:[%s800_s3] sm:$0xff] %v538_v5  }

// kernel: stfan_forward.165
= control target key start
LH: loop header
LB: loop body
LE: loop exit
PB: predicated region body
PF: predicated region fallthrough
CT: control target
= control target key end

     0   :  { %s983_s12 = smov 0   ;;  %s985_s13 = smov 0   ;;  %s1087_s0 = inlined_call_operand.vmem [shape: bf16[16,1152], index: 0, kind: input, shape index: {}]   ;;  %s1088_s1 = inlined_call_operand.vmem [shape: bf16[1152,128], index: 1, kind: input, shape index: {}]   ;;  %s1089_s2 = inlined_call_operand.vmem [shape: f32[1,128], index: 2, kind: input, shape index: {}]   ;;  %s1090_s3 = inlined_call_operand.vmem [shape: bf16[16,128], index: 3, kind: output, shape index: {}]  }
   0x1   :  { %s987_s14 = smov 0   ;;  %s989_s15 = smov 0  }
   0x2   :  { %s991_s16 = smov 0  }
   0x3 LB: > { %s25_s17 = sadd.s32 1, %s954_s15  ;;  %p48_p1 = scmp.ne.s32.totalorder %s946_s13, %s942_s12  ;;  %s958_s16 = sphi %s991_s16, %s13_s16   ;;  %s954_s15 = sphi %s989_s15, %s1094_s15   ;;  %s950_s14 = sphi %s987_s14, %s1093_s14   ;;  %s946_s13 = sphi %s985_s13, %s1092_s13   ;;  %s942_s12 = sphi %s983_s12, %s1091_s12  }
   0x4   : > { %p26_p0 = scmp.ge.s32.totalorder %s25_s17, 3  ;;  %p49_p2 = scmp.eq.s32.totalorder %s958_s16, 0 }
   0x5   : > { %s41_s19 = sadd.s32 1, %s946_s13  ;;  %p744_p5 = scmp.ge.s32.totalorder %s958_s16, 3 }
   0x6   : > { %s1096_s17 = smov (%p26_p0, %s25_s17), 0  ;;  %p50_p3 = por %p49_p2, %p48_p1 }
   0x7   : > { %s37_s18 = ssub.s32 %s954_s15, %s1096_s17  ;;  %162 = sbr.rel (%p744_p5) target bundleno = 21 (0x15), region = 20 }
   0x8   : > { %p39_p4 = scmp.eq.s32.totalorder %s37_s18, 0 }
   0xa   : > { %s1018_s20 = scalar_select %p39_p4, %s946_s13, %s41_s19  }
   0xe   : > { %165 = sbr.rel (!%p50_p3) target bundleno = 21 (0x15), region = 24  ;;  %s167_s21 = sand.u32 (%p50_p3), 1, %s946_s13  }
   0xf   : > { %s788_s22 = smul.u32 (%p50_p3), 12, %s954_s15 }
  0x10   : > { %s847_s23 = smul.u32 (%p50_p3), 24, %s167_s21 }
  0x11   : > { %s175_s26 = scalar_lea.vmem (%p50_p3), %s1087_s0, %s788_s22 }
  0x12   : > { %v190_v0 = vld [vmem:[%s175_s26] sm:$0xff] (%p50_p3)  ;;  %v746_v2 = vld [vmem:[%s175_s26 + $0x8] sm:$0xf] (%p50_p3)  ;;  %s169_s27 = scalar_lea.vmem (%p50_p3), [#allocation3], %s847_s23  ;;  %v748_v3 = vld [vmem:[%s175_s26 + $0x2c] sm:$0xf] (%p50_p3) }
  0x13   : > { %v192_v1 = vld [vmem:[%s175_s26 + $0x24] sm:$0xff] (%p50_p3)  ;;  %191 = vst [vmem:[%s169_s27] sm:$0xff] (%p50_p3), %v190_v0  ;;  %747 = vst [vmem:[%s169_s27 + $0x8] sm:$0xf] (%p50_p3), %v746_v2 }
  0x14   : > { %193 = vst [vmem:[%s169_s27 + $0xc] sm:$0xff] (%p50_p3), %v192_v1  ;;  %749 = vst [vmem:[%s169_s27 + $0x14] sm:$0xf] (%p50_p3), %v748_v3 }
  0x15 PF: > { %p750_p6 = scmp.ge.s32.totalorder %s958_s16, 1  ;;  %p221_p7 = scmp.lt.s32.totalorder %s958_s16, 4 }
  0x17   : > { %p222_p8 = pnand %p750_p6, %p221_p7 }
  0x18   : > { %s228_s28 = sand.u32 (!%p222_p8), 1, %s942_s12   ;;  %s267_s29 = smul.u32 (!%p222_p8), 48, %s950_s14 }
  0x19   : > { %225 = sbr.rel (%p222_p8) target bundleno = 309 (0x135), region = 54  ;;  %p752_p10 = scmp.ne.s32.totalorder (!%p222_p8), %s950_s14, 0 }
  0x1a   : > { %s848_s30 = smul.u32 (!%p222_p8), 24, %s228_s28  ;;  %p268_p9 = scmp.lt.s32.totalorder (!%p222_p8), %s267_s29, 143 }
  0x1c   : > { %s1035_s8 = scalar_lea.vmem (!%p222_p8), [#allocation3], %s848_s30 }
  0x20   : > { %s1098_s29 = smov (!%p268_p9, %s267_s29), 143  ;;  %292 = sbr.rel (%p752_p10) target bundleno = 39 (0x27), region = 62 }
  0x21   : > { %s751_s4 = sshll.u32 %s1098_s29, 2  ;;  %v960_v4 = vmov (!%p752_p10), 0.0  }
  0x22   : > { %s1033_s7 = scalar_lea.vmem %s1088_s1, %s751_s4  ;;  %293 = vst [vmem:[#allocation2] sm:$0xff] (!%p752_p10), %v960_v4  ;;  %294 = vst [vmem:[#allocation2 + $0x8] sm:$0xff] (!%p752_p10), %v960_v4 }
  0x27 PF: > { %v892_v5 = vld [vmem:[%s1033_s7 + $0x40] sm:$0xff]   ;;  %v961_v6 = vmov 0.0   ;;  %vm962_vm0 = vmmov 0   ;;  %v895_v9 = vld [vmem:[%s1033_s7 + $0x48] sm:$0xff]   ;;  %v898_v12 = vld [vmem:[%s1033_s7 + $0x50] sm:$0xff]   ;;  %p780_p11 = scmp.ne.s32.totalorder %s950_s14, 2 }
  0x28   : > { %827 = vmatprep.subr.bf16.mxu1 %v961_v6  ;;  %v893_v7 = vld [vmem:[%s1033_s7] sm:$0xff]   ;;  %796 = vmatprep.subr.bf16.mxu0 %v892_v5  ;;  %v896_v10 = vld [vmem:[%s1033_s7 + $0x8] sm:$0xff]   ;;  %v899_v13 = vld [vmem:[%s1033_s7 + $0x10] sm:$0xff]  }
  0x29   : > { %v894_v8 = vld [vmem:[%s1033_s7 + $0x80] sm:$0xff]   ;;  %843 = vmatprep.mubr.msk.bf16.mxu1 %vm962_vm0, %v961_v6  ;;  %797 = vmatpush3.bf16.msra.mxu0 %v893_v7  ;;  %v897_v11 = vld [vmem:[%s1033_s7 + $0x88] sm:$0xff]   ;;  %v900_v14 = vld [vmem:[%s1033_s7 + $0x90] sm:$0xff]  }
  0x2a   : > { %828 = vmatpush3.bf16.msra.mxu1 %v894_v8  ;;  %798 = vmatprep.subr.bf16.mxu0 %v895_v9  ;;  %v901_v15 = vld [vmem:[%s1033_s7 + $0x58] sm:$0xff]   ;;  %v904_v18 = vld [vmem:[%s1033_s7 + $0x60] sm:$0xff]   ;;  %v907_v21 = vld [vmem:[%s1033_s7 + $0x68] sm:$0xff]  }
  0x2b   : > { %829 = vmatprep.subr.bf16.mxu1 %v961_v6  ;;  %v902_v16 = vld [vmem:[%s1033_s7 + $0x18] sm:$0xff]   ;;  %v905_v19 = vld [vmem:[%s1033_s7 + $0x20] sm:$0xff]   ;;  %v908_v22 = vld [vmem:[%s1033_s7 + $0x28] sm:$0xff]  }
  0x2c   : > { %v903_v17 = vld [vmem:[%s1033_s7 + $0x98] sm:$0xff]   ;;  %v906_v20 = vld [vmem:[%s1033_s7 + $0xa0] sm:$0xff]   ;;  %v909_v23 = vld [vmem:[%s1033_s7 + $0xa8] sm:$0xff]  }
  0x2d   : > { %799 = vmatpush3.bf16.msra.mxu0 %v896_v10  ;;  %v910_v24 = vld [vmem:[%s1033_s7 + $0x70] sm:$0xff]   ;;  %v913_v27 = vld [vmem:[%s1033_s7 + $0x78] sm:$0xff]   ;;  %v295_v39 = vld [vmem:[#allocation2] sm:$0xff] }
  0x2e   : > { %830 = vmatpush3.bf16.msra.mxu1 %v897_v11  ;;  %800 = vmatprep.subr.bf16.mxu0 %v898_v12  ;;  %v911_v25 = vld [vmem:[%s1033_s7 + $0x30] sm:$0xff]   ;;  %v914_v29 = vld [vmem:[%s1033_s7 + $0x38] sm:$0xff]   ;;  %v296_v45 = vld [vmem:[#allocation2 + $0x8] sm:$0xff] }
  0x2f   : > { %831 = vmatprep.subr.bf16.mxu1 %v961_v6  ;;  %v912_v26 = vld [vmem:[%s1033_s7 + $0xb0] sm:$0xff]   ;;  %v915_v30 = vld [vmem:[%s1033_s7 + $0xb8] sm:$0xff]   ;;  %v781_v51 = vld [vmem:[%s1089_s2] ss:$0 sm:$0xff] (!%p780_p11) }
  0x30   : > { %v918_v28 = vld [vmem:[%s1035_s8 + $0x4] ss:$12 sps:$4 sm:$0xff]   ;;  %v916_v31 = vld [vmem:[%s1035_s8] ss:$12 sps:$4 sm:$0xff]   ;;  %v919_v32 = vld [vmem:[%s1035_s8 + $0x8] ss:$12 sps:$4 sm:$0xff]  }
  0x31   : > { %801 = vmatpush3.bf16.msra.mxu0 %v899_v13  ;;  %541 = vmatprep.mubr.bf16.mxu0 %v918_v28 }
  0x32   : > { %832 = vmatpush3.bf16.msra.mxu1 %v900_v14  ;;  %802 = vmatprep.subr.bf16.mxu0 %v901_v15 }
  0x33   : > { %833 = vmatprep.subr.bf16.mxu1 %v961_v6 }
  0x35   : > { %803 = vmatpush3.bf16.msra.mxu0 %v902_v16 }
  0x36   : > { %834 = vmatpush3.bf16.msra.mxu1 %v903_v17  ;;  %804 = vmatprep.subr.bf16.mxu0 %v904_v18 }
  0x37   : > { %835 = vmatprep.subr.bf16.mxu1 %v961_v6 }
  0x39   : > { %805 = vmatpush3.bf16.msra.mxu0 %v905_v19 }
  0x3a   : > { %836 = vmatpush3.bf16.msra.mxu1 %v906_v20  ;;  %806 = vmatprep.subr.bf16.mxu0 %v907_v21 }
  0x3b   : > { %837 = vmatprep.subr.bf16.mxu1 %v961_v6 }
  0x3d   : > { %807 = vmatpush3.bf16.msra.mxu0 %v908_v22 }
  0x3e   : > { %838 = vmatpush3.bf16.msra.mxu1 %v909_v23  ;;  %808 = vmatprep.subr.bf16.mxu0 %v910_v24 }
  0x3f   : > { %839 = vmatprep.subr.bf16.mxu1 %v961_v6 }
  0x41   : > { %809 = vmatpush3.bf16.msra.mxu0 %v911_v25 }
  0x42   : > { %840 = vmatpush3.bf16.msra.mxu1 %v912_v26  ;;  %810 = vmatprep.subr.bf16.mxu0 %v913_v27 }
  0x43   : > { %841 = vmatprep.subr.bf16.mxu1 %v961_v6 }
  0x45   : > { %811 = vmatpush3.bf16.msra.mxu0 %v914_v29 }
  0x46   : > { %842 = vmatpush3.bf16.msra.mxu1 %v915_v30 }
  0x48   : > { %542 = vmatmul.mubr.bf16.vlgmr.msra.gmra.mrb[0].mxu0 %v916_v31 }
  0x49   : > { %844 = vmatmul.mubr.bf16.vlgmr.msra.gmra.mrb[0].mxu1 %v919_v32 }
 0x11b   : > { %v812_v33 = vpop.f32.mrb[0].mxu0 }
 0x11c   : > { %v584_v34 = vpop.f32.mrb[0].mxu1  ;;  %v813_v35 = vpop.f32.mrb[1].mxu0 }
 0x11d   : > { %v814_v36 = vadd.f32 %v813_v35, %v812_v33  ;;  %v845_v37 = vpop.f32.mrb[1].mxu1  ;;  %v815_v38 = vpop.f32.mrb[2].mxu0 }
 0x11e   : > { %v587_v40 = vpop.f32.mrb[2].mxu1  ;;  %v816_v41 = vpop.f32.mrb[3].mxu0 }
 0x11f   : > { %v585_v42 = vadd.f32 %v814_v36, %v584_v34  ;;  %v817_v43 = vadd.f32 %v816_v41, %v815_v38  ;;  %v846_v44 = vpop.f32.mrb[3].mxu1  ;;  %598 = sbr.rel (%p780_p11) target bundleno = 309 (0x135), region = 66 }
 0x121   : > { %v591_v46 = vadd.f32 %v585_v42, %v295_v39  ;;  %v588_v47 = vadd.f32 %v817_v43, %v587_v40 }
 0x123   : > { %593 = vst [vmem:[#allocation2] sm:$0xff] %v591_v46  ;;  %v592_v48 = vadd.f32 %v588_v47, %v296_v45 }
 0x125   : > { %594 = vst [vmem:[#allocation2 + $0x8] sm:$0xff] %v592_v48 }
 0x12a   : > { %v599_v49 = vld [vmem:[#allocation2] sm:$0xff] }
 0x12b   : > { %v608_v52 = vadd.f32 %v781_v51, %v599_v49 }
 0x12c   : > { %v600_v50 = vld [vmem:[#allocation2 + $0x8] sm:$0xff] }
 0x12d   : > { %v609_v53 = vadd.f32 %v781_v51, %v600_v50  ;;  %vm610_vm1 = vcmp.ge.f32.partialorder %v608_v52, 0.0  ;;  %v612_v54 = vmul.f32 0.1, %v608_v52 }
 0x12f   : > { %vm611_vm2 = vcmp.ge.f32.partialorder %v609_v53, 0.0  ;;  %v613_v55 = vmul.f32 0.1, %v609_v53  ;;  %v614_v56 = vsel %vm610_vm1, %v608_v52, %v612_v54 }
 0x131   : > { %v615_v57 = vsel %vm611_vm2, %v609_v53, %v613_v55 }
 0x132   : > { %v794_v58 = vpack.c.bf16 %v615_v57, %v614_v56 }
 0x134   : > { %795 = vst [vmem:[%s1090_s3] sm:$0xff] %v794_v58  }
 0x135 PF: > { %s13_s16 = sadd.s32 1, %s958_s16   ;;  %s1091_s12 = smov %s946_s13 }
 0x136   : > { %p10_p12 = scmp.ge.s32.totalorder %s13_s16, 5   ;;  %s1092_s13 = smov %s1018_s20 }
 0x137   : > { %s1093_s14 = smov %s954_s15  ;;  %s1094_s15 = smov %s1096_s17 }
 0x138   :  { %12 = sbr.rel (!%p10_p12) target bundleno = 3 (0x3), region = 113 }

// kernel: stfan_forward.166
= control target key start
LH: loop header
LB: loop body
LE: loop exit
PB: predicated region body
PF: predicated region fallthrough
CT: control target
= control target key end

     0   :  { %s1071_s15 = smov 0   ;;  %s1073_s16 = smov 0   ;;  %s1178_s0 = inlined_call_operand.vmem [shape: bf16[16,1152], index: 0, kind: input, shape index: {}]   ;;  %s1179_s1 = inlined_call_operand.vmem [shape: bf16[1152,128], index: 1, kind: input, shape index: {}]   ;;  %s1180_s2 = inlined_call_operand.vmem [shape: f32[1,128], index: 2, kind: input, shape index: {}]   ;;  %s1181_s3 = inlined_call_operand.vmem [shape: bf16[16,128], index: 3, kind: input, shape index: {}]   ;;  %s1182_s4 = inlined_call_operand.vmem [shape: bf16[16,128], index: 4, kind: output, shape index: {}]  }
   0x1   :  { %s1075_s17 = smov 0   ;;  %s1077_s18 = smov 0  }
   0x2   :  { %s1079_s19 = smov 0  }
   0x3 LB: > { %s26_s20 = sadd.s32 1, %s1037_s18  ;;  %p49_p1 = scmp.ne.s32.totalorder %s1029_s16, %s1025_s15  ;;  %s1041_s19 = sphi %s1079_s19, %s14_s19   ;;  %s1037_s18 = sphi %s1077_s18, %s1186_s18   ;;  %s1033_s17 = sphi %s1075_s17, %s1185_s17   ;;  %s1029_s16 = sphi %s1073_s16, %s1184_s16   ;;  %s1025_s15 = sphi %s1071_s15, %s1183_s15  }
   0x4   : > { %p27_p0 = scmp.ge.s32.totalorder %s26_s20, 3  ;;  %p50_p2 = scmp.eq.s32.totalorder %s1041_s19, 0 }
   0x5   : > { %s42_s22 = sadd.s32 1, %s1029_s16  ;;  %p823_p5 = scmp.ge.s32.totalorder %s1041_s19, 3 }
   0x6   : > { %s1188_s20 = smov (%p27_p0, %s26_s20), 0  ;;  %p51_p3 = por %p50_p2, %p49_p1 }
   0x7   : > { %s38_s21 = ssub.s32 %s1037_s18, %s1188_s20  ;;  %203 = sbr.rel (%p823_p5) target bundleno = 21 (0x15), region = 24 }
   0x8   : > { %p40_p4 = scmp.eq.s32.totalorder %s38_s21, 0 }
   0xa   : > { %s1106_s23 = scalar_select %p40_p4, %s1029_s16, %s42_s22  }
   0xe   : > { %206 = sbr.rel (!%p51_p3) target bundleno = 21 (0x15), region = 28  ;;  %s208_s24 = sand.u32 (%p51_p3), 1, %s1029_s16  }
   0xf   : > { %s867_s25 = smul.u32 (%p51_p3), 12, %s1037_s18 }
  0x10   : > { %s930_s26 = smul.u32 (%p51_p3), 24, %s208_s24 }
  0x11   : > { %s216_s29 = scalar_lea.vmem (%p51_p3), %s1178_s0, %s867_s25 }
  0x12   : > { %v231_v0 = vld [vmem:[%s216_s29] sm:$0xff] (%p51_p3)  ;;  %v825_v2 = vld [vmem:[%s216_s29 + $0x8] sm:$0xf] (%p51_p3)  ;;  %s210_s30 = scalar_lea.vmem (%p51_p3), [#allocation3], %s930_s26  ;;  %v827_v3 = vld [vmem:[%s216_s29 + $0x2c] sm:$0xf] (%p51_p3) }
  0x13   : > { %v233_v1 = vld [vmem:[%s216_s29 + $0x24] sm:$0xff] (%p51_p3)  ;;  %232 = vst [vmem:[%s210_s30] sm:$0xff] (%p51_p3), %v231_v0  ;;  %826 = vst [vmem:[%s210_s30 + $0x8] sm:$0xf] (%p51_p3), %v825_v2 }
  0x14   : > { %234 = vst [vmem:[%s210_s30 + $0xc] sm:$0xff] (%p51_p3), %v233_v1  ;;  %828 = vst [vmem:[%s210_s30 + $0x14] sm:$0xf] (%p51_p3), %v827_v3 }
  0x15 PF: > { %p829_p6 = scmp.ge.s32.totalorder %s1041_s19, 1  ;;  %p262_p7 = scmp.lt.s32.totalorder %s1041_s19, 4 }
  0x17   : > { %p263_p8 = pnand %p829_p6, %p262_p7 }
  0x18   : > { %s269_s5 = sand.u32 (!%p263_p8), 1, %s1025_s15   ;;  %s318_s6 = smul.u32 (!%p263_p8), 48, %s1033_s17 }
  0x19   : > { %266 = sbr.rel (%p263_p8) target bundleno = 308 (0x134), region = 58  ;;  %p831_p10 = scmp.ne.s32.totalorder (!%p263_p8), %s1033_s17, 0 }
  0x1a   : > { %s931_s7 = smul.u32 (!%p263_p8), 24, %s269_s5  ;;  %p319_p9 = scmp.lt.s32.totalorder (!%p263_p8), %s318_s6, 143 }
  0x1c   : > { %s1123_s12 = scalar_lea.vmem (!%p263_p8), [#allocation3], %s931_s7 }
  0x20   : > { %s1190_s6 = smov (!%p319_p9, %s318_s6), 143  ;;  %352 = sbr.rel (%p831_p10) target bundleno = 39 (0x27), region = 66 }
  0x21   : > { %s830_s8 = sshll.u32 %s1190_s6, 2  ;;  %v1043_v4 = vmov (!%p831_p10), 0.0  }
  0x22   : > { %s1121_s11 = scalar_lea.vmem %s1179_s1, %s830_s8  ;;  %353 = vst [vmem:[#allocation2] sm:$0xff] (!%p831_p10), %v1043_v4  ;;  %354 = vst [vmem:[#allocation2 + $0x8] sm:$0xff] (!%p831_p10), %v1043_v4 }
  0x27 PF: > { %v975_v5 = vld [vmem:[%s1121_s11 + $0x40] sm:$0xff]   ;;  %v1044_v6 = vmov 0.0   ;;  %vm1045_vm0 = vmmov 0   ;;  %v978_v9 = vld [vmem:[%s1121_s11 + $0x48] sm:$0xff]   ;;  %v981_v12 = vld [vmem:[%s1121_s11 + $0x50] sm:$0xff]   ;;  %p859_p11 = scmp.ne.s32.totalorder %s1033_s17, 2 }
  0x28   : > { %910 = vmatprep.subr.bf16.mxu1 %v1044_v6  ;;  %v976_v7 = vld [vmem:[%s1121_s11] sm:$0xff]   ;;  %879 = vmatprep.subr.bf16.mxu0 %v975_v5  ;;  %v979_v10 = vld [vmem:[%s1121_s11 + $0x8] sm:$0xff]   ;;  %v982_v13 = vld [vmem:[%s1121_s11 + $0x10] sm:$0xff]  }
  0x29   : > { %v977_v8 = vld [vmem:[%s1121_s11 + $0x80] sm:$0xff]   ;;  %926 = vmatprep.mubr.msk.bf16.mxu1 %vm1045_vm0, %v1044_v6  ;;  %880 = vmatpush3.bf16.msra.mxu0 %v976_v7  ;;  %v980_v11 = vld [vmem:[%s1121_s11 + $0x88] sm:$0xff]   ;;  %v983_v14 = vld [vmem:[%s1121_s11 + $0x90] sm:$0xff]  }
  0x2a   : > { %911 = vmatpush3.bf16.msra.mxu1 %v977_v8  ;;  %881 = vmatprep.subr.bf16.mxu0 %v978_v9  ;;  %v984_v15 = vld [vmem:[%s1121_s11 + $0x58] sm:$0xff]   ;;  %v987_v18 = vld [vmem:[%s1121_s11 + $0x60] sm:$0xff]   ;;  %v990_v21 = vld [vmem:[%s1121_s11 + $0x68] sm:$0xff]  }
  0x2b   : > { %912 = vmatprep.subr.bf16.mxu1 %v1044_v6  ;;  %v985_v16 = vld [vmem:[%s1121_s11 + $0x18] sm:$0xff]   ;;  %v988_v19 = vld [vmem:[%s1121_s11 + $0x20] sm:$0xff]   ;;  %v991_v22 = vld [vmem:[%s1121_s11 + $0x28] sm:$0xff]  }
  0x2c   : > { %v986_v17 = vld [vmem:[%s1121_s11 + $0x98] sm:$0xff]   ;;  %v989_v20 = vld [vmem:[%s1121_s11 + $0xa0] sm:$0xff]   ;;  %v992_v23 = vld [vmem:[%s1121_s11 + $0xa8] sm:$0xff]  }
  0x2d   : > { %882 = vmatpush3.bf16.msra.mxu0 %v979_v10  ;;  %v993_v24 = vld [vmem:[%s1121_s11 + $0x70] sm:$0xff]   ;;  %v996_v27 = vld [vmem:[%s1121_s11 + $0x78] sm:$0xff]   ;;  %v355_v39 = vld [vmem:[#allocation2] sm:$0xff] }
  0x2e   : > { %913 = vmatpush3.bf16.msra.mxu1 %v980_v11  ;;  %883 = vmatprep.subr.bf16.mxu0 %v981_v12  ;;  %v994_v25 = vld [vmem:[%s1121_s11 + $0x30] sm:$0xff]   ;;  %v997_v29 = vld [vmem:[%s1121_s11 + $0x38] sm:$0xff]   ;;  %v356_v45 = vld [vmem:[#allocation2 + $0x8] sm:$0xff] }
  0x2f   : > { %914 = vmatprep.subr.bf16.mxu1 %v1044_v6  ;;  %v995_v26 = vld [vmem:[%s1121_s11 + $0xb0] sm:$0xff]   ;;  %v998_v30 = vld [vmem:[%s1121_s11 + $0xb8] sm:$0xff]   ;;  %v860_v51 = vld [vmem:[%s1180_s2] ss:$0 sm:$0xff] (!%p859_p11) }
  0x30   : > { %v1001_v28 = vld [vmem:[%s1123_s12 + $0x4] ss:$12 sps:$4 sm:$0xff]   ;;  %v999_v31 = vld [vmem:[%s1123_s12] ss:$12 sps:$4 sm:$0xff]   ;;  %v1002_v32 = vld [vmem:[%s1123_s12 + $0x8] ss:$12 sps:$4 sm:$0xff]  }
  0x31   : > { %884 = vmatpush3.bf16.msra.mxu0 %v982_v13  ;;  %601 = vmatprep.mubr.bf16.mxu0 %v1001_v28  ;;  %v871_v54 = vld [vmem:[%s1181_s3] sm:$0xff] (!%p859_p11)  }
  0x32   : > { %915 = vmatpush3.bf16.msra.mxu1 %v983_v14  ;;  %885 = vmatprep.subr.bf16.mxu0 %v984_v15  ;;  %v872_v55 = vunpack.c.l.bf16 (!%p859_p11), %v871_v54  ;;  %v873_v56 = vunpack.c.h.bf16 (!%p859_p11), %v871_v54 }
  0x33   : > { %916 = vmatprep.subr.bf16.mxu1 %v1044_v6 }
  0x35   : > { %886 = vmatpush3.bf16.msra.mxu0 %v985_v16 }
  0x36   : > { %917 = vmatpush3.bf16.msra.mxu1 %v986_v17  ;;  %887 = vmatprep.subr.bf16.mxu0 %v987_v18 }
  0x37   : > { %918 = vmatprep.subr.bf16.mxu1 %v1044_v6 }
  0x39   : > { %888 = vmatpush3.bf16.msra.mxu0 %v988_v19 }
  0x3a   : > { %919 = vmatpush3.bf16.msra.mxu1 %v989_v20  ;;  %889 = vmatprep.subr.bf16.mxu0 %v990_v21 }
  0x3b   : > { %920 = vmatprep.subr.bf16.mxu1 %v1044_v6 }
  0x3d   : > { %890 = vmatpush3.bf16.msra.mxu0 %v991_v22 }
  0x3e   : > { %921 = vmatpush3.bf16.msra.mxu1 %v992_v23  ;;  %891 = vmatprep.subr.bf16.mxu0 %v993_v24 }
  0x3f   : > { %922 = vmatprep.subr.bf16.mxu1 %v1044_v6 }
  0x41   : > { %892 = vmatpush3.bf16.msra.mxu0 %v994_v25 }
  0x42   : > { %923 = vmatpush3.bf16.msra.mxu1 %v995_v26  ;;  %893 = vmatprep.subr.bf16.mxu0 %v996_v27 }
  0x43   : > { %924 = vmatprep.subr.bf16.mxu1 %v1044_v6 }
  0x45   : > { %894 = vmatpush3.bf16.msra.mxu0 %v997_v29 }
  0x46   : > { %925 = vmatpush3.bf16.msra.mxu1 %v998_v30 }
  0x48   : > { %602 = vmatmul.mubr.bf16.vlgmr.msra.gmra.mrb[0].mxu0 %v999_v31 }
  0x49   : > { %927 = vmatmul.mubr.bf16.vlgmr.msra.gmra.mrb[0].mxu1 %v1002_v32 }
 0x11b   : > { %v895_v33 = vpop.f32.mrb[0].mxu0 }
 0x11c   : > { %v644_v34 = vpop.f32.mrb[0].mxu1  ;;  %v896_v35 = vpop.f32.mrb[1].mxu0 }
 0x11d   : > { %v897_v36 = vadd.f32 %v896_v35, %v895_v33  ;;  %v928_v37 = vpop.f32.mrb[1].mxu1  ;;  %v898_v38 = vpop.f32.mrb[2].mxu0 }
 0x11e   : > { %v647_v40 = vpop.f32.mrb[2].mxu1  ;;  %v899_v41 = vpop.f32.mrb[3].mxu0 }
 0x11f   : > { %v645_v42 = vadd.f32 %v897_v36, %v644_v34  ;;  %v900_v43 = vadd.f32 %v899_v41, %v898_v38  ;;  %v929_v44 = vpop.f32.mrb[3].mxu1  ;;  %658 = sbr.rel (%p859_p11) target bundleno = 308 (0x134), region = 70 }
 0x121   : > { %v651_v46 = vadd.f32 %v645_v42, %v355_v39  ;;  %v648_v47 = vadd.f32 %v900_v43, %v647_v40 }
 0x123   : > { %653 = vst [vmem:[#allocation2] sm:$0xff] %v651_v46  ;;  %v652_v48 = vadd.f32 %v648_v47, %v356_v45 }
 0x125   : > { %654 = vst [vmem:[#allocation2 + $0x8] sm:$0xff] %v652_v48 }
 0x12a   : > { %v659_v49 = vld [vmem:[#allocation2] sm:$0xff] }
 0x12b   : > { %v668_v52 = vadd.f32 %v860_v51, %v659_v49 }
 0x12c   : > { %v660_v50 = vld [vmem:[#allocation2 + $0x8] sm:$0xff] }
 0x12d   : > { %v669_v53 = vadd.f32 %v860_v51, %v660_v50  ;;  %v674_v57 = vadd.f32 %v872_v55, %v668_v52 }
 0x12f   : > { %v675_v58 = vadd.f32 %v873_v56, %v669_v53 }
 0x131   : > { %v877_v59 = vpack.c.bf16 %v675_v58, %v674_v57 }
 0x133   : > { %878 = vst [vmem:[%s1182_s4] sm:$0xff] %v877_v59  }
 0x134 PF: > { %s14_s19 = sadd.s32 1, %s1041_s19   ;;  %s1183_s15 = smov %s1029_s16 }
 0x135   : > { %p11_p12 = scmp.ge.s32.totalorder %s14_s19, 5   ;;  %s1184_s16 = smov %s1106_s23 }
 0x136   : > { %s1185_s17 = smov %s1037_s18  ;;  %s1186_s18 = smov %s1188_s20 }
 0x137   :  { %13 = sbr.rel (!%p11_p12) target bundleno = 3 (0x3), region = 120 }

// kernel: stfan_forward.170
= control target key start
LH: loop header
LB: loop body
LE: loop exit
PB: predicated region body
PF: predicated region fallthrough
CT: control target
= control target key end

     0   :  { %s983_s12 = smov 0   ;;  %s985_s13 = smov 0   ;;  %s1087_s0 = inlined_call_operand.vmem [shape: bf16[16,2304], index: 0, kind: input, shape index: {}]   ;;  %s1088_s1 = inlined_call_operand.vmem [shape: bf16[2304,128], index: 1, kind: input, shape index: {}]   ;;  %s1089_s2 = inlined_call_operand.vmem [shape: f32[1,128], index: 2, kind: input, shape index: {}]   ;;  %s1090_s3 = inlined_call_operand.vmem [shape: bf16[16,128], index: 3, kind: output, shape index: {}]  }
   0x1   :  { %s987_s14 = smov 0   ;;  %s989_s15 = smov 0  }
   0x2   :  { %s991_s16 = smov 0  }
   0x3 LB: > { %s25_s17 = sadd.s32 1, %s954_s15  ;;  %p48_p1 = scmp.ne.s32.totalorder %s946_s13, %s942_s12  ;;  %s958_s16 = sphi %s991_s16, %s13_s16   ;;  %s954_s15 = sphi %s989_s15, %s1094_s15   ;;  %s950_s14 = sphi %s987_s14, %s1093_s14   ;;  %s946_s13 = sphi %s985_s13, %s1092_s13   ;;  %s942_s12 = sphi %s983_s12, %s1091_s12  }
   0x4   : > { %p26_p0 = scmp.ge.s32.totalorder %s25_s17, 6  ;;  %p49_p2 = scmp.eq.s32.totalorder %s958_s16, 0 }
   0x5   : > { %s41_s19 = sadd.s32 1, %s946_s13  ;;  %p744_p5 = scmp.ge.s32.totalorder %s958_s16, 6 }
   0x6   : > { %s1096_s17 = smov (%p26_p0, %s25_s17), 0  ;;  %p50_p3 = por %p49_p2, %p48_p1 }
   0x7   : > { %s37_s18 = ssub.s32 %s954_s15, %s1096_s17  ;;  %162 = sbr.rel (%p744_p5) target bundleno = 21 (0x15), region = 20 }
   0x8   : > { %p39_p4 = scmp.eq.s32.totalorder %s37_s18, 0 }
   0xa   : > { %s1018_s20 = scalar_select %p39_p4, %s946_s13, %s41_s19  }
   0xe   : > { %165 = sbr.rel (!%p50_p3) target bundleno = 21 (0x15), region = 24  ;;  %s167_s21 = sand.u32 (%p50_p3), 1, %s946_s13  }
   0xf   : > { %s788_s22 = smul.u32 (%p50_p3), 12, %s954_s15 }
  0x10   : > { %s847_s23 = smul.u32 (%p50_p3), 24, %s167_s21 }
  0x11   : > { %s175_s26 = scalar_lea.vmem (%p50_p3), %s1087_s0, %s788_s22 }
  0x12   : > { %v190_v0 = vld [vmem:[%s175_s26] sm:$0xff] (%p50_p3)  ;;  %v192_v1 = vld [vmem:[%s175_s26 + $0x48] sm:$0xff] (%p50_p3)  ;;  %s169_s27 = scalar_lea.vmem (%p50_p3), [#allocation3], %s847_s23  ;;  %v748_v3 = vld [vmem:[%s175_s26 + $0x50] sm:$0xf] (%p50_p3) }
  0x13   : > { %v746_v2 = vld [vmem:[%s175_s26 + $0x8] sm:$0xf] (%p50_p3)  ;;  %191 = vst [vmem:[%s169_s27] sm:$0xff] (%p50_p3), %v190_v0  ;;  %193 = vst [vmem:[%s169_s27 + $0xc] sm:$0xff] (%p50_p3), %v192_v1 }
  0x14   : > { %747 = vst [vmem:[%s169_s27 + $0x8] sm:$0xf] (%p50_p3), %v746_v2  ;;  %749 = vst [vmem:[%s169_s27 + $0x14] sm:$0xf] (%p50_p3), %v748_v3 }
  0x15 PF: > { %p750_p6 = scmp.ge.s32.totalorder %s958_s16, 1  ;;  %p221_p7 = scmp.lt.s32.totalorder %s958_s16, 7 }
  0x17   : > { %p222_p8 = pnand %p750_p6, %p221_p7 }
  0x18   : > { %s228_s28 = sand.u32 (!%p222_p8), 1, %s942_s12   ;;  %s267_s29 = smul.u32 (!%p222_p8), 48, %s950_s14 }
  0x19   : > { %225 = sbr.rel (%p222_p8) target bundleno = 309 (0x135), region = 54  ;;  %p752_p10 = scmp.ne.s32.totalorder (!%p222_p8), %s950_s14, 0 }
  0x1a   : > { %s848_s30 = smul.u32 (!%p222_p8), 24, %s228_s28  ;;  %p268_p9 = scmp.lt.s32.totalorder (!%p222_p8), %s267_s29, 287 }
  0x1c   : > { %s1035_s8 = scalar_lea.vmem (!%p222_p8), [#allocation3], %s848_s30 }
  0x20   : > { %s1098_s29 = smov (!%p268_p9, %s267_s29), 287  ;;  %292 = sbr.rel (%p752_p10) target bundleno = 39 (0x27), region = 62 }
  0x21   : > { %s751_s4 = sshll.u32 %s1098_s29, 2  ;;  %v960_v4 = vmov (!%p752_p10), 0.0  }
  0x22   : > { %s1033_s7 = scalar_lea.vmem %s1088_s1, %s751_s4  ;;  %293 = vst [vmem:[#allocation2] sm:$0xff] (!%p752_p10), %v960_v4  ;;  %294 = vst [vmem:[#allocation2 + $0x8] sm:$0xff] (!%p752_p10), %v960_v4 }
  0x27 PF: > { %v892_v5 = vld [vmem:[%s1033_s7 + $0x40] sm:$0xff]   ;;  %v961_v6 = vmov 0.0   ;;  %vm962_vm0 = vmmov 0   ;;  %v895_v9 = vld [vmem:[%s1033_s7 + $0x48] sm:$0xff]   ;;  %v898_v12 = vld [vmem:[%s1033_s7 + $0x50] sm:$0xff]   ;;  %p780_p11 = scmp.ne.s32.totalorder %s950_s14, 5 }
  0x28   : > { %827 = vmatprep.subr.bf16.mxu1 %v961_v6  ;;  %v893_v7 = vld [vmem:[%s1033_s7] sm:$0xff]   ;;  %796 = vmatprep.subr.bf16.mxu0 %v892_v5  ;;  %v896_v10 = vld [vmem:[%s1033_s7 + $0x8] sm:$0xff]   ;;  %v899_v13 = vld [vmem:[%s1033_s7 + $0x10] sm:$0xff]  }
  0x29   : > { %v894_v8 = vld [vmem:[%s1033_s7 + $0x80] sm:$0xff]   ;;  %843 = vmatprep.mubr.msk.bf16.mxu1 %vm962_vm0, %v961_v6  ;;  %797 = vmatpush3.bf16.msra.mxu0 %v893_v7  ;;  %v897_v11 = vld [vmem:[%s1033_s7 + $0x88] sm:$0xff]   ;;  %v900_v14 = vld [vmem:[%s1033_s7 + $0x90] sm:$0xff]  }
  0x2a   : > { %828 = vmatpush3.bf16.msra.mxu1 %v894_v8  ;;  %798 = vmatprep.subr.bf16.mxu0 %v895_v9  ;;  %v901_v15 = vld [vmem:[%s1033_s7 + $0x58] sm:$0xff]   ;;  %v904_v18 = vld [vmem:[%s1033_s7 + $0x60] sm:$0xff]   ;;  %v907_v21 = vld [vmem:[%s1033_s7 + $0x68] sm:$0xff]  }
  0x2b   : > { %829 = vmatprep.subr.bf16.mxu1 %v961_v6  ;;  %v902_v16 = vld [vmem:[%s1033_s7 + $0x18] sm:$0xff]   ;;  %v905_v19 = vld [vmem:[%s1033_s7 + $0x20] sm:$0xff]   ;;  %v908_v22 = vld [vmem:[%s1033_s7 + $0x28] sm:$0xff]  }
  0x2c   : > { %v903_v17 = vld [vmem:[%s1033_s7 + $0x98] sm:$0xff]   ;;  %v906_v20 = vld [vmem:[%s1033_s7 + $0xa0] sm:$0xff]   ;;  %v909_v23 = vld [vmem:[%s1033_s7 + $0xa8] sm:$0xff]  }
  0x2d   : > { %799 = vmatpush3.bf16.msra.mxu0 %v896_v10  ;;  %v910_v24 = vld [vmem:[%s1033_s7 + $0x70] sm:$0xff]   ;;  %v913_v27 = vld [vmem:[%s1033_s7 + $0x78] sm:$0xff]   ;;  %v295_v39 = vld [vmem:[#allocation2] sm:$0xff] }
  0x2e   : > { %830 = vmatpush3.bf16.msra.mxu1 %v897_v11  ;;  %800 = vmatprep.subr.bf16.mxu0 %v898_v12  ;;  %v911_v25 = vld [vmem:[%s1033_s7 + $0x30] sm:$0xff]   ;;  %v914_v29 = vld [vmem:[%s1033_s7 + $0x38] sm:$0xff]   ;;  %v296_v45 = vld [vmem:[#allocation2 + $0x8] sm:$0xff] }
  0x2f   : > { %831 = vmatprep.subr.bf16.mxu1 %v961_v6  ;;  %v912_v26 = vld [vmem:[%s1033_s7 + $0xb0] sm:$0xff]   ;;  %v915_v30 = vld [vmem:[%s1033_s7 + $0xb8] sm:$0xff]   ;;  %v781_v51 = vld [vmem:[%s1089_s2] ss:$0 sm:$0xff] (!%p780_p11) }
  0x30   : > { %v918_v28 = vld [vmem:[%s1035_s8 + $0x4] ss:$12 sps:$4 sm:$0xff]   ;;  %v916_v31 = vld [vmem:[%s1035_s8] ss:$12 sps:$4 sm:$0xff]   ;;  %v919_v32 = vld [vmem:[%s1035_s8 + $0x8] ss:$12 sps:$4 sm:$0xff]  }
  0x31   : > { %801 = vmatpush3.bf16.msra.mxu0 %v899_v13  ;;  %541 = vmatprep.mubr.bf16.mxu0 %v918_v28 }
  0x32   : > { %832 = vmatpush3.bf16.msra.mxu1 %v900_v14  ;;  %802 = vmatprep.subr.bf16.mxu0 %v901_v15 }
  0x33   : > { %833 = vmatprep.subr.bf16.mxu1 %v961_v6 }
  0x35   : > { %803 = vmatpush3.bf16.msra.mxu0 %v902_v16 }
  0x36   : > { %834 = vmatpush3.bf16.msra.mxu1 %v903_v17  ;;  %804 = vmatprep.subr.bf16.mxu0 %v904_v18 }
  0x37   : > { %835 = vmatprep.subr.bf16.mxu1 %v961_v6 }
  0x39   : > { %805 = vmatpush3.bf16.msra.mxu0 %v905_v19 }
  0x3a   : > { %836 = vmatpush3.bf16.msra.mxu1 %v906_v20  ;;  %806 = vmatprep.subr.bf16.mxu0 %v907_v21 }
  0x3b   : > { %837 = vmatprep.subr.bf16.mxu1 %v961_v6 }
  0x3d   : > { %807 = vmatpush3.bf16.msra.mxu0 %v908_v22 }
  0x3e   : > { %838 = vmatpush3.bf16.msra.mxu1 %v909_v23  ;;  %808 = vmatprep.subr.bf16.mxu0 %v910_v24 }
  0x3f   : > { %839 = vmatprep.subr.bf16.mxu1 %v961_v6 }
  0x41   : > { %809 = vmatpush3.bf16.msra.mxu0 %v911_v25 }
  0x42   : > { %840 = vmatpush3.bf16.msra.mxu1 %v912_v26  ;;  %810 = vmatprep.subr.bf16.mxu0 %v913_v27 }
  0x43   : > { %841 = vmatprep.subr.bf16.mxu1 %v961_v6 }
  0x45   : > { %811 = vmatpush3.bf16.msra.mxu0 %v914_v29 }
  0x46   : > { %842 = vmatpush3.bf16.msra.mxu1 %v915_v30 }
  0x48   : > { %542 = vmatmul.mubr.bf16.vlgmr.msra.gmra.mrb[0].mxu0 %v916_v31 }
  0x49   : > { %844 = vmatmul.mubr.bf16.vlgmr.msra.gmra.mrb[0].mxu1 %v919_v32 }
 0x11b   : > { %v812_v33 = vpop.f32.mrb[0].mxu0 }
 0x11c   : > { %v584_v34 = vpop.f32.mrb[0].mxu1  ;;  %v813_v35 = vpop.f32.mrb[1].mxu0 }
 0x11d   : > { %v814_v36 = vadd.f32 %v813_v35, %v812_v33  ;;  %v845_v37 = vpop.f32.mrb[1].mxu1  ;;  %v815_v38 = vpop.f32.mrb[2].mxu0 }
 0x11e   : > { %v587_v40 = vpop.f32.mrb[2].mxu1  ;;  %v816_v41 = vpop.f32.mrb[3].mxu0 }
 0x11f   : > { %v585_v42 = vadd.f32 %v814_v36, %v584_v34  ;;  %v817_v43 = vadd.f32 %v816_v41, %v815_v38  ;;  %v846_v44 = vpop.f32.mrb[3].mxu1  ;;  %598 = sbr.rel (%p780_p11) target bundleno = 309 (0x135), region = 66 }
 0x121   : > { %v591_v46 = vadd.f32 %v585_v42, %v295_v39  ;;  %v588_v47 = vadd.f32 %v817_v43, %v587_v40 }
 0x123   : > { %593 = vst [vmem:[#allocation2] sm:$0xff] %v591_v46  ;;  %v592_v48 = vadd.f32 %v588_v47, %v296_v45 }
 0x125   : > { %594 = vst [vmem:[#allocation2 + $0x8] sm:$0xff] %v592_v48 }
 0x12a   : > { %v599_v49 = vld [vmem:[#allocation2] sm:$0xff] }
 0x12b   : > { %v608_v52 = vadd.f32 %v781_v51, %v599_v49 }
 0x12c   : > { %v600_v50 = vld [vmem:[#allocation2 + $0x8] sm:$0xff] }
 0x12d   : > { %v609_v53 = vadd.f32 %v781_v51, %v600_v50  ;;  %vm610_vm1 = vcmp.ge.f32.partialorder %v608_v52, 0.0  ;;  %v612_v54 = vmul.f32 0.1, %v608_v52 }
 0x12f   : > { %vm611_vm2 = vcmp.ge.f32.partialorder %v609_v53, 0.0  ;;  %v613_v55 = vmul.f32 0.1, %v609_v53  ;;  %v614_v56 = vsel %vm610_vm1, %v608_v52, %v612_v54 }
 0x131   : > { %v615_v57 = vsel %vm611_vm2, %v609_v53, %v613_v55 }
 0x132   : > { %v794_v58 = vpack.c.bf16 %v615_v57, %v614_v56 }
 0x134   : > { %795 = vst [vmem:[%s1090_s3] sm:$0xff] %v794_v58  }
 0x135 PF: > { %s13_s16 = sadd.s32 1, %s958_s16   ;;  %s1091_s12 = smov %s946_s13 }
 0x136   : > { %p10_p12 = scmp.ge.s32.totalorder %s13_s16, 8   ;;  %s1092_s13 = smov %s1018_s20 }
 0x137   : > { %s1093_s14 = smov %s954_s15  ;;  %s1094_s15 = smov %s1096_s17 }
 0x138   :  { %12 = sbr.rel (!%p10_p12) target bundleno = 3 (0x3), region = 113 }

// kernel: stfan_forward.126
= control target key start
LH: loop header
LB: loop body
LE: loop exit
PB: predicated region body
PF: predicated region fallthrough
CT: control target
= control target key end

     0   :  { %vm178_vm0 = vcmask 662528   ;;  %vm227_vm1 = vcmask 1040384   ;;  %v859_v8 = vmov 0   ;;  %vm618_vm2 = vcmask 257024   ;;  %s1128_s1 = inlined_call_operand.vmem [shape: bf16[81,32], index: 1, kind: input, shape index: {}]   ;;  %s1129_s0 = inlined_call_operand.vmem [shape: bf16[256,81], index: 0, kind: input, shape index: {}]   ;;  %s1130_s2 = inlined_call_operand.vmem [shape: f32[1,32], index: 2, kind: input, shape index: {}]   ;;  %s1131_s3 = inlined_call_operand.vmem [shape: bf16[256,32], index: 3, kind: output, shape index: {}]  }
   0x1   :  { %v837_v0 = vld [vmem:[%s1128_s1] sm:$0xff]   ;;  %v838_v1 = vld [vmem:[%s1128_s1 + $0x8] sm:$0xff]   ;;  %v839_v2 = vld [vmem:[%s1128_s1 + $0x10] sm:$0xff]   ;;  %v229_v9 = vsel %vm227_vm1, 65535, %v859_v8 }
   0x2   :  { %780 = vmatprep.subr.bf16.mxu0 %v837_v0  ;;  %824 = vmatprep.subr.bf16.mxu1 %v837_v0  ;;  %v843_v3 = vld [vmem:[%s1129_s0] sm:$0xff]   ;;  %v840_v5 = vld [vmem:[%s1128_s1 + $0x18] sm:$0xff]   ;;  %v842_v6 = vld [vmem:[%s1128_s1 + $0x28] ss:$0 sps:$4 sm:$0x11]  }
   0x3   :  { %781 = vmatpush3.bf16.msra.mxu0 %v837_v0  ;;  %830 = vmatpush3.bf16.msra.mxu1 %v837_v0  ;;  %v844_v4 = vld [vmem:[%s1129_s0 + $0x40] sm:$0xff]   ;;  %v231_v10 = vand.u32 %v842_v6, %v229_v9  ;;  %v845_v11 = vld [vmem:[%s1129_s0 + $0x8] sm:$0xff]   ;;  %v847_v13 = vld [vmem:[%s1129_s0 + $0x10] sm:$0xff]  }
   0x4   :  { %782 = vmatprep.subr.bf16.mxu0 %v838_v1  ;;  %825 = vmatprep.subr.bf16.mxu1 %v838_v1  ;;  %v841_v7 = vld [vmem:[%s1128_s1 + $0x20] sm:$0xff]   ;;  %v846_v12 = vld [vmem:[%s1129_s0 + $0x48] sm:$0xff]   ;;  %v848_v14 = vld [vmem:[%s1129_s0 + $0x50] sm:$0xff]  }
   0x5   :  { %792 = vmatprep.mubr.msk.bf16.mxu0 %vm178_vm0, %v843_v3  ;;  %808 = vmatprep.mubr.msk.bf16.mxu1 %vm178_vm0, %v844_v4  ;;  %v849_v15 = vld [vmem:[%s1129_s0 + $0x18] sm:$0xff]   ;;  %v851_v17 = vld [vmem:[%s1129_s0 + $0x20] sm:$0xff]   ;;  %v853_v19 = vld [vmem:[%s1129_s0 + $0x28] sm:$0xff]  }
   0x6   :  { %v850_v16 = vld [vmem:[%s1129_s0 + $0x58] sm:$0xff]   ;;  %v852_v18 = vld [vmem:[%s1129_s0 + $0x60] sm:$0xff]   ;;  %v854_v20 = vld [vmem:[%s1129_s0 + $0x68] sm:$0xff]  }
   0x7   :  { %783 = vmatpush3.bf16.msra.mxu0 %v838_v1  ;;  %831 = vmatpush3.bf16.msra.mxu1 %v838_v1  ;;  %v855_v21 = vld [vmem:[%s1129_s0 + $0x30] sm:$0xff]   ;;  %v857_v23 = vld [vmem:[%s1129_s0 + $0x38] sm:$0xff]   ;;  %v965_v25 = vld [vmem:[%s1130_s2] ss:$0 sm:$0xff] }
   0x8   :  { %784 = vmatprep.subr.bf16.mxu0 %v839_v2  ;;  %826 = vmatprep.subr.bf16.mxu1 %v839_v2  ;;  %v856_v22 = vld [vmem:[%s1129_s0 + $0x70] sm:$0xff]   ;;  %v858_v24 = vld [vmem:[%s1129_s0 + $0x78] sm:$0xff]  }
   0xb   :  { %785 = vmatpush3.bf16.msra.mxu0 %v839_v2  ;;  %832 = vmatpush3.bf16.msra.mxu1 %v839_v2 }
   0xc   :  { %786 = vmatprep.subr.bf16.mxu0 %v840_v5  ;;  %827 = vmatprep.subr.bf16.mxu1 %v840_v5 }
   0xf   :  { %787 = vmatpush3.bf16.msra.mxu0 %v840_v5  ;;  %833 = vmatpush3.bf16.msra.mxu1 %v840_v5 }
  0x10   :  { %788 = vmatprep.subr.bf16.mxu0 %v841_v7  ;;  %828 = vmatprep.subr.bf16.mxu1 %v841_v7 }
  0x13   :  { %789 = vmatpush3.bf16.msra.mxu0 %v841_v7  ;;  %834 = vmatpush3.bf16.msra.mxu1 %v841_v7 }
  0x14   :  { %790 = vmatprep.subr.bf16.mxu0 %v231_v10  ;;  %829 = vmatprep.subr.bf16.mxu1 %v231_v10 }
  0x17   :  { %791 = vmatpush3.bf16.msra.mxu0 %v231_v10  ;;  %835 = vmatpush3.bf16.msra.mxu1 %v231_v10 }
  0x1a   :  { %793 = vmatmul.mubr.msk.bf16.vlgmr.msra.gmra.mrb[0].mxu0 %vm178_vm0, %v845_v11  ;;  %809 = vmatmul.mubr.msk.bf16.vlgmr.msra.gmra.mrb[0].mxu1 %vm178_vm0, %v846_v12 }
  0x1b   :  { %796 = vmatprep.mubr.msk.bf16.mxu0 %vm178_vm0, %v847_v13  ;;  %812 = vmatprep.mubr.msk.bf16.mxu1 %vm178_vm0, %v848_v14 }
  0x22   :  { %797 = vmatmul.mubr.msk.bf16.gmra.mrb[4].mxu0 %vm178_vm0, %v849_v15  ;;  %813 = vmatmul.mubr.msk.bf16.gmra.mrb[4].mxu1 %vm178_vm0, %v850_v16 }
  0x23   :  { %800 = vmatprep.mubr.msk.bf16.mxu0 %vm178_vm0, %v851_v17  ;;  %816 = vmatprep.mubr.msk.bf16.mxu1 %vm178_vm0, %v852_v18 }
  0x2a   :  { %801 = vmatmul.mubr.msk.bf16.gmra.mrb[8].mxu0 %vm178_vm0, %v853_v19  ;;  %817 = vmatmul.mubr.msk.bf16.gmra.mrb[8].mxu1 %vm178_vm0, %v854_v20 }
  0x2b   :  { %804 = vmatprep.mubr.msk.bf16.mxu0 %vm178_vm0, %v855_v21  ;;  %820 = vmatprep.mubr.msk.bf16.mxu1 %vm178_vm0, %v856_v22 }
  0x32   :  { %805 = vmatmul.mubr.msk.bf16.gmra.mrb[12].mxu0 %vm178_vm0, %v857_v23  ;;  %821 = vmatmul.mubr.msk.bf16.gmra.mrb[12].mxu1 %vm178_vm0, %v858_v24 }
  0xed   :  { %v794_v26 = vpop.f32.mrb[0].mxu0  ;;  %v810_v27 = vpop.f32.mrb[0].mxu1 }
  0xee   :  { %v276_v28 = vadd.f32 %v794_v26, %v965_v25  ;;  %v340_v29 = vadd.f32 %v810_v27, %v965_v25  ;;  %v267_v30 = vpop.f32.mrb[1].mxu0  ;;  %v331_v31 = vpop.f32.mrb[1].mxu1 }
  0xef   :  { %v268_v32 = vadd.f32 %v965_v25, %v267_v30  ;;  %v332_v33 = vadd.f32 %v965_v25, %v331_v31  ;;  %v795_v34 = vpop.f32.mrb[2].mxu0  ;;  %v811_v35 = vpop.f32.mrb[2].mxu1 }
  0xf0   :  { %vm396_vm3 = vcmp.ge.f32.partialorder %v276_v28, 0.0  ;;  %v428_v36 = vmul.f32 0.1, %v276_v28  ;;  %vm412_vm4 = vcmp.ge.f32.partialorder %v340_v29, 0.0  ;;  %v444_v37 = vmul.f32 0.1, %v340_v29 }
  0xf1   :  { %vm394_vm5 = vcmp.ge.f32.partialorder %v268_v32, 0.0  ;;  %v426_v38 = vmul.f32 0.1, %v268_v32  ;;  %vm410_vm6 = vcmp.ge.f32.partialorder %v332_v33, 0.0  ;;  %v442_v39 = vmul.f32 0.1, %v332_v33 }
  0xf2   :  { %v460_v40 = vsel %vm396_vm3, %v276_v28, %v428_v36  ;;  %v476_v41 = vsel %vm412_vm4, %v340_v29, %v444_v37  ;;  %v279_v42 = vadd.f32 %v795_v34, %v965_v25  ;;  %v343_v43 = vadd.f32 %v811_v35, %v965_v25  ;;  %v270_v44 = vpop.f32.mrb[3].mxu0  ;;  %v334_v45 = vpop.f32.mrb[3].mxu1 }
  0xf3   :  { %v728_v46 = vpack.c.bf16 %v460_v40, %v460_v40  ;;  %v744_v47 = vpack.c.bf16 %v476_v41, %v476_v41  ;;  %v458_v48 = vsel %vm394_vm5, %v268_v32, %v426_v38  ;;  %v474_v49 = vsel %vm410_vm6, %v332_v33, %v442_v39 }
  0xf4   :  { %v726_v50 = vpack.c.bf16 %v458_v48, %v458_v48  ;;  %v742_v51 = vpack.c.bf16 %v474_v49, %v474_v49  ;;  %vm397_vm7 = vcmp.ge.f32.partialorder %v279_v42, 0.0  ;;  %v429_v52 = vmul.f32 0.1, %v279_v42 }
  0xf5   :  { %621 = vst.msk [vmem:[%s1131_s3 + $0x8] sm:$0xf] %vm618_vm2, %v728_v46  ;;  %637 = vst.msk [vmem:[%s1131_s3 + $0x48] sm:$0xf] %vm618_vm2, %v744_v47  ;;  %vm413_vm8 = vcmp.ge.f32.partialorder %v343_v43, 0.0  ;;  %v271_v54 = vadd.f32 %v965_v25, %v270_v44  ;;  %v335_v55 = vadd.f32 %v965_v25, %v334_v45  ;;  %v798_v56 = vpop.f32.mrb[4].mxu0 }
  0xf6   :  { %v445_v53 = vmul.f32 0.1, %v343_v43  ;;  %v814_v57 = vpop.f32.mrb[4].mxu1  ;;  %619 = vst.msk [vmem:[%s1131_s3] sm:$0xf] %vm618_vm2, %v726_v50  ;;  %v461_v58 = vsel %vm397_vm7, %v279_v42, %v429_v52  ;;  %v292_v59 = vadd.f32 %v798_v56, %v965_v25  ;;  %v283_v61 = vpop.f32.mrb[5].mxu0 }
  0xf7   :  { %635 = vst.msk [vmem:[%s1131_s3 + $0x40] sm:$0xf] %vm618_vm2, %v742_v51  ;;  %v356_v60 = vadd.f32 %v814_v57, %v965_v25  ;;  %v347_v62 = vpop.f32.mrb[5].mxu1  ;;  %v729_v63 = vpack.c.bf16 %v461_v58, %v461_v58  ;;  %vm395_vm9 = vcmp.ge.f32.partialorder %v271_v54, 0.0  ;;  %v427_v1 = vmul.f32 0.1, %v271_v54 }
  0xf8   :  { %v477_v0 = vsel %vm413_vm8, %v343_v43, %v445_v53  ;;  %v799_v2 = vpop.f32.mrb[6].mxu0  ;;  %v815_v3 = vpop.f32.mrb[6].mxu1  ;;  %vm411_vm10 = vcmp.ge.f32.partialorder %v335_v55, 0.0  ;;  %v443_v5 = vmul.f32 0.1, %v335_v55  ;;  %vm400_vm11 = vcmp.ge.f32.partialorder %v292_v59, 0.0 }
  0xf9   :  { %v745_v4 = vpack.c.bf16 %v477_v0, %v477_v0  ;;  %v286_v6 = vpop.f32.mrb[7].mxu0  ;;  %v350_v7 = vpop.f32.mrb[7].mxu1  ;;  %622 = vst.msk [vmem:[%s1131_s3 + $0xc] sm:$0xf] %vm618_vm2, %v729_v63  ;;  %v459_v8 = vsel %vm395_vm9, %v271_v54, %v427_v1  ;;  %v432_v9 = vmul.f32 0.1, %v292_v59  ;;  %v284_v13 = vadd.f32 %v965_v25, %v283_v61 }
  0xfa   :  { %vm416_vm12 = vcmp.ge.f32.partialorder %v356_v60, 0.0  ;;  %v448_v10 = vmul.f32 0.1, %v356_v60  ;;  %v727_v11 = vpack.c.bf16 %v459_v8, %v459_v8  ;;  %v475_v12 = vsel %vm411_vm10, %v335_v55, %v443_v5 }
  0xfb   :  { %638 = vst.msk [vmem:[%s1131_s3 + $0x4c] sm:$0xf] %vm618_vm2, %v745_v4  ;;  %v348_v14 = vadd.f32 %v965_v25, %v347_v62  ;;  %v743_v15 = vpack.c.bf16 %v475_v12, %v475_v12  ;;  %v464_v16 = vsel %vm400_vm11, %v292_v59, %v432_v9  ;;  %v295_v18 = vadd.f32 %v799_v2, %v965_v25 }
  0xfc   :  { %v480_v17 = vsel %vm416_vm12, %v356_v60, %v448_v10  ;;  %620 = vst.msk [vmem:[%s1131_s3 + $0x4] sm:$0xf] %vm618_vm2, %v727_v11  ;;  %v732_v19 = vpack.c.bf16 %v464_v16, %v464_v16  ;;  %vm398_vm13 = vcmp.ge.f32.partialorder %v284_v13, 0.0  ;;  %v430_v21 = vmul.f32 0.1, %v284_v13 }
  0xfd   :  { %v748_v20 = vpack.c.bf16 %v480_v17, %v480_v17  ;;  %636 = vst.msk [vmem:[%s1131_s3 + $0x44] sm:$0xf] %vm618_vm2, %v743_v15  ;;  %vm414_vm14 = vcmp.ge.f32.partialorder %v348_v14, 0.0  ;;  %v446_v22 = vmul.f32 0.1, %v348_v14  ;;  %vm401_vm15 = vcmp.ge.f32.partialorder %v295_v18, 0.0 }
  0xfe   :  { %v433_v23 = vmul.f32 0.1, %v295_v18  ;;  %625 = vst.msk [vmem:[%s1131_s3 + $0x18] sm:$0xf] %vm618_vm2, %v732_v19  ;;  %v462_v24 = vsel %vm398_vm13, %v284_v13, %v430_v21  ;;  %v359_v26 = vadd.f32 %v815_v3, %v965_v25  ;;  %v287_v27 = vadd.f32 %v965_v25, %v286_v6  ;;  %v802_v29 = vpop.f32.mrb[8].mxu0  ;;  %v818_v30 = vpop.f32.mrb[8].mxu1 }
  0xff   :  { %641 = vst.msk [vmem:[%s1131_s3 + $0x58] sm:$0xf] %vm618_vm2, %v748_v20  ;;  %v351_v28 = vadd.f32 %v965_v25, %v350_v7  ;;  %v730_v31 = vpack.c.bf16 %v462_v24, %v462_v24  ;;  %v478_v32 = vsel %vm414_vm14, %v348_v14, %v446_v22  ;;  %v308_v34 = vadd.f32 %v802_v29, %v965_v25  ;;  %v299_v35 = vpop.f32.mrb[9].mxu0  ;;  %v363_v36 = vpop.f32.mrb[9].mxu1 }
 0x100   :  { %v465_v33 = vsel %vm401_vm15, %v295_v18, %v433_v23  ;;  %v746_v37 = vpack.c.bf16 %v478_v32, %v478_v32  ;;  %vm417_vm0 = vcmp.ge.f32.partialorder %v359_v26, 0.0  ;;  %v449_v39 = vmul.f32 0.1, %v359_v26  ;;  %v803_v40 = vpop.f32.mrb[10].mxu0  ;;  %v819_v41 = vpop.f32.mrb[10].mxu1 }
 0x101   :  { %v733_v38 = vpack.c.bf16 %v465_v33, %v465_v33  ;;  %623 = vst.msk [vmem:[%s1131_s3 + $0x10] sm:$0xf] %vm618_vm2, %v730_v31  ;;  %vm399_vm1 = vcmp.ge.f32.partialorder %v287_v27, 0.0  ;;  %v431_v42 = vmul.f32 0.1, %v287_v27  ;;  %vm415_vm3 = vcmp.ge.f32.partialorder %v351_v28, 0.0 }
 0x102   :  { %v447_v43 = vmul.f32 0.1, %v351_v28  ;;  %639 = vst.msk [vmem:[%s1131_s3 + $0x50] sm:$0xf] %vm618_vm2, %v746_v37  ;;  %v481_v44 = vsel %vm417_vm0, %v359_v26, %v449_v39  ;;  %vm404_vm4 = vcmp.ge.f32.partialorder %v308_v34, 0.0  ;;  %v372_v46 = vadd.f32 %v818_v30, %v965_v25  ;;  %v302_v47 = vpop.f32.mrb[11].mxu0 }
 0x103   :  { %626 = vst.msk [vmem:[%s1131_s3 + $0x1c] sm:$0xf] %vm618_vm2, %v733_v38  ;;  %v436_v45 = vmul.f32 0.1, %v308_v34  ;;  %v366_v48 = vpop.f32.mrb[11].mxu1  ;;  %v749_v49 = vpack.c.bf16 %v481_v44, %v481_v44  ;;  %v463_v50 = vsel %vm399_vm1, %v287_v27, %v431_v42  ;;  %v300_v52 = vadd.f32 %v965_v25, %v299_v35 }
 0x104   :  { %v479_v51 = vsel %vm415_vm3, %v351_v28, %v447_v43  ;;  %v731_v53 = vpack.c.bf16 %v463_v50, %v463_v50  ;;  %vm420_vm5 = vcmp.ge.f32.partialorder %v372_v46, 0.0  ;;  %v452_v57 = vmul.f32 0.1, %v372_v46 }
 0x105   :  { %v747_v54 = vpack.c.bf16 %v479_v51, %v479_v51  ;;  %v468_v55 = vsel %vm404_vm4, %v308_v34, %v436_v45  ;;  %642 = vst.msk [vmem:[%s1131_s3 + $0x5c] sm:$0xf] %vm618_vm2, %v749_v49  ;;  %vm402_vm6 = vcmp.ge.f32.partialorder %v300_v52, 0.0  ;;  %v434_v58 = vmul.f32 0.1, %v300_v52  ;;  %v806_v59 = vpop.f32.mrb[12].mxu0 }
 0x106   :  { %v736_v56 = vpack.c.bf16 %v468_v55, %v468_v55  ;;  %624 = vst.msk [vmem:[%s1131_s3 + $0x14] sm:$0xf] %vm618_vm2, %v731_v53  ;;  %v364_v60 = vadd.f32 %v965_v25, %v363_v36  ;;  %v311_v61 = vadd.f32 %v803_v40, %v965_v25  ;;  %v375_v62 = vadd.f32 %v819_v41, %v965_v25  ;;  %v822_v0 = vpop.f32.mrb[12].mxu1  ;;  %v315_v1 = vpop.f32.mrb[13].mxu0 }
 0x107   :  { %640 = vst.msk [vmem:[%s1131_s3 + $0x54] sm:$0xf] %vm618_vm2, %v747_v54  ;;  %v303_v63 = vadd.f32 %v965_v25, %v302_v47  ;;  %v484_v2 = vsel %vm420_vm5, %v372_v46, %v452_v57  ;;  %v466_v3 = vsel %vm402_vm6, %v300_v52, %v434_v58  ;;  %v367_v4 = vadd.f32 %v965_v25, %v366_v48  ;;  %v379_v6 = vpop.f32.mrb[13].mxu1  ;;  %v807_v7 = vpop.f32.mrb[14].mxu0 }
 0x108   :  { %629 = vst.msk [vmem:[%s1131_s3 + $0x28] sm:$0xf] %vm618_vm2, %v736_v56  ;;  %v324_v5 = vadd.f32 %v806_v59, %v965_v25  ;;  %v752_v8 = vpack.c.bf16 %v484_v2, %v484_v2  ;;  %v734_v9 = vpack.c.bf16 %v466_v3, %v466_v3  ;;  %vm418_vm7 = vcmp.ge.f32.partialorder %v364_v60, 0.0  ;;  %v823_v11 = vpop.f32.mrb[14].mxu1  ;;  %v318_v12 = vpop.f32.mrb[15].mxu0 }
 0x109   :  { %v450_v10 = vmul.f32 0.1, %v364_v60  ;;  %vm405_vm8 = vcmp.ge.f32.partialorder %v311_v61, 0.0  ;;  %v437_v13 = vmul.f32 0.1, %v311_v61  ;;  %vm421_vm9 = vcmp.ge.f32.partialorder %v375_v62, 0.0 }
 0x10a   :  { %v453_v14 = vmul.f32 0.1, %v375_v62  ;;  %645 = vst.msk [vmem:[%s1131_s3 + $0x68] sm:$0xf] %vm618_vm2, %v752_v8  ;;  %627 = vst.msk [vmem:[%s1131_s3 + $0x20] sm:$0xf] %vm618_vm2, %v734_v9  ;;  %v388_v29 = vadd.f32 %v822_v0, %v965_v25  ;;  %v316_v31 = vadd.f32 %v965_v25, %v315_v1  ;;  %v380_v32 = vadd.f32 %v965_v25, %v379_v6 }
 0x10b   :  { %v482_v15 = vsel %vm418_vm7, %v364_v60, %v450_v10  ;;  %vm403_vm10 = vcmp.ge.f32.partialorder %v303_v63, 0.0  ;;  %v435_v16 = vmul.f32 0.1, %v303_v63  ;;  %vm419_vm11 = vcmp.ge.f32.partialorder %v367_v4, 0.0  ;;  %v382_v17 = vpop.f32.mrb[15].mxu1 }
 0x10c   :  { %v750_v18 = vpack.c.bf16 %v482_v15, %v482_v15  ;;  %v469_v19 = vsel %vm405_vm8, %v311_v61, %v437_v13  ;;  %v485_v20 = vsel %vm421_vm9, %v375_v62, %v453_v14  ;;  %v451_v21 = vmul.f32 0.1, %v367_v4 }
 0x10d   :  { %v737_v22 = vpack.c.bf16 %v469_v19, %v469_v19  ;;  %v753_v23 = vpack.c.bf16 %v485_v20, %v485_v20  ;;  %v467_v24 = vsel %vm403_vm10, %v303_v63, %v435_v16  ;;  %vm408_vm12 = vcmp.ge.f32.partialorder %v324_v5, 0.0 }
 0x10e   :  { %643 = vst.msk [vmem:[%s1131_s3 + $0x60] sm:$0xf] %vm618_vm2, %v750_v18  ;;  %v735_v26 = vpack.c.bf16 %v467_v24, %v467_v24  ;;  %v483_v27 = vsel %vm419_vm11, %v367_v4, %v451_v21  ;;  %v440_v28 = vmul.f32 0.1, %v324_v5  ;;  %v327_v33 = vadd.f32 %v807_v7, %v965_v25 }
 0x10f   :  { %630 = vst.msk [vmem:[%s1131_s3 + $0x2c] sm:$0xf] %vm618_vm2, %v737_v22  ;;  %646 = vst.msk [vmem:[%s1131_s3 + $0x6c] sm:$0xf] %vm618_vm2, %v753_v23  ;;  %v751_v30 = vpack.c.bf16 %v483_v27, %v483_v27  ;;  %vm424_vm13 = vcmp.ge.f32.partialorder %v388_v29, 0.0  ;;  %v391_v36 = vadd.f32 %v823_v11, %v965_v25  ;;  %vm406_vm14 = vcmp.ge.f32.partialorder %v316_v31, 0.0 }
 0x110   :  { %628 = vst.msk [vmem:[%s1131_s3 + $0x24] sm:$0xf] %vm618_vm2, %v735_v26  ;;  %v472_v34 = vsel %vm408_vm12, %v324_v5, %v440_v28  ;;  %v456_v35 = vmul.f32 0.1, %v388_v29  ;;  %v438_v38 = vmul.f32 0.1, %v316_v31  ;;  %v319_v48 = vadd.f32 %v965_v25, %v318_v12 }
 0x111   :  { %644 = vst.msk [vmem:[%s1131_s3 + $0x64] sm:$0xf] %vm618_vm2, %v751_v30  ;;  %v740_v37 = vpack.c.bf16 %v472_v34, %v472_v34  ;;  %vm422_vm15 = vcmp.ge.f32.partialorder %v380_v32, 0.0  ;;  %v454_v40 = vmul.f32 0.1, %v380_v32  ;;  %vm409_vm0 = vcmp.ge.f32.partialorder %v327_v33, 0.0 }
 0x112   :  { %v488_v39 = vsel %vm424_vm13, %v388_v29, %v456_v35  ;;  %v441_v41 = vmul.f32 0.1, %v327_v33  ;;  %v470_v43 = vsel %vm406_vm14, %v316_v31, %v438_v38  ;;  %vm425_vm1 = vcmp.ge.f32.partialorder %v391_v36, 0.0 }
 0x113   :  { %633 = vst.msk [vmem:[%s1131_s3 + $0x38] sm:$0xf] %vm618_vm2, %v740_v37  ;;  %v756_v42 = vpack.c.bf16 %v488_v39, %v488_v39  ;;  %v457_v44 = vmul.f32 0.1, %v391_v36  ;;  %v738_v45 = vpack.c.bf16 %v470_v43, %v470_v43  ;;  %v486_v46 = vsel %vm422_vm15, %v380_v32, %v454_v40 }
 0x114   :  { %v473_v47 = vsel %vm409_vm0, %v327_v33, %v441_v41  ;;  %v754_v49 = vpack.c.bf16 %v486_v46, %v486_v46  ;;  %v383_v52 = vadd.f32 %v965_v25, %v382_v17  ;;  %vm407_vm3 = vcmp.ge.f32.partialorder %v319_v48, 0.0 }
 0x115   :  { %649 = vst.msk [vmem:[%s1131_s3 + $0x78] sm:$0xf] %vm618_vm2, %v756_v42  ;;  %v741_v50 = vpack.c.bf16 %v473_v47, %v473_v47  ;;  %v489_v51 = vsel %vm425_vm1, %v391_v36, %v457_v44  ;;  %631 = vst.msk [vmem:[%s1131_s3 + $0x30] sm:$0xf] %vm618_vm2, %v738_v45  ;;  %v439_v54 = vmul.f32 0.1, %v319_v48 }
 0x116   :  { %v757_v53 = vpack.c.bf16 %v489_v51, %v489_v51  ;;  %647 = vst.msk [vmem:[%s1131_s3 + $0x70] sm:$0xf] %vm618_vm2, %v754_v49  ;;  %vm423_vm4 = vcmp.ge.f32.partialorder %v383_v52, 0.0  ;;  %v455_v25 = vmul.f32 0.1, %v383_v52 }
 0x117   :  { %634 = vst.msk [vmem:[%s1131_s3 + $0x3c] sm:$0xf] %vm618_vm2, %v741_v50  ;;  %v471_v55 = vsel %vm407_vm3, %v319_v48, %v439_v54 }
 0x118   :  { %650 = vst.msk [vmem:[%s1131_s3 + $0x7c] sm:$0xf] %vm618_vm2, %v757_v53  ;;  %v739_v56 = vpack.c.bf16 %v471_v55, %v471_v55  ;;  %v487_v57 = vsel %vm423_vm4, %v383_v52, %v455_v25 }
 0x119   :  { %v755_v58 = vpack.c.bf16 %v487_v57, %v487_v57 }
 0x11a   :  { %632 = vst.msk [vmem:[%s1131_s3 + $0x34] sm:$0xf] %vm618_vm2, %v739_v56 }
 0x11b   :  { %648 = vst.msk [vmem:[%s1131_s3 + $0x74] sm:$0xf] %vm618_vm2, %v755_v58 }

// kernel: stfan_forward.146
= control target key start
LH: loop header
LB: loop body
LE: loop exit
PB: predicated region body
PF: predicated region fallthrough
CT: control target
= control target key end

     0   :  { %s1278_s12 = smov 0   ;;  %s1280_s13 = smov 0   ;;  %s1524_s0 = inlined_call_operand.vmem [shape: bf16[16,128], index: 0, kind: input, shape index: {}]   ;;  %s1525_s1 = inlined_call_operand.vmem [shape: bf16[128,3200], index: 1, kind: input, shape index: {}]   ;;  %s1526_s2 = inlined_call_operand.vmem [shape: f32[1,3200], index: 2, kind: input, shape index: {}]   ;;  %s1527_s3 = inlined_call_operand.vmem [shape: bf16[16,3200], index: 3, kind: output, shape index: {}]  }
   0x1   :  { %s1282_s14 = smov 0   ;;  %s1284_s15 = smov 0  }
   0x2   :  { %s1286_s16 = smov 0  }
   0x3 LB: > { %s22_s17 = sadd.s32 1, %s1249_s15  ;;  %s982_s18 = sadd.s32 4294967295, %s1253_s16   ;;  %s1253_s16 = sphi %s1286_s16, %s13_s16   ;;  %s1249_s15 = sphi %s1284_s15, %s1532_s15   ;;  %s1245_s14 = sphi %s1282_s14, %s1531_s14   ;;  %s1241_s13 = sphi %s1280_s13, %s1530_s13   ;;  %s1237_s12 = sphi %s1278_s12, %s1529_s12  }
   0x4   : > { %p23_p0 = scmp.ge.s32.totalorder %s22_s17, 5  ;;  %p65_p1 = scmp.ne.s32.totalorder %s1241_s13, %s1237_s12 }
   0x5   : > { %p66_p2 = scmp.eq.s32.totalorder %s1253_s16, 0  ;;  %p123_p4 = scmp.eq.s32.totalorder %s982_s18, 4 }
   0x6   : > { %s1534_s17 = smov (%p23_p0, %s22_s17), 0  ;;  %s58_s20 = sadd.s32 1, %s1241_s13 }
   0x7   : > { %p67_p3 = por %p66_p2, %p65_p1  ;;  %s55_s19 = ssub.s32 %s1249_s15, %s1534_s17 }
   0x8   : > { %p56_p5 = scmp.eq.s32.totalorder %s55_s19, 0  ;;  %p1313_p6 = por %p123_p4, %p65_p1 }
   0x9   : > { %p986_p7 = scmp.ge.s32.totalorder %s1253_s16, 5 }
   0xa   : > { %s1318_s22 = scalar_select %p56_p5, %s1241_s13, %s58_s20  }
   0xb   : > { %154 = sbr.rel (%p986_p7) target bundleno = 49 (0x31), region = 20 }
  0x12   : > { %157 = sbr.rel (!%p67_p3) target bundleno = 49 (0x31), region = 24  ;;  %s159_s23 = sand.u32 (%p67_p3), 1, %s1241_s13  }
  0x13   : > { %s1075_s24 = smul.u32 (%p67_p3), 20, %s1249_s15 }
  0x14   : > { %s1112_s25 = smul.u32 (%p67_p3), 320, %s159_s23 }
  0x15   : > { %s1326_s28 = scalar_lea.vmem (%p67_p3), %s1525_s1, %s1075_s24 }
  0x16   : > { %v179_v0 = vld [vmem:[%s1326_s28] sm:$0xff] (%p67_p3)  ;;  %v181_v1 = vld [vmem:[%s1326_s28 + $0x8] sm:$0xff] (%p67_p3)  ;;  %s1331_s29 = scalar_lea.vmem (%p67_p3), [#allocation2], %s1112_s25  ;;  %v189_v5 = vld [vmem:[%s1326_s28 + $0xd0] sm:$0xff] (%p67_p3) }
  0x17   : > { %v183_v2 = vld [vmem:[%s1326_s28 + $0x64] sm:$0xff] (%p67_p3)  ;;  %180 = vst [vmem:[%s1331_s29] sm:$0xff] (%p67_p3), %v179_v0  ;;  %182 = vst [vmem:[%s1331_s29 + $0x8] sm:$0xff] (%p67_p3), %v181_v1  ;;  %v185_v3 = vld [vmem:[%s1326_s28 + $0x6c] sm:$0xff] (%p67_p3) }
  0x18   : > { %184 = vst [vmem:[%s1331_s29 + $0x14] sm:$0xff] (%p67_p3), %v183_v2  ;;  %v187_v4 = vld [vmem:[%s1326_s28 + $0xc8] sm:$0xff] (%p67_p3)  ;;  %186 = vst [vmem:[%s1331_s29 + $0x1c] sm:$0xff] (%p67_p3), %v185_v3  ;;  %v193_v7 = vld [vmem:[%s1326_s28 + $0x134] sm:$0xff] (%p67_p3) }
  0x19   : > { %188 = vst [vmem:[%s1331_s29 + $0x28] sm:$0xff] %v187_v4  ;;  %190 = vst [vmem:[%s1331_s29 + $0x30] sm:$0xff] %v189_v5  ;;  %v191_v6 = vld [vmem:[%s1326_s28 + $0x12c] sm:$0xff]  ;;  %v197_v9 = vld [vmem:[%s1326_s28 + $0x198] sm:$0xff] }
  0x1a   : > { %v195_v8 = vld [vmem:[%s1326_s28 + $0x190] sm:$0xff]  ;;  %192 = vst [vmem:[%s1331_s29 + $0x3c] sm:$0xff] %v191_v6  ;;  %194 = vst [vmem:[%s1331_s29 + $0x44] sm:$0xff] %v193_v7  ;;  %v201_v11 = vld [vmem:[%s1326_s28 + $0x1fc] sm:$0xff] }
  0x1b   : > { %196 = vst [vmem:[%s1331_s29 + $0x50] sm:$0xff] %v195_v8  ;;  %v199_v10 = vld [vmem:[%s1326_s28 + $0x1f4] sm:$0xff]  ;;  %198 = vst [vmem:[%s1331_s29 + $0x58] sm:$0xff] %v197_v9  ;;  %v205_v13 = vld [vmem:[%s1326_s28 + $0x260] sm:$0xff] }
  0x1c   : > { %200 = vst [vmem:[%s1331_s29 + $0x64] sm:$0xff] %v199_v10  ;;  %202 = vst [vmem:[%s1331_s29 + $0x6c] sm:$0xff] %v201_v11  ;;  %v203_v12 = vld [vmem:[%s1326_s28 + $0x258] sm:$0xff]  ;;  %v209_v15 = vld [vmem:[%s1326_s28 + $0x2c4] sm:$0xff] }
  0x1d   : > { %v207_v14 = vld [vmem:[%s1326_s28 + $0x2bc] sm:$0xff]  ;;  %204 = vst [vmem:[%s1331_s29 + $0x78] sm:$0xff] %v203_v12  ;;  %206 = vst [vmem:[%s1331_s29 + $0x80] sm:$0xff] %v205_v13  ;;  %v213_v17 = vld [vmem:[%s1326_s28 + $0x328] sm:$0xff] }
  0x1e   : > { %208 = vst [vmem:[%s1331_s29 + $0x8c] sm:$0xff] %v207_v14  ;;  %v211_v16 = vld [vmem:[%s1326_s28 + $0x320] sm:$0xff]  ;;  %210 = vst [vmem:[%s1331_s29 + $0x94] sm:$0xff] %v209_v15  ;;  %v217_v19 = vld [vmem:[%s1326_s28 + $0x38c] sm:$0xff] }
  0x1f   : > { %212 = vst [vmem:[%s1331_s29 + $0xa0] sm:$0xff] %v211_v16  ;;  %214 = vst [vmem:[%s1331_s29 + $0xa8] sm:$0xff] %v213_v17  ;;  %v215_v18 = vld [vmem:[%s1326_s28 + $0x384] sm:$0xff]  ;;  %v221_v21 = vld [vmem:[%s1326_s28 + $0x3f0] sm:$0xff] }
  0x20   : > { %v219_v20 = vld [vmem:[%s1326_s28 + $0x3e8] sm:$0xff]  ;;  %216 = vst [vmem:[%s1331_s29 + $0xb4] sm:$0xff] %v215_v18  ;;  %218 = vst [vmem:[%s1331_s29 + $0xbc] sm:$0xff] %v217_v19  ;;  %v225_v23 = vld [vmem:[%s1326_s28 + $0x454] sm:$0xff] }
  0x21   : > { %220 = vst [vmem:[%s1331_s29 + $0xc8] sm:$0xff] %v219_v20  ;;  %v223_v22 = vld [vmem:[%s1326_s28 + $0x44c] sm:$0xff]  ;;  %222 = vst [vmem:[%s1331_s29 + $0xd0] sm:$0xff] %v221_v21  ;;  %v229_v25 = vld [vmem:[%s1326_s28 + $0x4b8] sm:$0xff] }
  0x22   : > { %224 = vst [vmem:[%s1331_s29 + $0xdc] sm:$0xff] %v223_v22  ;;  %226 = vst [vmem:[%s1331_s29 + $0xe4] sm:$0xff] %v225_v23  ;;  %v227_v24 = vld [vmem:[%s1326_s28 + $0x4b0] sm:$0xff]  ;;  %v233_v27 = vld [vmem:[%s1326_s28 + $0x51c] sm:$0xff] }
  0x23   : > { %v231_v26 = vld [vmem:[%s1326_s28 + $0x514] sm:$0xff]  ;;  %228 = vst [vmem:[%s1331_s29 + $0xf0] sm:$0xff] %v227_v24  ;;  %230 = vst [vmem:[%s1331_s29 + $0xf8] sm:$0xff] %v229_v25  ;;  %v237_v29 = vld [vmem:[%s1326_s28 + $0x580] sm:$0xff] }
  0x24   : > { %232 = vst [vmem:[%s1331_s29 + $0x104] sm:$0xff] %v231_v26  ;;  %v235_v28 = vld [vmem:[%s1326_s28 + $0x578] sm:$0xff]  ;;  %234 = vst [vmem:[%s1331_s29 + $0x10c] sm:$0xff] %v233_v27  ;;  %v241_v31 = vld [vmem:[%s1326_s28 + $0x5e4] sm:$0xff] }
  0x25   : > { %236 = vst [vmem:[%s1331_s29 + $0x118] sm:$0xff] %v235_v28  ;;  %238 = vst [vmem:[%s1331_s29 + $0x120] sm:$0xff] %v237_v29  ;;  %v239_v30 = vld [vmem:[%s1326_s28 + $0x5dc] sm:$0xff]  ;;  %v988_v32 = vld [vmem:[%s1326_s28 + $0x10] sm:$0xf] }
  0x26   : > { %240 = vst [vmem:[%s1331_s29 + $0x12c] sm:$0xff] %v239_v30  ;;  %242 = vst [vmem:[%s1331_s29 + $0x134] sm:$0xff] %v241_v31  ;;  %v990_v33 = vld [vmem:[%s1326_s28 + $0x74] sm:$0xf]  ;;  %v992_v34 = vld [vmem:[%s1326_s28 + $0xd8] sm:$0xf] }
  0x27   : > { %989 = vst [vmem:[%s1331_s29 + $0x10] sm:$0xf] %v988_v32  ;;  %v994_v35 = vld [vmem:[%s1326_s28 + $0x13c] sm:$0xf]  ;;  %991 = vst [vmem:[%s1331_s29 + $0x24] sm:$0xf] %v990_v33 }
  0x28   : > { %993 = vst [vmem:[%s1331_s29 + $0x38] sm:$0xf] %v992_v34  ;;  %995 = vst [vmem:[%s1331_s29 + $0x4c] sm:$0xf] %v994_v35  ;;  %v996_v36 = vld [vmem:[%s1326_s28 + $0x1a0] sm:$0xf] }
  0x29   : > { %v998_v37 = vld [vmem:[%s1326_s28 + $0x204] sm:$0xf]  ;;  %v1000_v38 = vld [vmem:[%s1326_s28 + $0x268] sm:$0xf]  ;;  %997 = vst [vmem:[%s1331_s29 + $0x60] sm:$0xf] %v996_v36 }
  0x2a   : > { %999 = vst [vmem:[%s1331_s29 + $0x74] sm:$0xf] %v998_v37  ;;  %1001 = vst [vmem:[%s1331_s29 + $0x88] sm:$0xf] %v1000_v38  ;;  %v1002_v39 = vld [vmem:[%s1326_s28 + $0x2cc] sm:$0xf] }
  0x2b   : > { %v1004_v40 = vld [vmem:[%s1326_s28 + $0x330] sm:$0xf]  ;;  %v1006_v41 = vld [vmem:[%s1326_s28 + $0x394] sm:$0xf]  ;;  %1003 = vst [vmem:[%s1331_s29 + $0x9c] sm:$0xf] %v1002_v39 }
  0x2c   : > { %1005 = vst [vmem:[%s1331_s29 + $0xb0] sm:$0xf] %v1004_v40  ;;  %1007 = vst [vmem:[%s1331_s29 + $0xc4] sm:$0xf] %v1006_v41  ;;  %v1008_v42 = vld [vmem:[%s1326_s28 + $0x3f8] sm:$0xf] }
  0x2d   : > { %v1010_v43 = vld [vmem:[%s1326_s28 + $0x45c] sm:$0xf]  ;;  %v1012_v44 = vld [vmem:[%s1326_s28 + $0x4c0] sm:$0xf]  ;;  %1009 = vst [vmem:[%s1331_s29 + $0xd8] sm:$0xf] %v1008_v42 }
  0x2e   : > { %1011 = vst [vmem:[%s1331_s29 + $0xec] sm:$0xf] %v1010_v43  ;;  %1013 = vst [vmem:[%s1331_s29 + $0x100] sm:$0xf] %v1012_v44  ;;  %v1014_v45 = vld [vmem:[%s1326_s28 + $0x524] sm:$0xf] }
  0x2f   : > { %v1016_v46 = vld [vmem:[%s1326_s28 + $0x588] sm:$0xf]  ;;  %v1018_v47 = vld [vmem:[%s1326_s28 + $0x5ec] sm:$0xf]  ;;  %1015 = vst [vmem:[%s1331_s29 + $0x114] sm:$0xf] %v1014_v45 }
  0x30   : > { %1017 = vst [vmem:[%s1331_s29 + $0x128] sm:$0xf] %v1016_v46  ;;  %1019 = vst [vmem:[%s1331_s29 + $0x13c] sm:$0xf] %v1018_v47 }
  0x31 PF: > { %p1020_p8 = scmp.ge.s32.totalorder %s1253_s16, 1  ;;  %p294_p9 = scmp.lt.s32.totalorder %s1253_s16, 6 }
  0x33   : > { %p295_p10 = pnand %p1020_p8, %p294_p9 }
  0x34   : > { %s301_s30 = sand.u32 (!%p295_p10), 1, %s1237_s12   ;;  %v1255_v48 = vmov (!%p295_p10), 0   ;;  %v1188_v13 = vld [vmem:[%s1524_s0] sm:$0xff] (!%p295_p10)   ;;  %v1256_v16 = vmov (!%p295_p10), 0.0   ;;  %vm1257_vm0 = vmmov (!%p295_p10), 0   ;;  %s339_s8 = smul.u32 (!%p295_p10), 5, %s1245_s14  ;;  %v399_v27 = vlaneseq (!%p295_p10) }
  0x35   : > { %298 = sbr.rel (%p295_p10) target bundleno = 352 (0x160), region = 54  ;;  %670 = vmatprep.mubr.bf16.mxu0 (!%p295_p10), %v1255_v48  ;;  %713 = vmatprep.mubr.bf16.mxu1 (!%p295_p10), %v1255_v48 }
  0x36   : > { %s1113_s4 = smul.u32 (!%p295_p10), 320, %s301_s30  ;;  %p340_p11 = scmp.lt.s32.totalorder (!%p295_p10), %s339_s8, 24  ;;  %v1477_v28 = vshrl.u32 (!%p295_p10), %v399_v27, 7 }
  0x37   : > { %s1114_s18 = smul.u32 (!%p295_p10), 40, %s301_s30 }
  0x38   : > { %s1431_s5 = scalar_lea.vmem (!%p295_p10), [#allocation2], %s1113_s4  ;;  %v401_v29 = vsub.s32 (!%p295_p10), 0, %v1477_v28  ;;  %v405_v31 = vsub.s32 (!%p295_p10), 1, %v1477_v28  ;;  %v409_v42 = vsub.s32 (!%p295_p10), 2, %v1477_v28  ;;  %v413_v45 = vsub.s32 (!%p295_p10), 3, %v1477_v28 }
  0x39   : > { %v1158_v49 = vld [vmem:[%s1431_s5 + $0x4] ss:$20 sps:$4 sm:$0xff] (!%p295_p10)   ;;  %v1160_v50 = vld [vmem:[%s1431_s5] ss:$20 sps:$4 sm:$0xff] (!%p295_p10)   ;;  %v1163_v52 = vld [vmem:[%s1431_s5 + $0x28] ss:$20 sps:$4 sm:$0xff] (!%p295_p10)  }
  0x3a   : > { %638 = vmatprep.subr.bf16.mxu0 (!%p295_p10), %v1158_v49  ;;  %v1161_v51 = vld [vmem:[%s1431_s5 + $0x2c] ss:$20 sps:$4 sm:$0xff] (!%p295_p10)   ;;  %v1164_v53 = vld [vmem:[%s1431_s5 + $0x54] ss:$20 sps:$4 sm:$0xff] (!%p295_p10)   ;;  %v1166_v54 = vld [vmem:[%s1431_s5 + $0x50] ss:$20 sps:$4 sm:$0xff] (!%p295_p10)  }
  0x3b   : > { %639 = vmatpush1.bf16.msra.mxu0 (!%p295_p10), %v1160_v50  ;;  %v1167_v55 = vld [vmem:[%s1431_s5 + $0x7c] ss:$20 sps:$4 sm:$0xff] (!%p295_p10)   ;;  %v1179_v56 = vld [vmem:[%s1431_s5 + $0xc] ss:$20 sps:$4 sm:$0xff] (!%p295_p10)   ;;  %v1170_v59 = vld [vmem:[%s1431_s5 + $0xa4] ss:$20 sps:$4 sm:$0xff] (!%p295_p10)  }
  0x3c   : > { %640 = vmatprep.subr.bf16.mxu0 %v1161_v51  ;;  %v1181_v57 = vld [vmem:[%s1431_s5 + $0x8] ss:$20 sps:$4 sm:$0xff]   ;;  %v1169_v58 = vld [vmem:[%s1431_s5 + $0x78] ss:$20 sps:$4 sm:$0xff]   ;;  %681 = vmatprep.subr.bf16.mxu1 %v1179_v56  ;;  %v1187_v61 = vld [vmem:[%s1431_s5 + $0x30] ss:$20 sps:$4 sm:$0xff]  }
  0x3d   : > { %v1185_v60 = vld [vmem:[%s1431_s5 + $0x34] ss:$20 sps:$4 sm:$0xff]   ;;  %682 = vmatpush1.bf16.msra.mxu1 %v1181_v57  ;;  %v1190_v63 = vld [vmem:[%s1431_s5 + $0x5c] ss:$20 sps:$4 sm:$0xff]   ;;  %v1173_v0 = vld [vmem:[%s1431_s5 + $0xcc] ss:$20 sps:$4 sm:$0xff]  }
  0x3e   : > { %683 = vmatprep.subr.bf16.mxu1 %v1185_v60  ;;  %v1172_v62 = vld [vmem:[%s1431_s5 + $0xa0] ss:$20 sps:$4 sm:$0xff]   ;;  %v1192_v1 = vld [vmem:[%s1431_s5 + $0x58] ss:$20 sps:$4 sm:$0xff]   ;;  %v1175_v3 = vld [vmem:[%s1431_s5 + $0xc8] ss:$20 sps:$4 sm:$0xff]  }
  0x3f   : > { %641 = vmatpush1.bf16.msra.mxu0 %v1163_v52  ;;  %v1194_v2 = vld [vmem:[%s1431_s5 + $0x84] ss:$20 sps:$4 sm:$0xff]   ;;  %v1176_v4 = vld [vmem:[%s1431_s5 + $0xf4] ss:$20 sps:$4 sm:$0xff]   ;;  %v1198_v6 = vld [vmem:[%s1431_s5 + $0xac] ss:$20 sps:$4 sm:$0xff]  }
  0x40   : > { %642 = vmatprep.subr.bf16.mxu0 %v1164_v53  ;;  %v1196_v5 = vld [vmem:[%s1431_s5 + $0x80] ss:$20 sps:$4 sm:$0xff]   ;;  %v1178_v7 = vld [vmem:[%s1431_s5 + $0xf0] ss:$20 sps:$4 sm:$0xff]   ;;  %v1200_v9 = vld [vmem:[%s1431_s5 + $0xa8] ss:$20 sps:$4 sm:$0xff]  }
  0x41   : > { %684 = vmatpush1.bf16.msra.mxu1 %v1187_v61  ;;  %v1182_v8 = vld [vmem:[%s1431_s5 + $0x11c] ss:$20 sps:$4 sm:$0xff]   ;;  %v1202_v10 = vld [vmem:[%s1431_s5 + $0xd4] ss:$20 sps:$4 sm:$0xff]   ;;  %v1184_v11 = vld [vmem:[%s1431_s5 + $0x118] ss:$20 sps:$4 sm:$0xff]  }
  0x42   : > { %685 = vmatprep.subr.bf16.mxu1 %v1190_v63  ;;  %v1204_v12 = vld [vmem:[%s1431_s5 + $0xd0] ss:$20 sps:$4 sm:$0xff]   ;;  %v1208_v17 = vld [vmem:[%s1431_s5 + $0xf8] ss:$20 sps:$4 sm:$0xff]   ;;  %v1212_v20 = vld [vmem:[%s1431_s5 + $0x120] ss:$20 sps:$4 sm:$0xff]  }
  0x43   : > { %643 = vmatpush1.bf16.msra.mxu0 %v1166_v54  ;;  %v1206_v14 = vld [vmem:[%s1431_s5 + $0xfc] ss:$20 sps:$4 sm:$0xff]   ;;  %v1210_v18 = vld [vmem:[%s1431_s5 + $0x124] ss:$20 sps:$4 sm:$0xff]   ;;  %v1197_v21 = vld [vmem:[%s1431_s5 + $0x60] ss:$20 sps:$4 sm:$0xff]  }
  0x44   : > { %644 = vmatprep.subr.bf16.mxu0 %v1167_v55  ;;  %v1189_v15 = vld [vmem:[%s1431_s5 + $0x10] ss:$20 sps:$4 sm:$0xff]   ;;  %v1193_v19 = vld [vmem:[%s1431_s5 + $0x38] ss:$20 sps:$4 sm:$0xff]   ;;  %v1201_v22 = vld [vmem:[%s1431_s5 + $0x88] ss:$20 sps:$4 sm:$0xff]  }
  0x45   : > { %686 = vmatpush1.bf16.msra.mxu1 %v1192_v1  ;;  %v1205_v23 = vld [vmem:[%s1431_s5 + $0xb0] ss:$20 sps:$4 sm:$0xff]   ;;  %v1209_v24 = vld [vmem:[%s1431_s5 + $0xd8] ss:$20 sps:$4 sm:$0xff]   ;;  %v1213_v25 = vld [vmem:[%s1431_s5 + $0x100] ss:$20 sps:$4 sm:$0xff]  }
  0x46   : > { %687 = vmatprep.subr.bf16.mxu1 %v1194_v2  ;;  %v1214_v26 = vld [vmem:[%s1431_s5 + $0x128] ss:$20 sps:$4 sm:$0xff]   ;;  %s1536_s8 = smov (!%p340_p11, %s339_s8), 24  ;;  %s1488_s12 = scalar_lea.vmem [#allocation3], %s1114_s18 }
  0x47   : > { %645 = vmatpush1.bf16.msra.mxu0 %v1169_v58  ;;  %s342_s11 = scalar_lea.vmem %s1526_s2, %s1536_s8  ;;  %s1082_s19 = smul.u32 (%p1313_p6), 20, %s1245_s14 }
  0x48   : > { %646 = vmatprep.subr.bf16.mxu0 %v1170_v59  ;;  %v397_v30 = vld [vmem:[%s342_s11] sm:$0x1f] }
  0x49   : > { %688 = vmatpush1.bf16.msra.mxu1 %v1196_v5  ;;  %v402_v32 = vrot.slane %v397_v30, %v401_v29  ;;  %v406_v33 = vrot.slane %v397_v30, %v405_v31  ;;  %v410_v52 = vrot.slane %v397_v30, %v409_v42  ;;  %v414_v54 = vrot.slane %v397_v30, %v413_v45  ;;  %s845_s24 = scalar_lea.vmem (%p1313_p6), %s1527_s3, %s1082_s19 }
  0x4a   : > { %689 = vmatprep.subr.bf16.mxu1 %v1198_v6 }
  0x4b   : > { %647 = vmatpush1.bf16.msra.mxu0 %v1172_v62 }
  0x4c   : > { %648 = vmatprep.subr.bf16.mxu0 %v1173_v0 }
  0x4d   : > { %690 = vmatpush1.bf16.msra.mxu1 %v1200_v9 }
  0x4e   : > { %691 = vmatprep.subr.bf16.mxu1 %v1202_v10  ;;  %v417_v10 = vsub.s32 4, %v1477_v28 }
  0x4f   : > { %649 = vmatpush1.bf16.msra.mxu0 %v1175_v3 }
  0x50   : > { %650 = vmatprep.subr.bf16.mxu0 %v1176_v4 }
  0x51   : > { %692 = vmatpush1.bf16.msra.mxu1 %v1204_v12 }
  0x52   : > { %693 = vmatprep.subr.bf16.mxu1 %v1206_v14 }
  0x53   : > { %651 = vmatpush1.bf16.msra.mxu0 %v1178_v7 }
  0x54   : > { %652 = vmatprep.subr.bf16.mxu0 %v1182_v8 }
  0x55   : > { %694 = vmatpush1.bf16.msra.mxu1 %v1208_v17 }
  0x56   : > { %695 = vmatprep.subr.bf16.mxu1 %v1210_v18 }
  0x57   : > { %653 = vmatpush1.bf16.msra.mxu0 %v1184_v11  ;;  %v418_v11 = vrot.slane %v397_v30, %v417_v10 }
  0x58   : > { %1092 = vmatprep.subr.bf16.mxu0 %v1256_v16 }
  0x59   : > { %696 = vmatpush1.bf16.msra.mxu1 %v1212_v20 }
  0x5a   : > { %671 = vmatmul.mubr.bf16.vlgmr.msra.gmra.mrb[0].mxu0 %v1188_v13 }
  0x5b   : > { %1093 = vmatpush3.bf16.msra.mxu0 %v1189_v15  ;;  %1108 = vmatprep.mubr.msk.bf16.mxu0 %vm1257_vm0, %v1256_v16 }
  0x5c   : > { %1094 = vmatprep.subr.bf16.mxu0 %v1256_v16  ;;  %714 = vmatmul.mubr.bf16.vlgmr.msra.gmra.mrb[0].mxu1 %v1188_v13 }
  0x5f   : > { %1095 = vmatpush3.bf16.msra.mxu0 %v1193_v19 }
  0x60   : > { %1096 = vmatprep.subr.bf16.mxu0 %v1256_v16 }
  0x63   : > { %1097 = vmatpush3.bf16.msra.mxu0 %v1197_v21 }
  0x64   : > { %1098 = vmatprep.subr.bf16.mxu0 %v1256_v16 }
  0x67   : > { %1099 = vmatpush3.bf16.msra.mxu0 %v1201_v22 }
  0x68   : > { %1100 = vmatprep.subr.bf16.mxu0 %v1256_v16 }
  0x6b   : > { %1101 = vmatpush3.bf16.msra.mxu0 %v1205_v23 }
  0x6c   : > { %1102 = vmatprep.subr.bf16.mxu0 %v1256_v16 }
  0x6f   : > { %1103 = vmatpush3.bf16.msra.mxu0 %v1209_v24 }
  0x70   : > { %1104 = vmatprep.subr.bf16.mxu0 %v1256_v16 }
  0x73   : > { %1105 = vmatpush3.bf16.msra.mxu0 %v1213_v25 }
  0x74   : > { %1106 = vmatprep.subr.bf16.mxu0 %v1256_v16 }
  0x77   : > { %1107 = vmatpush3.bf16.msra.mxu0 %v1214_v26 }
  0x7a   : > { %1109 = vmatmul.mubr.bf16.vlgmr.msra.gmra.mrb[4].mxu0 %v1188_v13 }
 0x12d   : > { %v672_v34 = vpop.f32.mrb[0].mxu0 }
 0x12e   : > { %v673_v35 = vadd.f32 %v672_v34, %v402_v32  ;;  %v674_v36 = vpop.f32.mrb[1].mxu0 }
 0x12f   : > { %v675_v37 = vadd.f32 %v674_v36, %v406_v33  ;;  %v676_v38 = vpop.f32.mrb[2].mxu0  ;;  %v715_v56 = vpop.f32.mrb[0].mxu1 }
 0x130   : > { %vm765_vm1 = vcmp.ge.f32.partialorder %v673_v35, 0.0  ;;  %v775_v39 = vmul.f32 0.1, %v673_v35  ;;  %v677_v40 = vadd.f32 %v676_v38, %v402_v32  ;;  %v678_v41 = vpop.f32.mrb[3].mxu0  ;;  %v716_v57 = vadd.f32 %v715_v56, %v410_v52  ;;  %v717_v58 = vpop.f32.mrb[1].mxu1 }
 0x131   : > { %vm766_vm2 = vcmp.ge.f32.partialorder %v675_v37, 0.0  ;;  %v776_v43 = vmul.f32 0.1, %v675_v37  ;;  %v679_v44 = vadd.f32 %v678_v41, %v406_v33  ;;  %v718_v59 = vadd.f32 %v717_v58, %v414_v54  ;;  %v719_v60 = vpop.f32.mrb[2].mxu1 }
 0x132   : > { %v785_v46 = vsel %vm765_vm1, %v673_v35, %v775_v39  ;;  %vm770_vm3 = vcmp.ge.f32.partialorder %v677_v40, 0.0  ;;  %v780_v47 = vmul.f32 0.1, %v677_v40  ;;  %vm767_vm5 = vcmp.ge.f32.partialorder %v716_v57, 0.0  ;;  %v721_v63 = vpop.f32.mrb[3].mxu1 }
 0x133   : > { %v786_v48 = vsel %vm766_vm2, %v675_v37, %v776_v43  ;;  %vm771_vm4 = vcmp.ge.f32.partialorder %v679_v44, 0.0  ;;  %v781_v49 = vmul.f32 0.1, %v679_v44  ;;  %v777_v61 = vmul.f32 0.1, %v716_v57 }
 0x134   : > { %v1076_v50 = vpack.c.bf16 %v786_v48, %v785_v46  ;;  %v790_v51 = vsel %vm770_vm3, %v677_v40, %v780_v47  ;;  %v720_v62 = vadd.f32 %v719_v60, %v410_v52  ;;  %vm768_vm6 = vcmp.ge.f32.partialorder %v718_v59, 0.0 }
 0x135   : > { %v791_v53 = vsel %vm771_vm4, %v679_v44, %v781_v49  ;;  %v778_v0 = vmul.f32 0.1, %v718_v59  ;;  %v722_v1 = vadd.f32 %v721_v63, %v414_v54  ;;  %v787_v2 = vsel %vm767_vm5, %v716_v57, %v777_v61 }
 0x136   : > { %827 = vst [vmem:[%s1488_s12] sm:$0xff] %v1076_v50  ;;  %v1079_v55 = vpack.c.bf16 %v791_v53, %v790_v51  ;;  %vm772_vm7 = vcmp.ge.f32.partialorder %v720_v62, 0.0  ;;  %v782_v3 = vmul.f32 0.1, %v720_v62 }
 0x137   : > { %v788_v4 = vsel %vm768_vm6, %v718_v59, %v778_v0  ;;  %vm773_vm8 = vcmp.ge.f32.partialorder %v722_v1, 0.0  ;;  %v783_v5 = vmul.f32 0.1, %v722_v1 }
 0x138   : > { %830 = vst [vmem:[%s1488_s12 + $0x14] sm:$0xff] %v1079_v55  ;;  %v1077_v6 = vpack.c.bf16 %v788_v4, %v787_v2  ;;  %v792_v7 = vsel %vm772_vm7, %v720_v62, %v782_v3 }
 0x139   : > { %v793_v8 = vsel %vm773_vm8, %v722_v1, %v783_v5 }
 0x13a   : > { %828 = vst [vmem:[%s1488_s12 + $0x8] sm:$0xff] %v1077_v6  ;;  %v1080_v9 = vpack.c.bf16 %v793_v8, %v792_v7 }
 0x13c   : > { %831 = vst [vmem:[%s1488_s12 + $0x1c] sm:$0xff] %v1080_v9 }
 0x13d   : > { %v860_v24 = vld [vmem:[%s1488_s12] sm:$0xff] (%p1313_p6) }
 0x13e   : > { %861 = vst [vmem:[%s845_s24] sm:$0xff] (%p1313_p6), %v860_v24 }
 0x13f   : > { %v864_v26 = vld [vmem:[%s1488_s12 + $0x14] sm:$0xff] (%p1313_p6) }
 0x140   : > { %865 = vst [vmem:[%s845_s24 + $0x64] sm:$0xff] (%p1313_p6), %v864_v26 }
 0x141   : > { %v862_v25 = vld [vmem:[%s1488_s12 + $0x8] sm:$0xff] (%p1313_p6) }
 0x142   : > { %863 = vst [vmem:[%s845_s24 + $0x8] sm:$0xff] (%p1313_p6), %v862_v25 }
 0x143   : > { %v866_v27 = vld [vmem:[%s1488_s12 + $0x1c] sm:$0xff] (%p1313_p6) }
 0x144   : > { %867 = vst [vmem:[%s845_s24 + $0x6c] sm:$0xff] (%p1313_p6), %v866_v27 }
 0x14d   : > { %v758_v12 = vpop.f32.mrb[4].mxu0 }
 0x14e   : > { %v759_v13 = vadd.f32 %v758_v12, %v418_v11  ;;  %v1110_v14 = vpop.f32.mrb[5].mxu0 }
 0x14f   : > { %v761_v15 = vpop.f32.mrb[6].mxu0 }
 0x150   : > { %vm769_vm9 = vcmp.ge.f32.partialorder %v759_v13, 0.0  ;;  %v779_v16 = vmul.f32 0.1, %v759_v13  ;;  %v762_v17 = vadd.f32 %v761_v15, %v418_v11  ;;  %v1111_v18 = vpop.f32.mrb[7].mxu0 }
 0x151   : > { %839 = sbr.rel (!%p1313_p6) target bundleno = 352 (0x160), region = 62 }
 0x152   : > { %v789_v19 = vsel %vm769_vm9, %v759_v13, %v779_v16  ;;  %vm774_vm10 = vcmp.ge.f32.partialorder %v762_v17, 0.0  ;;  %v784_v20 = vmul.f32 0.1, %v762_v17 }
 0x153   : > { %v1078_v21 = vpack.c.bf16 %v789_v19, %v789_v19 }
 0x154   : > { %v794_v22 = vsel %vm774_vm10, %v762_v17, %v784_v20 }
 0x155   : > { %829 = vst [vmem:[%s1488_s12 + $0x10] sm:$0xf] %v1078_v21  ;;  %v1081_v23 = vpack.c.bf16 %v794_v22, %v794_v22 }
 0x157   : > { %832 = vst [vmem:[%s1488_s12 + $0x24] sm:$0xf] %v1081_v23 }
 0x15c   : > { %v1069_v28 = vld [vmem:[%s1488_s12 + $0x10] sm:$0xf] }
 0x15d   : > { %1070 = vst [vmem:[%s845_s24 + $0x10] sm:$0xf] %v1069_v28 }
 0x15e   : > { %v1071_v29 = vld [vmem:[%s1488_s12 + $0x24] sm:$0xf] }
 0x15f   : > { %1072 = vst [vmem:[%s845_s24 + $0x74] sm:$0xf] %v1071_v29 }
 0x160 PF: > { %s13_s16 = sadd.s32 1, %s1253_s16   ;;  %s1529_s12 = smov %s1241_s13 }
 0x161   : > { %p10_p12 = scmp.ge.s32.totalorder %s13_s16, 7   ;;  %s1530_s13 = smov %s1318_s22 }
 0x162   : > { %s1531_s14 = smov %s1249_s15  ;;  %s1532_s15 = smov %s1534_s17 }
 0x163   :  { %12 = sbr.rel (!%p10_p12) target bundleno = 3 (0x3), region = 137 }

// kernel: stfan_forward.147
= control target key start
LH: loop header
LB: loop body
LE: loop exit
PB: predicated region body
PF: predicated region fallthrough
CT: control target
= control target key end

     0   :  { %s1227_s12 = smov 0   ;;  %s1229_s13 = smov 0   ;;  %s1349_s0 = inlined_call_operand.vmem [shape: bf16[16,3200], index: 0, kind: input, shape index: {}]   ;;  %s1350_s1 = inlined_call_operand.vmem [shape: bf16[3200,128], index: 1, kind: input, shape index: {}]   ;;  %s1351_s2 = inlined_call_operand.vmem [shape: f32[1,128], index: 2, kind: input, shape index: {}]   ;;  %s1352_s3 = inlined_call_operand.vmem [shape: bf16[16,128], index: 3, kind: output, shape index: {}]  }
   0x1   :  { %s1231_s14 = smov 0   ;;  %s1233_s15 = smov 0  }
   0x2   :  { %s1235_s16 = smov 0  }
   0x3 LB: > { %s25_s17 = sadd.s32 1, %s1198_s15  ;;  %p48_p1 = scmp.ne.s32.totalorder %s1190_s13, %s1186_s12  ;;  %s1202_s16 = sphi %s1235_s16, %s13_s16   ;;  %s1198_s15 = sphi %s1233_s15, %s1356_s15   ;;  %s1194_s14 = sphi %s1231_s14, %s1355_s14   ;;  %s1190_s13 = sphi %s1229_s13, %s1354_s13   ;;  %s1186_s12 = sphi %s1227_s12, %s1353_s12  }
   0x4   : > { %p26_p0 = scmp.ge.s32.totalorder %s25_s17, 5  ;;  %p49_p2 = scmp.eq.s32.totalorder %s1202_s16, 0 }
   0x5   : > { %s41_s19 = sadd.s32 1, %s1190_s13  ;;  %p929_p5 = scmp.ge.s32.totalorder %s1202_s16, 5 }
   0x6   : > { %s1358_s17 = smov (%p26_p0, %s25_s17), 0  ;;  %p50_p3 = por %p49_p2, %p48_p1 }
   0x7   : > { %s37_s18 = ssub.s32 %s1198_s15, %s1358_s17  ;;  %162 = sbr.rel (%p929_p5) target bundleno = 22 (0x16), region = 20 }
   0x8   : > { %p39_p4 = scmp.eq.s32.totalorder %s37_s18, 0 }
   0xa   : > { %s1262_s20 = scalar_select %p39_p4, %s1190_s13, %s41_s19  }
   0xe   : > { %165 = sbr.rel (!%p50_p3) target bundleno = 22 (0x16), region = 24  ;;  %s167_s21 = sand.u32 (%p50_p3), 1, %s1190_s13  }
   0xf   : > { %s991_s22 = smul.u32 (%p50_p3), 20, %s1198_s15 }
  0x10   : > { %s1072_s23 = smul.u32 (%p50_p3), 40, %s167_s21 }
  0x11   : > { %s175_s26 = scalar_lea.vmem (%p50_p3), %s1349_s0, %s991_s22 }
  0x12   : > { %v190_v0 = vld [vmem:[%s175_s26] sm:$0xff] (%p50_p3)  ;;  %v192_v1 = vld [vmem:[%s175_s26 + $0x8] sm:$0xff] (%p50_p3)  ;;  %s169_s27 = scalar_lea.vmem (%p50_p3), [#allocation3], %s1072_s23  ;;  %v931_v4 = vld [vmem:[%s175_s26 + $0x10] sm:$0xf] (%p50_p3) }
  0x13   : > { %v194_v2 = vld [vmem:[%s175_s26 + $0x64] sm:$0xff] (%p50_p3)  ;;  %191 = vst [vmem:[%s169_s27] sm:$0xff] (%p50_p3), %v190_v0  ;;  %193 = vst [vmem:[%s169_s27 + $0x8] sm:$0xff] (%p50_p3), %v192_v1  ;;  %v196_v3 = vld [vmem:[%s175_s26 + $0x6c] sm:$0xff] (%p50_p3) }
  0x14   : > { %195 = vst [vmem:[%s169_s27 + $0x14] sm:$0xff] (%p50_p3), %v194_v2  ;;  %v933_v5 = vld [vmem:[%s175_s26 + $0x74] sm:$0xf] (%p50_p3)  ;;  %197 = vst [vmem:[%s169_s27 + $0x1c] sm:$0xff] (%p50_p3), %v196_v3 }
  0x15   : > { %932 = vst [vmem:[%s169_s27 + $0x10] sm:$0xf] %v931_v4  ;;  %934 = vst [vmem:[%s169_s27 + $0x24] sm:$0xf] %v933_v5 }
  0x16 PF: > { %p935_p6 = scmp.ge.s32.totalorder %s1202_s16, 1  ;;  %p225_p7 = scmp.lt.s32.totalorder %s1202_s16, 6 }
  0x18   : > { %p226_p8 = pnand %p935_p6, %p225_p7 }
  0x19   : > { %s232_s28 = sand.u32 (!%p226_p8), 1, %s1186_s12   ;;  %s271_s29 = smul.u32 (!%p226_p8), 80, %s1194_s14 }
  0x1a   : > { %229 = sbr.rel (%p226_p8) target bundleno = 340 (0x154), region = 54  ;;  %p937_p10 = scmp.ne.s32.totalorder (!%p226_p8), %s1194_s14, 0 }
  0x1b   : > { %s1073_s30 = smul.u32 (!%p226_p8), 40, %s232_s28  ;;  %p272_p9 = scmp.lt.s32.totalorder (!%p226_p8), %s271_s29, 399 }
  0x1d   : > { %s1279_s8 = scalar_lea.vmem (!%p226_p8), [#allocation3], %s1073_s30 }
  0x21   : > { %s1360_s29 = smov (!%p272_p9, %s271_s29), 399  ;;  %296 = sbr.rel (%p937_p10) target bundleno = 40 (0x28), region = 62 }
  0x22   : > { %s936_s4 = sshll.u32 %s1360_s29, 2  ;;  %v1204_v6 = vmov (!%p937_p10), 0.0  }
  0x23   : > { %s1277_s7 = scalar_lea.vmem %s1350_s1, %s936_s4  ;;  %297 = vst [vmem:[#allocation2] sm:$0xff] (!%p937_p10), %v1204_v6  ;;  %298 = vst [vmem:[#allocation2 + $0x8] sm:$0xff] (!%p937_p10), %v1204_v6 }
  0x28 PF: > { %v1117_v7 = vld [vmem:[%s1277_s7 + $0x40] sm:$0xff]   ;;  %v1121_v11 = vld [vmem:[%s1277_s7 + $0x48] sm:$0xff]   ;;  %v1125_v15 = vld [vmem:[%s1277_s7 + $0x50] sm:$0xff]   ;;  %v1205_v41 = vmov 0.0   ;;  %vm1206_vm0 = vmmov 0   ;;  %p983_p11 = scmp.ne.s32.totalorder %s1194_s14, 4 }
  0x29   : > { %v1118_v8 = vld [vmem:[%s1277_s7 + $0xc0] sm:$0xff]   ;;  %999 = vmatprep.subr.bf16.mxu0 %v1117_v7  ;;  %v1122_v12 = vld [vmem:[%s1277_s7 + $0xc8] sm:$0xff]   ;;  %v1126_v16 = vld [vmem:[%s1277_s7 + $0xd0] sm:$0xff]  }
  0x2a   : > { %v1119_v9 = vld [vmem:[%s1277_s7] sm:$0xff]   ;;  %1021 = vmatprep.subr.bf16.mxu1 %v1118_v8  ;;  %v1123_v13 = vld [vmem:[%s1277_s7 + $0x8] sm:$0xff]   ;;  %v1127_v17 = vld [vmem:[%s1277_s7 + $0x10] sm:$0xff]  }
  0x2b   : > { %v1120_v10 = vld [vmem:[%s1277_s7 + $0x80] sm:$0xff]   ;;  %1000 = vmatpush3.bf16.msra.mxu0 %v1119_v9  ;;  %v1124_v14 = vld [vmem:[%s1277_s7 + $0x88] sm:$0xff]   ;;  %v1128_v18 = vld [vmem:[%s1277_s7 + $0x90] sm:$0xff]  }
  0x2c   : > { %1022 = vmatpush3.bf16.msra.mxu1 %v1120_v10  ;;  %1001 = vmatprep.subr.bf16.mxu0 %v1121_v11  ;;  %v1129_v19 = vld [vmem:[%s1277_s7 + $0x58] sm:$0xff]   ;;  %v1133_v23 = vld [vmem:[%s1277_s7 + $0x60] sm:$0xff]   ;;  %v1137_v27 = vld [vmem:[%s1277_s7 + $0x68] sm:$0xff]  }
  0x2d   : > { %1023 = vmatprep.subr.bf16.mxu1 %v1122_v12  ;;  %v1130_v20 = vld [vmem:[%s1277_s7 + $0xd8] sm:$0xff]   ;;  %v1134_v24 = vld [vmem:[%s1277_s7 + $0xe0] sm:$0xff]   ;;  %v1138_v28 = vld [vmem:[%s1277_s7 + $0xe8] sm:$0xff]  }
  0x2e   : > { %v1131_v21 = vld [vmem:[%s1277_s7 + $0x18] sm:$0xff]   ;;  %v1135_v25 = vld [vmem:[%s1277_s7 + $0x20] sm:$0xff]   ;;  %v1139_v29 = vld [vmem:[%s1277_s7 + $0x28] sm:$0xff]  }
  0x2f   : > { %1002 = vmatpush3.bf16.msra.mxu0 %v1123_v13  ;;  %v1132_v22 = vld [vmem:[%s1277_s7 + $0x98] sm:$0xff]   ;;  %v1136_v26 = vld [vmem:[%s1277_s7 + $0xa0] sm:$0xff]   ;;  %v1140_v30 = vld [vmem:[%s1277_s7 + $0xa8] sm:$0xff]  }
  0x30   : > { %1024 = vmatpush3.bf16.msra.mxu1 %v1124_v14  ;;  %1003 = vmatprep.subr.bf16.mxu0 %v1125_v15  ;;  %v1141_v31 = vld [vmem:[%s1277_s7 + $0x70] sm:$0xff]   ;;  %v1145_v35 = vld [vmem:[%s1277_s7 + $0x78] sm:$0xff]   ;;  %v1155_v44 = vld [vmem:[%s1277_s7 + $0x100] sm:$0xff]  }
  0x31   : > { %1025 = vmatprep.subr.bf16.mxu1 %v1126_v16  ;;  %v1142_v32 = vld [vmem:[%s1277_s7 + $0xf0] sm:$0xff]   ;;  %v1146_v36 = vld [vmem:[%s1277_s7 + $0xf8] sm:$0xff]   ;;  %v1156_v45 = vld [vmem:[%s1277_s7 + $0x108] sm:$0xff]  }
  0x32   : > { %v1143_v33 = vld [vmem:[%s1277_s7 + $0x30] sm:$0xff]   ;;  %v1147_v37 = vld [vmem:[%s1277_s7 + $0x38] sm:$0xff]   ;;  %v1159_v48 = vld [vmem:[%s1277_s7 + $0x120] sm:$0xff]  }
  0x33   : > { %1004 = vmatpush3.bf16.msra.mxu0 %v1127_v17  ;;  %v1144_v34 = vld [vmem:[%s1277_s7 + $0xb0] sm:$0xff]   ;;  %v1148_v38 = vld [vmem:[%s1277_s7 + $0xb8] sm:$0xff]   ;;  %v1160_v49 = vld [vmem:[%s1277_s7 + $0x128] sm:$0xff]  }
  0x34   : > { %1026 = vmatpush3.bf16.msra.mxu1 %v1128_v18  ;;  %1005 = vmatprep.subr.bf16.mxu0 %v1129_v19  ;;  %v1149_v39 = vld [vmem:[%s1279_s8] ss:$20 sps:$4 sm:$0xff]   ;;  %v1151_v40 = vld [vmem:[%s1279_s8 + $0x4] ss:$20 sps:$4 sm:$0xff]   ;;  %v1152_v42 = vld [vmem:[%s1279_s8 + $0x8] ss:$20 sps:$4 sm:$0xff]  }
  0x35   : > { %1027 = vmatprep.subr.bf16.mxu1 %v1130_v20  ;;  %v1154_v43 = vld [vmem:[%s1279_s8 + $0xc] ss:$20 sps:$4 sm:$0xff]   ;;  %685 = vmatprep.mubr.bf16.mxu0 %v1151_v40  ;;  %v1163_v52 = vld [vmem:[%s1279_s8 + $0x10] ss:$20 sps:$4 sm:$0xff]  }
  0x36   : > { %726 = vmatprep.mubr.bf16.mxu1 %v1154_v43  ;;  %v1157_v46 = vld [vmem:[%s1277_s7 + $0x110] sm:$0xff]   ;;  %v1158_v47 = vld [vmem:[%s1277_s7 + $0x118] sm:$0xff]   ;;  %v299_v3 = vld [vmem:[#allocation2] sm:$0xff] }
  0x37   : > { %1006 = vmatpush3.bf16.msra.mxu0 %v1131_v21  ;;  %v1161_v50 = vld [vmem:[%s1277_s7 + $0x130] sm:$0xff]   ;;  %v1162_v51 = vld [vmem:[%s1277_s7 + $0x138] sm:$0xff]   ;;  %v300_v7 = vld [vmem:[#allocation2 + $0x8] sm:$0xff] }
  0x38   : > { %1028 = vmatpush3.bf16.msra.mxu1 %v1132_v22  ;;  %1007 = vmatprep.subr.bf16.mxu0 %v1133_v23  ;;  %v984_v15 = vld [vmem:[%s1351_s2] ss:$0 sm:$0xff] (!%p983_p11) }
  0x39   : > { %1029 = vmatprep.subr.bf16.mxu1 %v1134_v24 }
  0x3b   : > { %1008 = vmatpush3.bf16.msra.mxu0 %v1135_v25 }
  0x3c   : > { %1030 = vmatpush3.bf16.msra.mxu1 %v1136_v26  ;;  %1009 = vmatprep.subr.bf16.mxu0 %v1137_v27 }
  0x3d   : > { %1031 = vmatprep.subr.bf16.mxu1 %v1138_v28 }
  0x3f   : > { %1010 = vmatpush3.bf16.msra.mxu0 %v1139_v29 }
  0x40   : > { %1032 = vmatpush3.bf16.msra.mxu1 %v1140_v30  ;;  %1011 = vmatprep.subr.bf16.mxu0 %v1141_v31 }
  0x41   : > { %1033 = vmatprep.subr.bf16.mxu1 %v1142_v32 }
  0x43   : > { %1012 = vmatpush3.bf16.msra.mxu0 %v1143_v33 }
  0x44   : > { %1034 = vmatpush3.bf16.msra.mxu1 %v1144_v34  ;;  %1013 = vmatprep.subr.bf16.mxu0 %v1145_v35 }
  0x45   : > { %1035 = vmatprep.subr.bf16.mxu1 %v1146_v36 }
  0x47   : > { %1014 = vmatpush3.bf16.msra.mxu0 %v1147_v37 }
  0x48   : > { %1036 = vmatpush3.bf16.msra.mxu1 %v1148_v38  ;;  %1052 = vmatprep.subr.bf16.mxu0 %v1205_v41 }
  0x4a   : > { %686 = vmatmul.mubr.bf16.vlgmr.msra.gmra.mrb[0].mxu0 %v1149_v39 }
  0x4b   : > { %727 = vmatmul.mubr.bf16.vlgmr.msra.gmra.mrb[0].mxu1 %v1152_v42  ;;  %1053 = vmatpush3.bf16.msra.mxu0 %v1155_v44 }
  0x4c   : > { %1054 = vmatprep.subr.bf16.mxu0 %v1205_v41  ;;  %1068 = vmatprep.mubr.msk.bf16.mxu0 %vm1206_vm0, %v1205_v41 }
  0x4f   : > { %1055 = vmatpush3.bf16.msra.mxu0 %v1156_v45 }
  0x50   : > { %1056 = vmatprep.subr.bf16.mxu0 %v1205_v41 }
  0x53   : > { %1057 = vmatpush3.bf16.msra.mxu0 %v1157_v46 }
  0x54   : > { %1058 = vmatprep.subr.bf16.mxu0 %v1205_v41 }
  0x57   : > { %1059 = vmatpush3.bf16.msra.mxu0 %v1158_v47 }
  0x58   : > { %1060 = vmatprep.subr.bf16.mxu0 %v1205_v41 }
  0x5b   : > { %1061 = vmatpush3.bf16.msra.mxu0 %v1159_v48 }
  0x5c   : > { %1062 = vmatprep.subr.bf16.mxu0 %v1205_v41 }
  0x5f   : > { %1063 = vmatpush3.bf16.msra.mxu0 %v1160_v49 }
  0x60   : > { %1064 = vmatprep.subr.bf16.mxu0 %v1205_v41 }
  0x63   : > { %1065 = vmatpush3.bf16.msra.mxu0 %v1161_v50 }
  0x64   : > { %1066 = vmatprep.subr.bf16.mxu0 %v1205_v41 }
  0x67   : > { %1067 = vmatpush3.bf16.msra.mxu0 %v1162_v51 }
  0x6a   : > { %1069 = vmatmul.mubr.bf16.vlgmr.msra.gmra.mrb[4].mxu0 %v1163_v52 }
 0x11d   : > { %v1015_v53 = vpop.f32.mrb[0].mxu0 }
 0x11e   : > { %v1037_v54 = vpop.f32.mrb[0].mxu1  ;;  %v1016_v55 = vpop.f32.mrb[1].mxu0 }
 0x11f   : > { %v1017_v56 = vadd.f32 %v1016_v55, %v1015_v53  ;;  %v1038_v57 = vpop.f32.mrb[1].mxu1  ;;  %v1018_v58 = vpop.f32.mrb[2].mxu0 }
 0x120   : > { %v1039_v59 = vadd.f32 %v1038_v57, %v1037_v54  ;;  %v1040_v60 = vpop.f32.mrb[2].mxu1  ;;  %v1019_v61 = vpop.f32.mrb[3].mxu0 }
 0x121   : > { %v1020_v62 = vadd.f32 %v1019_v61, %v1018_v58  ;;  %v1041_v63 = vpop.f32.mrb[3].mxu1 }
 0x122   : > { %v1042_v0 = vadd.f32 %v1041_v63, %v1040_v60  ;;  %v729_v1 = vadd.f32 %v1039_v59, %v1017_v56 }
 0x124   : > { %v732_v2 = vadd.f32 %v1042_v0, %v1020_v62 }
 0x13d   : > { %v769_v4 = vpop.f32.mrb[4].mxu0 }
 0x13e   : > { %v770_v5 = vadd.f32 %v769_v4, %v729_v1  ;;  %v1070_v6 = vpop.f32.mrb[5].mxu0  ;;  %783 = sbr.rel (%p983_p11) target bundleno = 340 (0x154), region = 66 }
 0x13f   : > { %v772_v8 = vpop.f32.mrb[6].mxu0 }
 0x140   : > { %v776_v9 = vadd.f32 %v770_v5, %v299_v3  ;;  %v773_v10 = vadd.f32 %v772_v8, %v732_v2  ;;  %v1071_v11 = vpop.f32.mrb[7].mxu0 }
 0x142   : > { %778 = vst [vmem:[#allocation2] sm:$0xff] %v776_v9  ;;  %v777_v12 = vadd.f32 %v773_v10, %v300_v7 }
 0x144   : > { %779 = vst [vmem:[#allocation2 + $0x8] sm:$0xff] %v777_v12 }
 0x149   : > { %v784_v13 = vld [vmem:[#allocation2] sm:$0xff] }
 0x14a   : > { %v793_v16 = vadd.f32 %v984_v15, %v784_v13 }
 0x14b   : > { %v785_v14 = vld [vmem:[#allocation2 + $0x8] sm:$0xff] }
 0x14c   : > { %v794_v17 = vadd.f32 %v984_v15, %v785_v14  ;;  %vm795_vm1 = vcmp.ge.f32.partialorder %v793_v16, 0.0  ;;  %v797_v18 = vmul.f32 0.1, %v793_v16 }
 0x14e   : > { %vm796_vm2 = vcmp.ge.f32.partialorder %v794_v17, 0.0  ;;  %v798_v19 = vmul.f32 0.1, %v794_v17  ;;  %v799_v20 = vsel %vm795_vm1, %v793_v16, %v797_v18 }
 0x150   : > { %v800_v21 = vsel %vm796_vm2, %v794_v17, %v798_v19 }
 0x151   : > { %v997_v22 = vpack.c.bf16 %v800_v21, %v799_v20 }
 0x153   : > { %998 = vst [vmem:[%s1352_s3] sm:$0xff] %v997_v22  }
 0x154 PF: > { %s13_s16 = sadd.s32 1, %s1202_s16   ;;  %s1353_s12 = smov %s1190_s13 }
 0x155   : > { %p10_p12 = scmp.ge.s32.totalorder %s13_s16, 7   ;;  %s1354_s13 = smov %s1262_s20 }
 0x156   : > { %s1355_s14 = smov %s1198_s15  ;;  %s1356_s15 = smov %s1358_s17 }
 0x157   :  { %12 = sbr.rel (!%p10_p12) target bundleno = 3 (0x3), region = 113 }

// kernel: stfan_forward.171
= control target key start
LH: loop header
LB: loop body
LE: loop exit
PB: predicated region body
PF: predicated region fallthrough
CT: control target
= control target key end

     0   :  { %s1520_s0 = inlined_call_operand.vmem [shape: bf16[1,8,8,128], index: 0, kind: input, shape index: {}]   ;;  %s1521_s1 = inlined_call_operand.vmem [shape: bf16[1,4,4,3200], index: 1, kind: input, shape index: {}]   ;;  %s1522_s2 = inlined_call_operand.vmem [shape: bf16[1,4,4,128], index: 2, kind: output, shape index: {}]  }
   0x1   :  { %v46_v0 = vld [vmem:[%s1520_s0] sm:$0xff]  ;;  %v48_v1 = vld [vmem:[%s1520_s0 + $0x8] sm:$0xff]  ;;  %v50_v2 = vld [vmem:[%s1520_s0 + $0x10] sm:$0xff] }
   0x2   :  { %47 = vst [vmem:[#allocation2] sm:$0xff] %v46_v0  ;;  %49 = vst [vmem:[#allocation2 + $0x8] sm:$0xff] %v48_v1  ;;  %v52_v3 = vld [vmem:[%s1520_s0 + $0x18] sm:$0xff] }
   0x3   :  { %51 = vst [vmem:[#allocation2 + $0x10] sm:$0xff] %v50_v2  ;;  %53 = vst [vmem:[#allocation2 + $0x18] sm:$0xff] %v52_v3 }
   0x4   :  { %61 = vsyncadd [#allocation3], 512 }
   0x5   :  { %1179 = dma.done.wait [#allocation3], 512 }
   0x6   :  { %1180 = vsyncadd [#allocation3], 4294966784  ;;  %v76_v11 = vld [vmem:[%s1521_s1] sm:$0x3]  ;;  %v77_v12 = vld [vmem:[%s1521_s1 + $0x32] sm:$0x3] }
   0x7   :  { %v78_v14 = vld [vmem:[%s1521_s1 + $0x64] sm:$0x3]  ;;  %v79_v15 = vld [vmem:[%s1521_s1 + $0x96] sm:$0x3]  ;;  %v80_v16 = vunpack.c.l.bf16 %v76_v11  ;;  %v81_v17 = vunpack.c.l.bf16 %v77_v12  ;;  %v100_v29 = vld [vmem:[%s1521_s1 + $0x2] sm:$0x3] }
   0x8   :  { %v82_v19 = vunpack.c.l.bf16 %v78_v14  ;;  %v83_v20 = vunpack.c.l.bf16 %v79_v15  ;;  %v101_v30 = vld [vmem:[%s1521_s1 + $0x34] sm:$0x3]  ;;  %v102_v31 = vld [vmem:[%s1521_s1 + $0x66] sm:$0x3]  ;;  %v103_v35 = vld [vmem:[%s1521_s1 + $0x98] sm:$0x3]  ;;  %v104_v36 = vunpack.c.l.bf16 %v100_v29 }
   0x9   :  { %v68_v4 = vld [vmem:[#allocation2] sm:$0x3]  ;;  %v69_v5 = vld [vmem:[#allocation2 + $0x4] sm:$0x3]  ;;  %v70_v6 = vld [vmem:[#allocation2 + $0x8] sm:$0x3]  ;;  %v105_v39 = vunpack.c.l.bf16 %v101_v30  ;;  %v106_v40 = vunpack.c.l.bf16 %v102_v31  ;;  %v107_v41 = vunpack.c.l.bf16 %v103_v35 }
   0xa   :  { %v71_v7 = vld [vmem:[#allocation2 + $0xc] sm:$0x3]  ;;  %v72_v8 = vunpack.c.l.bf16 %v68_v4  ;;  %v73_v9 = vunpack.c.l.bf16 %v69_v5  ;;  %v74_v10 = vunpack.c.l.bf16 %v70_v6  ;;  %v92_v18 = vld [vmem:[#allocation2] sm:$0x7]  ;;  %v93_v21 = vld [vmem:[#allocation2 + $0x4] sm:$0x7] }
   0xb   :  { %v75_v13 = vunpack.c.l.bf16 %v71_v7  ;;  %v94_v22 = vld [vmem:[#allocation2 + $0x8] sm:$0x7]  ;;  %v95_v23 = vld [vmem:[#allocation2 + $0xc] sm:$0x7]  ;;  %v96_v24 = vunpack.c.l.bf16 %v92_v18  ;;  %v97_v27 = vunpack.c.l.bf16 %v93_v21  ;;  %v140_v37 = vld [vmem:[#allocation2] sm:$0x6] }
   0xc   :  { %v84_v25 = vmul.f32 %v80_v16, %v72_v8  ;;  %v85_v26 = vmul.f32 %v81_v17, %v73_v9  ;;  %v98_v28 = vunpack.c.l.bf16 %v94_v22  ;;  %v86_v32 = vmul.f32 %v82_v19, %v74_v10  ;;  %v141_v38 = vld [vmem:[#allocation2 + $0x4] sm:$0x6]  ;;  %v142_v42 = vld [vmem:[#allocation2 + $0x8] sm:$0x6]  ;;  %v143_v43 = vld [vmem:[#allocation2 + $0xc] sm:$0x6] }
   0xd   :  { %v87_v33 = vmul.f32 %v83_v20, %v75_v13  ;;  %v99_v34 = vunpack.c.l.bf16 %v95_v23  ;;  %v144_v44 = vunpack.c.l.bf16 %v140_v37  ;;  %v148_v45 = vld [vmem:[%s1521_s1 + $0x4] sm:$0x3]  ;;  %v112_v46 = vrot.slane %v104_v36, 7  ;;  %v149_v50 = vld [vmem:[%s1521_s1 + $0x36] sm:$0x3] }
   0xe   :  { %v145_v47 = vunpack.c.l.bf16 %v141_v38  ;;  %v146_v48 = vunpack.c.l.bf16 %v142_v42  ;;  %v147_v49 = vunpack.c.l.bf16 %v143_v43  ;;  %v150_v51 = vld [vmem:[%s1521_s1 + $0x68] sm:$0x3]  ;;  %v113_v52 = vrot.slane %v105_v39, 7  ;;  %v151_v55 = vld [vmem:[%s1521_s1 + $0x9a] sm:$0x3] }
   0xf   :  { %v114_v53 = vrot.slane %v106_v40, 7  ;;  %v115_v54 = vrot.slane %v107_v41, 7  ;;  %v152_v56 = vunpack.c.l.bf16 %v148_v45  ;;  %v120_v57 = vmul.f32 %v112_v46, %v96_v24  ;;  %v188_v1 = vld [vmem:[#allocation2] sm:$0xe]  ;;  %v189_v6 = vld [vmem:[#allocation2 + $0x4] sm:$0xe] }
  0x10   :  { %v153_v58 = vunpack.c.l.bf16 %v149_v50  ;;  %v154_v59 = vunpack.c.l.bf16 %v150_v51  ;;  %v155_v60 = vunpack.c.l.bf16 %v151_v55  ;;  %v121_v61 = vmul.f32 %v113_v52, %v97_v27  ;;  %v190_v11 = vld [vmem:[#allocation2 + $0x8] sm:$0xe]  ;;  %v191_v16 = vld [vmem:[#allocation2 + $0xc] sm:$0xe]  ;;  %v196_v17 = vld [vmem:[%s1521_s1 + $0x6] sm:$0x3] }
  0x11   :  { %v122_v62 = vmul.f32 %v114_v53, %v98_v28  ;;  %v123_v63 = vmul.f32 %v115_v54, %v99_v34  ;;  %v160_v0 = vrot.slane %v152_v56, 6  ;;  %v128_v2 = vrot.slane %v120_v57, 1  ;;  %v197_v18 = vld [vmem:[%s1521_s1 + $0x38] sm:$0x3]  ;;  %v198_v23 = vld [vmem:[%s1521_s1 + $0x6a] sm:$0x3] }
  0x12   :  { %v161_v3 = vrot.slane %v153_v58, 6  ;;  %v162_v4 = vrot.slane %v154_v59, 6  ;;  %v163_v5 = vrot.slane %v155_v60, 6  ;;  %v129_v7 = vrot.slane %v121_v61, 1  ;;  %v199_v24 = vld [vmem:[%s1521_s1 + $0x9c] sm:$0x3] }
  0x13   :  { %v130_v8 = vrot.slane %v122_v62, 1  ;;  %v131_v9 = vrot.slane %v123_v63, 1  ;;  %v168_v10 = vmul.f32 %v160_v0, %v144_v44  ;;  %v136_v12 = vadd.f32 %v128_v2, %v84_v25  ;;  %v236_v30 = vld [vmem:[#allocation2] sm:$0xc]  ;;  %v239_v36 = vld [vmem:[#allocation2 + $0xc] sm:$0xc] }
  0x14   :  { %v169_v13 = vmul.f32 %v161_v3, %v145_v47  ;;  %v170_v14 = vmul.f32 %v162_v4, %v146_v48  ;;  %v171_v15 = vmul.f32 %v163_v5, %v147_v49  ;;  %v137_v19 = vadd.f32 %v129_v7, %v85_v26  ;;  %v244_v41 = vld [vmem:[%s1521_s1 + $0x8] sm:$0x3]  ;;  %v245_v46 = vld [vmem:[%s1521_s1 + $0x3a] sm:$0x3]  ;;  %v246_v47 = vld [vmem:[%s1521_s1 + $0x6c] sm:$0x3] }
  0x15   :  { %v138_v20 = vadd.f32 %v130_v8, %v86_v32  ;;  %v139_v21 = vadd.f32 %v131_v9, %v87_v33  ;;  %v176_v22 = vrot.slane %v168_v10, 2  ;;  %v192_v29 = vunpack.c.l.bf16 %v188_v1  ;;  %v237_v32 = vld [vmem:[#allocation2 + $0x4] sm:$0xc]  ;;  %v238_v33 = vld [vmem:[#allocation2 + $0x8] sm:$0xc] }
  0x16   :  { %v177_v25 = vrot.slane %v169_v13, 2  ;;  %v178_v27 = vrot.slane %v170_v14, 2  ;;  %v179_v28 = vrot.slane %v171_v15, 2  ;;  %v193_v34 = vunpack.c.l.bf16 %v189_v6  ;;  %v247_v48 = vld [vmem:[%s1521_s1 + $0x9e] sm:$0x3] }
  0x17   :  { %v184_v31 = vadd.f32 %v176_v22, %v136_v12  ;;  %v194_v35 = vunpack.c.l.bf16 %v190_v11  ;;  %v195_v26 = vunpack.c.l.bf16 %v191_v16  ;;  %v200_v40 = vunpack.c.l.bf16 %v196_v17  ;;  %v285_v5 = vld [vmem:[#allocation2 + $0x4] sm:$0x3]  ;;  %v286_v6 = vld [vmem:[#allocation2 + $0x8] sm:$0x3]  ;;  %v287_v11 = vld [vmem:[#allocation2 + $0xc] sm:$0x3] }
  0x18   :  { %v185_v37 = vadd.f32 %v177_v25, %v137_v19  ;;  %v186_v38 = vadd.f32 %v178_v27, %v138_v20  ;;  %v187_v39 = vadd.f32 %v179_v28, %v139_v21  ;;  %v201_v42 = vunpack.c.l.bf16 %v197_v18  ;;  %v288_v16 = vld [vmem:[#allocation2 + $0x10] sm:$0x3]  ;;  %v293_v17 = vld [vmem:[%s1521_s1 + $0xa] sm:$0x3]  ;;  %v294_v18 = vld [vmem:[%s1521_s1 + $0x3c] sm:$0x3] }
  0x19   :  { %v202_v43 = vunpack.c.l.bf16 %v198_v23  ;;  %v203_v44 = vunpack.c.l.bf16 %v199_v24  ;;  %v240_v45 = vunpack.c.l.bf16 %v236_v30  ;;  %v208_v49 = vrot.slane %v200_v40, 5  ;;  %v295_v23 = vld [vmem:[%s1521_s1 + $0x6e] sm:$0x3]  ;;  %v296_v24 = vld [vmem:[%s1521_s1 + $0xa0] sm:$0x3] }
  0x1a   :  { %v241_v50 = vunpack.c.l.bf16 %v237_v32  ;;  %v242_v51 = vunpack.c.l.bf16 %v238_v33  ;;  %v243_v52 = vunpack.c.l.bf16 %v239_v36  ;;  %v209_v53 = vrot.slane %v201_v42, 5  ;;  %v309_v30 = vld [vmem:[#allocation2 + $0x4] sm:$0x7]  ;;  %v310_v32 = vld [vmem:[#allocation2 + $0x8] sm:$0x7] }
  0x1b   :  { %v210_v54 = vrot.slane %v202_v43, 5  ;;  %v211_v55 = vrot.slane %v203_v44, 5  ;;  %v248_v56 = vunpack.c.l.bf16 %v244_v41  ;;  %v216_v57 = vmul.f32 %v208_v49, %v192_v29  ;;  %v311_v33 = vld [vmem:[#allocation2 + $0xc] sm:$0x7]  ;;  %v312_v36 = vld [vmem:[#allocation2 + $0x10] sm:$0x7] }
  0x1c   :  { %v249_v58 = vunpack.c.l.bf16 %v245_v46  ;;  %v250_v59 = vunpack.c.l.bf16 %v246_v47  ;;  %v251_v60 = vunpack.c.l.bf16 %v247_v48  ;;  %v217_v61 = vmul.f32 %v209_v53, %v193_v34  ;;  %v317_v41 = vld [vmem:[%s1521_s1 + $0xc] sm:$0x3]  ;;  %v318_v46 = vld [vmem:[%s1521_s1 + $0x3e] sm:$0x3]  ;;  %v319_v47 = vld [vmem:[%s1521_s1 + $0x70] sm:$0x3] }
  0x1d   :  { %v218_v62 = vmul.f32 %v210_v54, %v194_v35  ;;  %v219_v63 = vmul.f32 %v211_v55, %v195_v26  ;;  %v256_v0 = vcombine.low %v248_v56, %v248_v56  ;;  %v224_v1 = vrot.slane %v216_v57, 3  ;;  %v320_v48 = vld [vmem:[%s1521_s1 + $0xa2] sm:$0x3]  ;;  %v357_v57 = vld [vmem:[#allocation2 + $0x4] sm:$0x6] }
  0x1e   :  { %v257_v2 = vcombine.low %v249_v58, %v249_v58  ;;  %v258_v3 = vcombine.low %v250_v59, %v250_v59  ;;  %v259_v4 = vcombine.low %v251_v60, %v251_v60  ;;  %v225_v7 = vrot.slane %v217_v61, 3  ;;  %v358_v58 = vld [vmem:[#allocation2 + $0x8] sm:$0x6] }
  0x1f   :  { %v226_v8 = vrot.slane %v218_v62, 3  ;;  %v227_v9 = vrot.slane %v219_v63, 3  ;;  %v264_v10 = vmul.f32 %v256_v0, %v240_v45  ;;  %v232_v12 = vadd.f32 %v224_v1, %v184_v31  ;;  %v359_v63 = vld [vmem:[#allocation2 + $0xc] sm:$0x6]  ;;  %v360_v0 = vld [vmem:[#allocation2 + $0x10] sm:$0x6] }
  0x20   :  { %v265_v13 = vmul.f32 %v257_v2, %v241_v50  ;;  %v266_v14 = vmul.f32 %v258_v3, %v242_v51  ;;  %v267_v15 = vmul.f32 %v259_v4, %v243_v52  ;;  %v233_v19 = vadd.f32 %v225_v7, %v185_v37  ;;  %v365_v1 = vld [vmem:[%s1521_s1 + $0xe] sm:$0x3]  ;;  %v367_v7 = vld [vmem:[%s1521_s1 + $0x72] sm:$0x3] }
  0x21   :  { %v234_v20 = vadd.f32 %v226_v8, %v186_v38  ;;  %v235_v21 = vadd.f32 %v227_v9, %v187_v39  ;;  %v272_v22 = vrot.slane %v264_v10, 4  ;;  %v289_v29 = vunpack.c.l.bf16 %v285_v5 }
  0x22   :  { %v273_v25 = vrot.slane %v265_v13, 4  ;;  %v274_v27 = vrot.slane %v266_v14, 4  ;;  %v275_v28 = vrot.slane %v267_v15, 4  ;;  %v290_v34 = vunpack.c.l.bf16 %v286_v6  ;;  %v366_v6 = vld [vmem:[%s1521_s1 + $0x40] sm:$0x3] }
  0x23   :  { %v280_v31 = vadd.f32 %v272_v22, %v232_v12  ;;  %v291_v35 = vunpack.c.l.bf16 %v287_v11  ;;  %v292_v26 = vunpack.c.l.bf16 %v288_v16  ;;  %v297_v40 = vunpack.c.l.bf16 %v293_v17  ;;  %v368_v12 = vld [vmem:[%s1521_s1 + $0xa4] sm:$0x3] }
  0x24   :  { %v281_v37 = vadd.f32 %v273_v25, %v233_v19  ;;  %v282_v38 = vadd.f32 %v274_v27, %v234_v20  ;;  %v283_v39 = vadd.f32 %v275_v28, %v235_v21  ;;  %v298_v42 = vunpack.c.l.bf16 %v294_v18  ;;  %v405_v25 = vld [vmem:[#allocation2 + $0x4] sm:$0xe]  ;;  %v406_v27 = vld [vmem:[#allocation2 + $0x8] sm:$0xe] }
  0x25   :  { %v299_v43 = vunpack.c.l.bf16 %v295_v23  ;;  %v300_v44 = vunpack.c.l.bf16 %v296_v24  ;;  %v313_v45 = vunpack.c.l.bf16 %v309_v30  ;;  %v301_v49 = vmul.f32 %v297_v40, %v289_v29 }
  0x26   :  { %v314_v50 = vunpack.c.l.bf16 %v310_v32  ;;  %v315_v51 = vunpack.c.l.bf16 %v311_v33  ;;  %v316_v52 = vunpack.c.l.bf16 %v312_v36  ;;  %v302_v53 = vmul.f32 %v298_v42, %v290_v34  ;;  %v407_v34 = vld [vmem:[#allocation2 + $0xc] sm:$0xe]  ;;  %v408_v36 = vld [vmem:[#allocation2 + $0x10] sm:$0xe] }
  0x27   :  { %v303_v54 = vmul.f32 %v299_v43, %v291_v35  ;;  %v304_v55 = vmul.f32 %v300_v44, %v292_v26  ;;  %v321_v56 = vunpack.c.l.bf16 %v317_v41  ;;  %v305_v59 = vadd.f32 %v301_v49, %v280_v31  ;;  %v413_v41 = vld [vmem:[%s1521_s1 + $0x10] sm:$0x3] }
  0x28   :  { %v322_v60 = vunpack.c.l.bf16 %v318_v46  ;;  %v323_v61 = vunpack.c.l.bf16 %v319_v47  ;;  %v324_v62 = vunpack.c.l.bf16 %v320_v48  ;;  %v306_v2 = vadd.f32 %v302_v53, %v281_v37  ;;  %v414_v46 = vld [vmem:[%s1521_s1 + $0x42] sm:$0x3]  ;;  %v415_v47 = vld [vmem:[%s1521_s1 + $0x74] sm:$0x3]  ;;  %v416_v48 = vld [vmem:[%s1521_s1 + $0xa6] sm:$0x3] }
  0x29   :  { %v307_v3 = vadd.f32 %v303_v54, %v282_v38  ;;  %v308_v4 = vadd.f32 %v304_v55, %v283_v39  ;;  %v329_v5 = vrot.slane %v321_v56, 7  ;;  %v361_v11 = vunpack.c.l.bf16 %v357_v57  ;;  %v453_v53 = vld [vmem:[#allocation2 + $0x4] sm:$0xc] }
  0x2a   :  { %v330_v8 = vrot.slane %v322_v60, 7  ;;  %v331_v9 = vrot.slane %v323_v61, 7  ;;  %v332_v10 = vrot.slane %v324_v62, 7  ;;  %v362_v14 = vunpack.c.l.bf16 %v358_v58  ;;  %v454_v58 = vld [vmem:[#allocation2 + $0x8] sm:$0xc] }
  0x2b   :  { %v337_v13 = vmul.f32 %v329_v5, %v313_v45  ;;  %v363_v15 = vunpack.c.l.bf16 %v359_v63  ;;  %v364_v16 = vunpack.c.l.bf16 %v360_v0  ;;  %v369_v20 = vunpack.c.l.bf16 %v365_v1  ;;  %v455_v63 = vld [vmem:[#allocation2 + $0xc] sm:$0xc]  ;;  %v456_v0 = vld [vmem:[#allocation2 + $0x10] sm:$0xc] }
  0x2c   :  { %v338_v17 = vmul.f32 %v330_v8, %v314_v50  ;;  %v339_v18 = vmul.f32 %v331_v9, %v315_v51  ;;  %v340_v19 = vmul.f32 %v332_v10, %v316_v52  ;;  %v370_v22 = vunpack.c.l.bf16 %v366_v6  ;;  %v461_v1 = vld [vmem:[%s1521_s1 + $0x12] sm:$0x3]  ;;  %v462_v6 = vld [vmem:[%s1521_s1 + $0x44] sm:$0x3] }
  0x2d   :  { %v345_v21 = vrot.slane %v337_v13, 1  ;;  %v371_v23 = vunpack.c.l.bf16 %v367_v7  ;;  %v372_v24 = vunpack.c.l.bf16 %v368_v12  ;;  %v377_v31 = vrot.slane %v369_v20, 6  ;;  %v463_v7 = vld [vmem:[%s1521_s1 + $0x76] sm:$0x3]  ;;  %v464_v12 = vld [vmem:[%s1521_s1 + $0xa8] sm:$0x3] }
  0x2e   :  { %v346_v28 = vrot.slane %v338_v17, 1  ;;  %v347_v29 = vrot.slane %v339_v18, 1  ;;  %v348_v30 = vrot.slane %v340_v19, 1  ;;  %v378_v26 = vrot.slane %v370_v22, 6 }
  0x2f   :  { %v353_v35 = vadd.f32 %v345_v21, %v305_v59  ;;  %v379_v32 = vrot.slane %v371_v23, 6  ;;  %v380_v33 = vrot.slane %v372_v24, 6  ;;  %v385_v40 = vmul.f32 %v377_v31, %v361_v11 }
  0x30   :  { %v354_v37 = vadd.f32 %v346_v28, %v306_v2  ;;  %v355_v38 = vadd.f32 %v347_v29, %v307_v3  ;;  %v356_v39 = vadd.f32 %v348_v30, %v308_v4  ;;  %v386_v42 = vmul.f32 %v378_v26, %v362_v14  ;;  %v502_v30 = vld [vmem:[#allocation2 + $0x8] sm:$0x3] }
  0x31   :  { %v387_v43 = vmul.f32 %v379_v32, %v363_v15  ;;  %v388_v44 = vmul.f32 %v380_v33, %v364_v16  ;;  %v409_v45 = vunpack.c.l.bf16 %v405_v25  ;;  %v393_v49 = vrot.slane %v385_v40, 2  ;;  %v503_v32 = vld [vmem:[#allocation2 + $0xc] sm:$0x3]  ;;  %v504_v33 = vld [vmem:[#allocation2 + $0x10] sm:$0x3] }
  0x32   :  { %v410_v50 = vunpack.c.l.bf16 %v406_v27  ;;  %v411_v51 = vunpack.c.l.bf16 %v407_v34  ;;  %v412_v52 = vunpack.c.l.bf16 %v408_v36  ;;  %v394_v54 = vrot.slane %v386_v42, 2  ;;  %v505_v36 = vld [vmem:[#allocation2 + $0x14] sm:$0x3] }
  0x33   :  { %v395_v55 = vrot.slane %v387_v43, 2  ;;  %v396_v56 = vrot.slane %v388_v44, 2  ;;  %v417_v57 = vunpack.c.l.bf16 %v413_v41  ;;  %v401_v59 = vadd.f32 %v393_v49, %v353_v35  ;;  %v510_v41 = vld [vmem:[%s1521_s1 + $0x14] sm:$0x3] }
  0x34   :  { %v418_v60 = vunpack.c.l.bf16 %v414_v46  ;;  %v419_v61 = vunpack.c.l.bf16 %v415_v47  ;;  %v420_v62 = vunpack.c.l.bf16 %v416_v48  ;;  %v402_v2 = vadd.f32 %v394_v54, %v354_v37  ;;  %v511_v46 = vld [vmem:[%s1521_s1 + $0x46] sm:$0x3]  ;;  %v512_v47 = vld [vmem:[%s1521_s1 + $0x78] sm:$0x3]  ;;  %v513_v48 = vld [vmem:[%s1521_s1 + $0xaa] sm:$0x3] }
  0x35   :  { %v403_v3 = vadd.f32 %v395_v55, %v355_v38  ;;  %v404_v4 = vadd.f32 %v396_v56, %v356_v39  ;;  %v425_v5 = vrot.slane %v417_v57, 5  ;;  %v457_v11 = vunpack.c.l.bf16 %v453_v53  ;;  %v526_v57 = vld [vmem:[#allocation2 + $0x8] sm:$0x7] }
  0x36   :  { %v426_v8 = vrot.slane %v418_v60, 5  ;;  %v427_v9 = vrot.slane %v419_v61, 5  ;;  %v428_v10 = vrot.slane %v420_v62, 5  ;;  %v458_v14 = vunpack.c.l.bf16 %v454_v58  ;;  %v527_v62 = vld [vmem:[#allocation2 + $0xc] sm:$0x7] }
  0x37   :  { %v433_v13 = vmul.f32 %v425_v5, %v409_v45  ;;  %v459_v15 = vunpack.c.l.bf16 %v455_v63  ;;  %v460_v16 = vunpack.c.l.bf16 %v456_v0  ;;  %v465_v20 = vunpack.c.l.bf16 %v461_v1  ;;  %v528_v63 = vld [vmem:[#allocation2 + $0x10] sm:$0x7]  ;;  %v529_v0 = vld [vmem:[#allocation2 + $0x14] sm:$0x7] }
  0x38   :  { %v434_v17 = vmul.f32 %v426_v8, %v410_v50  ;;  %v435_v18 = vmul.f32 %v427_v9, %v411_v51  ;;  %v436_v19 = vmul.f32 %v428_v10, %v412_v52  ;;  %v466_v22 = vunpack.c.l.bf16 %v462_v6  ;;  %v534_v5 = vld [vmem:[%s1521_s1 + $0x16] sm:$0x3]  ;;  %v535_v6 = vld [vmem:[%s1521_s1 + $0x48] sm:$0x3] }
  0x39   :  { %v441_v21 = vrot.slane %v433_v13, 3  ;;  %v467_v23 = vunpack.c.l.bf16 %v463_v7  ;;  %v468_v24 = vunpack.c.l.bf16 %v464_v12  ;;  %v473_v29 = vcombine.low %v465_v20, %v465_v20  ;;  %v537_v12 = vld [vmem:[%s1521_s1 + $0xac] sm:$0x3]  ;;  %v574_v13 = vld [vmem:[#allocation2 + $0x8] sm:$0x6] }
  0x3a   :  { %v442_v25 = vrot.slane %v434_v17, 3  ;;  %v443_v27 = vrot.slane %v435_v18, 3  ;;  %v444_v28 = vrot.slane %v436_v19, 3  ;;  %v474_v34 = vcombine.low %v466_v22, %v466_v22  ;;  %v575_v18 = vld [vmem:[#allocation2 + $0xc] sm:$0x6] }
  0x3b   :  { %v449_v31 = vadd.f32 %v441_v21, %v401_v59  ;;  %v475_v35 = vcombine.low %v467_v23, %v467_v23  ;;  %v476_v26 = vcombine.low %v468_v24, %v468_v24  ;;  %v481_v40 = vmul.f32 %v473_v29, %v457_v11  ;;  %v536_v11 = vld [vmem:[%s1521_s1 + $0x7a] sm:$0x3]  ;;  %v576_v19 = vld [vmem:[#allocation2 + $0x10] sm:$0x6]  ;;  %v577_v20 = vld [vmem:[#allocation2 + $0x14] sm:$0x6] }
  0x3c   :  { %v450_v37 = vadd.f32 %v442_v25, %v402_v2  ;;  %v451_v38 = vadd.f32 %v443_v27, %v403_v3  ;;  %v452_v39 = vadd.f32 %v444_v28, %v404_v4  ;;  %v482_v42 = vmul.f32 %v474_v34, %v458_v14  ;;  %v582_v25 = vld [vmem:[%s1521_s1 + $0x18] sm:$0x3]  ;;  %v584_v34 = vld [vmem:[%s1521_s1 + $0x7c] sm:$0x3] }
  0x3d   :  { %v483_v43 = vmul.f32 %v475_v35, %v459_v15  ;;  %v484_v44 = vmul.f32 %v476_v26, %v460_v16  ;;  %v506_v45 = vunpack.c.l.bf16 %v502_v30  ;;  %v489_v49 = vrot.slane %v481_v40, 4  ;;  %v585_v35 = vld [vmem:[%s1521_s1 + $0xae] sm:$0x3] }
  0x3e   :  { %v507_v50 = vunpack.c.l.bf16 %v503_v32  ;;  %v508_v51 = vunpack.c.l.bf16 %v504_v33  ;;  %v509_v52 = vunpack.c.l.bf16 %v505_v36  ;;  %v490_v53 = vrot.slane %v482_v42, 4 }
  0x3f   :  { %v491_v54 = vrot.slane %v483_v43, 4  ;;  %v492_v55 = vrot.slane %v484_v44, 4  ;;  %v514_v56 = vunpack.c.l.bf16 %v510_v41  ;;  %v497_v58 = vadd.f32 %v489_v49, %v449_v31  ;;  %v583_v31 = vld [vmem:[%s1521_s1 + $0x4a] sm:$0x3] }
  0x40   :  { %v515_v59 = vunpack.c.l.bf16 %v511_v46  ;;  %v516_v60 = vunpack.c.l.bf16 %v512_v47  ;;  %v517_v61 = vunpack.c.l.bf16 %v513_v48  ;;  %v498_v1 = vadd.f32 %v490_v53, %v450_v37  ;;  %v622_v49 = vld [vmem:[#allocation2 + $0x8] sm:$0xe] }
  0x41   :  { %v499_v2 = vadd.f32 %v491_v54, %v451_v38  ;;  %v500_v3 = vadd.f32 %v492_v55, %v452_v39  ;;  %v518_v4 = vmul.f32 %v514_v56, %v506_v45  ;;  %v530_v10 = vunpack.c.l.bf16 %v526_v57  ;;  %v623_v54 = vld [vmem:[#allocation2 + $0xc] sm:$0xe] }
  0x42   :  { %v519_v7 = vmul.f32 %v515_v59, %v507_v50  ;;  %v520_v8 = vmul.f32 %v516_v60, %v508_v51  ;;  %v521_v9 = vmul.f32 %v517_v61, %v509_v52  ;;  %v531_v15 = vunpack.c.l.bf16 %v527_v62  ;;  %v624_v59 = vld [vmem:[#allocation2 + $0x10] sm:$0xe] }
  0x43   :  { %v522_v14 = vadd.f32 %v518_v4, %v497_v58  ;;  %v532_v16 = vunpack.c.l.bf16 %v528_v63  ;;  %v533_v17 = vunpack.c.l.bf16 %v529_v0  ;;  %v538_v24 = vunpack.c.l.bf16 %v534_v5  ;;  %v625_v0 = vld [vmem:[#allocation2 + $0x14] sm:$0xe] }
  0x44   :  { %v523_v21 = vadd.f32 %v519_v7, %v498_v1  ;;  %v524_v22 = vadd.f32 %v520_v8, %v499_v2  ;;  %v525_v23 = vadd.f32 %v521_v9, %v500_v3  ;;  %v539_v27 = vunpack.c.l.bf16 %v535_v6  ;;  %v630_v1 = vld [vmem:[%s1521_s1 + $0x1a] sm:$0x3]  ;;  %v631_v2 = vld [vmem:[%s1521_s1 + $0x4c] sm:$0x3]  ;;  %v632_v7 = vld [vmem:[%s1521_s1 + $0x7e] sm:$0x3] }
  0x45   :  { %v540_v28 = vunpack.c.l.bf16 %v536_v11  ;;  %v541_v29 = vunpack.c.l.bf16 %v537_v12  ;;  %v578_v30 = vunpack.c.l.bf16 %v574_v13  ;;  %v546_v26 = vrot.slane %v538_v24, 7  ;;  %v633_v8 = vld [vmem:[%s1521_s1 + $0xb0] sm:$0x3]  ;;  %v670_v13 = vld [vmem:[#allocation2 + $0x8] sm:$0xc] }
  0x46   :  { %v579_v32 = vunpack.c.l.bf16 %v575_v18  ;;  %v580_v33 = vunpack.c.l.bf16 %v576_v19  ;;  %v581_v36 = vunpack.c.l.bf16 %v577_v20  ;;  %v547_v37 = vrot.slane %v539_v27, 7  ;;  %v671_v18 = vld [vmem:[#allocation2 + $0xc] sm:$0xc]  ;;  %v672_v19 = vld [vmem:[#allocation2 + $0x10] sm:$0xc] }
  0x47   :  { %v548_v38 = vrot.slane %v540_v28, 7  ;;  %v549_v39 = vrot.slane %v541_v29, 7  ;;  %v586_v40 = vunpack.c.l.bf16 %v582_v25  ;;  %v554_v41 = vmul.f32 %v546_v26, %v530_v10  ;;  %v673_v20 = vld [vmem:[#allocation2 + $0x14] sm:$0xc]  ;;  %v678_v25 = vld [vmem:[%s1521_s1 + $0x1c] sm:$0x3] }
  0x48   :  { %v587_v42 = vunpack.c.l.bf16 %v583_v31  ;;  %v588_v43 = vunpack.c.l.bf16 %v584_v34  ;;  %v589_v44 = vunpack.c.l.bf16 %v585_v35  ;;  %v555_v45 = vmul.f32 %v547_v37, %v531_v15  ;;  %v679_v31 = vld [vmem:[%s1521_s1 + $0x4e] sm:$0x3]  ;;  %v680_v34 = vld [vmem:[%s1521_s1 + $0x80] sm:$0x3]  ;;  %v681_v35 = vld [vmem:[%s1521_s1 + $0xb2] sm:$0x3] }
  0x49   :  { %v556_v46 = vmul.f32 %v548_v38, %v532_v16  ;;  %v557_v47 = vmul.f32 %v549_v39, %v533_v17  ;;  %v594_v48 = vrot.slane %v586_v40, 6  ;;  %v562_v50 = vrot.slane %v554_v41, 1 }
  0x4a   :  { %v595_v51 = vrot.slane %v587_v42, 6  ;;  %v596_v52 = vrot.slane %v588_v43, 6  ;;  %v597_v53 = vrot.slane %v589_v44, 6  ;;  %v563_v55 = vrot.slane %v555_v45, 1 }
  0x4b   :  { %v564_v56 = vrot.slane %v556_v46, 1  ;;  %v565_v57 = vrot.slane %v557_v47, 1  ;;  %v602_v58 = vmul.f32 %v594_v48, %v578_v30  ;;  %v570_v60 = vadd.f32 %v562_v50, %v522_v14 }
  0x4c   :  { %v603_v61 = vmul.f32 %v595_v51, %v579_v32  ;;  %v604_v62 = vmul.f32 %v596_v52, %v580_v33  ;;  %v605_v63 = vmul.f32 %v597_v53, %v581_v36  ;;  %v571_v3 = vadd.f32 %v563_v55, %v523_v21  ;;  %v719_v53 = vld [vmem:[#allocation2 + $0xc] sm:$0x3] }
  0x4d   :  { %v572_v4 = vadd.f32 %v564_v56, %v524_v22  ;;  %v573_v5 = vadd.f32 %v565_v57, %v525_v23  ;;  %v610_v6 = vrot.slane %v602_v58, 2  ;;  %v626_v12 = vunpack.c.l.bf16 %v622_v49 }
  0x4e   :  { %v611_v9 = vrot.slane %v603_v61, 2  ;;  %v612_v10 = vrot.slane %v604_v62, 2  ;;  %v613_v11 = vrot.slane %v605_v63, 2  ;;  %v627_v15 = vunpack.c.l.bf16 %v623_v54  ;;  %v720_v54 = vld [vmem:[#allocation2 + $0x10] sm:$0x3] }
  0x4f   :  { %v618_v14 = vadd.f32 %v610_v6, %v570_v60  ;;  %v628_v16 = vunpack.c.l.bf16 %v624_v59  ;;  %v629_v17 = vunpack.c.l.bf16 %v625_v0  ;;  %v634_v24 = vunpack.c.l.bf16 %v630_v1  ;;  %v721_v59 = vld [vmem:[#allocation2 + $0x14] sm:$0x3]  ;;  %v722_v0 = vld [vmem:[#allocation2 + $0x18] sm:$0x3]  ;;  %v727_v1 = vld [vmem:[%s1521_s1 + $0x1e] sm:$0x3] }
  0x50   :  { %v619_v21 = vadd.f32 %v611_v9, %v571_v3  ;;  %v620_v22 = vadd.f32 %v612_v10, %v572_v4  ;;  %v621_v23 = vadd.f32 %v613_v11, %v573_v5  ;;  %v635_v27 = vunpack.c.l.bf16 %v631_v2  ;;  %v728_v2 = vld [vmem:[%s1521_s1 + $0x50] sm:$0x3] }
  0x51   :  { %v636_v28 = vunpack.c.l.bf16 %v632_v7  ;;  %v637_v29 = vunpack.c.l.bf16 %v633_v8  ;;  %v674_v30 = vunpack.c.l.bf16 %v670_v13  ;;  %v642_v26 = vrot.slane %v634_v24, 5  ;;  %v729_v7 = vld [vmem:[%s1521_s1 + $0x82] sm:$0x3]  ;;  %v730_v8 = vld [vmem:[%s1521_s1 + $0xb4] sm:$0x3] }
  0x52   :  { %v675_v32 = vunpack.c.l.bf16 %v671_v18  ;;  %v676_v33 = vunpack.c.l.bf16 %v672_v19  ;;  %v677_v36 = vunpack.c.l.bf16 %v673_v20  ;;  %v643_v37 = vrot.slane %v635_v27, 5  ;;  %v743_v13 = vld [vmem:[#allocation2 + $0xc] sm:$0x7]  ;;  %v744_v18 = vld [vmem:[#allocation2 + $0x10] sm:$0x7] }
  0x53   :  { %v644_v38 = vrot.slane %v636_v28, 5  ;;  %v645_v39 = vrot.slane %v637_v29, 5  ;;  %v682_v40 = vunpack.c.l.bf16 %v678_v25  ;;  %v650_v41 = vmul.f32 %v642_v26, %v626_v12  ;;  %v745_v19 = vld [vmem:[#allocation2 + $0x14] sm:$0x7]  ;;  %v746_v20 = vld [vmem:[#allocation2 + $0x18] sm:$0x7] }
  0x54   :  { %v683_v42 = vunpack.c.l.bf16 %v679_v31  ;;  %v684_v43 = vunpack.c.l.bf16 %v680_v34  ;;  %v685_v44 = vunpack.c.l.bf16 %v681_v35  ;;  %v651_v45 = vmul.f32 %v643_v37, %v627_v15  ;;  %v751_v25 = vld [vmem:[%s1521_s1 + $0x20] sm:$0x3]  ;;  %v752_v31 = vld [vmem:[%s1521_s1 + $0x52] sm:$0x3]  ;;  %v753_v34 = vld [vmem:[%s1521_s1 + $0x84] sm:$0x3] }
  0x55   :  { %v652_v46 = vmul.f32 %v644_v38, %v628_v16  ;;  %v653_v47 = vmul.f32 %v645_v39, %v629_v17  ;;  %v690_v48 = vcombine.low %v682_v40, %v682_v40  ;;  %v658_v49 = vrot.slane %v650_v41, 3  ;;  %v754_v35 = vld [vmem:[%s1521_s1 + $0xb6] sm:$0x3]  ;;  %v791_v41 = vld [vmem:[#allocation2 + $0xc] sm:$0x6] }
  0x56   :  { %v691_v50 = vcombine.low %v683_v42, %v683_v42  ;;  %v692_v51 = vcombine.low %v684_v43, %v684_v43  ;;  %v693_v52 = vcombine.low %v685_v44, %v685_v44  ;;  %v659_v55 = vrot.slane %v651_v45, 3  ;;  %v792_v42 = vld [vmem:[#allocation2 + $0x10] sm:$0x6] }
  0x57   :  { %v660_v56 = vrot.slane %v652_v46, 3  ;;  %v661_v57 = vrot.slane %v653_v47, 3  ;;  %v698_v58 = vmul.f32 %v690_v48, %v674_v30  ;;  %v666_v60 = vadd.f32 %v658_v49, %v618_v14  ;;  %v793_v47 = vld [vmem:[#allocation2 + $0x14] sm:$0x6]  ;;  %v794_v48 = vld [vmem:[#allocation2 + $0x18] sm:$0x6] }
  0x58   :  { %v699_v61 = vmul.f32 %v691_v50, %v675_v32  ;;  %v700_v62 = vmul.f32 %v692_v51, %v676_v33  ;;  %v701_v63 = vmul.f32 %v693_v52, %v677_v36  ;;  %v667_v3 = vadd.f32 %v659_v55, %v619_v21  ;;  %v799_v49 = vld [vmem:[%s1521_s1 + $0x22] sm:$0x3]  ;;  %v801_v55 = vld [vmem:[%s1521_s1 + $0x86] sm:$0x3] }
  0x59   :  { %v668_v4 = vadd.f32 %v660_v56, %v620_v22  ;;  %v669_v5 = vadd.f32 %v661_v57, %v621_v23  ;;  %v706_v6 = vrot.slane %v698_v58, 4  ;;  %v723_v12 = vunpack.c.l.bf16 %v719_v53 }
  0x5a   :  { %v707_v9 = vrot.slane %v699_v61, 4  ;;  %v708_v10 = vrot.slane %v700_v62, 4  ;;  %v709_v11 = vrot.slane %v701_v63, 4  ;;  %v724_v15 = vunpack.c.l.bf16 %v720_v54  ;;  %v800_v54 = vld [vmem:[%s1521_s1 + $0x54] sm:$0x3] }
  0x5b   :  { %v714_v14 = vadd.f32 %v706_v6, %v666_v60  ;;  %v725_v16 = vunpack.c.l.bf16 %v721_v59  ;;  %v726_v17 = vunpack.c.l.bf16 %v722_v0  ;;  %v731_v24 = vunpack.c.l.bf16 %v727_v1  ;;  %v802_v60 = vld [vmem:[%s1521_s1 + $0xb8] sm:$0x3] }
  0x5c   :  { %v715_v21 = vadd.f32 %v707_v9, %v667_v3  ;;  %v716_v22 = vadd.f32 %v708_v10, %v668_v4  ;;  %v717_v23 = vadd.f32 %v709_v11, %v669_v5  ;;  %v732_v27 = vunpack.c.l.bf16 %v728_v2  ;;  %v839_v9 = vld [vmem:[#allocation2 + $0xc] sm:$0xe]  ;;  %v840_v10 = vld [vmem:[#allocation2 + $0x10] sm:$0xe] }
  0x5d   :  { %v733_v28 = vunpack.c.l.bf16 %v729_v7  ;;  %v734_v29 = vunpack.c.l.bf16 %v730_v8  ;;  %v747_v30 = vunpack.c.l.bf16 %v743_v13  ;;  %v735_v26 = vmul.f32 %v731_v24, %v723_v12 }
  0x5e   :  { %v748_v32 = vunpack.c.l.bf16 %v744_v18  ;;  %v749_v33 = vunpack.c.l.bf16 %v745_v19  ;;  %v750_v36 = vunpack.c.l.bf16 %v746_v20  ;;  %v736_v37 = vmul.f32 %v732_v27, %v724_v15  ;;  %v841_v15 = vld [vmem:[#allocation2 + $0x14] sm:$0xe]  ;;  %v842_v20 = vld [vmem:[#allocation2 + $0x18] sm:$0xe] }
  0x5f   :  { %v737_v38 = vmul.f32 %v733_v28, %v725_v16  ;;  %v738_v39 = vmul.f32 %v734_v29, %v726_v17  ;;  %v755_v40 = vunpack.c.l.bf16 %v751_v25  ;;  %v739_v43 = vadd.f32 %v735_v26, %v714_v14  ;;  %v847_v25 = vld [vmem:[%s1521_s1 + $0x24] sm:$0x3] }
  0x60   :  { %v756_v44 = vunpack.c.l.bf16 %v752_v31  ;;  %v757_v45 = vunpack.c.l.bf16 %v753_v34  ;;  %v758_v46 = vunpack.c.l.bf16 %v754_v35  ;;  %v740_v50 = vadd.f32 %v736_v37, %v715_v21  ;;  %v848_v31 = vld [vmem:[%s1521_s1 + $0x56] sm:$0x3]  ;;  %v849_v34 = vld [vmem:[%s1521_s1 + $0x88] sm:$0x3]  ;;  %v850_v35 = vld [vmem:[%s1521_s1 + $0xba] sm:$0x3] }
  0x61   :  { %v741_v51 = vadd.f32 %v737_v38, %v716_v22  ;;  %v742_v52 = vadd.f32 %v738_v39, %v717_v23  ;;  %v763_v53 = vrot.slane %v755_v40, 7  ;;  %v795_v59 = vunpack.c.l.bf16 %v791_v41  ;;  %v887_v37 = vld [vmem:[#allocation2 + $0xc] sm:$0xc] }
  0x62   :  { %v764_v56 = vrot.slane %v756_v44, 7  ;;  %v765_v57 = vrot.slane %v757_v45, 7  ;;  %v766_v58 = vrot.slane %v758_v46, 7  ;;  %v796_v62 = vunpack.c.l.bf16 %v792_v42  ;;  %v888_v42 = vld [vmem:[#allocation2 + $0x10] sm:$0xc] }
  0x63   :  { %v771_v61 = vmul.f32 %v763_v53, %v747_v30  ;;  %v797_v63 = vunpack.c.l.bf16 %v793_v47  ;;  %v798_v0 = vunpack.c.l.bf16 %v794_v48  ;;  %v803_v4 = vunpack.c.l.bf16 %v799_v49  ;;  %v889_v47 = vld [vmem:[#allocation2 + $0x14] sm:$0xc]  ;;  %v890_v48 = vld [vmem:[#allocation2 + $0x18] sm:$0xc]  ;;  %v895_v49 = vld [vmem:[%s1521_s1 + $0x26] sm:$0x3] }
  0x64   :  { %v772_v1 = vmul.f32 %v764_v56, %v748_v32  ;;  %v773_v2 = vmul.f32 %v765_v57, %v749_v33  ;;  %v774_v3 = vmul.f32 %v766_v58, %v750_v36  ;;  %v804_v6 = vunpack.c.l.bf16 %v800_v54  ;;  %v896_v54 = vld [vmem:[%s1521_s1 + $0x58] sm:$0x3] }
  0x65   :  { %v779_v5 = vrot.slane %v771_v61, 1  ;;  %v805_v7 = vunpack.c.l.bf16 %v801_v55  ;;  %v806_v8 = vunpack.c.l.bf16 %v802_v60  ;;  %v811_v14 = vrot.slane %v803_v4, 6  ;;  %v897_v55 = vld [vmem:[%s1521_s1 + $0x8a] sm:$0x3]  ;;  %v898_v60 = vld [vmem:[%s1521_s1 + $0xbc] sm:$0x3] }
  0x66   :  { %v780_v11 = vrot.slane %v772_v1, 1  ;;  %v781_v12 = vrot.slane %v773_v2, 1  ;;  %v782_v13 = vrot.slane %v774_v3, 1  ;;  %v812_v17 = vrot.slane %v804_v6, 6 }
  0x67   :  { %v787_v16 = vadd.f32 %v779_v5, %v739_v43  ;;  %v813_v18 = vrot.slane %v805_v7, 6  ;;  %v814_v19 = vrot.slane %v806_v8, 6  ;;  %v819_v24 = vmul.f32 %v811_v14, %v795_v59 }
  0x68   :  { %v788_v21 = vadd.f32 %v780_v11, %v740_v50  ;;  %v789_v22 = vadd.f32 %v781_v12, %v741_v51  ;;  %v790_v23 = vadd.f32 %v782_v13, %v742_v52  ;;  %v820_v27 = vmul.f32 %v812_v17, %v796_v62  ;;  %v936_v13 = vld [vmem:[#allocation2 + $0x10] sm:$0x3] }
  0x69   :  { %v821_v28 = vmul.f32 %v813_v18, %v797_v63  ;;  %v822_v29 = vmul.f32 %v814_v19, %v798_v0  ;;  %v843_v30 = vunpack.c.l.bf16 %v839_v9  ;;  %v827_v26 = vrot.slane %v819_v24, 2  ;;  %v937_v18 = vld [vmem:[#allocation2 + $0x14] sm:$0x3]  ;;  %v938_v19 = vld [vmem:[#allocation2 + $0x18] sm:$0x3] }
  0x6a   :  { %v844_v32 = vunpack.c.l.bf16 %v840_v10  ;;  %v845_v33 = vunpack.c.l.bf16 %v841_v15  ;;  %v846_v36 = vunpack.c.l.bf16 %v842_v20  ;;  %v828_v38 = vrot.slane %v820_v27, 2  ;;  %v939_v20 = vld [vmem:[#allocation2 + $0x1c] sm:$0x3] }
  0x6b   :  { %v829_v39 = vrot.slane %v821_v28, 2  ;;  %v830_v40 = vrot.slane %v822_v29, 2  ;;  %v851_v41 = vunpack.c.l.bf16 %v847_v25  ;;  %v835_v43 = vadd.f32 %v827_v26, %v787_v16  ;;  %v944_v25 = vld [vmem:[%s1521_s1 + $0x28] sm:$0x3] }
  0x6c   :  { %v852_v44 = vunpack.c.l.bf16 %v848_v31  ;;  %v853_v45 = vunpack.c.l.bf16 %v849_v34  ;;  %v854_v46 = vunpack.c.l.bf16 %v850_v35  ;;  %v836_v50 = vadd.f32 %v828_v38, %v788_v21  ;;  %v945_v31 = vld [vmem:[%s1521_s1 + $0x5a] sm:$0x3]  ;;  %v946_v34 = vld [vmem:[%s1521_s1 + $0x8c] sm:$0x3]  ;;  %v947_v35 = vld [vmem:[%s1521_s1 + $0xbe] sm:$0x3] }
  0x6d   :  { %v837_v51 = vadd.f32 %v829_v39, %v789_v22  ;;  %v838_v52 = vadd.f32 %v830_v40, %v790_v23  ;;  %v859_v53 = vrot.slane %v851_v41, 5  ;;  %v891_v59 = vunpack.c.l.bf16 %v887_v37  ;;  %v960_v41 = vld [vmem:[#allocation2 + $0x10] sm:$0x7] }
  0x6e   :  { %v860_v56 = vrot.slane %v852_v44, 5  ;;  %v861_v57 = vrot.slane %v853_v45, 5  ;;  %v862_v58 = vrot.slane %v854_v46, 5  ;;  %v892_v62 = vunpack.c.l.bf16 %v888_v42  ;;  %v961_v46 = vld [vmem:[#allocation2 + $0x14] sm:$0x7] }
  0x6f   :  { %v867_v61 = vmul.f32 %v859_v53, %v843_v30  ;;  %v893_v63 = vunpack.c.l.bf16 %v889_v47  ;;  %v894_v0 = vunpack.c.l.bf16 %v890_v48  ;;  %v899_v4 = vunpack.c.l.bf16 %v895_v49  ;;  %v962_v47 = vld [vmem:[#allocation2 + $0x18] sm:$0x7]  ;;  %v963_v48 = vld [vmem:[#allocation2 + $0x1c] sm:$0x7]  ;;  %v968_v53 = vld [vmem:[%s1521_s1 + $0x2a] sm:$0x3] }
  0x70   :  { %v868_v1 = vmul.f32 %v860_v56, %v844_v32  ;;  %v869_v2 = vmul.f32 %v861_v57, %v845_v33  ;;  %v870_v3 = vmul.f32 %v862_v58, %v846_v36  ;;  %v900_v6 = vunpack.c.l.bf16 %v896_v54  ;;  %v969_v54 = vld [vmem:[%s1521_s1 + $0x5c] sm:$0x3] }
  0x71   :  { %v875_v5 = vrot.slane %v867_v61, 3  ;;  %v901_v7 = vunpack.c.l.bf16 %v897_v55  ;;  %v902_v8 = vunpack.c.l.bf16 %v898_v60  ;;  %v907_v12 = vcombine.low %v899_v4, %v899_v4  ;;  %v971_v60 = vld [vmem:[%s1521_s1 + $0xc0] sm:$0x3]  ;;  %v1008_v61 = vld [vmem:[#allocation2 + $0x10] sm:$0x6] }
  0x72   :  { %v876_v9 = vrot.slane %v868_v1, 3  ;;  %v877_v10 = vrot.slane %v869_v2, 3  ;;  %v878_v11 = vrot.slane %v870_v3, 3  ;;  %v908_v15 = vcombine.low %v900_v6, %v900_v6  ;;  %v1009_v2 = vld [vmem:[#allocation2 + $0x14] sm:$0x6] }
  0x73   :  { %v883_v14 = vadd.f32 %v875_v5, %v835_v43  ;;  %v909_v16 = vcombine.low %v901_v7, %v901_v7  ;;  %v910_v17 = vcombine.low %v902_v8, %v902_v8  ;;  %v915_v24 = vmul.f32 %v907_v12, %v891_v59  ;;  %v970_v59 = vld [vmem:[%s1521_s1 + $0x8e] sm:$0x3]  ;;  %v1010_v3 = vld [vmem:[#allocation2 + $0x18] sm:$0x6]  ;;  %v1011_v4 = vld [vmem:[#allocation2 + $0x1c] sm:$0x6] }
  0x74   :  { %v884_v21 = vadd.f32 %v876_v9, %v836_v50  ;;  %v885_v22 = vadd.f32 %v877_v10, %v837_v51  ;;  %v886_v23 = vadd.f32 %v878_v11, %v838_v52  ;;  %v916_v27 = vmul.f32 %v908_v15, %v892_v62  ;;  %v1016_v9 = vld [vmem:[%s1521_s1 + $0x2c] sm:$0x3]  ;;  %v1018_v15 = vld [vmem:[%s1521_s1 + $0x90] sm:$0x3] }
  0x75   :  { %v917_v28 = vmul.f32 %v909_v16, %v893_v63  ;;  %v918_v29 = vmul.f32 %v910_v17, %v894_v0  ;;  %v940_v30 = vunpack.c.l.bf16 %v936_v13  ;;  %v923_v26 = vrot.slane %v915_v24, 4  ;;  %v1019_v16 = vld [vmem:[%s1521_s1 + $0xc2] sm:$0x3] }
  0x76   :  { %v941_v32 = vunpack.c.l.bf16 %v937_v18  ;;  %v942_v33 = vunpack.c.l.bf16 %v938_v19  ;;  %v943_v36 = vunpack.c.l.bf16 %v939_v20  ;;  %v924_v37 = vrot.slane %v916_v27, 4 }
  0x77   :  { %v925_v38 = vrot.slane %v917_v28, 4  ;;  %v926_v39 = vrot.slane %v918_v29, 4  ;;  %v948_v40 = vunpack.c.l.bf16 %v944_v25  ;;  %v931_v42 = vadd.f32 %v923_v26, %v883_v14  ;;  %v1017_v14 = vld [vmem:[%s1521_s1 + $0x5e] sm:$0x3]  ;;  %v1056_v26 = vld [vmem:[#allocation2 + $0x10] sm:$0xe] }
  0x78   :  { %v949_v43 = vunpack.c.l.bf16 %v945_v31  ;;  %v950_v44 = vunpack.c.l.bf16 %v946_v34  ;;  %v951_v45 = vunpack.c.l.bf16 %v947_v35  ;;  %v932_v49 = vadd.f32 %v924_v37, %v884_v21 }
  0x79   :  { %v933_v50 = vadd.f32 %v925_v38, %v885_v22  ;;  %v934_v51 = vadd.f32 %v926_v39, %v886_v23  ;;  %v952_v52 = vmul.f32 %v948_v40, %v940_v30  ;;  %v964_v58 = vunpack.c.l.bf16 %v960_v41  ;;  %v1057_v38 = vld [vmem:[#allocation2 + $0x14] sm:$0xe] }
  0x7a   :  { %v953_v55 = vmul.f32 %v949_v43, %v941_v32  ;;  %v954_v56 = vmul.f32 %v950_v44, %v942_v33  ;;  %v955_v57 = vmul.f32 %v951_v45, %v943_v36  ;;  %v965_v63 = vunpack.c.l.bf16 %v961_v46  ;;  %v1058_v43 = vld [vmem:[#allocation2 + $0x18] sm:$0xe] }
  0x7b   :  { %v956_v62 = vadd.f32 %v952_v52, %v931_v42  ;;  %v966_v0 = vunpack.c.l.bf16 %v962_v47  ;;  %v967_v1 = vunpack.c.l.bf16 %v963_v48  ;;  %v972_v8 = vunpack.c.l.bf16 %v968_v53  ;;  %v1059_v48 = vld [vmem:[#allocation2 + $0x1c] sm:$0xe] }
  0x7c   :  { %v957_v5 = vadd.f32 %v953_v55, %v932_v49  ;;  %v958_v6 = vadd.f32 %v954_v56, %v933_v50  ;;  %v959_v7 = vadd.f32 %v955_v57, %v934_v51  ;;  %v973_v10 = vunpack.c.l.bf16 %v969_v54  ;;  %v1064_v49 = vld [vmem:[%s1521_s1 + $0x2e] sm:$0x3]  ;;  %v1065_v50 = vld [vmem:[%s1521_s1 + $0x60] sm:$0x3]  ;;  %v1066_v55 = vld [vmem:[%s1521_s1 + $0x92] sm:$0x3] }
  0x7d   :  { %v974_v11 = vunpack.c.l.bf16 %v970_v59  ;;  %v975_v12 = vunpack.c.l.bf16 %v971_v60  ;;  %v1012_v13 = vunpack.c.l.bf16 %v1008_v61  ;;  %v980_v17 = vrot.slane %v972_v8, 7  ;;  %v1067_v56 = vld [vmem:[%s1521_s1 + $0xc4] sm:$0x3]  ;;  %v1104_v61 = vld [vmem:[#allocation2 + $0x10] sm:$0xc] }
  0x7e   :  { %v1013_v18 = vunpack.c.l.bf16 %v1009_v2  ;;  %v1014_v19 = vunpack.c.l.bf16 %v1010_v3  ;;  %v1015_v20 = vunpack.c.l.bf16 %v1011_v4  ;;  %v981_v21 = vrot.slane %v973_v10, 7  ;;  %v1105_v2 = vld [vmem:[#allocation2 + $0x14] sm:$0xc]  ;;  %v1106_v3 = vld [vmem:[#allocation2 + $0x18] sm:$0xc] }
  0x7f   :  { %v982_v22 = vrot.slane %v974_v11, 7  ;;  %v983_v23 = vrot.slane %v975_v12, 7  ;;  %v1020_v24 = vunpack.c.l.bf16 %v1016_v9  ;;  %v988_v25 = vmul.f32 %v980_v17, %v964_v58  ;;  %v1107_v4 = vld [vmem:[#allocation2 + $0x1c] sm:$0xc]  ;;  %v1112_v9 = vld [vmem:[%s1521_s1 + $0x30] sm:$0x3] }
  0x80   :  { %v1021_v27 = vunpack.c.l.bf16 %v1017_v14  ;;  %v1022_v28 = vunpack.c.l.bf16 %v1018_v15  ;;  %v1023_v29 = vunpack.c.l.bf16 %v1019_v16  ;;  %v989_v30 = vmul.f32 %v981_v21, %v965_v63  ;;  %v1113_v14 = vld [vmem:[%s1521_s1 + $0x62] sm:$0x3]  ;;  %v1114_v15 = vld [vmem:[%s1521_s1 + $0x94] sm:$0x3]  ;;  %v1115_v16 = vld [vmem:[%s1521_s1 + $0xc6] sm:$0x3] }
  0x81   :  { %v990_v31 = vmul.f32 %v982_v22, %v966_v0  ;;  %v991_v34 = vmul.f32 %v983_v23, %v967_v1  ;;  %v1028_v35 = vrot.slane %v1020_v24, 6  ;;  %v996_v32 = vrot.slane %v988_v25, 1 }
  0x82   :  { %v1029_v33 = vrot.slane %v1021_v27, 6  ;;  %v1030_v36 = vrot.slane %v1022_v28, 6  ;;  %v1031_v37 = vrot.slane %v1023_v29, 6  ;;  %v997_v39 = vrot.slane %v989_v30, 1 }
  0x83   :  { %v998_v40 = vrot.slane %v990_v31, 1  ;;  %v999_v41 = vrot.slane %v991_v34, 1  ;;  %v1036_v42 = vmul.f32 %v1028_v35, %v1012_v13  ;;  %v1004_v44 = vadd.f32 %v996_v32, %v956_v62 }
  0x84   :  { %v1037_v45 = vmul.f32 %v1029_v33, %v1013_v18  ;;  %v1038_v46 = vmul.f32 %v1030_v36, %v1014_v19  ;;  %v1039_v47 = vmul.f32 %v1031_v37, %v1015_v20  ;;  %v1005_v51 = vadd.f32 %v997_v39, %v957_v5 }
  0x85   :  { %v1006_v52 = vadd.f32 %v998_v40, %v958_v6  ;;  %v1007_v53 = vadd.f32 %v999_v41, %v959_v7  ;;  %v1044_v54 = vrot.slane %v1036_v42, 2  ;;  %v1060_v60 = vunpack.c.l.bf16 %v1056_v26 }
  0x86   :  { %v1045_v57 = vrot.slane %v1037_v45, 2  ;;  %v1046_v58 = vrot.slane %v1038_v46, 2  ;;  %v1047_v59 = vrot.slane %v1039_v47, 2  ;;  %v1061_v63 = vunpack.c.l.bf16 %v1057_v38 }
  0x87   :  { %v1052_v62 = vadd.f32 %v1044_v54, %v1004_v44  ;;  %v1062_v0 = vunpack.c.l.bf16 %v1058_v43  ;;  %v1063_v1 = vunpack.c.l.bf16 %v1059_v48  ;;  %v1068_v8 = vunpack.c.l.bf16 %v1064_v49 }
  0x88   :  { %v1053_v5 = vadd.f32 %v1045_v57, %v1005_v51  ;;  %v1054_v6 = vadd.f32 %v1046_v58, %v1006_v52  ;;  %v1055_v7 = vadd.f32 %v1047_v59, %v1007_v53  ;;  %v1069_v10 = vunpack.c.l.bf16 %v1065_v50 }
  0x89   :  { %v1070_v11 = vunpack.c.l.bf16 %v1066_v55  ;;  %v1071_v12 = vunpack.c.l.bf16 %v1067_v56  ;;  %v1108_v13 = vunpack.c.l.bf16 %v1104_v61  ;;  %v1076_v17 = vrot.slane %v1068_v8, 5 }
  0x8a   :  { %v1109_v18 = vunpack.c.l.bf16 %v1105_v2  ;;  %v1110_v19 = vunpack.c.l.bf16 %v1106_v3  ;;  %v1111_v20 = vunpack.c.l.bf16 %v1107_v4  ;;  %v1077_v21 = vrot.slane %v1069_v10, 5 }
  0x8b   :  { %v1078_v22 = vrot.slane %v1070_v11, 5  ;;  %v1079_v23 = vrot.slane %v1071_v12, 5  ;;  %v1116_v24 = vunpack.c.l.bf16 %v1112_v9  ;;  %v1084_v25 = vmul.f32 %v1076_v17, %v1060_v60 }
  0x8c   :  { %v1117_v27 = vunpack.c.l.bf16 %v1113_v14  ;;  %v1118_v28 = vunpack.c.l.bf16 %v1114_v15  ;;  %v1119_v29 = vunpack.c.l.bf16 %v1115_v16  ;;  %v1085_v30 = vmul.f32 %v1077_v21, %v1061_v63 }
  0x8d   :  { %v1086_v31 = vmul.f32 %v1078_v22, %v1062_v0  ;;  %v1087_v34 = vmul.f32 %v1079_v23, %v1063_v1  ;;  %v1124_v35 = vcombine.low %v1116_v24, %v1116_v24  ;;  %v1092_v26 = vrot.slane %v1084_v25, 3 }
  0x8e   :  { %v1125_v32 = vcombine.low %v1117_v27, %v1117_v27  ;;  %v1126_v33 = vcombine.low %v1118_v28, %v1118_v28  ;;  %v1127_v36 = vcombine.low %v1119_v29, %v1119_v29  ;;  %v1093_v37 = vrot.slane %v1085_v30, 3 }
  0x8f   :  { %v1094_v38 = vrot.slane %v1086_v31, 3  ;;  %v1095_v39 = vrot.slane %v1087_v34, 3  ;;  %v1132_v40 = vmul.f32 %v1124_v35, %v1108_v13  ;;  %v1100_v41 = vadd.f32 %v1092_v26, %v1052_v62 }
  0x90   :  { %v1133_v42 = vmul.f32 %v1125_v32, %v1109_v18  ;;  %v1134_v43 = vmul.f32 %v1126_v33, %v1110_v19  ;;  %v1135_v44 = vmul.f32 %v1127_v36, %v1111_v20  ;;  %v1101_v45 = vadd.f32 %v1093_v37, %v1053_v5 }
  0x91   :  { %v1102_v46 = vadd.f32 %v1094_v38, %v1054_v6  ;;  %v1103_v47 = vadd.f32 %v1095_v39, %v1055_v7  ;;  %v1140_v48 = vrot.slane %v1132_v40, 4 }
  0x92   :  { %v1141_v49 = vrot.slane %v1133_v42, 4  ;;  %v1142_v50 = vrot.slane %v1134_v43, 4  ;;  %v1143_v51 = vrot.slane %v1135_v44, 4 }
  0x93   :  { %v1148_v52 = vadd.f32 %v1140_v48, %v1100_v41 }
  0x94   :  { %v1149_v53 = vadd.f32 %v1141_v49, %v1101_v45  ;;  %v1150_v54 = vadd.f32 %v1142_v50, %v1102_v46  ;;  %v1151_v55 = vadd.f32 %v1143_v51, %v1103_v47 }
  0x95   :  { %v1152_v56 = vpack.c.bf16 %v1148_v52, %v1148_v52 }
  0x96   :  { %v1153_v57 = vpack.c.bf16 %v1149_v53, %v1149_v53  ;;  %v1154_v58 = vpack.c.bf16 %v1150_v54, %v1150_v54  ;;  %v1155_v59 = vpack.c.bf16 %v1151_v55, %v1151_v55 }
  0x97   :  { %1156 = vst [vmem:[%s1522_s2] sm:$0x3] %v1152_v56 }
  0x98   :  { %1157 = vst [vmem:[%s1522_s2 + $0x2] sm:$0x3] %v1153_v57  ;;  %1158 = vst [vmem:[%s1522_s2 + $0x4] sm:$0x3] %v1154_v58 }
  0x99   :  { %1159 = vst [vmem:[%s1522_s2 + $0x6] sm:$0x3] %v1155_v59 }
  0x9a   :  { %1164 = vsyncmov [#allocation3] }
  0x9d   :  { %s1165_s0 = vpop.sfrf %1164 }
  0x9e   :  { %p1178_p0 = scmp.ne.s32.totalorder %s1165_s0, 0 }
  0xa0   :  { %1169 = shalt.err (%p1178_p0)  }

// kernel: stfan_forward.175
= control target key start
LH: loop header
LB: loop body
LE: loop exit
PB: predicated region body
PF: predicated region fallthrough
CT: control target
= control target key end

     0   :  { %s1042_s12 = smov 0   ;;  %s1044_s13 = smov 0   ;;  %s1158_s0 = inlined_call_operand.vmem [shape: bf16[16,1024], index: 0, kind: input, shape index: {}]   ;;  %s1159_s1 = inlined_call_operand.vmem [shape: bf16[1024,64], index: 1, kind: input, shape index: {}]   ;;  %s1160_s2 = inlined_call_operand.vmem [shape: f32[1,64], index: 2, kind: input, shape index: {}]   ;;  %s1161_s3 = inlined_call_operand.vmem [shape: bf16[16,64], index: 3, kind: output, shape index: {}]  }
   0x1   :  { %s1046_s14 = smov 0   ;;  %s1048_s15 = smov 0  }
   0x2   :  { %s1050_s16 = smov 0  }
   0x3 LB: > { %s25_s17 = sadd.s32 1, %s1015_s15  ;;  %p48_p1 = scmp.ne.s32.totalorder %s1007_s13, %s1003_s12  ;;  %s1019_s16 = sphi %s1050_s16, %s13_s16   ;;  %s1015_s15 = sphi %s1048_s15, %s1165_s15   ;;  %s1011_s14 = sphi %s1046_s14, %s1164_s14   ;;  %s1007_s13 = sphi %s1044_s13, %s1163_s13   ;;  %s1003_s12 = sphi %s1042_s12, %s1162_s12  }
   0x4   : > { %p26_p0 = scmp.ge.s32.totalorder %s25_s17, 2  ;;  %p49_p2 = scmp.eq.s32.totalorder %s1019_s16, 0 }
   0x5   : > { %s41_s19 = sadd.s32 1, %s1007_s13  ;;  %p802_p5 = scmp.ge.s32.totalorder %s1019_s16, 2 }
   0x6   : > { %s1167_s17 = smov (%p26_p0, %s25_s17), 0  ;;  %p50_p3 = por %p49_p2, %p48_p1 }
   0x7   : > { %s37_s18 = ssub.s32 %s1015_s15, %s1167_s17  ;;  %162 = sbr.rel (%p802_p5) target bundleno = 21 (0x15), region = 20 }
   0x8   : > { %p39_p4 = scmp.eq.s32.totalorder %s37_s18, 0 }
   0xa   : > { %s1077_s20 = scalar_select %p39_p4, %s1007_s13, %s41_s19  }
   0xe   : > { %165 = sbr.rel (!%p50_p3) target bundleno = 21 (0x15), region = 24  ;;  %s167_s21 = sand.u32 (%p50_p3), 1, %s1007_s13  }
   0xf   : > { %s855_s22 = sshll.u32 (%p50_p3), %s1015_s15, 4  ;;  %s803_s23 = sshll.u32 (%p50_p3), %s167_s21, 5 }
  0x10   : > { %s175_s26 = scalar_lea.vmem (%p50_p3), %s1158_s0, %s855_s22  ;;  %s169_s27 = scalar_lea.vmem (%p50_p3), [#allocation3], %s803_s23 }
  0x11   : > { %v188_v0 = vld [vmem:[%s175_s26] sm:$0xff] (%p50_p3)  ;;  %v190_v1 = vld [vmem:[%s175_s26 + $0x8] sm:$0xff] (%p50_p3) }
  0x12   : > { %v192_v2 = vld [vmem:[%s175_s26 + $0x20] sm:$0xff] (%p50_p3)  ;;  %189 = vst [vmem:[%s169_s27] sm:$0xff] (%p50_p3), %v188_v0  ;;  %191 = vst [vmem:[%s169_s27 + $0x8] sm:$0xff] (%p50_p3), %v190_v1  ;;  %v194_v3 = vld [vmem:[%s175_s26 + $0x28] sm:$0xff] (%p50_p3) }
  0x13   : > { %193 = vst [vmem:[%s169_s27 + $0x10] sm:$0xff] (%p50_p3), %v192_v2  ;;  %195 = vst [vmem:[%s169_s27 + $0x18] sm:$0xff] (%p50_p3), %v194_v3 }
  0x15 PF: > { %p806_p6 = scmp.ge.s32.totalorder %s1019_s16, 1  ;;  %p212_p7 = scmp.lt.s32.totalorder %s1019_s16, 3 }
  0x17   : > { %p213_p8 = pnand %p806_p6, %p212_p7 }
  0x18   : > { %s219_s28 = sand.u32 (!%p213_p8), 1, %s1003_s12   ;;  %s808_s29 = sshll.u32 (!%p213_p8), %s1011_s14, 6 }
  0x19   : > { %216 = sbr.rel (%p213_p8) target bundleno = 311 (0x137), region = 51  ;;  %s807_s30 = sshll.u32 (!%p213_p8), %s219_s28, 5 }
  0x1a   : > { %p259_p9 = scmp.lt.s32.totalorder (!%p213_p8), %s808_s29, 127  ;;  %s1094_s8 = scalar_lea.vmem (!%p213_p8), [#allocation3], %s807_s30 }
  0x1b   : > { %p810_p10 = scmp.ne.s32.totalorder (!%p213_p8), %s1011_s14, 0 }
  0x20   : > { %s1169_s29 = smov (!%p259_p9, %s808_s29), 127  ;;  %283 = sbr.rel (%p810_p10) target bundleno = 39 (0x27), region = 59 }
  0x21   : > { %s809_s4 = sshll.u32 %s1169_s29, 2  ;;  %vm284_vm0 = vcmask (!%p810_p10), 523264   ;;  %v1021_v4 = vmov (!%p810_p10), 0.0  }
  0x22   : > { %s1092_s7 = scalar_lea.vmem %s1159_s1, %s809_s4  ;;  %285 = vst.msk [vmem:[#allocation2] sm:$0xff] (!%p810_p10), %vm284_vm0, %v1021_v4  ;;  %286 = vst.msk [vmem:[#allocation2 + $0x8] sm:$0xff] (!%p810_p10), %vm284_vm0, %v1021_v4 }
  0x27 PF: > { %v943_v5 = vld [vmem:[%s1092_s7 + $0x40] sm:$0xff]   ;;  %v947_v9 = vld [vmem:[%s1092_s7 + $0x48] sm:$0xff]   ;;  %v951_v13 = vld [vmem:[%s1092_s7 + $0x50] sm:$0xff]   ;;  %vm653_vm1 = vcmask 523264   ;;  %p847_p11 = scmp.ne.s32.totalorder %s1011_s14, 1 }
  0x28   : > { %v944_v6 = vld [vmem:[%s1092_s7 + $0xc0] sm:$0xff]   ;;  %858 = vmatprep.subr.bf16.mxu0 %v943_v5  ;;  %v948_v10 = vld [vmem:[%s1092_s7 + $0xc8] sm:$0xff]   ;;  %v952_v14 = vld [vmem:[%s1092_s7 + $0xd0] sm:$0xff]   ;;  %vm685_vm4 = vcmask (!%p847_p11), 519168  }
  0x29   : > { %v945_v7 = vld [vmem:[%s1092_s7] sm:$0xff]   ;;  %880 = vmatprep.subr.bf16.mxu1 %v944_v6  ;;  %v949_v11 = vld [vmem:[%s1092_s7 + $0x8] sm:$0xff]   ;;  %v953_v15 = vld [vmem:[%s1092_s7 + $0x10] sm:$0xff]  }
  0x2a   : > { %v946_v8 = vld [vmem:[%s1092_s7 + $0x80] sm:$0xff]   ;;  %859 = vmatpush3.bf16.msra.mxu0 %v945_v7  ;;  %v950_v12 = vld [vmem:[%s1092_s7 + $0x88] sm:$0xff]   ;;  %v954_v16 = vld [vmem:[%s1092_s7 + $0x90] sm:$0xff]  }
  0x2b   : > { %881 = vmatpush3.bf16.msra.mxu1 %v946_v8  ;;  %860 = vmatprep.subr.bf16.mxu0 %v947_v9  ;;  %v955_v17 = vld [vmem:[%s1092_s7 + $0x58] sm:$0xff]   ;;  %v959_v21 = vld [vmem:[%s1092_s7 + $0x60] sm:$0xff]   ;;  %v963_v25 = vld [vmem:[%s1092_s7 + $0x68] sm:$0xff]  }
  0x2c   : > { %882 = vmatprep.subr.bf16.mxu1 %v948_v10  ;;  %v956_v18 = vld [vmem:[%s1092_s7 + $0xd8] sm:$0xff]   ;;  %v960_v22 = vld [vmem:[%s1092_s7 + $0xe0] sm:$0xff]   ;;  %v964_v26 = vld [vmem:[%s1092_s7 + $0xe8] sm:$0xff]  }
  0x2d   : > { %v957_v19 = vld [vmem:[%s1092_s7 + $0x18] sm:$0xff]   ;;  %v961_v23 = vld [vmem:[%s1092_s7 + $0x20] sm:$0xff]   ;;  %v965_v27 = vld [vmem:[%s1092_s7 + $0x28] sm:$0xff]  }
  0x2e   : > { %861 = vmatpush3.bf16.msra.mxu0 %v949_v11  ;;  %v958_v20 = vld [vmem:[%s1092_s7 + $0x98] sm:$0xff]   ;;  %v962_v24 = vld [vmem:[%s1092_s7 + $0xa0] sm:$0xff]   ;;  %v966_v28 = vld [vmem:[%s1092_s7 + $0xa8] sm:$0xff]  }
  0x2f   : > { %883 = vmatpush3.bf16.msra.mxu1 %v950_v12  ;;  %862 = vmatprep.subr.bf16.mxu0 %v951_v13  ;;  %v967_v29 = vld [vmem:[%s1092_s7 + $0x70] sm:$0xff]   ;;  %v971_v33 = vld [vmem:[%s1092_s7 + $0x78] sm:$0xff]   ;;  %v287_v50 = vld [vmem:[#allocation2] sm:$0xff] }
  0x30   : > { %884 = vmatprep.subr.bf16.mxu1 %v952_v14  ;;  %v968_v30 = vld [vmem:[%s1092_s7 + $0xf0] sm:$0xff]   ;;  %v972_v34 = vld [vmem:[%s1092_s7 + $0xf8] sm:$0xff]   ;;  %v288_v55 = vld [vmem:[#allocation2 + $0x8] sm:$0xff] }
  0x31   : > { %v969_v31 = vld [vmem:[%s1092_s7 + $0x30] sm:$0xff]   ;;  %v973_v35 = vld [vmem:[%s1092_s7 + $0x38] sm:$0xff]   ;;  %v848_v60 = vld [vmem:[%s1160_s2] ss:$0 sm:$0xff] (!%p847_p11) }
  0x32   : > { %863 = vmatpush3.bf16.msra.mxu0 %v953_v15  ;;  %v970_v32 = vld [vmem:[%s1092_s7 + $0xb0] sm:$0xff]   ;;  %v974_v36 = vld [vmem:[%s1092_s7 + $0xb8] sm:$0xff]  }
  0x33   : > { %885 = vmatpush3.bf16.msra.mxu1 %v954_v16  ;;  %864 = vmatprep.subr.bf16.mxu0 %v955_v17  ;;  %v975_v37 = vld [vmem:[%s1094_s8] ss:$16 sps:$4 sm:$0xff]   ;;  %v977_v38 = vld [vmem:[%s1094_s8 + $0x4] ss:$16 sps:$4 sm:$0xff]   ;;  %v978_v39 = vld [vmem:[%s1094_s8 + $0x8] ss:$16 sps:$4 sm:$0xff]  }
  0x34   : > { %886 = vmatprep.subr.bf16.mxu1 %v956_v18  ;;  %v980_v40 = vld [vmem:[%s1094_s8 + $0xc] ss:$16 sps:$4 sm:$0xff]   ;;  %601 = vmatprep.mubr.bf16.mxu0 %v977_v38 }
  0x35   : > { %642 = vmatprep.mubr.bf16.mxu1 %v980_v40 }
  0x36   : > { %865 = vmatpush3.bf16.msra.mxu0 %v957_v19 }
  0x37   : > { %887 = vmatpush3.bf16.msra.mxu1 %v958_v20  ;;  %866 = vmatprep.subr.bf16.mxu0 %v959_v21 }
  0x38   : > { %888 = vmatprep.subr.bf16.mxu1 %v960_v22 }
  0x3a   : > { %867 = vmatpush3.bf16.msra.mxu0 %v961_v23 }
  0x3b   : > { %889 = vmatpush3.bf16.msra.mxu1 %v962_v24  ;;  %868 = vmatprep.subr.bf16.mxu0 %v963_v25 }
  0x3c   : > { %890 = vmatprep.subr.bf16.mxu1 %v964_v26 }
  0x3e   : > { %869 = vmatpush3.bf16.msra.mxu0 %v965_v27 }
  0x3f   : > { %891 = vmatpush3.bf16.msra.mxu1 %v966_v28  ;;  %870 = vmatprep.subr.bf16.mxu0 %v967_v29 }
  0x40   : > { %892 = vmatprep.subr.bf16.mxu1 %v968_v30 }
  0x42   : > { %871 = vmatpush3.bf16.msra.mxu0 %v969_v31 }
  0x43   : > { %893 = vmatpush3.bf16.msra.mxu1 %v970_v32  ;;  %872 = vmatprep.subr.bf16.mxu0 %v971_v33 }
  0x44   : > { %894 = vmatprep.subr.bf16.mxu1 %v972_v34 }
  0x46   : > { %873 = vmatpush3.bf16.msra.mxu0 %v973_v35 }
  0x47   : > { %895 = vmatpush3.bf16.msra.mxu1 %v974_v36 }
  0x49   : > { %602 = vmatmul.mubr.bf16.vlgmr.msra.gmra.mrb[0].mxu0 %v975_v37 }
  0x4a   : > { %643 = vmatmul.mubr.bf16.vlgmr.msra.gmra.mrb[0].mxu1 %v978_v39 }
 0x11c   : > { %v874_v41 = vpop.f32.mrb[0].mxu0 }
 0x11d   : > { %v896_v42 = vpop.f32.mrb[0].mxu1  ;;  %v875_v43 = vpop.f32.mrb[1].mxu0 }
 0x11e   : > { %v876_v44 = vadd.f32 %v875_v43, %v874_v41  ;;  %v897_v45 = vpop.f32.mrb[1].mxu1  ;;  %v877_v46 = vpop.f32.mrb[2].mxu0 }
 0x11f   : > { %v898_v47 = vadd.f32 %v897_v45, %v896_v42  ;;  %v899_v48 = vpop.f32.mrb[2].mxu1  ;;  %v878_v49 = vpop.f32.mrb[3].mxu0 }
 0x120   : > { %v879_v51 = vadd.f32 %v878_v49, %v877_v46  ;;  %v900_v52 = vpop.f32.mrb[3].mxu1 }
 0x121   : > { %v645_v53 = vadd.f32 %v898_v47, %v876_v44  ;;  %v901_v54 = vadd.f32 %v900_v52, %v899_v48  ;;  %659 = sbr.rel (%p847_p11) target bundleno = 311 (0x137), region = 63 }
 0x123   : > { %v651_v56 = vadd.f32 %v645_v53, %v287_v50  ;;  %v648_v57 = vadd.f32 %v901_v54, %v879_v51 }
 0x125   : > { %654 = vst.msk [vmem:[#allocation2] sm:$0xff] %vm653_vm1, %v651_v56  ;;  %v652_v58 = vadd.f32 %v648_v57, %v288_v55 }
 0x127   : > { %655 = vst.msk [vmem:[#allocation2 + $0x8] sm:$0xff] %vm653_vm1, %v652_v58 }
 0x12c   : > { %v660_v59 = vld [vmem:[#allocation2] sm:$0xff] }
 0x12d   : > { %v669_v62 = vadd.f32 %v848_v60, %v660_v59 }
 0x12e   : > { %v661_v61 = vld [vmem:[#allocation2 + $0x8] sm:$0xff] }
 0x12f   : > { %v670_v63 = vadd.f32 %v848_v60, %v661_v61  ;;  %vm671_vm2 = vcmp.ge.f32.partialorder %v669_v62, 0.0  ;;  %v673_v0 = vmul.f32 0.1, %v669_v62 }
 0x131   : > { %vm672_vm3 = vcmp.ge.f32.partialorder %v670_v63, 0.0  ;;  %v674_v1 = vmul.f32 0.1, %v670_v63  ;;  %v675_v2 = vsel %vm671_vm2, %v669_v62, %v673_v0 }
 0x132   : > { %v856_v4 = vpack.c.bf16 %v675_v2, %v675_v2 }
 0x133   : > { %v676_v3 = vsel %vm672_vm3, %v670_v63, %v674_v1 }
 0x134   : > { %v857_v5 = vpack.c.bf16 %v676_v3, %v676_v3  ;;  %686 = vst.msk [vmem:[%s1161_s3] sm:$0xf] %vm685_vm4, %v856_v4 }
 0x136   : > { %687 = vst.msk [vmem:[%s1161_s3 + $0x4] sm:$0xf] %vm685_vm4, %v857_v5 }
 0x137 PF: > { %s13_s16 = sadd.s32 1, %s1019_s16   ;;  %s1162_s12 = smov %s1007_s13 }
 0x138   : > { %p10_p12 = scmp.ge.s32.totalorder %s13_s16, 4   ;;  %s1163_s13 = smov %s1077_s20 }
 0x139   : > { %s1164_s14 = smov %s1015_s15  ;;  %s1165_s15 = smov %s1167_s17 }
 0x13a   :  { %12 = sbr.rel (!%p10_p12) target bundleno = 3 (0x3), region = 104 }

// kernel: stfan_forward.183
= control target key start
LH: loop header
LB: loop body
LE: loop exit
PB: predicated region body
PF: predicated region fallthrough
CT: control target
= control target key end

     0   :  { %vm319_vm2 = vcmask 257024   ;;  %s584_s1 = inlined_call_operand.vmem [shape: bf16[256,32], index: 1, kind: input, shape index: {}]   ;;  %s585_s0 = inlined_call_operand.vmem [shape: bf16[64,256], index: 0, kind: input, shape index: {}]   ;;  %s586_s2 = inlined_call_operand.vmem [shape: f32[1,32], index: 2, kind: input, shape index: {}]   ;;  %s587_s3 = inlined_call_operand.vmem [shape: bf16[64,32], index: 3, kind: output, shape index: {}]  }
   0x1   :  { %v429_v0 = vld [vmem:[%s584_s1 + $0x40] sm:$0xff]   ;;  %v431_v2 = vld [vmem:[%s584_s1 + $0x48] sm:$0xff]   ;;  %v433_v4 = vld [vmem:[%s584_s1 + $0x50] sm:$0xff]  }
   0x2   :  { %v430_v1 = vld [vmem:[%s584_s1] sm:$0xff]   ;;  %373 = vmatprep.subr.bf16.mxu0 %v429_v0  ;;  %413 = vmatprep.subr.bf16.mxu1 %v429_v0  ;;  %v432_v3 = vld [vmem:[%s584_s1 + $0x8] sm:$0xff]   ;;  %v434_v5 = vld [vmem:[%s584_s1 + $0x10] sm:$0xff]  }
   0x3   :  { %374 = vmatpush3.bf16.msra.mxu0 %v430_v1  ;;  %421 = vmatpush3.bf16.msra.mxu1 %v430_v1  ;;  %v435_v6 = vld [vmem:[%s584_s1 + $0x58] sm:$0xff]   ;;  %v437_v8 = vld [vmem:[%s584_s1 + $0x60] sm:$0xff]   ;;  %v439_v10 = vld [vmem:[%s584_s1 + $0x68] sm:$0xff]  }
   0x4   :  { %375 = vmatprep.subr.bf16.mxu0 %v431_v2  ;;  %414 = vmatprep.subr.bf16.mxu1 %v431_v2  ;;  %v436_v7 = vld [vmem:[%s584_s1 + $0x18] sm:$0xff]   ;;  %v438_v9 = vld [vmem:[%s584_s1 + $0x20] sm:$0xff]   ;;  %v440_v13 = vld [vmem:[%s584_s1 + $0x28] sm:$0xff]  }
   0x5   :  { %v447_v11 = vld [vmem:[%s585_s0 + $0x4] ss:$8 sps:$4 sm:$0xff]   ;;  %v441_v14 = vld [vmem:[%s584_s1 + $0x70] sm:$0xff]   ;;  %v443_v16 = vld [vmem:[%s584_s1 + $0x78] sm:$0xff]  }
   0x6   :  { %v450_v12 = vld [vmem:[%s585_s0 + $0x24] ss:$8 sps:$4 sm:$0xff]   ;;  %230 = vmatprep.mubr.bf16.mxu0 %v447_v11  ;;  %v442_v15 = vld [vmem:[%s584_s1 + $0x30] sm:$0xff]   ;;  %v444_v17 = vld [vmem:[%s584_s1 + $0x38] sm:$0xff]  }
   0x7   :  { %376 = vmatpush3.bf16.msra.mxu0 %v432_v3  ;;  %422 = vmatpush3.bf16.msra.mxu1 %v432_v3  ;;  %v445_v18 = vld [vmem:[%s585_s0] ss:$8 sps:$4 sm:$0xff]   ;;  %v451_v20 = vld [vmem:[%s585_s0 + $0x14] ss:$8 sps:$4 sm:$0xff]   ;;  %v455_v22 = vld [vmem:[%s585_s0 + $0x10] ss:$8 sps:$4 sm:$0xff]  }
   0x8   :  { %377 = vmatprep.subr.bf16.mxu0 %v433_v4  ;;  %415 = vmatprep.subr.bf16.mxu1 %v433_v4  ;;  %v448_v19 = vld [vmem:[%s585_s0 + $0x20] ss:$8 sps:$4 sm:$0xff]   ;;  %v453_v21 = vld [vmem:[%s585_s0 + $0x34] ss:$8 sps:$4 sm:$0xff]   ;;  %v456_v23 = vld [vmem:[%s585_s0 + $0x30] ss:$8 sps:$4 sm:$0xff]  }
   0x9   :  { %246 = vmatprep.mubr.bf16.mxu1 %v450_v12  ;;  %v332_v26 = vld [vmem:[%s586_s2] ss:$0 sm:$0xff] }
   0xb   :  { %378 = vmatpush3.bf16.msra.mxu0 %v434_v5  ;;  %423 = vmatpush3.bf16.msra.mxu1 %v434_v5 }
   0xc   :  { %379 = vmatprep.subr.bf16.mxu0 %v435_v6  ;;  %416 = vmatprep.subr.bf16.mxu1 %v435_v6 }
   0xf   :  { %380 = vmatpush3.bf16.msra.mxu0 %v436_v7  ;;  %424 = vmatpush3.bf16.msra.mxu1 %v436_v7 }
  0x10   :  { %381 = vmatprep.subr.bf16.mxu0 %v437_v8  ;;  %417 = vmatprep.subr.bf16.mxu1 %v437_v8 }
  0x13   :  { %382 = vmatpush3.bf16.msra.mxu0 %v438_v9  ;;  %425 = vmatpush3.bf16.msra.mxu1 %v438_v9 }
  0x14   :  { %383 = vmatprep.subr.bf16.mxu0 %v439_v10  ;;  %418 = vmatprep.subr.bf16.mxu1 %v439_v10 }
  0x17   :  { %384 = vmatpush3.bf16.msra.mxu0 %v440_v13  ;;  %426 = vmatpush3.bf16.msra.mxu1 %v440_v13 }
  0x18   :  { %385 = vmatprep.subr.bf16.mxu0 %v441_v14  ;;  %419 = vmatprep.subr.bf16.mxu1 %v441_v14 }
  0x1b   :  { %386 = vmatpush3.bf16.msra.mxu0 %v442_v15  ;;  %427 = vmatpush3.bf16.msra.mxu1 %v442_v15 }
  0x1c   :  { %387 = vmatprep.subr.bf16.mxu0 %v443_v16  ;;  %420 = vmatprep.subr.bf16.mxu1 %v443_v16 }
  0x1f   :  { %388 = vmatpush3.bf16.msra.mxu0 %v444_v17  ;;  %428 = vmatpush3.bf16.msra.mxu1 %v444_v17 }
  0x22   :  { %231 = vmatmul.mubr.bf16.vlgmr.msra.gmra.mrb[0].mxu0 %v445_v18  ;;  %247 = vmatmul.mubr.bf16.vlgmr.msra.gmra.mrb[0].mxu1 %v448_v19 }
  0x23   :  { %238 = vmatprep.mubr.bf16.mxu0 %v451_v20  ;;  %254 = vmatprep.mubr.bf16.mxu1 %v453_v21 }
  0x2a   :  { %239 = vmatmul.mubr.bf16.gmra.mrb[4].mxu0 %v455_v22  ;;  %255 = vmatmul.mubr.bf16.gmra.mrb[4].mxu1 %v456_v23 }
  0xf5   :  { %v389_v24 = vpop.f32.mrb[0].mxu0  ;;  %v401_v25 = vpop.f32.mrb[0].mxu1 }
  0xf6   :  { %v390_v27 = vpop.f32.mrb[1].mxu0  ;;  %v402_v28 = vpop.f32.mrb[1].mxu1 }
  0xf7   :  { %v391_v29 = vadd.f32 %v390_v27, %v389_v24  ;;  %v403_v30 = vadd.f32 %v402_v28, %v401_v25  ;;  %v392_v31 = vpop.f32.mrb[2].mxu0  ;;  %v404_v32 = vpop.f32.mrb[2].mxu1 }
  0xf8   :  { %v393_v33 = vpop.f32.mrb[3].mxu0  ;;  %v405_v34 = vpop.f32.mrb[3].mxu1 }
  0xf9   :  { %v233_v35 = vadd.f32 %v391_v29, %v332_v26  ;;  %v249_v36 = vadd.f32 %v403_v30, %v332_v26  ;;  %v394_v37 = vadd.f32 %v393_v33, %v392_v31  ;;  %v406_v38 = vadd.f32 %v405_v34, %v404_v32 }
  0xfb   :  { %vm263_vm0 = vcmp.ge.f32.partialorder %v233_v35, 0.0  ;;  %v271_v39 = vmul.f32 0.1, %v233_v35  ;;  %vm267_vm1 = vcmp.ge.f32.partialorder %v249_v36, 0.0  ;;  %v275_v40 = vmul.f32 0.1, %v249_v36 }
  0xfc   :  { %v236_v41 = vadd.f32 %v394_v37, %v332_v26  ;;  %v252_v42 = vadd.f32 %v406_v38, %v332_v26 }
  0xfd   :  { %v279_v43 = vsel %vm263_vm0, %v233_v35, %v271_v39  ;;  %v283_v44 = vsel %vm267_vm1, %v249_v36, %v275_v40  ;;  %v395_v45 = vpop.f32.mrb[4].mxu0  ;;  %v407_v46 = vpop.f32.mrb[4].mxu1 }
  0xfe   :  { %v365_v47 = vpack.c.bf16 %v279_v43, %v279_v43  ;;  %v369_v48 = vpack.c.bf16 %v283_v44, %v283_v44  ;;  %vm264_vm3 = vcmp.ge.f32.partialorder %v236_v41, 0.0  ;;  %v272_v49 = vmul.f32 0.1, %v236_v41  ;;  %v396_v50 = vpop.f32.mrb[5].mxu0  ;;  %v408_v51 = vpop.f32.mrb[5].mxu1 }
  0xff   :  { %vm268_vm4 = vcmp.ge.f32.partialorder %v252_v42, 0.0  ;;  %v276_v52 = vmul.f32 0.1, %v252_v42  ;;  %v397_v53 = vadd.f32 %v396_v50, %v395_v45  ;;  %v409_v54 = vadd.f32 %v408_v51, %v407_v46  ;;  %v398_v55 = vpop.f32.mrb[6].mxu0  ;;  %v410_v56 = vpop.f32.mrb[6].mxu1 }
 0x100   :  { %320 = vst.msk [vmem:[%s587_s3] sm:$0xf] %vm319_vm2, %v365_v47  ;;  %324 = vst.msk [vmem:[%s587_s3 + $0x10] sm:$0xf] %vm319_vm2, %v369_v48  ;;  %v280_v57 = vsel %vm264_vm3, %v236_v41, %v272_v49  ;;  %v399_v58 = vpop.f32.mrb[7].mxu0  ;;  %v411_v59 = vpop.f32.mrb[7].mxu1 }
 0x101   :  { %v366_v60 = vpack.c.bf16 %v280_v57, %v280_v57  ;;  %v284_v61 = vsel %vm268_vm4, %v252_v42, %v276_v52  ;;  %v241_v62 = vadd.f32 %v397_v53, %v332_v26  ;;  %v257_v63 = vadd.f32 %v409_v54, %v332_v26 }
 0x102   :  { %v370_v0 = vpack.c.bf16 %v284_v61, %v284_v61  ;;  %v400_v1 = vadd.f32 %v399_v58, %v398_v55  ;;  %v412_v2 = vadd.f32 %v411_v59, %v410_v56 }
 0x103   :  { %321 = vst.msk [vmem:[%s587_s3 + $0x4] sm:$0xf] %vm319_vm2, %v366_v60  ;;  %vm265_vm5 = vcmp.ge.f32.partialorder %v241_v62, 0.0  ;;  %v273_v3 = vmul.f32 0.1, %v241_v62  ;;  %vm269_vm6 = vcmp.ge.f32.partialorder %v257_v63, 0.0 }
 0x104   :  { %v277_v4 = vmul.f32 0.1, %v257_v63  ;;  %325 = vst.msk [vmem:[%s587_s3 + $0x14] sm:$0xf] %vm319_vm2, %v370_v0  ;;  %v244_v5 = vadd.f32 %v400_v1, %v332_v26  ;;  %v260_v6 = vadd.f32 %v412_v2, %v332_v26 }
 0x105   :  { %v281_v7 = vsel %vm265_vm5, %v241_v62, %v273_v3 }
 0x106   :  { %v285_v8 = vsel %vm269_vm6, %v257_v63, %v277_v4  ;;  %v367_v9 = vpack.c.bf16 %v281_v7, %v281_v7  ;;  %vm266_vm7 = vcmp.ge.f32.partialorder %v244_v5, 0.0  ;;  %v274_v11 = vmul.f32 0.1, %v244_v5 }
 0x107   :  { %v371_v10 = vpack.c.bf16 %v285_v8, %v285_v8  ;;  %vm270_vm8 = vcmp.ge.f32.partialorder %v260_v6, 0.0  ;;  %v278_v12 = vmul.f32 0.1, %v260_v6 }
 0x108   :  { %322 = vst.msk [vmem:[%s587_s3 + $0x8] sm:$0xf] %vm319_vm2, %v367_v9  ;;  %v282_v13 = vsel %vm266_vm7, %v244_v5, %v274_v11 }
 0x109   :  { %326 = vst.msk [vmem:[%s587_s3 + $0x18] sm:$0xf] %vm319_vm2, %v371_v10  ;;  %v368_v14 = vpack.c.bf16 %v282_v13, %v282_v13  ;;  %v286_v15 = vsel %vm270_vm8, %v260_v6, %v278_v12 }
 0x10a   :  { %v372_v16 = vpack.c.bf16 %v286_v15, %v286_v15 }
 0x10b   :  { %323 = vst.msk [vmem:[%s587_s3 + $0xc] sm:$0xf] %vm319_vm2, %v368_v14 }
 0x10c   :  { %327 = vst.msk [vmem:[%s587_s3 + $0x1c] sm:$0xf] %vm319_vm2, %v372_v16 }

// kernel: stfan_forward.188
= control target key start
LH: loop header
LB: loop body
LE: loop exit
PB: predicated region body
PF: predicated region fallthrough
CT: control target
= control target key end

     0   :  { %vm473_vm0 = vcmask 261120   ;;  %vm1004_vm3 = vcmask 23552   ;;  %s1937_s1 = inlined_call_operand.vmem [shape: bf16[288,3], index: 1, kind: input, shape index: {}]   ;;  %s1938_s0 = inlined_call_operand.vmem [shape: bf16[256,288], index: 0, kind: input, shape index: {}]   ;;  %s1939_s2 = inlined_call_operand.vmem [shape: f32[1,3], index: 2, kind: input, shape index: {}]   ;;  %s1940_s3 = inlined_call_operand.vmem [shape: f32[256,3], index: 3, kind: input, shape index: {}]   ;;  %s1941_s4 = inlined_call_operand.vmem [shape: f32[256,3], index: 4, kind: output, shape index: {}]  }
   0x1   :  { %v1306_v0 = vld [vmem:[%s1937_s1 + $0x40] sm:$0xff]   ;;  %v1308_v2 = vld [vmem:[%s1937_s1 + $0x48] sm:$0xff]   ;;  %v1310_v4 = vld [vmem:[%s1937_s1 + $0x50] sm:$0xff]  }
   0x2   :  { %v1307_v1 = vld [vmem:[%s1937_s1] sm:$0xff]   ;;  %1124 = vmatprep.subr.bf16.mxu0 %v1306_v0  ;;  %1290 = vmatprep.subr.bf16.mxu1 %v1306_v0  ;;  %v1309_v3 = vld [vmem:[%s1937_s1 + $0x8] sm:$0xff]   ;;  %v1311_v5 = vld [vmem:[%s1937_s1 + $0x10] sm:$0xff]  }
   0x3   :  { %1125 = vmatpush3.bf16.msra.mxu0 %v1307_v1  ;;  %1298 = vmatpush3.bf16.msra.mxu1 %v1307_v1  ;;  %v1312_v6 = vld [vmem:[%s1937_s1 + $0x58] sm:$0xff]   ;;  %v1314_v8 = vld [vmem:[%s1937_s1 + $0x60] sm:$0xff]   ;;  %v1316_v10 = vld [vmem:[%s1937_s1 + $0x68] sm:$0xff]  }
   0x4   :  { %1126 = vmatprep.subr.bf16.mxu0 %v1308_v2  ;;  %1291 = vmatprep.subr.bf16.mxu1 %v1308_v2  ;;  %v1313_v7 = vld [vmem:[%s1937_s1 + $0x18] sm:$0xff]   ;;  %v1315_v9 = vld [vmem:[%s1937_s1 + $0x20] sm:$0xff]   ;;  %v1317_v13 = vld [vmem:[%s1937_s1 + $0x28] sm:$0xff]  }
   0x5   :  { %v1324_v11 = vld [vmem:[%s1938_s0 + $0x4] ss:$12 sps:$4 sm:$0xff]   ;;  %v1320_v16 = vld [vmem:[%s1937_s1 + $0x78] sm:$0xff]   ;;  %v1322_v19 = vld [vmem:[%s1938_s0] ss:$12 sps:$4 sm:$0xff]  }
   0x6   :  { %v1327_v12 = vld [vmem:[%s1938_s0 + $0x124] ss:$12 sps:$4 sm:$0xff]   ;;  %554 = vmatprep.mubr.bf16.mxu0 %v1324_v11  ;;  %v1321_v17 = vld [vmem:[%s1937_s1 + $0x38] sm:$0xff]   ;;  %v1325_v20 = vld [vmem:[%s1938_s0 + $0x120] ss:$12 sps:$4 sm:$0xff]  }
   0x7   :  { %1127 = vmatpush3.bf16.msra.mxu0 %v1309_v3  ;;  %1299 = vmatpush3.bf16.msra.mxu1 %v1309_v3  ;;  %v1318_v14 = vld [vmem:[%s1937_s1 + $0x70] sm:$0xff]   ;;  %v1328_v18 = vld [vmem:[%s1937_s1 + $0x80] sm:$0xff]   ;;  %v1329_v21 = vld [vmem:[%s1938_s0 + $0x1c] ss:$12 sps:$4 sm:$0xff]  }
   0x8   :  { %1128 = vmatprep.subr.bf16.mxu0 %v1310_v4  ;;  %1292 = vmatprep.subr.bf16.mxu1 %v1310_v4  ;;  %v1319_v15 = vld [vmem:[%s1937_s1 + $0x30] sm:$0xff]   ;;  %v1331_v22 = vld [vmem:[%s1938_s0 + $0x13c] ss:$12 sps:$4 sm:$0xff]   ;;  %v1333_v24 = vld [vmem:[%s1938_s0 + $0x18] ss:$12 sps:$4 sm:$0xff]  }
   0x9   :  { %650 = vmatprep.mubr.bf16.mxu1 %v1327_v12  ;;  %v1341_v23 = vld [vmem:[%s1937_s1 + $0x88] sm:$0xff]   ;;  %v1334_v25 = vld [vmem:[%s1938_s0 + $0x138] ss:$12 sps:$4 sm:$0xff]   ;;  %v1335_v26 = vld [vmem:[%s1938_s0 + $0x34] ss:$12 sps:$4 sm:$0xff]  }
   0xa   :  { %v1337_v27 = vld [vmem:[%s1938_s0 + $0x154] ss:$12 sps:$4 sm:$0xff]   ;;  %v1339_v28 = vld [vmem:[%s1938_s0 + $0x30] ss:$12 sps:$4 sm:$0xff]   ;;  %v1342_v30 = vld [vmem:[%s1938_s0 + $0x4c] ss:$12 sps:$4 sm:$0xff]  }
   0xb   :  { %1129 = vmatpush3.bf16.msra.mxu0 %v1311_v5  ;;  %1300 = vmatpush3.bf16.msra.mxu1 %v1311_v5  ;;  %v1340_v29 = vld [vmem:[%s1938_s0 + $0x150] ss:$12 sps:$4 sm:$0xff]   ;;  %v1344_v31 = vld [vmem:[%s1938_s0 + $0x16c] ss:$12 sps:$4 sm:$0xff]   ;;  %v1346_v32 = vld [vmem:[%s1938_s0 + $0x48] ss:$12 sps:$4 sm:$0xff]  }
   0xc   :  { %1130 = vmatprep.subr.bf16.mxu0 %v1312_v6  ;;  %1293 = vmatprep.subr.bf16.mxu1 %v1312_v6  ;;  %v1347_v33 = vld [vmem:[%s1938_s0 + $0x168] ss:$12 sps:$4 sm:$0xff]   ;;  %v1348_v34 = vld [vmem:[%s1938_s0 + $0x64] ss:$12 sps:$4 sm:$0xff]   ;;  %v1351_v36 = vld [vmem:[%s1938_s0 + $0x60] ss:$12 sps:$4 sm:$0xff]  }
   0xd   :  { %v1350_v35 = vld [vmem:[%s1938_s0 + $0x8] ss:$12 sps:$4 sm:$0xff]   ;;  %v1352_v37 = vld [vmem:[%s1938_s0 + $0x20] ss:$12 sps:$4 sm:$0xff]   ;;  %v1355_v39 = vld [vmem:[%s1938_s0 + $0x38] ss:$12 sps:$4 sm:$0xff]  }
   0xe   :  { %v1353_v38 = vld [vmem:[%s1938_s0 + $0x7c] ss:$12 sps:$4 sm:$0xff]   ;;  %v1356_v40 = vld [vmem:[%s1938_s0 + $0x78] ss:$12 sps:$4 sm:$0xff]   ;;  %v1358_v42 = vld [vmem:[%s1938_s0 + $0x94] ss:$12 sps:$4 sm:$0xff]  }
   0xf   :  { %1131 = vmatpush3.bf16.msra.mxu0 %v1313_v7  ;;  %1301 = vmatpush3.bf16.msra.mxu1 %v1313_v7  ;;  %v1357_v41 = vld [vmem:[%s1938_s0 + $0x50] ss:$12 sps:$4 sm:$0xff]   ;;  %v1360_v43 = vld [vmem:[%s1938_s0 + $0x68] ss:$12 sps:$4 sm:$0xff]   ;;  %v1362_v45 = vld [vmem:[%s1938_s0 + $0x80] ss:$12 sps:$4 sm:$0xff]  }
  0x10   :  { %1132 = vmatprep.subr.bf16.mxu0 %v1314_v8  ;;  %1294 = vmatprep.subr.bf16.mxu1 %v1314_v8  ;;  %v1361_v44 = vld [vmem:[%s1938_s0 + $0x90] ss:$12 sps:$4 sm:$0xff]   ;;  %v1363_v46 = vld [vmem:[%s1938_s0 + $0xac] ss:$12 sps:$4 sm:$0xff]   ;;  %v1366_v48 = vld [vmem:[%s1938_s0 + $0xa8] ss:$12 sps:$4 sm:$0xff]  }
  0x11   :  { %v1365_v47 = vld [vmem:[%s1938_s0 + $0x98] ss:$12 sps:$4 sm:$0xff]   ;;  %v1367_v49 = vld [vmem:[%s1938_s0 + $0xb0] ss:$12 sps:$4 sm:$0xff]   ;;  %v1370_v51 = vld [vmem:[%s1938_s0 + $0xc8] ss:$12 sps:$4 sm:$0xff]  }
  0x12   :  { %v1368_v50 = vld [vmem:[%s1938_s0 + $0xc4] ss:$12 sps:$4 sm:$0xff]   ;;  %v1371_v52 = vld [vmem:[%s1938_s0 + $0xc0] ss:$12 sps:$4 sm:$0xff]   ;;  %v1373_v54 = vld [vmem:[%s1938_s0 + $0xdc] ss:$12 sps:$4 sm:$0xff]  }
  0x13   :  { %1133 = vmatpush3.bf16.msra.mxu0 %v1315_v9  ;;  %1302 = vmatpush3.bf16.msra.mxu1 %v1315_v9  ;;  %v1372_v53 = vld [vmem:[%s1938_s0 + $0xe0] ss:$12 sps:$4 sm:$0xff]   ;;  %v1375_v55 = vld [vmem:[%s1938_s0 + $0xf8] ss:$12 sps:$4 sm:$0xff]   ;;  %v1377_v57 = vld [vmem:[%s1938_s0 + $0x110] ss:$12 sps:$4 sm:$0xff]  }
  0x14   :  { %1134 = vmatprep.subr.bf16.mxu0 %v1316_v10  ;;  %1295 = vmatprep.subr.bf16.mxu1 %v1316_v10  ;;  %v1376_v56 = vld [vmem:[%s1938_s0 + $0xd8] ss:$12 sps:$4 sm:$0xff]   ;;  %v1378_v58 = vld [vmem:[%s1938_s0 + $0xf4] ss:$12 sps:$4 sm:$0xff]   ;;  %v1381_v60 = vld [vmem:[%s1938_s0 + $0xf0] ss:$12 sps:$4 sm:$0xff]  }
  0x15   :  { %v1380_v59 = vld [vmem:[%s1938_s0 + $0x128] ss:$12 sps:$4 sm:$0xff]   ;;  %v1382_v61 = vld [vmem:[%s1938_s0 + $0x140] ss:$12 sps:$4 sm:$0xff]   ;;  %v1385_v63 = vld [vmem:[%s1938_s0 + $0x158] ss:$12 sps:$4 sm:$0xff]  }
  0x16   :  { %v1383_v62 = vld [vmem:[%s1938_s0 + $0x10c] ss:$12 sps:$4 sm:$0xff]   ;;  %v1386_v0 = vld [vmem:[%s1938_s0 + $0x108] ss:$12 sps:$4 sm:$0xff]   ;;  %v1387_v1 = vld [vmem:[%s1938_s0 + $0x170] ss:$12 sps:$4 sm:$0xff]  }
  0x17   :  { %1135 = vmatpush3.bf16.msra.mxu0 %v1317_v13  ;;  %1303 = vmatpush3.bf16.msra.mxu1 %v1317_v13 }
  0x18   :  { %1136 = vmatprep.subr.bf16.mxu0 %v1318_v14  ;;  %1296 = vmatprep.subr.bf16.mxu1 %v1318_v14 }
  0x1b   :  { %1137 = vmatpush3.bf16.msra.mxu0 %v1319_v15  ;;  %1304 = vmatpush3.bf16.msra.mxu1 %v1319_v15 }
  0x1c   :  { %1138 = vmatprep.subr.bf16.mxu0 %v1320_v16  ;;  %1297 = vmatprep.subr.bf16.mxu1 %v1320_v16 }
  0x1f   :  { %1139 = vmatpush3.bf16.msra.mxu0 %v1321_v17  ;;  %1305 = vmatpush3.bf16.msra.mxu1 %v1321_v17 }
  0x20   :  { %1254 = vmatprep.subr.bf16.mxu1 %v1328_v18 }
  0x22   :  { %555 = vmatmul.mubr.bf16.vlgmr.msra.gmra.mrb[0].mxu0 %v1322_v19  ;;  %651 = vmatmul.mubr.bf16.vlgmr.msra.gmra.mrb[0].mxu1 %v1325_v20 }
  0x23   :  { %1255 = vmatpush3.bf16.msra.mxu1 %v1328_v18  ;;  %562 = vmatprep.mubr.bf16.mxu0 %v1329_v21 }
  0x24   :  { %658 = vmatprep.mubr.bf16.mxu1 %v1331_v22  ;;  %1256 = vmatprep.subr.bf16.mxu1 %v1341_v23 }
  0x27   :  { %1257 = vmatpush3.bf16.msra.mxu1 %v1341_v23 }
  0x2a   :  { %563 = vmatmul.mubr.bf16.gmra.mrb[4].mxu0 %v1333_v24  ;;  %659 = vmatmul.mubr.bf16.gmra.mrb[4].mxu1 %v1334_v25 }
  0x2b   :  { %570 = vmatprep.mubr.bf16.mxu0 %v1335_v26  ;;  %666 = vmatprep.mubr.bf16.mxu1 %v1337_v27 }
  0x32   :  { %571 = vmatmul.mubr.bf16.gmra.mrb[8].mxu0 %v1339_v28  ;;  %667 = vmatmul.mubr.bf16.gmra.mrb[8].mxu1 %v1340_v29 }
  0x33   :  { %578 = vmatprep.mubr.bf16.mxu0 %v1342_v30  ;;  %674 = vmatprep.mubr.bf16.mxu1 %v1344_v31 }
  0x3a   :  { %579 = vmatmul.mubr.bf16.gmra.mrb[12].mxu0 %v1346_v32  ;;  %675 = vmatmul.mubr.bf16.gmra.mrb[12].mxu1 %v1347_v33 }
  0x3b   :  { %586 = vmatprep.mubr.bf16.mxu0 %v1348_v34  ;;  %1258 = vmatprep.mubr.msk.bf16.mxu1 %vm473_vm0, %v1350_v35 }
  0x42   :  { %587 = vmatmul.mubr.bf16.gmra.mrb[16].mxu0 %v1351_v36  ;;  %1259 = vmatmul.mubr.msk.bf16.vlgmr.msra.gmra.mrb[16].mxu1 %vm473_vm0, %v1352_v37 }
  0x43   :  { %594 = vmatprep.mubr.bf16.mxu0 %v1353_v38  ;;  %1262 = vmatprep.mubr.msk.bf16.mxu1 %vm473_vm0, %v1355_v39 }
  0x4a   :  { %595 = vmatmul.mubr.bf16.gmra.mrb[20].mxu0 %v1356_v40  ;;  %1263 = vmatmul.mubr.msk.bf16.gmra.mrb[20].mxu1 %vm473_vm0, %v1357_v41 }
  0x4b   :  { %602 = vmatprep.mubr.bf16.mxu0 %v1358_v42  ;;  %1266 = vmatprep.mubr.msk.bf16.mxu1 %vm473_vm0, %v1360_v43 }
  0x52   :  { %603 = vmatmul.mubr.bf16.gmra.mrb[24].mxu0 %v1361_v44  ;;  %1267 = vmatmul.mubr.msk.bf16.gmra.mrb[24].mxu1 %vm473_vm0, %v1362_v45 }
  0x53   :  { %610 = vmatprep.mubr.bf16.mxu0 %v1363_v46  ;;  %1270 = vmatprep.mubr.msk.bf16.mxu1 %vm473_vm0, %v1365_v47 }
  0x5a   :  { %611 = vmatmul.mubr.bf16.gmra.mrb[28].mxu0 %v1366_v48  ;;  %1271 = vmatmul.mubr.msk.bf16.gmra.mrb[28].mxu1 %vm473_vm0, %v1367_v49 }
  0x5b   :  { %618 = vmatprep.mubr.bf16.mxu0 %v1368_v50  ;;  %1274 = vmatprep.mubr.msk.bf16.mxu1 %vm473_vm0, %v1370_v51  ;;  %v1650_v50 = vld [vmem:[%s1939_s2] ss:$0 sm:$0xff] }
  0x62   :  { %619 = vmatmul.mubr.bf16.gmra.mrb[32].mxu0 %v1371_v52  ;;  %1275 = vmatmul.mubr.msk.bf16.gmra.mrb[32].mxu1 %vm473_vm0, %v1372_v53 }
  0x63   :  { %626 = vmatprep.mubr.bf16.mxu0 %v1373_v54  ;;  %1278 = vmatprep.mubr.msk.bf16.mxu1 %vm473_vm0, %v1375_v55 }
  0x6a   :  { %627 = vmatmul.mubr.bf16.gmra.mrb[36].mxu0 %v1376_v56  ;;  %1279 = vmatmul.mubr.msk.bf16.gmra.mrb[36].mxu1 %vm473_vm0, %v1377_v57 }
  0x6b   :  { %634 = vmatprep.mubr.bf16.mxu0 %v1378_v58  ;;  %1282 = vmatprep.mubr.msk.bf16.mxu1 %vm473_vm0, %v1380_v59 }
  0x72   :  { %635 = vmatmul.mubr.bf16.gmra.mrb[40].mxu0 %v1381_v60  ;;  %1283 = vmatmul.mubr.msk.bf16.gmra.mrb[40].mxu1 %vm473_vm0, %v1382_v61 }
  0x73   :  { %642 = vmatprep.mubr.bf16.mxu0 %v1383_v62  ;;  %1286 = vmatprep.mubr.msk.bf16.mxu1 %vm473_vm0, %v1385_v63 }
  0x7a   :  { %643 = vmatmul.mubr.bf16.gmra.mrb[44].mxu0 %v1386_v0  ;;  %1287 = vmatmul.mubr.msk.bf16.gmra.mrb[44].mxu1 %vm473_vm0, %v1387_v1  ;;  %v942_v1 = vld [vmem:[%s1940_s3 + $0x10] sm:$0xff] }
  0xf5   :  { %v1140_v2 = vpop.f32.mrb[0].mxu0  ;;  %v1212_v3 = vpop.f32.mrb[0].mxu1 }
  0xf6   :  { %v1141_v4 = vpop.f32.mrb[1].mxu0  ;;  %v1213_v5 = vpop.f32.mrb[1].mxu1 }
  0xf7   :  { %v1142_v6 = vadd.f32 %v1141_v4, %v1140_v2  ;;  %v1143_v7 = vpop.f32.mrb[2].mxu0  ;;  %v1627_v8 = vadd.f32 %v1213_v5, %v1212_v3  ;;  %v1215_v9 = vpop.f32.mrb[2].mxu1 }
  0xf8   :  { %v1144_v10 = vpop.f32.mrb[3].mxu0  ;;  %v1216_v11 = vpop.f32.mrb[3].mxu1 }
  0xf9   :  { %v1145_v12 = vadd.f32 %v1144_v10, %v1143_v7  ;;  %v1629_v13 = vadd.f32 %v1216_v11, %v1215_v9  ;;  %v557_v54 = vadd.f32 %v1142_v6, %v1650_v50  ;;  %v940_v6 = vld [vmem:[%s1940_s3] sm:$0xff] }
  0xfb   :  { %v560_v63 = vadd.f32 %v1145_v12, %v1650_v50  ;;  %v943_v12 = vld [vmem:[%s1940_s3 + $0x18] sm:$0xff] }
  0xfd   :  { %v1146_v14 = vpop.f32.mrb[4].mxu0  ;;  %v1218_v15 = vpop.f32.mrb[4].mxu1 }
  0xfe   :  { %v1147_v16 = vpop.f32.mrb[5].mxu0  ;;  %v1219_v17 = vpop.f32.mrb[5].mxu1 }
  0xff   :  { %v1148_v18 = vadd.f32 %v1147_v16, %v1146_v14  ;;  %v1149_v19 = vpop.f32.mrb[6].mxu0  ;;  %v1631_v20 = vadd.f32 %v1219_v17, %v1218_v15  ;;  %v1221_v21 = vpop.f32.mrb[6].mxu1  ;;  %v941_v17 = vld [vmem:[%s1940_s3 + $0x8] sm:$0xff] }
 0x100   :  { %v1150_v22 = vpop.f32.mrb[7].mxu0  ;;  %v1222_v23 = vpop.f32.mrb[7].mxu1 }
 0x101   :  { %v1151_v24 = vadd.f32 %v1150_v22, %v1149_v19  ;;  %v1633_v25 = vadd.f32 %v1222_v23, %v1221_v21  ;;  %v565_v51 = vadd.f32 %v1148_v18, %v1650_v50 }
 0x103   :  { %v568_v58 = vadd.f32 %v1151_v24, %v1650_v50 }
 0x105   :  { %v1152_v26 = vpop.f32.mrb[8].mxu0  ;;  %v1224_v27 = vpop.f32.mrb[8].mxu1 }
 0x106   :  { %v1153_v28 = vpop.f32.mrb[9].mxu0  ;;  %v1225_v29 = vpop.f32.mrb[9].mxu1 }
 0x107   :  { %v1635_v30 = vadd.f32 %v1153_v28, %v1152_v26  ;;  %v1155_v31 = vpop.f32.mrb[10].mxu0  ;;  %v1637_v32 = vadd.f32 %v1225_v29, %v1224_v27  ;;  %v1227_v33 = vpop.f32.mrb[10].mxu1 }
 0x108   :  { %v1156_v34 = vpop.f32.mrb[11].mxu0  ;;  %v1228_v35 = vpop.f32.mrb[11].mxu1 }
 0x109   :  { %v1639_v36 = vadd.f32 %v1156_v34, %v1155_v31  ;;  %v1641_v37 = vadd.f32 %v1228_v35, %v1227_v33  ;;  %v573_v27 = vadd.f32 %v1635_v30, %v1650_v50 }
 0x10d   :  { %v1158_v38 = vpop.f32.mrb[12].mxu0  ;;  %v1230_v39 = vpop.f32.mrb[12].mxu1 }
 0x10e   :  { %v1159_v40 = vpop.f32.mrb[13].mxu0  ;;  %v1231_v41 = vpop.f32.mrb[13].mxu1 }
 0x10f   :  { %v1160_v42 = vadd.f32 %v1159_v40, %v1158_v38  ;;  %v1161_v43 = vpop.f32.mrb[14].mxu0  ;;  %v1643_v44 = vadd.f32 %v1231_v41, %v1230_v39  ;;  %v1233_v45 = vpop.f32.mrb[14].mxu1  ;;  %v576_v40 = vadd.f32 %v1639_v36, %v1650_v50  ;;  %v944_v36 = vld [vmem:[%s1940_s3 + $0x20] sm:$0xff] }
 0x110   :  { %v1162_v46 = vpop.f32.mrb[15].mxu0  ;;  %v1234_v47 = vpop.f32.mrb[15].mxu1 }
 0x111   :  { %v1163_v48 = vadd.f32 %v1162_v46, %v1161_v43  ;;  %v1645_v49 = vadd.f32 %v1234_v47, %v1233_v45  ;;  %v581_v21 = vadd.f32 %v1160_v42, %v1650_v50  ;;  %v946_v42 = vld [vmem:[%s1940_s3 + $0x30] sm:$0xff] }
 0x113   :  { %v584_v34 = vadd.f32 %v1163_v48, %v1650_v50 }
 0x115   :  { %v1164_v52 = vpop.f32.mrb[16].mxu0  ;;  %v1260_v53 = vpop.f32.mrb[16].mxu1 }
 0x116   :  { %v726_v55 = vadd.f32 %v1260_v53, %v565_v51  ;;  %v1165_v56 = vpop.f32.mrb[17].mxu0  ;;  %v717_v57 = vpop.f32.mrb[17].mxu1 }
 0x117   :  { %v1655_v59 = vadd.f32 %v1165_v56, %v1164_v52  ;;  %v718_v60 = vadd.f32 %v717_v57, %v557_v54  ;;  %v1167_v61 = vpop.f32.mrb[18].mxu0  ;;  %v1261_v62 = vpop.f32.mrb[18].mxu1  ;;  %v947_v54 = vld [vmem:[%s1940_s3 + $0x38] sm:$0xff] }
 0x118   :  { %vm846_vm1 = vcmp.ge.f32.partialorder %v726_v55, 0.0  ;;  %v878_v0 = vmul.f32 0.1, %v726_v55  ;;  %v729_v2 = vadd.f32 %v1261_v62, %v568_v58  ;;  %v1168_v3 = vpop.f32.mrb[19].mxu0  ;;  %v720_v4 = vpop.f32.mrb[19].mxu1  ;;  %v945_v58 = vld [vmem:[%s1940_s3 + $0x28] sm:$0xff] }
 0x119   :  { %vm844_vm2 = vcmp.ge.f32.partialorder %v718_v60, 0.0  ;;  %v876_v5 = vmul.f32 0.1, %v718_v60  ;;  %v1664_v7 = vadd.f32 %v1168_v3, %v1167_v61  ;;  %v721_v9 = vadd.f32 %v720_v4, %v560_v63 }
 0x11a   :  { %v910_v10 = vsel %vm846_vm1, %v726_v55, %v878_v0  ;;  %vm847_vm4 = vcmp.ge.f32.partialorder %v729_v2, 0.0  ;;  %v879_v11 = vmul.f32 0.1, %v729_v2  ;;  %v589_v3 = vadd.f32 %v1655_v59, %v1650_v50 }
 0x11b   :  { %v974_v14 = vadd.f32 %v942_v1, %v910_v10  ;;  %v908_v15 = vsel %vm844_vm2, %v718_v60, %v876_v5  ;;  %vm845_vm5 = vcmp.ge.f32.partialorder %v721_v9, 0.0  ;;  %v877_v16 = vmul.f32 0.1, %v721_v9 }
 0x11c   :  { %v972_v18 = vadd.f32 %v940_v6, %v908_v15  ;;  %v911_v19 = vsel %vm847_vm4, %v729_v2, %v879_v11  ;;  %v592_v15 = vadd.f32 %v1664_v7, %v1650_v50  ;;  %v948_v7 = vld [vmem:[%s1940_s3 + $0x40] sm:$0xff] }
 0x11d   :  { %1007 = vst.msk [vmem:[%s1941_s4 + $0x10] sm:$0xff] %vm1004_vm3, %v974_v14  ;;  %v975_v22 = vadd.f32 %v943_v12, %v911_v19  ;;  %v909_v23 = vsel %vm845_vm5, %v721_v9, %v877_v16  ;;  %v1170_v24 = vpop.f32.mrb[20].mxu0  ;;  %v1264_v26 = vpop.f32.mrb[20].mxu1 }
 0x11e   :  { %1005 = vst.msk [vmem:[%s1941_s4] sm:$0xff] %vm1004_vm3, %v972_v18  ;;  %v973_v28 = vadd.f32 %v941_v17, %v909_v23  ;;  %v742_v29 = vadd.f32 %v1264_v26, %v581_v21  ;;  %v1171_v31 = vpop.f32.mrb[21].mxu0  ;;  %v733_v33 = vpop.f32.mrb[21].mxu1  ;;  %v950_v17 = vld [vmem:[%s1940_s3 + $0x50] sm:$0xff] }
 0x11f   :  { %1008 = vst.msk [vmem:[%s1941_s4 + $0x18] sm:$0xff] %vm1004_vm3, %v975_v22  ;;  %v1172_v35 = vadd.f32 %v1171_v31, %v1170_v24  ;;  %v734_v38 = vadd.f32 %v733_v33, %v573_v27  ;;  %v1173_v39 = vpop.f32.mrb[22].mxu0  ;;  %v1265_v30 = vpop.f32.mrb[22].mxu1 }
 0x120   :  { %1006 = vst.msk [vmem:[%s1941_s4 + $0x8] sm:$0xff] %vm1004_vm3, %v973_v28  ;;  %vm850_vm6 = vcmp.ge.f32.partialorder %v742_v29, 0.0  ;;  %v882_v41 = vmul.f32 0.1, %v742_v29  ;;  %v745_v43 = vadd.f32 %v1265_v30, %v584_v34  ;;  %v1174_v45 = vpop.f32.mrb[23].mxu0  ;;  %v736_v46 = vpop.f32.mrb[23].mxu1 }
 0x121   :  { %vm848_vm7 = vcmp.ge.f32.partialorder %v734_v38, 0.0  ;;  %v880_v47 = vmul.f32 0.1, %v734_v38  ;;  %v1175_v48 = vadd.f32 %v1174_v45, %v1173_v39  ;;  %v737_v51 = vadd.f32 %v736_v46, %v576_v40  ;;  %v951_v28 = vld [vmem:[%s1940_s3 + $0x58] sm:$0xff]  ;;  %v949_v34 = vld [vmem:[%s1940_s3 + $0x48] sm:$0xff] }
 0x122   :  { %v914_v52 = vsel %vm850_vm6, %v742_v29, %v882_v41  ;;  %vm851_vm8 = vcmp.ge.f32.partialorder %v745_v43, 0.0  ;;  %v883_v53 = vmul.f32 0.1, %v745_v43  ;;  %v597_v62 = vadd.f32 %v1172_v35, %v1650_v50 }
 0x123   :  { %v978_v55 = vadd.f32 %v946_v42, %v914_v52  ;;  %v912_v56 = vsel %vm848_vm7, %v734_v38, %v880_v47  ;;  %vm849_vm9 = vcmp.ge.f32.partialorder %v737_v51, 0.0  ;;  %v881_v57 = vmul.f32 0.1, %v737_v51 }
 0x124   :  { %v976_v60 = vadd.f32 %v944_v36, %v912_v56  ;;  %v915_v61 = vsel %vm851_vm8, %v745_v43, %v883_v53  ;;  %v600_v10 = vadd.f32 %v1175_v48, %v1650_v50 }
 0x125   :  { %1011 = vst.msk [vmem:[%s1941_s4 + $0x30] sm:$0xff] %vm1004_vm3, %v978_v55  ;;  %v979_v63 = vadd.f32 %v947_v54, %v915_v61  ;;  %v913_v0 = vsel %vm849_vm9, %v737_v51, %v881_v57  ;;  %v1176_v1 = vpop.f32.mrb[24].mxu0  ;;  %v1268_v2 = vpop.f32.mrb[24].mxu1  ;;  %v952_v57 = vld [vmem:[%s1940_s3 + $0x60] sm:$0xff] }
 0x126   :  { %1009 = vst.msk [vmem:[%s1941_s4 + $0x20] sm:$0xff] %vm1004_vm3, %v976_v60  ;;  %v977_v4 = vadd.f32 %v945_v58, %v913_v0  ;;  %v758_v5 = vadd.f32 %v1268_v2, %v597_v62  ;;  %v1177_v6 = vpop.f32.mrb[25].mxu0  ;;  %v749_v9 = vpop.f32.mrb[25].mxu1  ;;  %v953_v2 = vld [vmem:[%s1940_s3 + $0x68] sm:$0xff] }
 0x127   :  { %1012 = vst.msk [vmem:[%s1941_s4 + $0x38] sm:$0xff] %vm1004_vm3, %v979_v63  ;;  %v1178_v11 = vadd.f32 %v1177_v6, %v1176_v1  ;;  %v750_v12 = vadd.f32 %v749_v9, %v589_v3  ;;  %v1179_v14 = vpop.f32.mrb[26].mxu0  ;;  %v1269_v59 = vpop.f32.mrb[26].mxu1 }
 0x128   :  { %1010 = vst.msk [vmem:[%s1941_s4 + $0x28] sm:$0xff] %vm1004_vm3, %v977_v4  ;;  %vm854_vm10 = vcmp.ge.f32.partialorder %v758_v5, 0.0  ;;  %v886_v16 = vmul.f32 0.1, %v758_v5  ;;  %v761_v18 = vadd.f32 %v1269_v59, %v600_v10  ;;  %v1180_v19 = vpop.f32.mrb[27].mxu0  ;;  %v752_v21 = vpop.f32.mrb[27].mxu1 }
 0x129   :  { %vm852_vm11 = vcmp.ge.f32.partialorder %v750_v12, 0.0  ;;  %v884_v22 = vmul.f32 0.1, %v750_v12  ;;  %v1181_v23 = vadd.f32 %v1180_v19, %v1179_v14  ;;  %v753_v24 = vadd.f32 %v752_v21, %v592_v15  ;;  %v954_v4 = vld [vmem:[%s1940_s3 + $0x70] sm:$0xff]  ;;  %v955_v15 = vld [vmem:[%s1940_s3 + $0x78] sm:$0xff] }
 0x12a   :  { %v918_v26 = vsel %vm854_vm10, %v758_v5, %v886_v16  ;;  %vm855_vm12 = vcmp.ge.f32.partialorder %v761_v18, 0.0  ;;  %v887_v27 = vmul.f32 0.1, %v761_v18  ;;  %v605_v42 = vadd.f32 %v1178_v11, %v1650_v50 }
 0x12b   :  { %v982_v29 = vadd.f32 %v950_v17, %v918_v26  ;;  %v916_v31 = vsel %vm852_vm11, %v750_v12, %v884_v22  ;;  %vm853_vm13 = vcmp.ge.f32.partialorder %v753_v24, 0.0  ;;  %v885_v33 = vmul.f32 0.1, %v753_v24 }
 0x12c   :  { %v980_v35 = vadd.f32 %v948_v7, %v916_v31  ;;  %v919_v38 = vsel %vm855_vm12, %v761_v18, %v887_v27  ;;  %v608_v53 = vadd.f32 %v1181_v23, %v1650_v50 }
 0x12d   :  { %1015 = vst.msk [vmem:[%s1941_s4 + $0x50] sm:$0xff] %vm1004_vm3, %v982_v29  ;;  %v983_v39 = vadd.f32 %v951_v28, %v919_v38  ;;  %v917_v30 = vsel %vm853_vm13, %v753_v24, %v885_v33  ;;  %v1182_v40 = vpop.f32.mrb[28].mxu0  ;;  %v1272_v41 = vpop.f32.mrb[28].mxu1  ;;  %v956_v38 = vld [vmem:[%s1940_s3 + $0x80] sm:$0xff] }
 0x12e   :  { %1013 = vst.msk [vmem:[%s1941_s4 + $0x40] sm:$0xff] %vm1004_vm3, %v980_v35  ;;  %v981_v43 = vadd.f32 %v949_v34, %v917_v30  ;;  %v1183_v45 = vpop.f32.mrb[29].mxu0  ;;  %v765_v46 = vpop.f32.mrb[29].mxu1 }
 0x12f   :  { %1016 = vst.msk [vmem:[%s1941_s4 + $0x58] sm:$0xff] %vm1004_vm3, %v983_v39  ;;  %v1184_v47 = vadd.f32 %v1183_v45, %v1182_v40  ;;  %v766_v36 = vadd.f32 %v765_v46, %v605_v42  ;;  %v1185_v48 = vpop.f32.mrb[30].mxu0  ;;  %v1273_v51 = vpop.f32.mrb[30].mxu1 }
 0x130   :  { %1014 = vst.msk [vmem:[%s1941_s4 + $0x48] sm:$0xff] %vm1004_vm3, %v981_v43  ;;  %v1186_v52 = vpop.f32.mrb[31].mxu0  ;;  %v768_v54 = vpop.f32.mrb[31].mxu1 }
 0x131   :  { %v613_v55 = vadd.f32 %v1184_v47, %v1650_v50  ;;  %vm856_vm14 = vcmp.ge.f32.partialorder %v766_v36, 0.0  ;;  %v888_v56 = vmul.f32 0.1, %v766_v36  ;;  %v1187_v58 = vadd.f32 %v1186_v52, %v1185_v48 }
 0x132   :  { %v769_v60 = vadd.f32 %v768_v54, %v608_v53 }
 0x133   :  { %v774_v61 = vadd.f32 %v1272_v41, %v613_v55  ;;  %v920_v62 = vsel %vm856_vm14, %v766_v36, %v888_v56  ;;  %v616_v63 = vadd.f32 %v1187_v58, %v1650_v50  ;;  %v957_v41 = vld [vmem:[%s1940_s3 + $0x88] sm:$0xff]  ;;  %v653_v58 = vadd.f32 %v1627_v8, %v1650_v50 }
 0x134   :  { %v984_v0 = vadd.f32 %v952_v57, %v920_v62  ;;  %vm857_vm15 = vcmp.ge.f32.partialorder %v769_v60, 0.0  ;;  %v889_v1 = vmul.f32 0.1, %v769_v60  ;;  %v661_v57 = vadd.f32 %v1631_v20, %v1650_v50  ;;  %v958_v62 = vld [vmem:[%s1940_s3 + $0x90] sm:$0xff] }
 0x135   :  { %vm858_vm0 = vcmp.ge.f32.partialorder %v774_v61, 0.0  ;;  %v890_v3 = vmul.f32 0.1, %v774_v61  ;;  %v777_v5 = vadd.f32 %v1273_v51, %v616_v63  ;;  %v1188_v6 = vpop.f32.mrb[32].mxu0  ;;  %v1276_v9 = vpop.f32.mrb[32].mxu1  ;;  %v677_v8 = vadd.f32 %v1643_v44, %v1650_v50 }
 0x136   :  { %1017 = vst.msk [vmem:[%s1941_s4 + $0x60] sm:$0xff] %vm1004_vm3, %v984_v0  ;;  %v921_v10 = vsel %vm857_vm15, %v769_v60, %v889_v1  ;;  %v1189_v11 = vpop.f32.mrb[33].mxu0  ;;  %v781_v12 = vpop.f32.mrb[33].mxu1  ;;  %v656_v60 = vadd.f32 %v1629_v13, %v1650_v50  ;;  %v669_v13 = vadd.f32 %v1637_v32, %v1650_v50  ;;  %v966_v32 = vld [vmem:[%s1940_s3 + $0xd0] sm:$0xff] }
 0x137   :  { %v922_v14 = vsel %vm858_vm0, %v774_v61, %v890_v3  ;;  %vm859_vm1 = vcmp.ge.f32.partialorder %v777_v5, 0.0  ;;  %v891_v59 = vmul.f32 0.1, %v777_v5  ;;  %v985_v16 = vadd.f32 %v953_v2, %v921_v10  ;;  %v1191_v17 = vpop.f32.mrb[34].mxu0  ;;  %v1277_v18 = vpop.f32.mrb[34].mxu1 }
 0x138   :  { %v986_v19 = vadd.f32 %v954_v4, %v922_v14  ;;  %v1190_v21 = vadd.f32 %v1189_v11, %v1188_v6  ;;  %v1192_v22 = vpop.f32.mrb[35].mxu0  ;;  %v784_v7 = vpop.f32.mrb[35].mxu1  ;;  %v664_v2 = vadd.f32 %v1633_v25, %v1650_v50  ;;  %v959_v25 = vld [vmem:[%s1940_s3 + $0x98] sm:$0xff] }
 0x139   :  { %v923_v23 = vsel %vm859_vm1, %v777_v5, %v891_v59  ;;  %1018 = vst.msk [vmem:[%s1941_s4 + $0x68] sm:$0xff] %vm1004_vm3, %v985_v16  ;;  %v1193_v24 = vadd.f32 %v1192_v22, %v1191_v17  ;;  %v1829_v5 = vadd.f32 %v1641_v37, %v1650_v50 }
 0x13a   :  { %1019 = vst.msk [vmem:[%s1941_s4 + $0x70] sm:$0xff] %vm1004_vm3, %v986_v19  ;;  %v987_v26 = vadd.f32 %v955_v15, %v923_v23  ;;  %v621_v27 = vadd.f32 %v1190_v21, %v1650_v50  ;;  %v964_v23 = vld [vmem:[%s1940_s3 + $0xc0] sm:$0xff] }
 0x13b   :  { %v624_v28 = vadd.f32 %v1193_v24, %v1650_v50 }
 0x13c   :  { %1020 = vst.msk [vmem:[%s1941_s4 + $0x78] sm:$0xff] %vm1004_vm3, %v987_v26  ;;  %v782_v29 = vadd.f32 %v781_v12, %v621_v27 }
 0x13d   :  { %v785_v31 = vadd.f32 %v784_v7, %v624_v28  ;;  %v1194_v33 = vpop.f32.mrb[36].mxu0  ;;  %v1790_v34 = vpop.f32.mrb[36].mxu1  ;;  %v967_v28 = vld [vmem:[%s1940_s3 + $0xd8] sm:$0xff] }
 0x13e   :  { %vm860_vm2 = vcmp.ge.f32.partialorder %v782_v29, 0.0  ;;  %v892_v35 = vmul.f32 0.1, %v782_v29  ;;  %v1195_v39 = vpop.f32.mrb[37].mxu0  ;;  %v797_v30 = vpop.f32.mrb[37].mxu1 }
 0x13f   :  { %vm861_vm4 = vcmp.ge.f32.partialorder %v785_v31, 0.0  ;;  %v893_v40 = vmul.f32 0.1, %v785_v31  ;;  %v1196_v42 = vadd.f32 %v1195_v39, %v1194_v33  ;;  %v1197_v43 = vpop.f32.mrb[38].mxu0  ;;  %v1798_v45 = vpop.f32.mrb[38].mxu1  ;;  %v960_v39 = vld [vmem:[%s1940_s3 + $0xa0] sm:$0xff] }
 0x140   :  { %v924_v46 = vsel %vm860_vm2, %v782_v29, %v892_v35  ;;  %v1198_v47 = vpop.f32.mrb[39].mxu0  ;;  %v1800_v36 = vpop.f32.mrb[39].mxu1  ;;  %v680_v35 = vadd.f32 %v1645_v49, %v1650_v50 }
 0x141   :  { %v988_v48 = vadd.f32 %v956_v38, %v924_v46  ;;  %v925_v51 = vsel %vm861_vm4, %v785_v31, %v893_v40  ;;  %v629_v52 = vadd.f32 %v1196_v42, %v1650_v50  ;;  %v1199_v53 = vadd.f32 %v1198_v47, %v1197_v43  ;;  %v965_v47 = vld [vmem:[%s1940_s3 + $0xc8] sm:$0xff] }
 0x142   :  { %v989_v54 = vadd.f32 %v957_v41, %v925_v51 }
 0x143   :  { %1021 = vst.msk [vmem:[%s1941_s4 + $0x80] sm:$0xff] %vm1004_vm3, %v988_v48  ;;  %v790_v55 = vadd.f32 %v1276_v9, %v629_v52  ;;  %v632_v56 = vadd.f32 %v1199_v53, %v1650_v50 }
 0x144   :  { %1022 = vst.msk [vmem:[%s1941_s4 + $0x88] sm:$0xff] %vm1004_vm3, %v989_v54 }
 0x145   :  { %vm862_vm5 = vcmp.ge.f32.partialorder %v790_v55, 0.0  ;;  %v894_v61 = vmul.f32 0.1, %v790_v55  ;;  %v793_v63 = vadd.f32 %v1277_v18, %v632_v56  ;;  %v1200_v0 = vpop.f32.mrb[40].mxu0  ;;  %v1284_v1 = vpop.f32.mrb[40].mxu1 }
 0x146   :  { %v822_v3 = vadd.f32 %v1284_v1, %v661_v57  ;;  %v1201_v20 = vpop.f32.mrb[41].mxu0  ;;  %v813_v4 = vpop.f32.mrb[41].mxu1 }
 0x147   :  { %v926_v6 = vsel %vm862_vm5, %v790_v55, %v894_v61  ;;  %vm863_vm6 = vcmp.ge.f32.partialorder %v793_v63, 0.0  ;;  %v895_v9 = vmul.f32 0.1, %v793_v63  ;;  %v1202_v10 = vadd.f32 %v1201_v20, %v1200_v0  ;;  %v1203_v11 = vpop.f32.mrb[42].mxu0  ;;  %v1285_v12 = vpop.f32.mrb[42].mxu1 }
 0x148   :  { %v990_v14 = vadd.f32 %v958_v62, %v926_v6  ;;  %vm870_vm7 = vcmp.ge.f32.partialorder %v822_v3, 0.0  ;;  %v902_v44 = vmul.f32 0.1, %v822_v3  ;;  %v814_v59 = vadd.f32 %v813_v4, %v653_v58  ;;  %v1204_v37 = vpop.f32.mrb[43].mxu0  ;;  %v816_v15 = vpop.f32.mrb[43].mxu1 }
 0x149   :  { %v927_v16 = vsel %vm863_vm6, %v793_v63, %v895_v9  ;;  %v637_v17 = vadd.f32 %v1202_v10, %v1650_v50  ;;  %v825_v18 = vadd.f32 %v1285_v12, %v664_v2  ;;  %v1205_v19 = vadd.f32 %v1204_v37, %v1203_v11  ;;  %v970_v2 = vld [vmem:[%s1940_s3 + $0xf0] sm:$0xff] }
 0x14a   :  { %1023 = vst.msk [vmem:[%s1941_s4 + $0x90] sm:$0xff] %vm1004_vm3, %v990_v14  ;;  %v991_v21 = vadd.f32 %v959_v25, %v927_v16  ;;  %v934_v22 = vsel %vm870_vm7, %v822_v3, %v902_v44  ;;  %vm868_vm8 = vcmp.ge.f32.partialorder %v814_v59, 0.0  ;;  %v900_v7 = vmul.f32 0.1, %v814_v59  ;;  %v971_v44 = vld [vmem:[%s1940_s3 + $0xf8] sm:$0xff] }
 0x14b   :  { %v998_v24 = vadd.f32 %v966_v32, %v934_v22  ;;  %v798_v26 = vadd.f32 %v797_v30, %v637_v17  ;;  %vm871_vm9 = vcmp.ge.f32.partialorder %v825_v18, 0.0  ;;  %v903_v27 = vmul.f32 0.1, %v825_v18  ;;  %v969_v22 = vld [vmem:[%s1940_s3 + $0xe8] sm:$0xff] }
 0x14c   :  { %1024 = vst.msk [vmem:[%s1941_s4 + $0x98] sm:$0xff] %vm1004_vm3, %v991_v21  ;;  %v932_v29 = vsel %vm868_vm8, %v814_v59, %v900_v7  ;;  %v640_v31 = vadd.f32 %v1205_v19, %v1650_v50  ;;  %v817_v33 = vadd.f32 %v816_v15, %v656_v60  ;;  %v961_v60 = vld [vmem:[%s1940_s3 + $0xa8] sm:$0xff]  ;;  %v963_v7 = vld [vmem:[%s1940_s3 + $0xb8] sm:$0xff] }
 0x14d   :  { %1031 = vst.msk [vmem:[%s1941_s4 + $0xd0] sm:$0xff] %vm1004_vm3, %v998_v24  ;;  %vm864_vm10 = vcmp.ge.f32.partialorder %v798_v26, 0.0  ;;  %v896_v38 = vmul.f32 0.1, %v798_v26  ;;  %v996_v30 = vadd.f32 %v964_v23, %v932_v29  ;;  %v935_v40 = vsel %vm871_vm9, %v825_v18, %v903_v27  ;;  %v1206_v41 = vpop.f32.mrb[44].mxu0  ;;  %v1288_v42 = vpop.f32.mrb[44].mxu1 }
 0x14e   :  { %v999_v43 = vadd.f32 %v967_v28, %v935_v40  ;;  %v801_v46 = vadd.f32 %v1800_v36, %v640_v31  ;;  %vm869_vm11 = vcmp.ge.f32.partialorder %v817_v33, 0.0  ;;  %v901_v49 = vmul.f32 0.1, %v817_v33  ;;  %v1207_v48 = vpop.f32.mrb[45].mxu0  ;;  %v829_v51 = vpop.f32.mrb[45].mxu1 }
 0x14f   :  { %v928_v52 = vsel %vm864_vm10, %v798_v26, %v896_v38  ;;  %1029 = vst.msk [vmem:[%s1941_s4 + $0xc0] sm:$0xff] %vm1004_vm3, %v996_v30  ;;  %v838_v53 = vadd.f32 %v1288_v42, %v677_v8  ;;  %v1208_v54 = vadd.f32 %v1207_v48, %v1206_v41  ;;  %v830_v55 = vadd.f32 %v829_v51, %v669_v13  ;;  %v1209_v56 = vpop.f32.mrb[46].mxu0  ;;  %v1289_v57 = vpop.f32.mrb[46].mxu1  ;;  %v968_v8 = vld [vmem:[%s1940_s3 + $0xe0] sm:$0xff] }
 0x150   :  { %v992_v36 = vadd.f32 %v960_v39, %v928_v52  ;;  %1032 = vst.msk [vmem:[%s1941_s4 + $0xd8] sm:$0xff] %vm1004_vm3, %v999_v43  ;;  %vm865_vm12 = vcmp.ge.f32.partialorder %v801_v46, 0.0  ;;  %v897_v58 = vmul.f32 0.1, %v801_v46  ;;  %v933_v61 = vsel %vm869_vm11, %v817_v33, %v901_v49  ;;  %v1210_v62 = vpop.f32.mrb[47].mxu0  ;;  %v832_v63 = vpop.f32.mrb[47].mxu1 }
 0x151   :  { %v997_v0 = vadd.f32 %v965_v47, %v933_v61  ;;  %vm874_vm13 = vcmp.ge.f32.partialorder %v838_v53, 0.0  ;;  %v906_v1 = vmul.f32 0.1, %v838_v53  ;;  %v645_v3 = vadd.f32 %v1208_v54, %v1650_v50 }
 0x152   :  { %1025 = vst.msk [vmem:[%s1941_s4 + $0xa0] sm:$0xff] %vm1004_vm3, %v992_v36  ;;  %v929_v20 = vsel %vm865_vm12, %v801_v46, %v897_v58  ;;  %vm872_vm14 = vcmp.ge.f32.partialorder %v830_v55, 0.0  ;;  %v904_v4 = vmul.f32 0.1, %v830_v55  ;;  %v841_v13 = vadd.f32 %v1289_v57, %v680_v35 }
 0x153   :  { %v993_v6 = vadd.f32 %v961_v60, %v929_v20  ;;  %1030 = vst.msk [vmem:[%s1941_s4 + $0xc8] sm:$0xff] %vm1004_vm3, %v997_v0  ;;  %v938_v9 = vsel %vm874_vm13, %v838_v53, %v906_v1  ;;  %v806_v25 = vadd.f32 %v1790_v34, %v645_v3  ;;  %v1211_v10 = vadd.f32 %v1210_v62, %v1209_v56  ;;  %v962_v34 = vld [vmem:[%s1940_s3 + $0xb0] sm:$0xff] }
 0x154   :  { %v1002_v11 = vadd.f32 %v970_v2, %v938_v9  ;;  %v936_v12 = vsel %vm872_vm14, %v830_v55, %v904_v4  ;;  %vm875_vm15 = vcmp.ge.f32.partialorder %v841_v13, 0.0  ;;  %v907_v14 = vmul.f32 0.1, %v841_v13 }
 0x155   :  { %1026 = vst.msk [vmem:[%s1941_s4 + $0xa8] sm:$0xff] %vm1004_vm3, %v993_v6  ;;  %vm866_vm0 = vcmp.ge.f32.partialorder %v806_v25, 0.0  ;;  %v898_v32 = vmul.f32 0.1, %v806_v25  ;;  %v1000_v59 = vadd.f32 %v968_v8, %v936_v12  ;;  %v648_v37 = vadd.f32 %v1211_v10, %v1650_v50 }
 0x156   :  { %1035 = vst.msk [vmem:[%s1941_s4 + $0xf0] sm:$0xff] %vm1004_vm3, %v1002_v11  ;;  %v939_v15 = vsel %vm875_vm15, %v841_v13, %v907_v14  ;;  %v833_v16 = vadd.f32 %v832_v63, %v1829_v5 }
 0x157   :  { %v930_v17 = vsel %vm866_vm0, %v806_v25, %v898_v32  ;;  %1033 = vst.msk [vmem:[%s1941_s4 + $0xe0] sm:$0xff] %vm1004_vm3, %v1000_v59  ;;  %v1003_v18 = vadd.f32 %v971_v44, %v939_v15  ;;  %v809_v19 = vadd.f32 %v1798_v45, %v648_v37 }
 0x158   :  { %v994_v21 = vadd.f32 %v962_v34, %v930_v17  ;;  %vm873_vm1 = vcmp.ge.f32.partialorder %v833_v16, 0.0  ;;  %v905_v50 = vmul.f32 0.1, %v833_v16 }
 0x159   :  { %1036 = vst.msk [vmem:[%s1941_s4 + $0xf8] sm:$0xff] %vm1004_vm3, %v1003_v18  ;;  %vm867_vm2 = vcmp.ge.f32.partialorder %v809_v19, 0.0  ;;  %v899_v5 = vmul.f32 0.1, %v809_v19 }
 0x15a   :  { %1027 = vst.msk [vmem:[%s1941_s4 + $0xb0] sm:$0xff] %vm1004_vm3, %v994_v21  ;;  %v937_v45 = vsel %vm873_vm1, %v833_v16, %v905_v50 }
 0x15b   :  { %v931_v23 = vsel %vm867_vm2, %v809_v19, %v899_v5  ;;  %v1001_v24 = vadd.f32 %v969_v22, %v937_v45 }
 0x15c   :  { %v995_v26 = vadd.f32 %v963_v7, %v931_v23 }
 0x15d   :  { %1034 = vst.msk [vmem:[%s1941_s4 + $0xe8] sm:$0xff] %vm1004_vm3, %v1001_v24 }
 0x15e   :  { %1028 = vst.msk [vmem:[%s1941_s4 + $0xb8] sm:$0xff] %vm1004_vm3, %v995_v26 }

</bundles_post_ra>
